<compile_context>
chip_gen: v7x
topology: tpu7x:2x2x1
jax: 0.10.0
libtpu: 0.0.40
codegen_flags: <defaults>
</compile_context>

<pallas_src>
import functools
from types import SimpleNamespace

import jax
import jax.numpy as jnp
from jax.experimental import pallas as pl
from jax.experimental.pallas import tpu as pltpu

STATE_NORM_FACTOR = 25.0
MATMUL_DTYPE = jnp.bfloat16   # MXU input dtype for conv/deconv matmuls (f32 accum)


# ----------------------------------------------------------------------------
# Pallas kernels
# ----------------------------------------------------------------------------
def _linear_kernel(a_ref, w_ref, b_ref, o_ref, *, act):
    y = jnp.dot(a_ref[...], w_ref[...], preferred_element_type=jnp.float32)
    y = y + b_ref[...]
    if act == "relu":
        y = jnp.maximum(y, 0.0)
    elif act == "sigmoid":
        y = jax.nn.sigmoid(y)
    o_ref[...] = y


def _head_kernel(x_ref, w1_ref, b1_ref, g_ref, be_ref, w2_ref, b2_ref, o_ref):
    # lstm_head linear -> LayerNorm -> block-diagonal [z_head | state_head]
    h = jnp.dot(x_ref[...], w1_ref[...], preferred_element_type=jnp.float32)
    h = h + b1_ref[...]
    mu = jnp.mean(h, axis=-1, keepdims=True)
    var = jnp.mean((h - mu) ** 2, axis=-1, keepdims=True)
    h = (h - mu) * jax.lax.rsqrt(var + 1e-5) * g_ref[...] + be_ref[...]
    o_ref[...] = (jnp.dot(h, w2_ref[...], preferred_element_type=jnp.float32)
                  + b2_ref[...])


def _lstm_fused_kernel(xg0_ref, h0_ref, c0_ref, whh_ref, wih_r_ref, b_r_ref,
                       y_ref, hn_ref, cn_ref, h_s, c_s):
    # All LSTM layers fused; layer-0's x@Wih+b is precomputed (hoisted) outside.
    t = pl.program_id(0)

    @pl.when(t == 0)
    def _():
        h_s[...] = h0_ref[...]
        c_s[...] = c0_ref[...]

    L, _, H = h_s.shape
    gates_in = xg0_ref[0]                       # (B, 4H) = x_t @ Wih_0 + b_0
    h_new = None
    for layer in range(L):
        h_prev = h_s[layer]
        c_prev = c_s[layer]
        gates = gates_in + jnp.dot(h_prev, whh_ref[layer],
                                   preferred_element_type=jnp.float32)
        i_g = jax.nn.sigmoid(gates[:, 0 * H:1 * H])   # torch gate order i,f,g,o
        f_g = jax.nn.sigmoid(gates[:, 1 * H:2 * H])
        g_g = jnp.tanh(gates[:, 2 * H:3 * H])
        o_g = jax.nn.sigmoid(gates[:, 3 * H:4 * H])
        c_new = f_g * c_prev + i_g * g_g
        h_new = o_g * jnp.tanh(c_new)
        h_s[layer] = h_new
        c_s[layer] = c_new
        if layer + 1 < L:
            gates_in = (jnp.dot(h_new, wih_r_ref[layer],
                                preferred_element_type=jnp.float32)
                        + b_r_ref[layer])
    y_ref[...] = h_new[None]

    @pl.when(t == pl.num_programs(0) - 1)       # write final state only once
    def _():
        hn_ref[...] = h_s[...]
        cn_ref[...] = c_s[...]


# ----------------------------------------------------------------------------
# Pallas wrappers
# ----------------------------------------------------------------------------
def _round_up(x, m):
    return (x + m - 1) // m * m


def pallas_linear(a, w, bias=None, act=None, tm=1024, in_dtype=jnp.float32):
    """a: (M, K) @ w: (K, N) + bias, optional relu/sigmoid epilogue."""
    a = a.astype(in_dtype)
    w = w.astype(in_dtype)
    M, K = a.shape
    N = w.shape[1]
    if bias is None:
        bias = jnp.zeros((N,), jnp.float32)
    bias = bias.astype(jnp.float32).reshape(1, N)

    Mp = _round_up(M, 8)
    if Mp <= tm:
        block_m = Mp
    else:
        Mp = _round_up(M, tm)
        block_m = tm
    a_p = jnp.pad(a, ((0, Mp - M), (0, 0)))

    out = pl.pallas_call(
        functools.partial(_linear_kernel, act=act),
        out_shape=jax.ShapeDtypeStruct((Mp, N), jnp.float32),
        grid=(Mp // block_m,),
        in_specs=[
            pl.BlockSpec((block_m, K), lambda i: (i, 0)),
            pl.BlockSpec((K, N), lambda i: (0, 0)),
            pl.BlockSpec((1, N), lambda i: (0, 0)),
        ],
        out_specs=pl.BlockSpec((block_m, N), lambda i: (i, 0)),
        compiler_params=pltpu.CompilerParams(
            dimension_semantics=("parallel",)),   # no vmem_limit (v7x = 64 MiB)
    )(a_p, w, bias)
    return out[:M]


def fused_head(x, p, Z, S):
    """lstm_head -> LayerNorm -> [z_head | state_head] in one kernel."""
    N, _ = x.shape
    w2 = jnp.zeros((2 * Z, Z + S), jnp.float32)
    w2 = w2.at[:Z, :Z].set(p['z_head_w'])
    w2 = w2.at[Z:, Z:].set(p['state_head_w'])
    b2 = jnp.concatenate([p['z_head_b'], p['state_head_b']])
    out = pl.pallas_call(
        _head_kernel,
        out_shape=jax.ShapeDtypeStruct((N, Z + S), jnp.float32),
    )(x.astype(jnp.float32), p['lstm_head_w'], p['lstm_head_b'].reshape(1, -1),
      p['ln_g'].reshape(1, -1), p['ln_b'].reshape(1, -1),
      w2, b2.reshape(1, -1))
    return out[:, :Z], out[:, Z:]                 # z_pred, state_pred


def lstm_fused(x_bti, h0, c0, params):
    """Multi-layer nn.LSTM, batch_first input (b, t, In). Returns (y_tbh, hn, cn)."""
    b, t, In = x_bti.shape
    L, B, H = h0.shape
    # hoist layer-0 input projection out of the recurrence: one (b*t,In)@(In,4H)
    xg0 = pallas_linear(x_bti.reshape(b * t, In),
                        params['lstm_wih_0'], params['lstm_b_0'])
    xg0 = jnp.transpose(xg0.reshape(b, t, 4 * H), (1, 0, 2))   # (T, B, 4H)
    whh = jnp.stack([params[f'lstm_whh_{l}'] for l in range(L)])
    if L > 1:
        wih_r = jnp.stack([params[f'lstm_wih_{l}'] for l in range(1, L)])
        b_r = jnp.stack([params[f'lstm_b_{l}'].reshape(1, -1) for l in range(1, L)])
    else:
        wih_r = jnp.zeros((1, H, 4 * H), jnp.float32)
        b_r = jnp.zeros((1, 1, 4 * H), jnp.float32)

    y, hn, cn = pl.pallas_call(
        _lstm_fused_kernel,
        out_shape=(jax.ShapeDtypeStruct((t, B, H), jnp.float32),
                   jax.ShapeDtypeStruct((L, B, H), jnp.float32),
                   jax.ShapeDtypeStruct((L, B, H), jnp.float32)),
        grid=(t,),
        in_specs=[
            pl.BlockSpec((1, B, 4 * H), lambda i: (i, 0, 0)),
            pl.BlockSpec((L, B, H), lambda i: (0, 0, 0)),
            pl.BlockSpec((L, B, H), lambda i: (0, 0, 0)),
            pl.BlockSpec((L, H, 4 * H), lambda i: (0, 0, 0)),
            pl.BlockSpec(wih_r.shape, lambda i: (0, 0, 0)),
            pl.BlockSpec(b_r.shape, lambda i: (0, 0, 0)),
        ],
        out_specs=(pl.BlockSpec((1, B, H), lambda i: (i, 0, 0)),
                   pl.BlockSpec((L, B, H), lambda i: (0, 0, 0)),
                   pl.BlockSpec((L, B, H), lambda i: (0, 0, 0))),
        scratch_shapes=[pltpu.VMEM((L, B, H), jnp.float32),
                        pltpu.VMEM((L, B, H), jnp.float32)],
        compiler_params=pltpu.CompilerParams(
            dimension_semantics=("arbitrary",)),
    )(xg0, h0.astype(jnp.float32), c0.astype(jnp.float32), whh, wih_r, b_r)
    return y, hn, cn


# ----------------------------------------------------------------------------
# conv / transposed-conv = im2col (glue) + Pallas matmul (hot path)
# ----------------------------------------------------------------------------
def _im2col(x, kh, kw, stride):
    # x: (N, H, W, C) NHWC -> (N*OH*OW, kh*kw*C)
    N, H, W, C = x.shape
    OH = (H - kh) // stride + 1
    OW = (W - kw) // stride + 1
    cols = []
    for i in range(kh):
        for j in range(kw):
            cols.append(x[:, i:i + (OH - 1) * stride + 1:stride,
                          j:j + (OW - 1) * stride + 1:stride, :])
    p = jnp.stack(cols, axis=3)                      # (N, OH, OW, kh*kw, C)
    return p.reshape(N * OH * OW, kh * kw * C), OH, OW


def conv2d_nhwc(x, w_oihw, b, stride, act):
    # w_oihw: (Cout, Cin, kh, kw)  -- PyTorch Conv2d layout
    Cout, Cin, kh, kw = w_oihw.shape
    patches, OH, OW = _im2col(x.astype(MATMUL_DTYPE), kh, kw, stride)
    w_mat = jnp.transpose(w_oihw, (2, 3, 1, 0)).reshape(kh * kw * Cin, Cout)
    y = pallas_linear(patches, w_mat, b, act=act, in_dtype=MATMUL_DTYPE)
    return y.reshape(x.shape[0], OH, OW, Cout)


def deconv2d_s2_nhwc(x, w_iohw, b, act):
    """ConvTranspose2d(stride=2, even kernel, no padding) via sub-pixel decomposition.

    The 4 output parities are 4 stride-1 convs with (k/2 x k/2) sub-kernels that
    share one im2col, computed as a single (M, R*R*Cin) @ (R*R*Cin, 4*Cout) matmul
    -- no structurally-zero columns from zero-upsampling.
    """
    Cin, Cout, kh, kw = w_iohw.shape
    assert kh == kw and kh % 2 == 0
    R = kh // 2
    N = x.shape[0]
    xp = jnp.pad(x.astype(MATMUL_DTYPE),
                 ((0, 0), (R - 1, R - 1), (R - 1, R - 1), (0, 0)))
    patches, oh2, ow2 = _im2col(xp, R, R, 1)         # (N*OH2*OW2, R*R*Cin)
    blocks = []
    for pi in range(2):
        for pj in range(2):
            # y[n, 2m+pi, 2l+pj, co] = sum_{u,v,ci} xpad[n, m+u, l+v, ci] * w[ci,co,k-2-2u+pi,k-2-2v+pj]
            wp = w_iohw[:, :, pi::2, pj::2][:, :, ::-1, ::-1]   # (Cin,Cout,R,R) [ci,co,u,v]
            blocks.append(jnp.transpose(wp, (2, 3, 0, 1)).reshape(R * R * Cin, Cout))
    w_mat = jnp.concatenate(blocks, axis=1)          # (R*R*Cin, 4*Cout)
    b4 = jnp.tile(b, 4)
    # NOTE: for Cout=1 the (M, 4) output uses masked stores; with K reduced 4x,
    # traffic is dominated by the bf16 patch DMA, so the transposed lane-dense
    # formulation was not worth its extra glue transpose at these sizes.
    y = pallas_linear(patches, w_mat, b4, act=act, in_dtype=MATMUL_DTYPE)
    y = y.reshape(N, oh2, ow2, 2, 2, Cout)
    y = jnp.transpose(y, (0, 1, 3, 2, 4, 5)).reshape(N, 2 * oh2, 2 * ow2, Cout)
    return y


# ----------------------------------------------------------------------------
# VAE encode / decode
# ----------------------------------------------------------------------------
def vae_encode(params, x_nchw, eps):
    x = jnp.transpose(x_nchw, (0, 2, 3, 1))                      # NCHW -> NHWC
    h = conv2d_nhwc(x, params['e_conv1_w'], params['e_conv1_b'], 2, 'relu')
    h = conv2d_nhwc(h, params['e_conv2_w'], params['e_conv2_b'], 2, 'relu')
    h = conv2d_nhwc(h, params['e_conv3_w'], params['e_conv3_b'], 2, 'relu')
    # flatten in NCHW order to match torch .view(-1, C*H*W)
    flat = jnp.transpose(h, (0, 3, 1, 2)).reshape(h.shape[0], -1)
    # fused mu | logvar matmul
    w_ml = jnp.concatenate([params['fc_mu_w'], params['fc_logvar_w']], axis=1)
    b_ml = jnp.concatenate([params['fc_mu_b'], params['fc_logvar_b']])
    ml = pallas_linear(flat, w_ml, b_ml)
    Z = params['fc_mu_w'].shape[1]
    mu, logvar = ml[:, :Z], ml[:, Z:]
    z = mu + eps * jnp.exp(0.5 * logvar)                         # reparameterize
    return z, mu, logvar


def vae_decode(params, z):
    N = z.shape[0]
    # d_fc and the 1x1-input deconv1 are both linear -> fold into one matmul.
    d1w = params['d_deconv1_w']                                  # (256, 64, kh, kw)
    Cout1, kh, kw = d1w.shape[1], d1w.shape[2], d1w.shape[3]
    w1 = jnp.transpose(d1w, (0, 2, 3, 1)).reshape(d1w.shape[0], -1)   # (256, kh*kw*Cout1)
    b1 = jnp.tile(params['d_deconv1_b'], kh * kw)
    w_fold = jnp.dot(params['d_fc_w'], w1)                       # (Z, kh*kw*Cout1)
    b_fold = jnp.dot(params['d_fc_b'], w1) + b1
    h = pallas_linear(z, w_fold, b_fold, act='relu', in_dtype=MATMUL_DTYPE)
    h = h.reshape(N, kh, kw, Cout1)                              # NHWC (N,5,5,64)
    h = deconv2d_s2_nhwc(h, params['d_deconv2_w'], params['d_deconv2_b'], 'relu')
    h = deconv2d_s2_nhwc(h, params['d_deconv3_w'], params['d_deconv3_b'], 'sigmoid')
    return jnp.transpose(h, (0, 3, 1, 2))                        # NHWC -> NCHW


# ----------------------------------------------------------------------------
# VAELSTM forward
# ----------------------------------------------------------------------------
def _bce(p, t):
    logp = jnp.maximum(jnp.log(p), -100.0)        # torch clamps log at -100
    log1mp = jnp.maximum(jnp.log(1.0 - p), -100.0)
    return -jnp.mean(t * logp + (1.0 - t) * log1mp)


def vaelstm_forward(params, img, state, action, dones, h0, c0, eps,
                    targets=None):
    del dones  # unused in the reference forward as well
    b, t, CH, W, H = img.shape
    S = state.shape[-1]
    A = action.shape[-1]
    Z = params['fc_mu_w'].shape[1]
    HS = params['lstm_whh_0'].shape[0]
    N = b * t

    z, mu, logvar = vae_encode(params, img.reshape(N, CH, W, H), eps)

    # fused action/state embedding: one block-diagonal (A+S, 2Z) matmul
    emb_in = jnp.concatenate([action.reshape(N, A), state.reshape(N, S)], axis=-1)
    w_emb = jnp.zeros((A + S, 2 * Z), jnp.float32)
    w_emb = w_emb.at[:A, :Z].set(params['action_emb_w'])
    w_emb = w_emb.at[A:, Z:].set(params['state_emb_w'])
    b_emb = jnp.concatenate([params['action_emb_b'], params['state_emb_b']])
    emb = pallas_linear(emb_in, w_emb, b_emb)          # (N, 2Z) = [action | state]

    x = jnp.concatenate([z, emb], axis=-1).reshape(b, t, 3 * Z)
    # TODO(synk): nn.Dropout is identity in eval mode; torch's randn_like reparam
    # noise is replaced by the deterministic `eps` arg.

    y_tbh, hn, cn = lstm_fused(x, h0, c0, params)
    xo = jnp.transpose(y_tbh, (1, 0, 2)).reshape(N, HS)

    z_pred, state_pred_flat = fused_head(xo, params, Z, S)
    state_pred = state_pred_flat.reshape(b, t, S)

    # single decoder pass over [z ; z_pred] (batch 2N)
    dec = vae_decode(params, jnp.concatenate([z, z_pred], axis=0))
    img_rec = dec[:N].reshape(b, t, CH, W, H)
    img_pred = dec[N:].reshape(b, t, CH, W, H)

    loss = None
    if targets is not None:
        # scalar loss reductions kept in plain JAX (glue)
        img_targets, state_targets = targets
        rec_loss = _bce(img_rec, img)
        pred_loss = _bce(img_pred, img_targets)
        state_loss = jnp.mean((state_pred - state_targets) ** 2) / STATE_NORM_FACTOR ** 2
        kld = -0.5 * jnp.mean(1.0 + logvar - mu ** 2 - jnp.exp(logvar))
        kld = jnp.maximum(kld, 0.5)
        loss = rec_loss + 0.001 * kld + pred_loss + state_loss

    return img_pred, state_pred, loss, hn, cn


# ----------------------------------------------------------------------------
# deterministic synthetic parameters
# ----------------------------------------------------------------------------
def init_params(key, config):
    Z, HS = config.vae.z_size, config.lstm.h_size
    A, S = config.n_action, config.n_states
    kit = iter(jax.random.split(key, 64))

    def nrm(shape, std=0.02):
        return (std * jax.random.normal(next(kit), shape)).astype(jnp.float32)

    p = {}
    # conv VAE encoder (world-models style, scaled to 1x32x32 inputs)
    p['e_conv1_w'] = nrm((16, 1, 4, 4));   p['e_conv1_b'] = nrm((16,))
    p['e_conv2_w'] = nrm((32, 16, 4, 4));  p['e_conv2_b'] = nrm((32,))
    p['e_conv3_w'] = nrm((64, 32, 4, 4));  p['e_conv3_b'] = nrm((64,))
    p['fc_mu_w'] = nrm((256, Z));          p['fc_mu_b'] = jnp.zeros((Z,), jnp.float32)
    p['fc_logvar_w'] = nrm((256, Z));      p['fc_logvar_b'] = jnp.zeros((Z,), jnp.float32)
    # conv VAE decoder
    p['d_fc_w'] = nrm((Z, 256));           p['d_fc_b'] = jnp.zeros((256,), jnp.float32)
    p['d_deconv1_w'] = nrm((256, 64, 5, 5)); p['d_deconv1_b'] = nrm((64,))
    p['d_deconv2_w'] = nrm((64, 32, 6, 6));  p['d_deconv2_b'] = nrm((32,))
    p['d_deconv3_w'] = nrm((32, 1, 6, 6));   p['d_deconv3_b'] = nrm((1,))
    # embeddings (nn.Linear: weight ~ N(0, 0.02), bias = 0)
    p['action_emb_w'] = nrm((A, Z));       p['action_emb_b'] = jnp.zeros((Z,), jnp.float32)
    p['state_emb_w'] = nrm((S, Z));        p['state_emb_b'] = jnp.zeros((Z,), jnp.float32)
    # LSTM (weights stored transposed (In, 4H); bias = b_ih + b_hh combined)
    in_sizes = [3 * Z] + [HS] * (config.lstm.n_layer - 1)
    for layer, In in enumerate(in_sizes):
        p[f'lstm_wih_{layer}'] = nrm((In, 4 * HS))
        p[f'lstm_whh_{layer}'] = nrm((HS, 4 * HS))
        p[f'lstm_b_{layer}'] = nrm((4 * HS,))
    # heads
    p['lstm_head_w'] = nrm((HS, 2 * Z));   p['lstm_head_b'] = jnp.zeros((2 * Z,), jnp.float32)
    p['ln_g'] = jnp.ones((2 * Z,), jnp.float32)
    p['ln_b'] = jnp.zeros((2 * Z,), jnp.float32)
    p['z_head_w'] = nrm((Z, Z));           p['z_head_b'] = jnp.zeros((Z,), jnp.float32)
    p['state_head_w'] = nrm((Z, S));       p['state_head_b'] = jnp.zeros((S,), jnp.float32)
    return p


# ----------------------------------------------------------------------------
# main
# ----------------------------------------------------------------------------
if __name__ == "__main__":
    config = SimpleNamespace(
        n_action=3, n_states=2, pdrop=0.1,
        vae=SimpleNamespace(z_size=32),
        lstm=SimpleNamespace(h_size=64, n_layer=2))

    key = jax.random.PRNGKey(0)
    kp, ki = jax.random.split(key)
    params = init_params(kp, config)

    b, t, CH, W, H = 2, 3, 1, 32, 32
    ks = jax.random.split(ki, 8)
    img = jax.random.uniform(ks[0], (b, t, CH, W, H), jnp.float32)
    state = jax.random.normal(ks[1], (b, t, config.n_states), jnp.float32)
    action = jax.random.normal(ks[2], (b, t, config.n_action), jnp.float32)
    dones = jnp.zeros((b, t), jnp.float32)
    h0 = jax.random.normal(ks[3], (config.lstm.n_layer, b, config.lstm.h_size), jnp.float32)
    c0 = jax.random.normal(ks[4], (config.lstm.n_layer, b, config.lstm.h_size), jnp.float32)
    eps = jax.random.normal(ks[5], (b * t, config.vae.z_size), jnp.float32)
    img_targets = jax.random.uniform(ks[6], (b, t, CH, W, H), jnp.float32)
    state_targets = jax.random.normal(ks[7], (b, t, config.n_states), jnp.float32)

    @jax.jit
    def fwd(params, img, state, action, dones, h0, c0, eps, img_t, state_t):
        return vaelstm_forward(params, img, state, action, dones, h0, c0, eps,
                               targets=(img_t, state_t))

    img_pred, state_pred, loss, hn, cn = fwd(
        params, img, state, action, dones, h0, c0, eps, img_targets, state_targets)
    jax.block_until_ready((img_pred, state_pred, loss, hn, cn))

    assert img_pred.shape == img.shape
    assert state_pred.shape == state.shape
    assert hn.shape == h0.shape and cn.shape == c0.shape
    assert bool(jnp.isfinite(loss))
    print("KERNEL_OK")
</pallas_src>

<mosaic_0001>
module attributes {stable_mosaic.version = 11 : i64} {
  func.func @_linear_kernel(%arg0: i32, %arg1: memref<1024x16xbf16, #tpu.memory_space<vmem>>, %arg2: memref<16x16xbf16, #tpu.memory_space<vmem>>, %arg3: memref<1x16xf32, #tpu.memory_space<vmem>>, %arg4: memref<1024x16xf32, #tpu.memory_space<vmem>>) attributes {dimension_semantics = [#tpu.dimension_semantics<parallel>], iteration_bounds = array<i64: 2>, scalar_prefetch = 0 : i64, scratch_operands = 0 : i64, tpu.core_type = #tpu.core_type<tc>, window_params = [{transform_indices = @transform_0, window_bounds = array<i64: 1024, 16>}, {pipeline_mode = #tpu.pipeline_mode<synchronous>, transform_indices = @transform_1, window_bounds = array<i64: 16, 16>}, {pipeline_mode = #tpu.pipeline_mode<synchronous>, transform_indices = @transform_2, window_bounds = array<i64: 1, 16>}, {transform_indices = @transform_3, window_bounds = array<i64: 1024, 16>}]} {
    %c0 = arith.constant 0 : index
    %c0_0 = arith.constant 0 : index
    %0 = vector.load %arg1[%c0, %c0_0] : memref<1024x16xbf16, #tpu.memory_space<vmem>>, vector<1024x16xbf16>
    %c0_1 = arith.constant 0 : index
    %c0_2 = arith.constant 0 : index
    %1 = vector.load %arg2[%c0_1, %c0_2] : memref<16x16xbf16, #tpu.memory_space<vmem>>, vector<16x16xbf16>
    %cst = arith.constant dense<0.000000e+00> : vector<1024x16xf32>
    %2 = tpu.matmul %0, %1, %cst {dimension_numbers = #tpu.dot_dimension_numbers<[1], [0], [0], [1], [0, 0, 1, 1], [], []>} : vector<1024x16xbf16>, vector<16x16xbf16>, vector<1024x16xf32> -> vector<1024x16xf32>
    %c0_3 = arith.constant 0 : index
    %c0_4 = arith.constant 0 : index
    %3 = vector.load %arg3[%c0_3, %c0_4] : memref<1x16xf32, #tpu.memory_space<vmem>>, vector<1x16xf32>
    %4 = vector.broadcast %3 : vector<1x16xf32> to vector<1024x16xf32>
    %5 = arith.addf %2, %4 : vector<1024x16xf32>
    %cst_5 = arith.constant 0.000000e+00 : f32
    %6 = vector.broadcast %cst_5 : f32 to vector<1024x16xf32>
    %7 = arith.maximumf %5, %6 : vector<1024x16xf32>
    %c0_6 = arith.constant 0 : index
    %c0_7 = arith.constant 0 : index
    %8 = vector.load %arg4[%c0_6, %c0_7] : memref<1024x16xf32, #tpu.memory_space<vmem>>, vector<1024x16xf32>
    tpu.vector_store %arg4[%c0_6, %c0_7], %7 {strides = array<i32>} : memref<1024x16xf32, #tpu.memory_space<vmem>>, vector<1024x16xf32>,
    return
  }
  func.func @transform_0(%arg0: i32) -> (i32, i32) {
    %c0_i32 = arith.constant 0 : i32
    %c0_i32_0 = arith.constant 0 : i32
    return %arg0, %c0_i32 : i32, i32
  }
  func.func @transform_1(%arg0: i32) -> (i32, i32) {
    %c0_i32 = arith.constant 0 : i32
    %c0_i32_0 = arith.constant 0 : i32
    %c0_i32_1 = arith.constant 0 : i32
    return %c0_i32, %c0_i32_0 : i32, i32
  }
  func.func @transform_2(%arg0: i32) -> (i32, i32) {
    %c0_i32 = arith.constant 0 : i32
    %c0_i32_0 = arith.constant 0 : i32
    %c0_i32_1 = arith.constant 0 : i32
    return %c0_i32, %c0_i32_0 : i32, i32
  }
  func.func @transform_3(%arg0: i32) -> (i32, i32) {
    %c0_i32 = arith.constant 0 : i32
    %c0_i32_0 = arith.constant 0 : i32
    return %arg0, %c0_i32 : i32, i32
  }
}

module attributes {stable_mosaic.version = 11 : i64} {
  func.func @_linear_kernel(%arg0: i32, %arg1: memref<216x256xbf16, #tpu.memory_space<vmem>>, %arg2: memref<256x32xbf16, #tpu.memory_space<vmem>>, %arg3: memref<1x32xf32, #tpu.memory_space<vmem>>, %arg4: memref<216x32xf32, #tpu.memory_space<vmem>>) attributes {dimension_semantics = [#tpu.dimension_semantics<parallel>], iteration_bounds = array<i64: 1>, scalar_prefetch = 0 : i64, scratch_operands = 0 : i64, tpu.core_type = #tpu.core_type<tc>, window_params = [{transform_indices = @transform_0, window_bounds = array<i64: 216, 256>}, {pipeline_mode = #tpu.pipeline_mode<synchronous>, transform_indices = @transform_1, window_bounds = array<i64: 256, 32>}, {pipeline_mode = #tpu.pipeline_mode<synchronous>, transform_indices = @transform_2, window_bounds = array<i64: 1, 32>}, {transform_indices = @transform_3, window_bounds = array<i64: 216, 32>}]} {
    %c0 = arith.constant 0 : index
    %c0_0 = arith.constant 0 : index
    %0 = vector.load %arg1[%c0, %c0_0] : memref<216x256xbf16, #tpu.memory_space<vmem>>, vector<216x256xbf16>
    %c0_1 = arith.constant 0 : index
    %c0_2 = arith.constant 0 : index
    %1 = vector.load %arg2[%c0_1, %c0_2] : memref<256x32xbf16, #tpu.memory_space<vmem>>, vector<256x32xbf16>
    %cst = arith.constant dense<0.000000e+00> : vector<216x32xf32>
    %2 = tpu.matmul %0, %1, %cst {dimension_numbers = #tpu.dot_dimension_numbers<[1], [0], [0], [1], [0, 0, 1, 1], [], []>} : vector<216x256xbf16>, vector<256x32xbf16>, vector<216x32xf32> -> vector<216x32xf32>
    %c0_3 = arith.constant 0 : index
    %c0_4 = arith.constant 0 : index
    %3 = vector.load %arg3[%c0_3, %c0_4] : memref<1x32xf32, #tpu.memory_space<vmem>>, vector<1x32xf32>
    %4 = vector.broadcast %3 : vector<1x32xf32> to vector<216x32xf32>
    %5 = arith.addf %2, %4 : vector<216x32xf32>
    %cst_5 = arith.constant 0.000000e+00 : f32
    %6 = vector.broadcast %cst_5 : f32 to vector<216x32xf32>
    %7 = arith.maximumf %5, %6 : vector<216x32xf32>
    %c0_6 = arith.constant 0 : index
    %c0_7 = arith.constant 0 : index
    %8 = vector.load %arg4[%c0_6, %c0_7] : memref<216x32xf32, #tpu.memory_space<vmem>>, vector<216x32xf32>
    tpu.vector_store %arg4[%c0_6, %c0_7], %7 {strides = array<i32>} : memref<216x32xf32, #tpu.memory_space<vmem>>, vector<216x32xf32>,
    return
  }
  func.func @transform_0(%arg0: i32) -> (i32, i32) {
    %c0_i32 = arith.constant 0 : i32
    %c0_i32_0 = arith.constant 0 : i32
    return %arg0, %c0_i32 : i32, i32
  }
  func.func @transform_1(%arg0: i32) -> (i32, i32) {
    %c0_i32 = arith.constant 0 : i32
    %c0_i32_0 = arith.constant 0 : i32
    %c0_i32_1 = arith.constant 0 : i32
    return %c0_i32, %c0_i32_0 : i32, i32
  }
  func.func @transform_2(%arg0: i32) -> (i32, i32) {
    %c0_i32 = arith.constant 0 : i32
    %c0_i32_0 = arith.constant 0 : i32
    %c0_i32_1 = arith.constant 0 : i32
    return %c0_i32, %c0_i32_0 : i32, i32
  }
  func.func @transform_3(%arg0: i32) -> (i32, i32) {
    %c0_i32 = arith.constant 0 : i32
    %c0_i32_0 = arith.constant 0 : i32
    return %arg0, %c0_i32 : i32, i32
  }
}

module attributes {stable_mosaic.version = 11 : i64} {
  func.func @_linear_kernel(%arg0: i32, %arg1: memref<24x512xbf16, #tpu.memory_space<vmem>>, %arg2: memref<512x64xbf16, #tpu.memory_space<vmem>>, %arg3: memref<1x64xf32, #tpu.memory_space<vmem>>, %arg4: memref<24x64xf32, #tpu.memory_space<vmem>>) attributes {dimension_semantics = [#tpu.dimension_semantics<parallel>], iteration_bounds = array<i64: 1>, scalar_prefetch = 0 : i64, scratch_operands = 0 : i64, tpu.core_type = #tpu.core_type<tc>, window_params = [{transform_indices = @transform_0, window_bounds = array<i64: 24, 512>}, {pipeline_mode = #tpu.pipeline_mode<synchronous>, transform_indices = @transform_1, window_bounds = array<i64: 512, 64>}, {pipeline_mode = #tpu.pipeline_mode<synchronous>, transform_indices = @transform_2, window_bounds = array<i64: 1, 64>}, {transform_indices = @transform_3, window_bounds = array<i64: 24, 64>}]} {
    %c0 = arith.constant 0 : index
    %c0_0 = arith.constant 0 : index
    %0 = vector.load %arg1[%c0, %c0_0] : memref<24x512xbf16, #tpu.memory_space<vmem>>, vector<24x512xbf16>
    %c0_1 = arith.constant 0 : index
    %c0_2 = arith.constant 0 : index
    %1 = vector.load %arg2[%c0_1, %c0_2] : memref<512x64xbf16, #tpu.memory_space<vmem>>, vector<512x64xbf16>
    %cst = arith.constant dense<0.000000e+00> : vector<24x64xf32>
    %2 = tpu.matmul %0, %1, %cst {dimension_numbers = #tpu.dot_dimension_numbers<[1], [0], [0], [1], [0, 0, 1, 1], [], []>} : vector<24x512xbf16>, vector<512x64xbf16>, vector<24x64xf32> -> vector<24x64xf32>
    %c0_3 = arith.constant 0 : index
    %c0_4 = arith.constant 0 : index
    %3 = vector.load %arg3[%c0_3, %c0_4] : memref<1x64xf32, #tpu.memory_space<vmem>>, vector<1x64xf32>
    %4 = vector.broadcast %3 : vector<1x64xf32> to vector<24x64xf32>
    %5 = arith.addf %2, %4 : vector<24x64xf32>
    %cst_5 = arith.constant 0.000000e+00 : f32
    %6 = vector.broadcast %cst_5 : f32 to vector<24x64xf32>
    %7 = arith.maximumf %5, %6 : vector<24x64xf32>
    %c0_6 = arith.constant 0 : index
    %c0_7 = arith.constant 0 : index
    %8 = vector.load %arg4[%c0_6, %c0_7] : memref<24x64xf32, #tpu.memory_space<vmem>>, vector<24x64xf32>
    tpu.vector_store %arg4[%c0_6, %c0_7], %7 {strides = array<i32>} : memref<24x64xf32, #tpu.memory_space<vmem>>, vector<24x64xf32>,
    return
  }
  func.func @transform_0(%arg0: i32) -> (i32, i32) {
    %c0_i32 = arith.constant 0 : i32
    %c0_i32_0 = arith.constant 0 : i32
    return %arg0, %c0_i32 : i32, i32
  }
  func.func @transform_1(%arg0: i32) -> (i32, i32) {
    %c0_i32 = arith.constant 0 : i32
    %c0_i32_0 = arith.constant 0 : i32
    %c0_i32_1 = arith.constant 0 : i32
    return %c0_i32, %c0_i32_0 : i32, i32
  }
  func.func @transform_2(%arg0: i32) -> (i32, i32) {
    %c0_i32 = arith.constant 0 : i32
    %c0_i32_0 = arith.constant 0 : i32
    %c0_i32_1 = arith.constant 0 : i32
    return %c0_i32, %c0_i32_0 : i32, i32
  }
  func.func @transform_3(%arg0: i32) -> (i32, i32) {
    %c0_i32 = arith.constant 0 : i32
    %c0_i32_0 = arith.constant 0 : i32
    return %arg0, %c0_i32 : i32, i32
  }
}

module attributes {stable_mosaic.version = 11 : i64} {
  func.func @_linear_kernel(%arg0: i32, %arg1: memref<8x256xf32, #tpu.memory_space<vmem>>, %arg2: memref<256x64xf32, #tpu.memory_space<vmem>>, %arg3: memref<1x64xf32, #tpu.memory_space<vmem>>, %arg4: memref<8x64xf32, #tpu.memory_space<vmem>>) attributes {dimension_semantics = [#tpu.dimension_semantics<parallel>], iteration_bounds = array<i64: 1>, scalar_prefetch = 0 : i64, scratch_operands = 0 : i64, tpu.core_type = #tpu.core_type<tc>, window_params = [{transform_indices = @transform_0, window_bounds = array<i64: 8, 256>}, {pipeline_mode = #tpu.pipeline_mode<synchronous>, transform_indices = @transform_1, window_bounds = array<i64: 256, 64>}, {pipeline_mode = #tpu.pipeline_mode<synchronous>, transform_indices = @transform_2, window_bounds = array<i64: 1, 64>}, {transform_indices = @transform_3, window_bounds = array<i64: 8, 64>}]} {
    %c0 = arith.constant 0 : index
    %c0_0 = arith.constant 0 : index
    %0 = vector.load %arg1[%c0, %c0_0] : memref<8x256xf32, #tpu.memory_space<vmem>>, vector<8x256xf32>
    %c0_1 = arith.constant 0 : index
    %c0_2 = arith.constant 0 : index
    %1 = vector.load %arg2[%c0_1, %c0_2] : memref<256x64xf32, #tpu.memory_space<vmem>>, vector<256x64xf32>
    %cst = arith.constant dense<0.000000e+00> : vector<8x64xf32>
    %2 = tpu.matmul %0, %1, %cst {dimension_numbers = #tpu.dot_dimension_numbers<[1], [0], [0], [1], [0, 0, 1, 1], [], []>} : vector<8x256xf32>, vector<256x64xf32>, vector<8x64xf32> -> vector<8x64xf32>
    %c0_3 = arith.constant 0 : index
    %c0_4 = arith.constant 0 : index
    %3 = vector.load %arg3[%c0_3, %c0_4] : memref<1x64xf32, #tpu.memory_space<vmem>>, vector<1x64xf32>
    %4 = vector.broadcast %3 : vector<1x64xf32> to vector<8x64xf32>
    %5 = arith.addf %2, %4 : vector<8x64xf32>
    %c0_5 = arith.constant 0 : index
    %c0_6 = arith.constant 0 : index
    %6 = vector.load %arg4[%c0_5, %c0_6] : memref<8x64xf32, #tpu.memory_space<vmem>>, vector<8x64xf32>
    tpu.vector_store %arg4[%c0_5, %c0_6], %5 {strides = array<i32>} : memref<8x64xf32, #tpu.memory_space<vmem>>, vector<8x64xf32>,
    return
  }
  func.func @transform_0(%arg0: i32) -> (i32, i32) {
    %c0_i32 = arith.constant 0 : i32
    %c0_i32_0 = arith.constant 0 : i32
    return %arg0, %c0_i32 : i32, i32
  }
  func.func @transform_1(%arg0: i32) -> (i32, i32) {
    %c0_i32 = arith.constant 0 : i32
    %c0_i32_0 = arith.constant 0 : i32
    %c0_i32_1 = arith.constant 0 : i32
    return %c0_i32, %c0_i32_0 : i32, i32
  }
  func.func @transform_2(%arg0: i32) -> (i32, i32) {
    %c0_i32 = arith.constant 0 : i32
    %c0_i32_0 = arith.constant 0 : i32
    %c0_i32_1 = arith.constant 0 : i32
    return %c0_i32, %c0_i32_0 : i32, i32
  }
  func.func @transform_3(%arg0: i32) -> (i32, i32) {
    %c0_i32 = arith.constant 0 : i32
    %c0_i32_0 = arith.constant 0 : i32
    return %arg0, %c0_i32 : i32, i32
  }
}

module attributes {stable_mosaic.version = 11 : i64} {
  func.func @_linear_kernel(%arg0: i32, %arg1: memref<8x5xf32, #tpu.memory_space<vmem>>, %arg2: memref<5x64xf32, #tpu.memory_space<vmem>>, %arg3: memref<1x64xf32, #tpu.memory_space<vmem>>, %arg4: memref<8x64xf32, #tpu.memory_space<vmem>>) attributes {dimension_semantics = [#tpu.dimension_semantics<parallel>], iteration_bounds = array<i64: 1>, scalar_prefetch = 0 : i64, scratch_operands = 0 : i64, tpu.core_type = #tpu.core_type<tc>, window_params = [{transform_indices = @transform_0, window_bounds = array<i64: 8, 5>}, {pipeline_mode = #tpu.pipeline_mode<synchronous>, transform_indices = @transform_1, window_bounds = array<i64: 5, 64>}, {pipeline_mode = #tpu.pipeline_mode<synchronous>, transform_indices = @transform_2, window_bounds = array<i64: 1, 64>}, {transform_indices = @transform_3, window_bounds = array<i64: 8, 64>}]} {
    %c0 = arith.constant 0 : index
    %c0_0 = arith.constant 0 : index
    %0 = vector.load %arg1[%c0, %c0_0] : memref<8x5xf32, #tpu.memory_space<vmem>>, vector<8x5xf32>
    %c0_1 = arith.constant 0 : index
    %c0_2 = arith.constant 0 : index
    %1 = vector.load %arg2[%c0_1, %c0_2] : memref<5x64xf32, #tpu.memory_space<vmem>>, vector<5x64xf32>
    %cst = arith.constant dense<0.000000e+00> : vector<8x64xf32>
    %2 = tpu.matmul %0, %1, %cst {dimension_numbers = #tpu.dot_dimension_numbers<[1], [0], [0], [1], [0, 0, 1, 1], [], []>} : vector<8x5xf32>, vector<5x64xf32>, vector<8x64xf32> -> vector<8x64xf32>
    %c0_3 = arith.constant 0 : index
    %c0_4 = arith.constant 0 : index
    %3 = vector.load %arg3[%c0_3, %c0_4] : memref<1x64xf32, #tpu.memory_space<vmem>>, vector<1x64xf32>
    %4 = vector.broadcast %3 : vector<1x64xf32> to vector<8x64xf32>
    %5 = arith.addf %2, %4 : vector<8x64xf32>
    %c0_5 = arith.constant 0 : index
    %c0_6 = arith.constant 0 : index
    %6 = vector.load %arg4[%c0_5, %c0_6] : memref<8x64xf32, #tpu.memory_space<vmem>>, vector<8x64xf32>
    tpu.vector_store %arg4[%c0_5, %c0_6], %5 {strides = array<i32>} : memref<8x64xf32, #tpu.memory_space<vmem>>, vector<8x64xf32>,
    return
  }
  func.func @transform_0(%arg0: i32) -> (i32, i32) {
    %c0_i32 = arith.constant 0 : i32
    %c0_i32_0 = arith.constant 0 : i32
    return %arg0, %c0_i32 : i32, i32
  }
  func.func @transform_1(%arg0: i32) -> (i32, i32) {
    %c0_i32 = arith.constant 0 : i32
    %c0_i32_0 = arith.constant 0 : i32
    %c0_i32_1 = arith.constant 0 : i32
    return %c0_i32, %c0_i32_0 : i32, i32
  }
  func.func @transform_2(%arg0: i32) -> (i32, i32) {
    %c0_i32 = arith.constant 0 : i32
    %c0_i32_0 = arith.constant 0 : i32
    %c0_i32_1 = arith.constant 0 : i32
    return %c0_i32, %c0_i32_0 : i32, i32
  }
  func.func @transform_3(%arg0: i32) -> (i32, i32) {
    %c0_i32 = arith.constant 0 : i32
    %c0_i32_0 = arith.constant 0 : i32
    return %arg0, %c0_i32 : i32, i32
  }
}

module attributes {stable_mosaic.version = 11 : i64} {
  func.func @_linear_kernel(%arg0: i32, %arg1: memref<8x96xf32, #tpu.memory_space<vmem>>, %arg2: memref<96x256xf32, #tpu.memory_space<vmem>>, %arg3: memref<1x256xf32, #tpu.memory_space<vmem>>, %arg4: memref<8x256xf32, #tpu.memory_space<vmem>>) attributes {dimension_semantics = [#tpu.dimension_semantics<parallel>], iteration_bounds = array<i64: 1>, scalar_prefetch = 0 : i64, scratch_operands = 0 : i64, tpu.core_type = #tpu.core_type<tc>, window_params = [{transform_indices = @transform_0, window_bounds = array<i64: 8, 96>}, {pipeline_mode = #tpu.pipeline_mode<synchronous>, transform_indices = @transform_1, window_bounds = array<i64: 96, 256>}, {pipeline_mode = #tpu.pipeline_mode<synchronous>, transform_indices = @transform_2, window_bounds = array<i64: 1, 256>}, {transform_indices = @transform_3, window_bounds = array<i64: 8, 256>}]} {
    %c0 = arith.constant 0 : index
    %c0_0 = arith.constant 0 : index
    %0 = vector.load %arg1[%c0, %c0_0] : memref<8x96xf32, #tpu.memory_space<vmem>>, vector<8x96xf32>
    %c0_1 = arith.constant 0 : index
    %c0_2 = arith.constant 0 : index
    %1 = vector.load %arg2[%c0_1, %c0_2] : memref<96x256xf32, #tpu.memory_space<vmem>>, vector<96x256xf32>
    %cst = arith.constant dense<0.000000e+00> : vector<8x256xf32>
    %2 = tpu.matmul %0, %1, %cst {dimension_numbers = #tpu.dot_dimension_numbers<[1], [0], [0], [1], [0, 0, 1, 1], [], []>} : vector<8x96xf32>, vector<96x256xf32>, vector<8x256xf32> -> vector<8x256xf32>
    %c0_3 = arith.constant 0 : index
    %c0_4 = arith.constant 0 : index
    %3 = vector.load %arg3[%c0_3, %c0_4] : memref<1x256xf32, #tpu.memory_space<vmem>>, vector<1x256xf32>
    %4 = vector.broadcast %3 : vector<1x256xf32> to vector<8x256xf32>
    %5 = arith.addf %2, %4 : vector<8x256xf32>
    %c0_5 = arith.constant 0 : index
    %c0_6 = arith.constant 0 : index
    %6 = vector.load %arg4[%c0_5, %c0_6] : memref<8x256xf32, #tpu.memory_space<vmem>>, vector<8x256xf32>
    tpu.vector_store %arg4[%c0_5, %c0_6], %5 {strides = array<i32>} : memref<8x256xf32, #tpu.memory_space<vmem>>, vector<8x256xf32>,
    return
  }
  func.func @transform_0(%arg0: i32) -> (i32, i32) {
    %c0_i32 = arith.constant 0 : i32
    %c0_i32_0 = arith.constant 0 : i32
    return %arg0, %c0_i32 : i32, i32
  }
  func.func @transform_1(%arg0: i32) -> (i32, i32) {
    %c0_i32 = arith.constant 0 : i32
    %c0_i32_0 = arith.constant 0 : i32
    %c0_i32_1 = arith.constant 0 : i32
    return %c0_i32, %c0_i32_0 : i32, i32
  }
  func.func @transform_2(%arg0: i32) -> (i32, i32) {
    %c0_i32 = arith.constant 0 : i32
    %c0_i32_0 = arith.constant 0 : i32
    %c0_i32_1 = arith.constant 0 : i32
    return %c0_i32, %c0_i32_0 : i32, i32
  }
  func.func @transform_3(%arg0: i32) -> (i32, i32) {
    %c0_i32 = arith.constant 0 : i32
    %c0_i32_0 = arith.constant 0 : i32
    return %arg0, %c0_i32 : i32, i32
  }
}

module attributes {stable_mosaic.version = 11 : i64} {
  func.func @_lstm_fused_kernel(%arg0: i32, %arg1: memref<1x2x256xf32, #tpu.memory_space<vmem>>, %arg2: memref<2x2x64xf32, #tpu.memory_space<vmem>>, %arg3: memref<2x2x64xf32, #tpu.memory_space<vmem>>, %arg4: memref<2x64x256xf32, #tpu.memory_space<vmem>>, %arg5: memref<1x64x256xf32, #tpu.memory_space<vmem>>, %arg6: memref<1x1x256xf32, #tpu.memory_space<vmem>>, %arg7: memref<1x2x64xf32, #tpu.memory_space<vmem>>, %arg8: memref<2x2x64xf32, #tpu.memory_space<vmem>>, %arg9: memref<2x2x64xf32, #tpu.memory_space<vmem>>, %arg10: memref<2x2x64xf32, #tpu.memory_space<vmem>>, %arg11: memref<2x2x64xf32, #tpu.memory_space<vmem>>) attributes {dimension_semantics = [#tpu.dimension_semantics<arbitrary>], iteration_bounds = array<i64: 3>, scalar_prefetch = 0 : i64, scratch_operands = 2 : i64, tpu.core_type = #tpu.core_type<tc>, window_params = [{transform_indices = @transform_0, window_bounds = array<i64: 1, 2, 256>}, {pipeline_mode = #tpu.pipeline_mode<synchronous>, transform_indices = @transform_1, window_bounds = array<i64: 2, 2, 64>}, {pipeline_mode = #tpu.pipeline_mode<synchronous>, transform_indices = @transform_2, window_bounds = array<i64: 2, 2, 64>}, {pipeline_mode = #tpu.pipeline_mode<synchronous>, transform_indices = @transform_3, window_bounds = array<i64: 2, 64, 256>}, {pipeline_mode = #tpu.pipeline_mode<synchronous>, transform_indices = @transform_4, window_bounds = array<i64: 1, 64, 256>}, {pipeline_mode = #tpu.pipeline_mode<synchronous>, transform_indices = @transform_5, window_bounds = array<i64: 1, 1, 256>}, {transform_indices = @transform_6, window_bounds = array<i64: 1, 2, 64>}, {pipeline_mode = #tpu.pipeline_mode<synchronous>, transform_indices = @transform_7, window_bounds = array<i64: 2, 2, 64>}, {pipeline_mode = #tpu.pipeline_mode<synchronous>, transform_indices = @transform_8, window_bounds = array<i64: 2, 2, 64>}]} {
    %c0_i32 = arith.constant 0 : i32
    %0 = arith.cmpi eq, %arg0, %c0_i32 : i32
    %1 = arith.extui %0 : i1 to i32
    %c0_i32_0 = arith.constant 0 : i32
    %2 = arith.cmpi ne, %1, %c0_i32_0 : i32
    scf.if %2 {
      %c0_50 = arith.constant 0 : index
      %c0_51 = arith.constant 0 : index
      %c0_52 = arith.constant 0 : index
      %95 = vector.load %arg2[%c0_50, %c0_51, %c0_52] : memref<2x2x64xf32, #tpu.memory_space<vmem>>, vector<2x2x64xf32>
      %c0_53 = arith.constant 0 : index
      %c0_54 = arith.constant 0 : index
      %c0_55 = arith.constant 0 : index
      %96 = vector.load %arg10[%c0_53, %c0_54, %c0_55] : memref<2x2x64xf32, #tpu.memory_space<vmem>>, vector<2x2x64xf32>
      tpu.vector_store %arg10[%c0_53, %c0_54, %c0_55], %95 {strides = array<i32>} : memref<2x2x64xf32, #tpu.memory_space<vmem>>, vector<2x2x64xf32>,
      %c0_56 = arith.constant 0 : index
      %c0_57 = arith.constant 0 : index
      %c0_58 = arith.constant 0 : index
      %97 = vector.load %arg3[%c0_56, %c0_57, %c0_58] : memref<2x2x64xf32, #tpu.memory_space<vmem>>, vector<2x2x64xf32>
      %c0_59 = arith.constant 0 : index
      %c0_60 = arith.constant 0 : index
      %c0_61 = arith.constant 0 : index
      %98 = vector.load %arg11[%c0_59, %c0_60, %c0_61] : memref<2x2x64xf32, #tpu.memory_space<vmem>>, vector<2x2x64xf32>
      tpu.vector_store %arg11[%c0_59, %c0_60, %c0_61], %97 {strides = array<i32>} : memref<2x2x64xf32, #tpu.memory_space<vmem>>, vector<2x2x64xf32>,
    } else {
    }
    %c0 = arith.constant 0 : index
    %c0_1 = arith.constant 0 : index
    %c0_2 = arith.constant 0 : index
    %3 = vector.load %arg1[%c0, %c0_1, %c0_2] : memref<1x2x256xf32, #tpu.memory_space<vmem>>, vector<1x2x256xf32>
    %4 = vector.shape_cast %3 : vector<1x2x256xf32> to vector<2x256xf32>
    %c0_3 = arith.constant 0 : index
    %c0_4 = arith.constant 0 : index
    %c0_5 = arith.constant 0 : index
    %5 = vector.load %arg10[%c0_3, %c0_4, %c0_5] : memref<2x2x64xf32, #tpu.memory_space<vmem>>, vector<1x2x64xf32>
    %6 = vector.shape_cast %5 : vector<1x2x64xf32> to vector<2x64xf32>
    %c0_6 = arith.constant 0 : index
    %c0_7 = arith.constant 0 : index
    %c0_8 = arith.constant 0 : index
    %7 = vector.load %arg11[%c0_6, %c0_7, %c0_8] : memref<2x2x64xf32, #tpu.memory_space<vmem>>, vector<1x2x64xf32>
    %8 = vector.shape_cast %7 : vector<1x2x64xf32> to vector<2x64xf32>
    %c0_9 = arith.constant 0 : index
    %c0_10 = arith.constant 0 : index
    %c0_11 = arith.constant 0 : index
    %9 = vector.load %arg4[%c0_9, %c0_10, %c0_11] : memref<2x64x256xf32, #tpu.memory_space<vmem>>, vector<1x64x256xf32>
    %10 = vector.shape_cast %9 : vector<1x64x256xf32> to vector<64x256xf32>
    %cst = arith.constant dense<0.000000e+00> : vector<2x256xf32>
    %11 = tpu.matmul %6, %10, %cst {dimension_numbers = #tpu.dot_dimension_numbers<[1], [0], [0], [1], [0, 0, 1, 1], [], []>} : vector<2x64xf32>, vector<64x256xf32>, vector<2x256xf32> -> vector<2x256xf32>
    %12 = arith.addf %4, %11 : vector<2x256xf32>
    %13 = vector.extract_strided_slice %12 {offsets = [0, 0], sizes = [2, 64], strides = [1, 1]} : vector<2x256xf32> to vector<2x64xf32>
    %14 = arith.negf %13 : vector<2x64xf32>
    %15 = math.exp %14 : vector<2x64xf32>
    %cst_12 = arith.constant 1.000000e+00 : f32
    %16 = vector.broadcast %cst_12 : f32 to vector<2x64xf32>
    %17 = arith.addf %16, %15 : vector<2x64xf32>
    %18 = arith.divf %16, %17 : vector<2x64xf32>
    %19 = vector.extract_strided_slice %12 {offsets = [0, 64], sizes = [2, 64], strides = [1, 1]} : vector<2x256xf32> to vector<2x64xf32>
    %20 = arith.negf %19 : vector<2x64xf32>
    %21 = math.exp %20 : vector<2x64xf32>
    %cst_13 = arith.constant 1.000000e+00 : f32
    %22 = vector.broadcast %cst_13 : f32 to vector<2x64xf32>
    %23 = arith.addf %22, %21 : vector<2x64xf32>
    %24 = arith.divf %22, %23 : vector<2x64xf32>
    %25 = vector.extract_strided_slice %12 {offsets = [0, 128], sizes = [2, 64], strides = [1, 1]} : vector<2x256xf32> to vector<2x64xf32>
    %26 = math.tanh %25 : vector<2x64xf32>
    %27 = vector.extract_strided_slice %12 {offsets = [0, 192], sizes = [2, 64], strides = [1, 1]} : vector<2x256xf32> to vector<2x64xf32>
    %28 = arith.negf %27 : vector<2x64xf32>
    %29 = math.exp %28 : vector<2x64xf32>
    %cst_14 = arith.constant 1.000000e+00 : f32
    %30 = vector.broadcast %cst_14 : f32 to vector<2x64xf32>
    %31 = arith.addf %30, %29 : vector<2x64xf32>
    %32 = arith.divf %30, %31 : vector<2x64xf32>
    %33 = arith.mulf %24, %8 : vector<2x64xf32>
    %34 = arith.mulf %18, %26 : vector<2x64xf32>
    %35 = arith.addf %33, %34 : vector<2x64xf32>
    %36 = math.tanh %35 : vector<2x64xf32>
    %37 = arith.mulf %32, %36 : vector<2x64xf32>
    %c0_15 = arith.constant 0 : index
    %c0_16 = arith.constant 0 : index
    %c0_17 = arith.constant 0 : index
    %38 = vector.load %arg10[%c0_15, %c0_16, %c0_17] : memref<2x2x64xf32, #tpu.memory_space<vmem>>, vector<1x2x64xf32>
    %39 = vector.shape_cast %38 : vector<1x2x64xf32> to vector<2x64xf32>
    %40 = vector.shape_cast %37 : vector<2x64xf32> to vector<1x2x64xf32>
    tpu.vector_store %arg10[%c0_15, %c0_16, %c0_17], %40 {strides = array<i32>} : memref<2x2x64xf32, #tpu.memory_space<vmem>>, vector<1x2x64xf32>,
    %c0_18 = arith.constant 0 : index
    %c0_19 = arith.constant 0 : index
    %c0_20 = arith.constant 0 : index
    %41 = vector.load %arg11[%c0_18, %c0_19, %c0_20] : memref<2x2x64xf32, #tpu.memory_space<vmem>>, vector<1x2x64xf32>
    %42 = vector.shape_cast %41 : vector<1x2x64xf32> to vector<2x64xf32>
    %43 = vector.shape_cast %35 : vector<2x64xf32> to vector<1x2x64xf32>
    tpu.vector_store %arg11[%c0_18, %c0_19, %c0_20], %43 {strides = array<i32>} : memref<2x2x64xf32, #tpu.memory_space<vmem>>, vector<1x2x64xf32>,
    %c0_21 = arith.constant 0 : index
    %c0_22 = arith.constant 0 : index
    %c0_23 = arith.constant 0 : index
    %44 = vector.load %arg5[%c0_21, %c0_22, %c0_23] : memref<1x64x256xf32, #tpu.memory_space<vmem>>, vector<1x64x256xf32>
    %45 = vector.shape_cast %44 : vector<1x64x256xf32> to vector<64x256xf32>
    %cst_24 = arith.constant dense<0.000000e+00> : vector<2x256xf32>
    %46 = tpu.matmul %37, %45, %cst_24 {dimension_numbers = #tpu.dot_dimension_numbers<[1], [0], [0], [1], [0, 0, 1, 1], [], []>} : vector<2x64xf32>, vector<64x256xf32>, vector<2x256xf32> -> vector<2x256xf32>
    %c0_25 = arith.constant 0 : index
    %c0_26 = arith.constant 0 : index
    %c0_27 = arith.constant 0 : index
    %47 = vector.load %arg6[%c0_25, %c0_26, %c0_27] : memref<1x1x256xf32, #tpu.memory_space<vmem>>, vector<1x1x256xf32>
    %48 = vector.shape_cast %47 : vector<1x1x256xf32> to vector<1x256xf32>
    %49 = vector.broadcast %48 : vector<1x256xf32> to vector<2x256xf32>
    %50 = arith.addf %46, %49 : vector<2x256xf32>
    %c1 = arith.constant 1 : index
    %c0_28 = arith.constant 0 : index
    %c0_29 = arith.constant 0 : index
    %51 = vector.load %arg10[%c1, %c0_28, %c0_29] : memref<2x2x64xf32, #tpu.memory_space<vmem>>, vector<1x2x64xf32>
    %52 = vector.shape_cast %51 : vector<1x2x64xf32> to vector<2x64xf32>
    %c1_30 = arith.constant 1 : index
    %c0_31 = arith.constant 0 : index
    %c0_32 = arith.constant 0 : index
    %53 = vector.load %arg11[%c1_30, %c0_31, %c0_32] : memref<2x2x64xf32, #tpu.memory_space<vmem>>, vector<1x2x64xf32>
    %54 = vector.shape_cast %53 : vector<1x2x64xf32> to vector<2x64xf32>
    %c1_33 = arith.constant 1 : index
    %c0_34 = arith.constant 0 : index
    %c0_35 = arith.constant 0 : index
    %55 = vector.load %arg4[%c1_33, %c0_34, %c0_35] : memref<2x64x256xf32, #tpu.memory_space<vmem>>, vector<1x64x256xf32>
    %56 = vector.shape_cast %55 : vector<1x64x256xf32> to vector<64x256xf32>
    %cst_36 = arith.constant dense<0.000000e+00> : vector<2x256xf32>
    %57 = tpu.matmul %52, %56, %cst_36 {dimension_numbers = #tpu.dot_dimension_numbers<[1], [0], [0], [1], [0, 0, 1, 1], [], []>} : vector<2x64xf32>, vector<64x256xf32>, vector<2x256xf32> -> vector<2x256xf32>
    %58 = arith.addf %50, %57 : vector<2x256xf32>
    %59 = vector.extract_strided_slice %58 {offsets = [0, 0], sizes = [2, 64], strides = [1, 1]} : vector<2x256xf32> to vector<2x64xf32>
    %60 = arith.negf %59 : vector<2x64xf32>
    %61 = math.exp %60 : vector<2x64xf32>
    %cst_37 = arith.constant 1.000000e+00 : f32
    %62 = vector.broadcast %cst_37 : f32 to vector<2x64xf32>
    %63 = arith.addf %62, %61 : vector<2x64xf32>
    %64 = arith.divf %62, %63 : vector<2x64xf32>
    %65 = vector.extract_strided_slice %58 {offsets = [0, 64], sizes = [2, 64], strides = [1, 1]} : vector<2x256xf32> to vector<2x64xf32>
    %66 = arith.negf %65 : vector<2x64xf32>
    %67 = math.exp %66 : vector<2x64xf32>
    %cst_38 = arith.constant 1.000000e+00 : f32
    %68 = vector.broadcast %cst_38 : f32 to vector<2x64xf32>
    %69 = arith.addf %68, %67 : vector<2x64xf32>
    %70 = arith.divf %68, %69 : vector<2x64xf32>
    %71 = vector.extract_strided_slice %58 {offsets = [0, 128], sizes = [2, 64], strides = [1, 1]} : vector<2x256xf32> to vector<2x64xf32>
    %72 = math.tanh %71 : vector<2x64xf32>
    %73 = vector.extract_strided_slice %58 {offsets = [0, 192], sizes = [2, 64], strides = [1, 1]} : vector<2x256xf32> to vector<2x64xf32>
    %74 = arith.negf %73 : vector<2x64xf32>
    %75 = math.exp %74 : vector<2x64xf32>
    %cst_39 = arith.constant 1.000000e+00 : f32
    %76 = vector.broadcast %cst_39 : f32 to vector<2x64xf32>
    %77 = arith.addf %76, %75 : vector<2x64xf32>
    %78 = arith.divf %76, %77 : vector<2x64xf32>
    %79 = arith.mulf %70, %54 : vector<2x64xf32>
    %80 = arith.mulf %64, %72 : vector<2x64xf32>
    %81 = arith.addf %79, %80 : vector<2x64xf32>
    %82 = math.tanh %81 : vector<2x64xf32>
    %83 = arith.mulf %78, %82 : vector<2x64xf32>
    %c1_40 = arith.constant 1 : index
    %c0_41 = arith.constant 0 : index
    %c0_42 = arith.constant 0 : index
    %84 = vector.load %arg10[%c1_40, %c0_41, %c0_42] : memref<2x2x64xf32, #tpu.memory_space<vmem>>, vector<1x2x64xf32>
    %85 = vector.shape_cast %84 : vector<1x2x64xf32> to vector<2x64xf32>
    %86 = vector.shape_cast %83 : vector<2x64xf32> to vector<1x2x64xf32>
    tpu.vector_store %arg10[%c1_40, %c0_41, %c0_42], %86 {strides = array<i32>} : memref<2x2x64xf32, #tpu.memory_space<vmem>>, vector<1x2x64xf32>,
    %c1_43 = arith.constant 1 : index
    %c0_44 = arith.constant 0 : index
    %c0_45 = arith.constant 0 : index
    %87 = vector.load %arg11[%c1_43, %c0_44, %c0_45] : memref<2x2x64xf32, #tpu.memory_space<vmem>>, vector<1x2x64xf32>
    %88 = vector.shape_cast %87 : vector<1x2x64xf32> to vector<2x64xf32>
    %89 = vector.shape_cast %81 : vector<2x64xf32> to vector<1x2x64xf32>
    tpu.vector_store %arg11[%c1_43, %c0_44, %c0_45], %89 {strides = array<i32>} : memref<2x2x64xf32, #tpu.memory_space<vmem>>, vector<1x2x64xf32>,
    %90 = vector.shape_cast %83 : vector<2x64xf32> to vector<1x2x64xf32>
    %c0_46 = arith.constant 0 : index
    %c0_47 = arith.constant 0 : index
    %c0_48 = arith.constant 0 : index
    %91 = vector.load %arg7[%c0_46, %c0_47, %c0_48] : memref<1x2x64xf32, #tpu.memory_space<vmem>>, vector<1x2x64xf32>
    tpu.vector_store %arg7[%c0_46, %c0_47, %c0_48], %90 {strides = array<i32>} : memref<1x2x64xf32, #tpu.memory_space<vmem>>, vector<1x2x64xf32>,
    %c2_i32 = arith.constant 2 : i32
    %92 = arith.cmpi eq, %arg0, %c2_i32 : i32
    %93 = arith.extui %92 : i1 to i32
    %c0_i32_49 = arith.constant 0 : i32
    %94 = arith.cmpi ne, %93, %c0_i32_49 : i32
    scf.if %94 {
      %c0_50 = arith.constant 0 : index
      %c0_51 = arith.constant 0 : index
      %c0_52 = arith.constant 0 : index
      %95 = vector.load %arg10[%c0_50, %c0_51, %c0_52] : memref<2x2x64xf32, #tpu.memory_space<vmem>>, vector<2x2x64xf32>
      %c0_53 = arith.constant 0 : index
      %c0_54 = arith.constant 0 : index
      %c0_55 = arith.constant 0 : index
      %96 = vector.load %arg8[%c0_53, %c0_54, %c0_55] : memref<2x2x64xf32, #tpu.memory_space<vmem>>, vector<2x2x64xf32>
      tpu.vector_store %arg8[%c0_53, %c0_54, %c0_55], %95 {strides = array<i32>} : memref<2x2x64xf32, #tpu.memory_space<vmem>>, vector<2x2x64xf32>,
      %c0_56 = arith.constant 0 : index
      %c0_57 = arith.constant 0 : index
      %c0_58 = arith.constant 0 : index
      %97 = vector.load %arg11[%c0_56, %c0_57, %c0_58] : memref<2x2x64xf32, #tpu.memory_space<vmem>>, vector<2x2x64xf32>
      %c0_59 = arith.constant 0 : index
      %c0_60 = arith.constant 0 : index
      %c0_61 = arith.constant 0 : index
      %98 = vector.load %arg9[%c0_59, %c0_60, %c0_61] : memref<2x2x64xf32, #tpu.memory_space<vmem>>, vector<2x2x64xf32>
      tpu.vector_store %arg9[%c0_59, %c0_60, %c0_61], %97 {strides = array<i32>} : memref<2x2x64xf32, #tpu.memory_space<vmem>>, vector<2x2x64xf32>,
    } else {
    }
    return
  }
  func.func @transform_0(%arg0: i32) -> (i32, i32, i32) {
    %c0_i32 = arith.constant 0 : i32
    %c0_i32_0 = arith.constant 0 : i32
    %c0_i32_1 = arith.constant 0 : i32
    return %arg0, %c0_i32, %c0_i32_0 : i32, i32, i32
  }
  func.func @transform_1(%arg0: i32) -> (i32, i32, i32) {
    %c0_i32 = arith.constant 0 : i32
    %c0_i32_0 = arith.constant 0 : i32
    %c0_i32_1 = arith.constant 0 : i32
    %c0_i32_2 = arith.constant 0 : i32
    return %c0_i32, %c0_i32_0, %c0_i32_1 : i32, i32, i32
  }
  func.func @transform_2(%arg0: i32) -> (i32, i32, i32) {
    %c0_i32 = arith.constant 0 : i32
    %c0_i32_0 = arith.constant 0 : i32
    %c0_i32_1 = arith.constant 0 : i32
    %c0_i32_2 = arith.constant 0 : i32
    return %c0_i32, %c0_i32_0, %c0_i32_1 : i32, i32, i32
  }
  func.func @transform_3(%arg0: i32) -> (i32, i32, i32) {
    %c0_i32 = arith.constant 0 : i32
    %c0_i32_0 = arith.constant 0 : i32
    %c0_i32_1 = arith.constant 0 : i32
    %c0_i32_2 = arith.constant 0 : i32
    return %c0_i32, %c0_i32_0, %c0_i32_1 : i32, i32, i32
  }
  func.func @transform_4(%arg0: i32) -> (i32, i32, i32) {
    %c0_i32 = arith.constant 0 : i32
    %c0_i32_0 = arith.constant 0 : i32
    %c0_i32_1 = arith.constant 0 : i32
    %c0_i32_2 = arith.constant 0 : i32
    return %c0_i32, %c0_i32_0, %c0_i32_1 : i32, i32, i32
  }
  func.func @transform_5(%arg0: i32) -> (i32, i32, i32) {
    %c0_i32 = arith.constant 0 : i32
    %c0_i32_0 = arith.constant 0 : i32
    %c0_i32_1 = arith.constant 0 : i32
    %c0_i32_2 = arith.constant 0 : i32
    return %c0_i32, %c0_i32_0, %c0_i32_1 : i32, i32, i32
  }
  func.func @transform_6(%arg0: i32) -> (i32, i32, i32) {
    %c0_i32 = arith.constant 0 : i32
    %c0_i32_0 = arith.constant 0 : i32
    %c0_i32_1 = arith.constant 0 : i32
    return %arg0, %c0_i32, %c0_i32_0 : i32, i32, i32
  }
  func.func @transform_7(%arg0: i32) -> (i32, i32, i32) {
    %c0_i32 = arith.constant 0 : i32
    %c0_i32_0 = arith.constant 0 : i32
    %c0_i32_1 = arith.constant 0 : i32
    %c0_i32_2 = arith.constant 0 : i32
    return %c0_i32, %c0_i32_0, %c0_i32_1 : i32, i32, i32
  }
  func.func @transform_8(%arg0: i32) -> (i32, i32, i32) {
    %c0_i32 = arith.constant 0 : i32
    %c0_i32_0 = arith.constant 0 : i32
    %c0_i32_1 = arith.constant 0 : i32
    %c0_i32_2 = arith.constant 0 : i32
    return %c0_i32, %c0_i32_0, %c0_i32_1 : i32, i32, i32
  }
}

module attributes {stable_mosaic.version = 11 : i64} {
  func.func @_head_kernel(%arg0: memref<6x64xf32, #tpu.memory_space<vmem>>, %arg1: memref<64x64xf32, #tpu.memory_space<vmem>>, %arg2: memref<1x64xf32, #tpu.memory_space<vmem>>, %arg3: memref<1x64xf32, #tpu.memory_space<vmem>>, %arg4: memref<1x64xf32, #tpu.memory_space<vmem>>, %arg5: memref<64x34xf32, #tpu.memory_space<vmem>>, %arg6: memref<1x34xf32, #tpu.memory_space<vmem>>, %arg7: memref<6x34xf32, #tpu.memory_space<vmem>>) attributes {dimension_semantics = [], scalar_prefetch = 0 : i64, scratch_operands = 0 : i64, tpu.core_type = #tpu.core_type<tc>} {
    %c0 = arith.constant 0 : index
    %c0_0 = arith.constant 0 : index
    %0 = vector.load %arg0[%c0, %c0_0] : memref<6x64xf32, #tpu.memory_space<vmem>>, vector<6x64xf32>
    %c0_1 = arith.constant 0 : index
    %c0_2 = arith.constant 0 : index
    %1 = vector.load %arg1[%c0_1, %c0_2] : memref<64x64xf32, #tpu.memory_space<vmem>>, vector<64x64xf32>
    %cst = arith.constant dense<0.000000e+00> : vector<6x64xf32>
    %2 = tpu.matmul %0, %1, %cst {dimension_numbers = #tpu.dot_dimension_numbers<[1], [0], [0], [1], [0, 0, 1, 1], [], []>} : vector<6x64xf32>, vector<64x64xf32>, vector<6x64xf32> -> vector<6x64xf32>
    %c0_3 = arith.constant 0 : index
    %c0_4 = arith.constant 0 : index
    %3 = vector.load %arg2[%c0_3, %c0_4] : memref<1x64xf32, #tpu.memory_space<vmem>>, vector<1x64xf32>
    %4 = vector.broadcast %3 : vector<1x64xf32> to vector<6x64xf32>
    %5 = arith.addf %2, %4 : vector<6x64xf32>
    %cst_5 = arith.constant dense<0.000000e+00> : vector<6xf32>
    %6 = vector.multi_reduction <add>, %5, %cst_5 [1] : vector<6x64xf32> to vector<6xf32>
    %7 = vector.shape_cast %6 : vector<6xf32> to vector<6x1xf32>
    %cst_6 = arith.constant 6.400000e+01 : f32
    %8 = vector.broadcast %cst_6 : f32 to vector<6x1xf32>
    %9 = arith.divf %7, %8 : vector<6x1xf32>
    %10 = vector.broadcast %9 : vector<6x1xf32> to vector<6x64xf32>
    %11 = arith.subf %5, %10 : vector<6x64xf32>
    %12 = arith.mulf %11, %11 : vector<6x64xf32>
    %cst_7 = arith.constant dense<0.000000e+00> : vector<6xf32>
    %13 = vector.multi_reduction <add>, %12, %cst_7 [1] : vector<6x64xf32> to vector<6xf32>
    %14 = vector.shape_cast %13 : vector<6xf32> to vector<6x1xf32>
    %cst_8 = arith.constant 6.400000e+01 : f32
    %15 = vector.broadcast %cst_8 : f32 to vector<6x1xf32>
    %16 = arith.divf %14, %15 : vector<6x1xf32>
    %17 = vector.broadcast %9 : vector<6x1xf32> to vector<6x64xf32>
    %18 = arith.subf %5, %17 : vector<6x64xf32>
    %cst_9 = arith.constant 9.99999974E-6 : f32
    %19 = vector.broadcast %cst_9 : f32 to vector<6x1xf32>
    %20 = arith.addf %16, %19 : vector<6x1xf32>
    %21 = math.rsqrt %20 : vector<6x1xf32>
    %22 = vector.broadcast %21 : vector<6x1xf32> to vector<6x64xf32>
    %23 = arith.mulf %18, %22 : vector<6x64xf32>
    %c0_10 = arith.constant 0 : index
    %c0_11 = arith.constant 0 : index
    %24 = vector.load %arg3[%c0_10, %c0_11] : memref<1x64xf32, #tpu.memory_space<vmem>>, vector<1x64xf32>
    %25 = vector.broadcast %24 : vector<1x64xf32> to vector<6x64xf32>
    %26 = arith.mulf %23, %25 : vector<6x64xf32>
    %c0_12 = arith.constant 0 : index
    %c0_13 = arith.constant 0 : index
    %27 = vector.load %arg4[%c0_12, %c0_13] : memref<1x64xf32, #tpu.memory_space<vmem>>, vector<1x64xf32>
    %28 = vector.broadcast %27 : vector<1x64xf32> to vector<6x64xf32>
    %29 = arith.addf %26, %28 : vector<6x64xf32>
    %c0_14 = arith.constant 0 : index
    %c0_15 = arith.constant 0 : index
    %30 = vector.load %arg5[%c0_14, %c0_15] : memref<64x34xf32, #tpu.memory_space<vmem>>, vector<64x34xf32>
    %cst_16 = arith.constant dense<0.000000e+00> : vector<6x34xf32>
    %31 = tpu.matmul %29, %30, %cst_16 {dimension_numbers = #tpu.dot_dimension_numbers<[1], [0], [0], [1], [0, 0, 1, 1], [], []>} : vector<6x64xf32>, vector<64x34xf32>, vector<6x34xf32> -> vector<6x34xf32>
    %c0_17 = arith.constant 0 : index
    %c0_18 = arith.constant 0 : index
    %32 = vector.load %arg6[%c0_17, %c0_18] : memref<1x34xf32, #tpu.memory_space<vmem>>, vector<1x34xf32>
    %33 = vector.broadcast %32 : vector<1x34xf32> to vector<6x34xf32>
    %34 = arith.addf %31, %33 : vector<6x34xf32>
    %c0_19 = arith.constant 0 : index
    %c0_20 = arith.constant 0 : index
    %35 = vector.load %arg7[%c0_19, %c0_20] : memref<6x34xf32, #tpu.memory_space<vmem>>, vector<6x34xf32>
    tpu.vector_store %arg7[%c0_19, %c0_20], %34 {strides = array<i32>} : memref<6x34xf32, #tpu.memory_space<vmem>>, vector<6x34xf32>,
    return
  }
}

module attributes {stable_mosaic.version = 11 : i64} {
  func.func @_linear_kernel(%arg0: i32, %arg1: memref<16x32xbf16, #tpu.memory_space<vmem>>, %arg2: memref<32x1600xbf16, #tpu.memory_space<vmem>>, %arg3: memref<1x1600xf32, #tpu.memory_space<vmem>>, %arg4: memref<16x1600xf32, #tpu.memory_space<vmem>>) attributes {dimension_semantics = [#tpu.dimension_semantics<parallel>], iteration_bounds = array<i64: 1>, scalar_prefetch = 0 : i64, scratch_operands = 0 : i64, tpu.core_type = #tpu.core_type<tc>, window_params = [{transform_indices = @transform_0, window_bounds = array<i64: 16, 32>}, {pipeline_mode = #tpu.pipeline_mode<synchronous>, transform_indices = @transform_1, window_bounds = array<i64: 32, 1600>}, {pipeline_mode = #tpu.pipeline_mode<synchronous>, transform_indices = @transform_2, window_bounds = array<i64: 1, 1600>}, {transform_indices = @transform_3, window_bounds = array<i64: 16, 1600>}]} {
    %c0 = arith.constant 0 : index
    %c0_0 = arith.constant 0 : index
    %0 = vector.load %arg1[%c0, %c0_0] : memref<16x32xbf16, #tpu.memory_space<vmem>>, vector<16x32xbf16>
    %c0_1 = arith.constant 0 : index
    %c0_2 = arith.constant 0 : index
    %1 = vector.load %arg2[%c0_1, %c0_2] : memref<32x1600xbf16, #tpu.memory_space<vmem>>, vector<32x1600xbf16>
    %cst = arith.constant dense<0.000000e+00> : vector<16x1600xf32>
    %2 = tpu.matmul %0, %1, %cst {dimension_numbers = #tpu.dot_dimension_numbers<[1], [0], [0], [1], [0, 0, 1, 1], [], []>} : vector<16x32xbf16>, vector<32x1600xbf16>, vector<16x1600xf32> -> vector<16x1600xf32>
    %c0_3 = arith.constant 0 : index
    %c0_4 = arith.constant 0 : index
    %3 = vector.load %arg3[%c0_3, %c0_4] : memref<1x1600xf32, #tpu.memory_space<vmem>>, vector<1x1600xf32>
    %4 = vector.broadcast %3 : vector<1x1600xf32> to vector<16x1600xf32>
    %5 = arith.addf %2, %4 : vector<16x1600xf32>
    %cst_5 = arith.constant 0.000000e+00 : f32
    %6 = vector.broadcast %cst_5 : f32 to vector<16x1600xf32>
    %7 = arith.maximumf %5, %6 : vector<16x1600xf32>
    %c0_6 = arith.constant 0 : index
    %c0_7 = arith.constant 0 : index
    %8 = vector.load %arg4[%c0_6, %c0_7] : memref<16x1600xf32, #tpu.memory_space<vmem>>, vector<16x1600xf32>
    tpu.vector_store %arg4[%c0_6, %c0_7], %7 {strides = array<i32>} : memref<16x1600xf32, #tpu.memory_space<vmem>>, vector<16x1600xf32>,
    return
  }
  func.func @transform_0(%arg0: i32) -> (i32, i32) {
    %c0_i32 = arith.constant 0 : i32
    %c0_i32_0 = arith.constant 0 : i32
    return %arg0, %c0_i32 : i32, i32
  }
  func.func @transform_1(%arg0: i32) -> (i32, i32) {
    %c0_i32 = arith.constant 0 : i32
    %c0_i32_0 = arith.constant 0 : i32
    %c0_i32_1 = arith.constant 0 : i32
    return %c0_i32, %c0_i32_0 : i32, i32
  }
  func.func @transform_2(%arg0: i32) -> (i32, i32) {
    %c0_i32 = arith.constant 0 : i32
    %c0_i32_0 = arith.constant 0 : i32
    %c0_i32_1 = arith.constant 0 : i32
    return %c0_i32, %c0_i32_0 : i32, i32
  }
  func.func @transform_3(%arg0: i32) -> (i32, i32) {
    %c0_i32 = arith.constant 0 : i32
    %c0_i32_0 = arith.constant 0 : i32
    return %arg0, %c0_i32 : i32, i32
  }
}

module attributes {stable_mosaic.version = 11 : i64} {
  func.func @_linear_kernel(%arg0: i32, %arg1: memref<592x576xbf16, #tpu.memory_space<vmem>>, %arg2: memref<576x128xbf16, #tpu.memory_space<vmem>>, %arg3: memref<1x128xf32, #tpu.memory_space<vmem>>, %arg4: memref<592x128xf32, #tpu.memory_space<vmem>>) attributes {dimension_semantics = [#tpu.dimension_semantics<parallel>], iteration_bounds = array<i64: 1>, scalar_prefetch = 0 : i64, scratch_operands = 0 : i64, tpu.core_type = #tpu.core_type<tc>, window_params = [{transform_indices = @transform_0, window_bounds = array<i64: 592, 576>}, {pipeline_mode = #tpu.pipeline_mode<synchronous>, transform_indices = @transform_1, window_bounds = array<i64: 576, 128>}, {pipeline_mode = #tpu.pipeline_mode<synchronous>, transform_indices = @transform_2, window_bounds = array<i64: 1, 128>}, {transform_indices = @transform_3, window_bounds = array<i64: 592, 128>}]} {
    %c0 = arith.constant 0 : index
    %c0_0 = arith.constant 0 : index
    %0 = vector.load %arg1[%c0, %c0_0] : memref<592x576xbf16, #tpu.memory_space<vmem>>, vector<592x576xbf16>
    %c0_1 = arith.constant 0 : index
    %c0_2 = arith.constant 0 : index
    %1 = vector.load %arg2[%c0_1, %c0_2] : memref<576x128xbf16, #tpu.memory_space<vmem>>, vector<576x128xbf16>
    %cst = arith.constant dense<0.000000e+00> : vector<592x128xf32>
    %2 = tpu.matmul %0, %1, %cst {dimension_numbers = #tpu.dot_dimension_numbers<[1], [0], [0], [1], [0, 0, 1, 1], [], []>} : vector<592x576xbf16>, vector<576x128xbf16>, vector<592x128xf32> -> vector<592x128xf32>
    %c0_3 = arith.constant 0 : index
    %c0_4 = arith.constant 0 : index
    %3 = vector.load %arg3[%c0_3, %c0_4] : memref<1x128xf32, #tpu.memory_space<vmem>>, vector<1x128xf32>
    %4 = vector.broadcast %3 : vector<1x128xf32> to vector<592x128xf32>
    %5 = arith.addf %2, %4 : vector<592x128xf32>
    %cst_5 = arith.constant 0.000000e+00 : f32
    %6 = vector.broadcast %cst_5 : f32 to vector<592x128xf32>
    %7 = arith.maximumf %5, %6 : vector<592x128xf32>
    %c0_6 = arith.constant 0 : index
    %c0_7 = arith.constant 0 : index
    %8 = vector.load %arg4[%c0_6, %c0_7] : memref<592x128xf32, #tpu.memory_space<vmem>>, vector<592x128xf32>
    tpu.vector_store %arg4[%c0_6, %c0_7], %7 {strides = array<i32>} : memref<592x128xf32, #tpu.memory_space<vmem>>, vector<592x128xf32>,
    return
  }
  func.func @transform_0(%arg0: i32) -> (i32, i32) {
    %c0_i32 = arith.constant 0 : i32
    %c0_i32_0 = arith.constant 0 : i32
    return %arg0, %c0_i32 : i32, i32
  }
  func.func @transform_1(%arg0: i32) -> (i32, i32) {
    %c0_i32 = arith.constant 0 : i32
    %c0_i32_0 = arith.constant 0 : i32
    %c0_i32_1 = arith.constant 0 : i32
    return %c0_i32, %c0_i32_0 : i32, i32
  }
  func.func @transform_2(%arg0: i32) -> (i32, i32) {
    %c0_i32 = arith.constant 0 : i32
    %c0_i32_0 = arith.constant 0 : i32
    %c0_i32_1 = arith.constant 0 : i32
    return %c0_i32, %c0_i32_0 : i32, i32
  }
  func.func @transform_3(%arg0: i32) -> (i32, i32) {
    %c0_i32 = arith.constant 0 : i32
    %c0_i32_0 = arith.constant 0 : i32
    return %arg0, %c0_i32 : i32, i32
  }
}

module attributes {stable_mosaic.version = 11 : i64} {
  func.func @_linear_kernel(%arg0: i32, %arg1: memref<1024x288xbf16, #tpu.memory_space<vmem>>, %arg2: memref<288x4xbf16, #tpu.memory_space<vmem>>, %arg3: memref<1x4xf32, #tpu.memory_space<vmem>>, %arg4: memref<1024x4xf32, #tpu.memory_space<vmem>>) attributes {dimension_semantics = [#tpu.dimension_semantics<parallel>], iteration_bounds = array<i64: 3>, scalar_prefetch = 0 : i64, scratch_operands = 0 : i64, tpu.core_type = #tpu.core_type<tc>, window_params = [{transform_indices = @transform_0, window_bounds = array<i64: 1024, 288>}, {pipeline_mode = #tpu.pipeline_mode<synchronous>, transform_indices = @transform_1, window_bounds = array<i64: 288, 4>}, {pipeline_mode = #tpu.pipeline_mode<synchronous>, transform_indices = @transform_2, window_bounds = array<i64: 1, 4>}, {transform_indices = @transform_3, window_bounds = array<i64: 1024, 4>}]} {
    %c0 = arith.constant 0 : index
    %c0_0 = arith.constant 0 : index
    %0 = vector.load %arg1[%c0, %c0_0] : memref<1024x288xbf16, #tpu.memory_space<vmem>>, vector<1024x288xbf16>
    %c0_1 = arith.constant 0 : index
    %c0_2 = arith.constant 0 : index
    %1 = vector.load %arg2[%c0_1, %c0_2] : memref<288x4xbf16, #tpu.memory_space<vmem>>, vector<288x4xbf16>
    %cst = arith.constant dense<0.000000e+00> : vector<1024x4xf32>
    %2 = tpu.matmul %0, %1, %cst {dimension_numbers = #tpu.dot_dimension_numbers<[1], [0], [0], [1], [0, 0, 1, 1], [], []>} : vector<1024x288xbf16>, vector<288x4xbf16>, vector<1024x4xf32> -> vector<1024x4xf32>
    %c0_3 = arith.constant 0 : index
    %c0_4 = arith.constant 0 : index
    %3 = vector.load %arg3[%c0_3, %c0_4] : memref<1x4xf32, #tpu.memory_space<vmem>>, vector<1x4xf32>
    %4 = vector.broadcast %3 : vector<1x4xf32> to vector<1024x4xf32>
    %5 = arith.addf %2, %4 : vector<1024x4xf32>
    %6 = arith.negf %5 : vector<1024x4xf32>
    %7 = math.exp %6 : vector<1024x4xf32>
    %cst_5 = arith.constant 1.000000e+00 : f32
    %8 = vector.broadcast %cst_5 : f32 to vector<1024x4xf32>
    %9 = arith.addf %8, %7 : vector<1024x4xf32>
    %10 = arith.divf %8, %9 : vector<1024x4xf32>
    %c0_6 = arith.constant 0 : index
    %c0_7 = arith.constant 0 : index
    %11 = vector.load %arg4[%c0_6, %c0_7] : memref<1024x4xf32, #tpu.memory_space<vmem>>, vector<1024x4xf32>
    tpu.vector_store %arg4[%c0_6, %c0_7], %10 {strides = array<i32>} : memref<1024x4xf32, #tpu.memory_space<vmem>>, vector<1024x4xf32>,
    return
  }
  func.func @transform_0(%arg0: i32) -> (i32, i32) {
    %c0_i32 = arith.constant 0 : i32
    %c0_i32_0 = arith.constant 0 : i32
    return %arg0, %c0_i32 : i32, i32
  }
  func.func @transform_1(%arg0: i32) -> (i32, i32) {
    %c0_i32 = arith.constant 0 : i32
    %c0_i32_0 = arith.constant 0 : i32
    %c0_i32_1 = arith.constant 0 : i32
    return %c0_i32, %c0_i32_0 : i32, i32
  }
  func.func @transform_2(%arg0: i32) -> (i32, i32) {
    %c0_i32 = arith.constant 0 : i32
    %c0_i32_0 = arith.constant 0 : i32
    %c0_i32_1 = arith.constant 0 : i32
    return %c0_i32, %c0_i32_0 : i32, i32
  }
  func.func @transform_3(%arg0: i32) -> (i32, i32) {
    %c0_i32 = arith.constant 0 : i32
    %c0_i32_0 = arith.constant 0 : i32
    return %arg0, %c0_i32 : i32, i32
  }
}

</mosaic_0001>

<bundles_post_ra>
// kernel: fwd.11
= control target key start
LH: loop header
LB: loop body
LE: loop exit
PB: predicated region body
PF: predicated region fallthrough
CT: control target
= control target key end

     0   :  { %s2127_s12 = smov 0   ;;  %s2672_s0 = inlined_call_operand.vmem [shape: bf16[2048,16], index: 0, kind: input, shape index: {}]   ;;  %s2673_s1 = inlined_call_operand.vmem [shape: bf16[16,16], index: 1, kind: input, shape index: {}]   ;;  %s2674_s2 = inlined_call_operand.vmem [shape: f32[1,16], index: 2, kind: input, shape index: {}]   ;;  %s2675_s3 = inlined_call_operand.vmem [shape: f32[2048,16], index: 3, kind: output, shape index: {}]  }
   0x1 LB: > { %s1688_s13 = sadd.s32 4294967295, %s2105_s12   ;;  %p1692_p0 = scmp.ge.s32.totalorder %s2105_s12, 1  ;;  %s2105_s12 = sphi %s2127_s12, %s13_s12  }
   0x2   : > { %p138_p1 = scmp.lt.s32.totalorder %s2105_s12, 3 }
   0x4   : > { %p139_p2 = pnand %p1692_p0, %p138_p1 }
   0x5   : > { %v2034_v0 = vld [vmem:[%s2673_s1] sm:$0xff] (!%p139_p2)   ;;  %s1693_s16 = sshll.u32 (!%p139_p2), %s1688_s13, 7  ;;  %vm638_vm0 = vcmask (!%p139_p2), 130048  }
   0x6   : > { %142 = sbr.rel (%p139_p2) target bundleno = 359 (0x167), region = 32  ;;  %p163_p3 = scmp.lt.s32.totalorder (!%p139_p2), %s1693_s16, 255  ;;  %1894 = vmatprep.subr.bf16.mxu0 (!%p139_p2), %v2034_v0  ;;  %2024 = vmatprep.subr.bf16.mxu1 (!%p139_p2), %v2034_v0 }
   0x7   : > { %1895 = vmatpush3.bf16.msra.mxu0 (!%p139_p2), %v2034_v0  ;;  %2025 = vmatpush3.bf16.msra.mxu1 (!%p139_p2), %v2034_v0 }
   0xd   : > { %s2677_s16 = smov (!%p163_p3, %s1693_s16), 255 }
   0xe   : > { %s1694_s17 = sshll.u32 %s2677_s16, 2  ;;  %s1696_s23 = sshll.u32 %s2677_s16, 3 }
   0xf   : > { %s2144_s20 = scalar_lea.vmem %s2672_s0, %s1694_s17  ;;  %s2284_s26 = scalar_lea.vmem %s2675_s3, %s1696_s23 }
  0x10   : > { %v2035_v1 = vld [vmem:[%s2144_s20] sm:$0xff]   ;;  %v2037_v3 = vld [vmem:[%s2144_s20 + $0x8] sm:$0xff]   ;;  %v2039_v5 = vld [vmem:[%s2144_s20 + $0x10] sm:$0xff]  }
  0x11   : > { %v2036_v2 = vld [vmem:[%s2144_s20 + $0x100] sm:$0xff]   ;;  %1896 = vmatprep.mubr.msk.bf16.mxu0 %vm638_vm0, %v2035_v1  ;;  %v2038_v4 = vld [vmem:[%s2144_s20 + $0x108] sm:$0xff]   ;;  %v2040_v6 = vld [vmem:[%s2144_s20 + $0x110] sm:$0xff]  }
  0x12   : > { %1960 = vmatprep.mubr.msk.bf16.mxu1 %vm638_vm0, %v2036_v2  ;;  %1897 = vmatmul.mubr.msk.bf16.vlgmr.msra.gmra.mrb[0].mxu0 %vm638_vm0, %v2037_v3  ;;  %v2041_v7 = vld [vmem:[%s2144_s20 + $0x18] sm:$0xff]   ;;  %v2043_v9 = vld [vmem:[%s2144_s20 + $0x20] sm:$0xff]   ;;  %v2045_v11 = vld [vmem:[%s2144_s20 + $0x28] sm:$0xff]  }
  0x13   : > { %1961 = vmatmul.mubr.msk.bf16.vlgmr.msra.gmra.mrb[0].mxu1 %vm638_vm0, %v2038_v4  ;;  %1900 = vmatprep.mubr.msk.bf16.mxu0 %vm638_vm0, %v2039_v5  ;;  %v2042_v8 = vld [vmem:[%s2144_s20 + $0x118] sm:$0xff]   ;;  %v2044_v10 = vld [vmem:[%s2144_s20 + $0x120] sm:$0xff]   ;;  %v2046_v12 = vld [vmem:[%s2144_s20 + $0x128] sm:$0xff]  }
  0x14   : > { %1964 = vmatprep.mubr.msk.bf16.mxu1 %vm638_vm0, %v2040_v6  ;;  %v2047_v13 = vld [vmem:[%s2144_s20 + $0x30] sm:$0xff]   ;;  %v2049_v15 = vld [vmem:[%s2144_s20 + $0x38] sm:$0xff]   ;;  %v2051_v17 = vld [vmem:[%s2144_s20 + $0x40] sm:$0xff]  }
  0x15   : > { %v2048_v14 = vld [vmem:[%s2144_s20 + $0x130] sm:$0xff]   ;;  %v2050_v16 = vld [vmem:[%s2144_s20 + $0x138] sm:$0xff]   ;;  %v2052_v18 = vld [vmem:[%s2144_s20 + $0x140] sm:$0xff]  }
  0x16   : > { %v2053_v19 = vld [vmem:[%s2144_s20 + $0x48] sm:$0xff]   ;;  %v2055_v21 = vld [vmem:[%s2144_s20 + $0x50] sm:$0xff]   ;;  %v2057_v23 = vld [vmem:[%s2144_s20 + $0x58] sm:$0xff]  }
  0x17   : > { %v2054_v20 = vld [vmem:[%s2144_s20 + $0x148] sm:$0xff]   ;;  %v2056_v22 = vld [vmem:[%s2144_s20 + $0x150] sm:$0xff]   ;;  %v2058_v24 = vld [vmem:[%s2144_s20 + $0x158] sm:$0xff]  }
  0x18   : > { %v2059_v25 = vld [vmem:[%s2144_s20 + $0x60] sm:$0xff]   ;;  %v2061_v27 = vld [vmem:[%s2144_s20 + $0x68] sm:$0xff]   ;;  %v2063_v29 = vld [vmem:[%s2144_s20 + $0x70] sm:$0xff]  }
  0x19   : > { %v2060_v26 = vld [vmem:[%s2144_s20 + $0x160] sm:$0xff]   ;;  %v2062_v28 = vld [vmem:[%s2144_s20 + $0x168] sm:$0xff]   ;;  %v2064_v30 = vld [vmem:[%s2144_s20 + $0x170] sm:$0xff]  }
  0x1a   : > { %1901 = vmatmul.mubr.msk.bf16.gmra.mrb[4].mxu0 %vm638_vm0, %v2041_v7  ;;  %v2065_v31 = vld [vmem:[%s2144_s20 + $0x78] sm:$0xff]   ;;  %v2067_v33 = vld [vmem:[%s2144_s20 + $0x80] sm:$0xff]   ;;  %v2069_v35 = vld [vmem:[%s2144_s20 + $0x88] sm:$0xff]  }
  0x1b   : > { %1965 = vmatmul.mubr.msk.bf16.gmra.mrb[4].mxu1 %vm638_vm0, %v2042_v8  ;;  %1904 = vmatprep.mubr.msk.bf16.mxu0 %vm638_vm0, %v2043_v9  ;;  %v2066_v32 = vld [vmem:[%s2144_s20 + $0x178] sm:$0xff]   ;;  %v2068_v34 = vld [vmem:[%s2144_s20 + $0x180] sm:$0xff]   ;;  %v2070_v36 = vld [vmem:[%s2144_s20 + $0x188] sm:$0xff]  }
  0x1c   : > { %1968 = vmatprep.mubr.msk.bf16.mxu1 %vm638_vm0, %v2044_v10  ;;  %v2071_v37 = vld [vmem:[%s2144_s20 + $0x90] sm:$0xff]   ;;  %v2073_v39 = vld [vmem:[%s2144_s20 + $0x98] sm:$0xff]   ;;  %v2075_v41 = vld [vmem:[%s2144_s20 + $0xa0] sm:$0xff]  }
  0x1d   : > { %v2072_v38 = vld [vmem:[%s2144_s20 + $0x190] sm:$0xff]   ;;  %v2074_v40 = vld [vmem:[%s2144_s20 + $0x198] sm:$0xff]   ;;  %v2076_v42 = vld [vmem:[%s2144_s20 + $0x1a0] sm:$0xff]  }
  0x1e   : > { %v2077_v43 = vld [vmem:[%s2144_s20 + $0xa8] sm:$0xff]   ;;  %v2079_v45 = vld [vmem:[%s2144_s20 + $0xb0] sm:$0xff]   ;;  %v2081_v47 = vld [vmem:[%s2144_s20 + $0xb8] sm:$0xff]  }
  0x1f   : > { %v2078_v44 = vld [vmem:[%s2144_s20 + $0x1a8] sm:$0xff]   ;;  %v2080_v46 = vld [vmem:[%s2144_s20 + $0x1b0] sm:$0xff]   ;;  %v2082_v48 = vld [vmem:[%s2144_s20 + $0x1b8] sm:$0xff]  }
  0x20   : > { %v2083_v49 = vld [vmem:[%s2144_s20 + $0xc0] sm:$0xff]   ;;  %v2085_v51 = vld [vmem:[%s2144_s20 + $0xc8] sm:$0xff]   ;;  %v2087_v53 = vld [vmem:[%s2144_s20 + $0xd0] sm:$0xff]  }
  0x21   : > { %v2084_v50 = vld [vmem:[%s2144_s20 + $0x1c0] sm:$0xff]   ;;  %v2086_v52 = vld [vmem:[%s2144_s20 + $0x1c8] sm:$0xff]   ;;  %v2088_v54 = vld [vmem:[%s2144_s20 + $0x1d0] sm:$0xff]  }
  0x22   : > { %1905 = vmatmul.mubr.msk.bf16.gmra.mrb[8].mxu0 %vm638_vm0, %v2045_v11  ;;  %v2089_v55 = vld [vmem:[%s2144_s20 + $0xd8] sm:$0xff]   ;;  %v2091_v57 = vld [vmem:[%s2144_s20 + $0xe0] sm:$0xff]   ;;  %v2093_v59 = vld [vmem:[%s2144_s20 + $0xe8] sm:$0xff]  }
  0x23   : > { %1969 = vmatmul.mubr.msk.bf16.gmra.mrb[8].mxu1 %vm638_vm0, %v2046_v12  ;;  %1908 = vmatprep.mubr.msk.bf16.mxu0 %vm638_vm0, %v2047_v13  ;;  %v2090_v56 = vld [vmem:[%s2144_s20 + $0x1d8] sm:$0xff]   ;;  %v2092_v58 = vld [vmem:[%s2144_s20 + $0x1e0] sm:$0xff]   ;;  %v2094_v60 = vld [vmem:[%s2144_s20 + $0x1e8] sm:$0xff]  }
  0x24   : > { %1972 = vmatprep.mubr.msk.bf16.mxu1 %vm638_vm0, %v2048_v14  ;;  %v2095_v61 = vld [vmem:[%s2144_s20 + $0xf0] sm:$0xff]   ;;  %v2097_v63 = vld [vmem:[%s2144_s20 + $0xf8] sm:$0xff]   ;;  %v2277_v1 = vld [vmem:[%s2674_s2] ss:$0 sm:$0xff] }
  0x25   : > { %v2096_v62 = vld [vmem:[%s2144_s20 + $0x1f0] sm:$0xff]   ;;  %v2098_v0 = vld [vmem:[%s2144_s20 + $0x1f8] sm:$0xff]  }
  0x2a   : > { %1909 = vmatmul.mubr.msk.bf16.gmra.mrb[12].mxu0 %vm638_vm0, %v2049_v15 }
  0x2b   : > { %1973 = vmatmul.mubr.msk.bf16.gmra.mrb[12].mxu1 %vm638_vm0, %v2050_v16  ;;  %1912 = vmatprep.mubr.msk.bf16.mxu0 %vm638_vm0, %v2051_v17 }
  0x2c   : > { %1976 = vmatprep.mubr.msk.bf16.mxu1 %vm638_vm0, %v2052_v18 }
  0x32   : > { %1913 = vmatmul.mubr.msk.bf16.gmra.mrb[16].mxu0 %vm638_vm0, %v2053_v19 }
  0x33   : > { %1977 = vmatmul.mubr.msk.bf16.gmra.mrb[16].mxu1 %vm638_vm0, %v2054_v20  ;;  %1916 = vmatprep.mubr.msk.bf16.mxu0 %vm638_vm0, %v2055_v21 }
  0x34   : > { %1980 = vmatprep.mubr.msk.bf16.mxu1 %vm638_vm0, %v2056_v22 }
  0x3a   : > { %1917 = vmatmul.mubr.msk.bf16.gmra.mrb[20].mxu0 %vm638_vm0, %v2057_v23 }
  0x3b   : > { %1981 = vmatmul.mubr.msk.bf16.gmra.mrb[20].mxu1 %vm638_vm0, %v2058_v24  ;;  %1920 = vmatprep.mubr.msk.bf16.mxu0 %vm638_vm0, %v2059_v25 }
  0x3c   : > { %1984 = vmatprep.mubr.msk.bf16.mxu1 %vm638_vm0, %v2060_v26 }
  0x42   : > { %1921 = vmatmul.mubr.msk.bf16.gmra.mrb[24].mxu0 %vm638_vm0, %v2061_v27 }
  0x43   : > { %1985 = vmatmul.mubr.msk.bf16.gmra.mrb[24].mxu1 %vm638_vm0, %v2062_v28  ;;  %1924 = vmatprep.mubr.msk.bf16.mxu0 %vm638_vm0, %v2063_v29 }
  0x44   : > { %1988 = vmatprep.mubr.msk.bf16.mxu1 %vm638_vm0, %v2064_v30 }
  0x4a   : > { %1925 = vmatmul.mubr.msk.bf16.gmra.mrb[28].mxu0 %vm638_vm0, %v2065_v31 }
  0x4b   : > { %1989 = vmatmul.mubr.msk.bf16.gmra.mrb[28].mxu1 %vm638_vm0, %v2066_v32  ;;  %1928 = vmatprep.mubr.msk.bf16.mxu0 %vm638_vm0, %v2067_v33 }
  0x4c   : > { %1992 = vmatprep.mubr.msk.bf16.mxu1 %vm638_vm0, %v2068_v34 }
  0x52   : > { %1929 = vmatmul.mubr.msk.bf16.gmra.mrb[32].mxu0 %vm638_vm0, %v2069_v35 }
  0x53   : > { %1993 = vmatmul.mubr.msk.bf16.gmra.mrb[32].mxu1 %vm638_vm0, %v2070_v36  ;;  %1932 = vmatprep.mubr.msk.bf16.mxu0 %vm638_vm0, %v2071_v37 }
  0x54   : > { %1996 = vmatprep.mubr.msk.bf16.mxu1 %vm638_vm0, %v2072_v38 }
  0x5a   : > { %1933 = vmatmul.mubr.msk.bf16.gmra.mrb[36].mxu0 %vm638_vm0, %v2073_v39 }
  0x5b   : > { %1997 = vmatmul.mubr.msk.bf16.gmra.mrb[36].mxu1 %vm638_vm0, %v2074_v40  ;;  %1936 = vmatprep.mubr.msk.bf16.mxu0 %vm638_vm0, %v2075_v41 }
  0x5c   : > { %2000 = vmatprep.mubr.msk.bf16.mxu1 %vm638_vm0, %v2076_v42 }
  0x62   : > { %1937 = vmatmul.mubr.msk.bf16.gmra.mrb[40].mxu0 %vm638_vm0, %v2077_v43 }
  0x63   : > { %2001 = vmatmul.mubr.msk.bf16.gmra.mrb[40].mxu1 %vm638_vm0, %v2078_v44  ;;  %1940 = vmatprep.mubr.msk.bf16.mxu0 %vm638_vm0, %v2079_v45 }
  0x64   : > { %2004 = vmatprep.mubr.msk.bf16.mxu1 %vm638_vm0, %v2080_v46 }
  0x6a   : > { %1941 = vmatmul.mubr.msk.bf16.gmra.mrb[44].mxu0 %vm638_vm0, %v2081_v47 }
  0x6b   : > { %2005 = vmatmul.mubr.msk.bf16.gmra.mrb[44].mxu1 %vm638_vm0, %v2082_v48  ;;  %1944 = vmatprep.mubr.msk.bf16.mxu0 %vm638_vm0, %v2083_v49 }
  0x6c   : > { %2008 = vmatprep.mubr.msk.bf16.mxu1 %vm638_vm0, %v2084_v50 }
  0x72   : > { %1945 = vmatmul.mubr.msk.bf16.gmra.mrb[48].mxu0 %vm638_vm0, %v2085_v51 }
  0x73   : > { %2009 = vmatmul.mubr.msk.bf16.gmra.mrb[48].mxu1 %vm638_vm0, %v2086_v52  ;;  %1948 = vmatprep.mubr.msk.bf16.mxu0 %vm638_vm0, %v2087_v53 }
  0x74   : > { %2012 = vmatprep.mubr.msk.bf16.mxu1 %vm638_vm0, %v2088_v54 }
  0x7a   : > { %1949 = vmatmul.mubr.msk.bf16.gmra.mrb[52].mxu0 %vm638_vm0, %v2089_v55 }
  0x7b   : > { %2013 = vmatmul.mubr.msk.bf16.gmra.mrb[52].mxu1 %vm638_vm0, %v2090_v56  ;;  %1952 = vmatprep.mubr.msk.bf16.mxu0 %vm638_vm0, %v2091_v57 }
  0x7c   : > { %2016 = vmatprep.mubr.msk.bf16.mxu1 %vm638_vm0, %v2092_v58 }
  0x82   : > { %1953 = vmatmul.mubr.msk.bf16.gmra.mrb[56].mxu0 %vm638_vm0, %v2093_v59 }
  0x83   : > { %2017 = vmatmul.mubr.msk.bf16.gmra.mrb[56].mxu1 %vm638_vm0, %v2094_v60  ;;  %1956 = vmatprep.mubr.msk.bf16.mxu0 %vm638_vm0, %v2095_v61 }
  0x84   : > { %2020 = vmatprep.mubr.msk.bf16.mxu1 %vm638_vm0, %v2096_v62 }
  0x8a   : > { %1957 = vmatmul.mubr.msk.bf16.gmra.mrb[60].mxu0 %vm638_vm0, %v2097_v63 }
  0x8b   : > { %2021 = vmatmul.mubr.msk.bf16.gmra.mrb[60].mxu1 %vm638_vm0, %v2098_v0 }
  0xe5   : > { %v1898_v2 = vpop.f32.mrb[0].mxu0 }
  0xe6   : > { %v874_v3 = vadd.f32 %v1898_v2, %v2277_v1  ;;  %v1962_v4 = vpop.f32.mrb[0].mxu1  ;;  %v865_v5 = vpop.f32.mrb[1].mxu0 }
  0xe7   : > { %v1130_v6 = vadd.f32 %v1962_v4, %v2277_v1  ;;  %v866_v7 = vadd.f32 %v2277_v1, %v865_v5  ;;  %v1121_v8 = vpop.f32.mrb[1].mxu1  ;;  %v1899_v9 = vpop.f32.mrb[2].mxu0 }
  0xe8   : > { %v1378_v10 = vmax.f32 %v874_v3, 0.0  ;;  %v1122_v11 = vadd.f32 %v2277_v1, %v1121_v8  ;;  %v877_v12 = vadd.f32 %v1899_v9, %v2277_v1  ;;  %v1963_v13 = vpop.f32.mrb[2].mxu1  ;;  %v868_v14 = vpop.f32.mrb[3].mxu0 }
  0xe9   : > { %v1442_v15 = vmax.f32 %v1130_v6, 0.0  ;;  %v1376_v16 = vmax.f32 %v866_v7, 0.0  ;;  %v1133_v17 = vadd.f32 %v1963_v13, %v2277_v1  ;;  %v869_v18 = vadd.f32 %v2277_v1, %v868_v14  ;;  %v1124_v19 = vpop.f32.mrb[3].mxu1 }
  0xea   : > { %1506 = vst.msk [vmem:[%s2284_s26 + $0x10] sm:$0xff] %vm638_vm0, %v1378_v10  ;;  %v1440_v20 = vmax.f32 %v1122_v11, 0.0  ;;  %v1379_v21 = vmax.f32 %v877_v12, 0.0  ;;  %v1125_v22 = vadd.f32 %v2277_v1, %v1124_v19 }
  0xeb   : > { %1570 = vst.msk [vmem:[%s2284_s26 + $0x210] sm:$0xff] %vm638_vm0, %v1442_v15  ;;  %1504 = vst.msk [vmem:[%s2284_s26] sm:$0xff] %vm638_vm0, %v1376_v16  ;;  %v1443_v23 = vmax.f32 %v1133_v17, 0.0  ;;  %v1377_v24 = vmax.f32 %v869_v18, 0.0 }
  0xec   : > { %1568 = vst.msk [vmem:[%s2284_s26 + $0x200] sm:$0xff] %vm638_vm0, %v1440_v20  ;;  %1507 = vst.msk [vmem:[%s2284_s26 + $0x18] sm:$0xff] %vm638_vm0, %v1379_v21  ;;  %v1441_v25 = vmax.f32 %v1125_v22, 0.0 }
  0xed   : > { %1571 = vst.msk [vmem:[%s2284_s26 + $0x218] sm:$0xff] %vm638_vm0, %v1443_v23  ;;  %1505 = vst.msk [vmem:[%s2284_s26 + $0x8] sm:$0xff] %vm638_vm0, %v1377_v24  ;;  %v1902_v26 = vpop.f32.mrb[4].mxu0 }
  0xee   : > { %1569 = vst.msk [vmem:[%s2284_s26 + $0x208] sm:$0xff] %vm638_vm0, %v1441_v25  ;;  %v890_v27 = vadd.f32 %v1902_v26, %v2277_v1  ;;  %v1966_v28 = vpop.f32.mrb[4].mxu1  ;;  %v881_v29 = vpop.f32.mrb[5].mxu0 }
  0xef   : > { %v1146_v30 = vadd.f32 %v1966_v28, %v2277_v1  ;;  %v882_v31 = vadd.f32 %v2277_v1, %v881_v29  ;;  %v1137_v32 = vpop.f32.mrb[5].mxu1  ;;  %v1903_v33 = vpop.f32.mrb[6].mxu0 }
  0xf0   : > { %v1382_v34 = vmax.f32 %v890_v27, 0.0  ;;  %v1138_v35 = vadd.f32 %v2277_v1, %v1137_v32  ;;  %v893_v36 = vadd.f32 %v1903_v33, %v2277_v1  ;;  %v1967_v37 = vpop.f32.mrb[6].mxu1  ;;  %v884_v38 = vpop.f32.mrb[7].mxu0 }
  0xf1   : > { %v1446_v39 = vmax.f32 %v1146_v30, 0.0  ;;  %v1380_v40 = vmax.f32 %v882_v31, 0.0  ;;  %v1149_v41 = vadd.f32 %v1967_v37, %v2277_v1  ;;  %v885_v42 = vadd.f32 %v2277_v1, %v884_v38  ;;  %v1140_v43 = vpop.f32.mrb[7].mxu1 }
  0xf2   : > { %1510 = vst.msk [vmem:[%s2284_s26 + $0x30] sm:$0xff] %vm638_vm0, %v1382_v34  ;;  %v1444_v44 = vmax.f32 %v1138_v35, 0.0  ;;  %v1383_v45 = vmax.f32 %v893_v36, 0.0  ;;  %v1141_v46 = vadd.f32 %v2277_v1, %v1140_v43 }
  0xf3   : > { %1574 = vst.msk [vmem:[%s2284_s26 + $0x230] sm:$0xff] %vm638_vm0, %v1446_v39  ;;  %1508 = vst.msk [vmem:[%s2284_s26 + $0x20] sm:$0xff] %vm638_vm0, %v1380_v40  ;;  %v1447_v47 = vmax.f32 %v1149_v41, 0.0  ;;  %v1381_v48 = vmax.f32 %v885_v42, 0.0 }
  0xf4   : > { %1572 = vst.msk [vmem:[%s2284_s26 + $0x220] sm:$0xff] %vm638_vm0, %v1444_v44  ;;  %1511 = vst.msk [vmem:[%s2284_s26 + $0x38] sm:$0xff] %vm638_vm0, %v1383_v45  ;;  %v1445_v49 = vmax.f32 %v1141_v46, 0.0 }
  0xf5   : > { %1575 = vst.msk [vmem:[%s2284_s26 + $0x238] sm:$0xff] %vm638_vm0, %v1447_v47  ;;  %1509 = vst.msk [vmem:[%s2284_s26 + $0x28] sm:$0xff] %vm638_vm0, %v1381_v48  ;;  %v1906_v50 = vpop.f32.mrb[8].mxu0 }
  0xf6   : > { %1573 = vst.msk [vmem:[%s2284_s26 + $0x228] sm:$0xff] %vm638_vm0, %v1445_v49  ;;  %v906_v51 = vadd.f32 %v1906_v50, %v2277_v1  ;;  %v1970_v52 = vpop.f32.mrb[8].mxu1  ;;  %v897_v53 = vpop.f32.mrb[9].mxu0 }
  0xf7   : > { %v1162_v54 = vadd.f32 %v1970_v52, %v2277_v1  ;;  %v898_v55 = vadd.f32 %v2277_v1, %v897_v53  ;;  %v1153_v56 = vpop.f32.mrb[9].mxu1  ;;  %v1907_v57 = vpop.f32.mrb[10].mxu0 }
  0xf8   : > { %v1386_v58 = vmax.f32 %v906_v51, 0.0  ;;  %v1154_v59 = vadd.f32 %v2277_v1, %v1153_v56  ;;  %v909_v60 = vadd.f32 %v1907_v57, %v2277_v1  ;;  %v1971_v61 = vpop.f32.mrb[10].mxu1  ;;  %v900_v62 = vpop.f32.mrb[11].mxu0 }
  0xf9   : > { %v1450_v63 = vmax.f32 %v1162_v54, 0.0  ;;  %v1384_v0 = vmax.f32 %v898_v55, 0.0  ;;  %v1165_v2 = vadd.f32 %v1971_v61, %v2277_v1  ;;  %v901_v3 = vadd.f32 %v2277_v1, %v900_v62  ;;  %v1156_v4 = vpop.f32.mrb[11].mxu1 }
  0xfa   : > { %1514 = vst.msk [vmem:[%s2284_s26 + $0x50] sm:$0xff] %vm638_vm0, %v1386_v58  ;;  %v1448_v5 = vmax.f32 %v1154_v59, 0.0  ;;  %v1387_v6 = vmax.f32 %v909_v60, 0.0  ;;  %v1157_v7 = vadd.f32 %v2277_v1, %v1156_v4 }
  0xfb   : > { %1578 = vst.msk [vmem:[%s2284_s26 + $0x250] sm:$0xff] %vm638_vm0, %v1450_v63  ;;  %1512 = vst.msk [vmem:[%s2284_s26 + $0x40] sm:$0xff] %vm638_vm0, %v1384_v0  ;;  %v1451_v8 = vmax.f32 %v1165_v2, 0.0  ;;  %v1385_v9 = vmax.f32 %v901_v3, 0.0 }
  0xfc   : > { %1576 = vst.msk [vmem:[%s2284_s26 + $0x240] sm:$0xff] %vm638_vm0, %v1448_v5  ;;  %1515 = vst.msk [vmem:[%s2284_s26 + $0x58] sm:$0xff] %vm638_vm0, %v1387_v6  ;;  %v1449_v10 = vmax.f32 %v1157_v7, 0.0 }
  0xfd   : > { %1579 = vst.msk [vmem:[%s2284_s26 + $0x258] sm:$0xff] %vm638_vm0, %v1451_v8  ;;  %1513 = vst.msk [vmem:[%s2284_s26 + $0x48] sm:$0xff] %vm638_vm0, %v1385_v9  ;;  %v1910_v11 = vpop.f32.mrb[12].mxu0 }
  0xfe   : > { %1577 = vst.msk [vmem:[%s2284_s26 + $0x248] sm:$0xff] %vm638_vm0, %v1449_v10  ;;  %v922_v12 = vadd.f32 %v1910_v11, %v2277_v1  ;;  %v1974_v13 = vpop.f32.mrb[12].mxu1  ;;  %v913_v14 = vpop.f32.mrb[13].mxu0 }
  0xff   : > { %v1178_v15 = vadd.f32 %v1974_v13, %v2277_v1  ;;  %v914_v16 = vadd.f32 %v2277_v1, %v913_v14  ;;  %v1169_v17 = vpop.f32.mrb[13].mxu1  ;;  %v1911_v18 = vpop.f32.mrb[14].mxu0 }
 0x100   : > { %v1390_v19 = vmax.f32 %v922_v12, 0.0  ;;  %v1170_v20 = vadd.f32 %v2277_v1, %v1169_v17  ;;  %v925_v21 = vadd.f32 %v1911_v18, %v2277_v1  ;;  %v1975_v22 = vpop.f32.mrb[14].mxu1  ;;  %v916_v23 = vpop.f32.mrb[15].mxu0 }
 0x101   : > { %v1454_v24 = vmax.f32 %v1178_v15, 0.0  ;;  %v1388_v25 = vmax.f32 %v914_v16, 0.0  ;;  %v1181_v26 = vadd.f32 %v1975_v22, %v2277_v1  ;;  %v917_v27 = vadd.f32 %v2277_v1, %v916_v23  ;;  %v1172_v28 = vpop.f32.mrb[15].mxu1 }
 0x102   : > { %1518 = vst.msk [vmem:[%s2284_s26 + $0x70] sm:$0xff] %vm638_vm0, %v1390_v19  ;;  %v1452_v29 = vmax.f32 %v1170_v20, 0.0  ;;  %v1391_v30 = vmax.f32 %v925_v21, 0.0  ;;  %v1173_v31 = vadd.f32 %v2277_v1, %v1172_v28 }
 0x103   : > { %1582 = vst.msk [vmem:[%s2284_s26 + $0x270] sm:$0xff] %vm638_vm0, %v1454_v24  ;;  %1516 = vst.msk [vmem:[%s2284_s26 + $0x60] sm:$0xff] %vm638_vm0, %v1388_v25  ;;  %v1455_v32 = vmax.f32 %v1181_v26, 0.0  ;;  %v1389_v33 = vmax.f32 %v917_v27, 0.0 }
 0x104   : > { %1580 = vst.msk [vmem:[%s2284_s26 + $0x260] sm:$0xff] %vm638_vm0, %v1452_v29  ;;  %1519 = vst.msk [vmem:[%s2284_s26 + $0x78] sm:$0xff] %vm638_vm0, %v1391_v30  ;;  %v1453_v34 = vmax.f32 %v1173_v31, 0.0 }
 0x105   : > { %1583 = vst.msk [vmem:[%s2284_s26 + $0x278] sm:$0xff] %vm638_vm0, %v1455_v32  ;;  %1517 = vst.msk [vmem:[%s2284_s26 + $0x68] sm:$0xff] %vm638_vm0, %v1389_v33  ;;  %v1914_v35 = vpop.f32.mrb[16].mxu0 }
 0x106   : > { %1581 = vst.msk [vmem:[%s2284_s26 + $0x268] sm:$0xff] %vm638_vm0, %v1453_v34  ;;  %v938_v36 = vadd.f32 %v1914_v35, %v2277_v1  ;;  %v1978_v37 = vpop.f32.mrb[16].mxu1  ;;  %v929_v38 = vpop.f32.mrb[17].mxu0 }
 0x107   : > { %v1194_v39 = vadd.f32 %v1978_v37, %v2277_v1  ;;  %v930_v40 = vadd.f32 %v2277_v1, %v929_v38  ;;  %v1185_v41 = vpop.f32.mrb[17].mxu1  ;;  %v1915_v42 = vpop.f32.mrb[18].mxu0 }
 0x108   : > { %v1394_v43 = vmax.f32 %v938_v36, 0.0  ;;  %v1186_v44 = vadd.f32 %v2277_v1, %v1185_v41  ;;  %v941_v45 = vadd.f32 %v1915_v42, %v2277_v1  ;;  %v1979_v46 = vpop.f32.mrb[18].mxu1  ;;  %v932_v47 = vpop.f32.mrb[19].mxu0 }
 0x109   : > { %v1458_v48 = vmax.f32 %v1194_v39, 0.0  ;;  %v1392_v49 = vmax.f32 %v930_v40, 0.0  ;;  %v1197_v50 = vadd.f32 %v1979_v46, %v2277_v1  ;;  %v933_v51 = vadd.f32 %v2277_v1, %v932_v47  ;;  %v1188_v52 = vpop.f32.mrb[19].mxu1 }
 0x10a   : > { %1522 = vst.msk [vmem:[%s2284_s26 + $0x90] sm:$0xff] %vm638_vm0, %v1394_v43  ;;  %v1456_v53 = vmax.f32 %v1186_v44, 0.0  ;;  %v1395_v54 = vmax.f32 %v941_v45, 0.0  ;;  %v1189_v55 = vadd.f32 %v2277_v1, %v1188_v52 }
 0x10b   : > { %1586 = vst.msk [vmem:[%s2284_s26 + $0x290] sm:$0xff] %vm638_vm0, %v1458_v48  ;;  %1520 = vst.msk [vmem:[%s2284_s26 + $0x80] sm:$0xff] %vm638_vm0, %v1392_v49  ;;  %v1459_v56 = vmax.f32 %v1197_v50, 0.0  ;;  %v1393_v57 = vmax.f32 %v933_v51, 0.0 }
 0x10c   : > { %1584 = vst.msk [vmem:[%s2284_s26 + $0x280] sm:$0xff] %vm638_vm0, %v1456_v53  ;;  %1523 = vst.msk [vmem:[%s2284_s26 + $0x98] sm:$0xff] %vm638_vm0, %v1395_v54  ;;  %v1457_v58 = vmax.f32 %v1189_v55, 0.0 }
 0x10d   : > { %1587 = vst.msk [vmem:[%s2284_s26 + $0x298] sm:$0xff] %vm638_vm0, %v1459_v56  ;;  %1521 = vst.msk [vmem:[%s2284_s26 + $0x88] sm:$0xff] %vm638_vm0, %v1393_v57  ;;  %v1918_v59 = vpop.f32.mrb[20].mxu0 }
 0x10e   : > { %1585 = vst.msk [vmem:[%s2284_s26 + $0x288] sm:$0xff] %vm638_vm0, %v1457_v58  ;;  %v954_v60 = vadd.f32 %v1918_v59, %v2277_v1  ;;  %v1982_v61 = vpop.f32.mrb[20].mxu1  ;;  %v945_v62 = vpop.f32.mrb[21].mxu0 }
 0x10f   : > { %v1210_v63 = vadd.f32 %v1982_v61, %v2277_v1  ;;  %v946_v0 = vadd.f32 %v2277_v1, %v945_v62  ;;  %v1201_v2 = vpop.f32.mrb[21].mxu1  ;;  %v1919_v3 = vpop.f32.mrb[22].mxu0 }
 0x110   : > { %v1398_v4 = vmax.f32 %v954_v60, 0.0  ;;  %v1202_v5 = vadd.f32 %v2277_v1, %v1201_v2  ;;  %v957_v6 = vadd.f32 %v1919_v3, %v2277_v1  ;;  %v1983_v7 = vpop.f32.mrb[22].mxu1  ;;  %v948_v8 = vpop.f32.mrb[23].mxu0 }
 0x111   : > { %v1462_v9 = vmax.f32 %v1210_v63, 0.0  ;;  %v1396_v10 = vmax.f32 %v946_v0, 0.0  ;;  %v1213_v11 = vadd.f32 %v1983_v7, %v2277_v1  ;;  %v949_v12 = vadd.f32 %v2277_v1, %v948_v8  ;;  %v1204_v13 = vpop.f32.mrb[23].mxu1 }
 0x112   : > { %1526 = vst.msk [vmem:[%s2284_s26 + $0xb0] sm:$0xff] %vm638_vm0, %v1398_v4  ;;  %v1460_v14 = vmax.f32 %v1202_v5, 0.0  ;;  %v1399_v15 = vmax.f32 %v957_v6, 0.0  ;;  %v1205_v16 = vadd.f32 %v2277_v1, %v1204_v13 }
 0x113   : > { %1590 = vst.msk [vmem:[%s2284_s26 + $0x2b0] sm:$0xff] %vm638_vm0, %v1462_v9  ;;  %1524 = vst.msk [vmem:[%s2284_s26 + $0xa0] sm:$0xff] %vm638_vm0, %v1396_v10  ;;  %v1463_v17 = vmax.f32 %v1213_v11, 0.0  ;;  %v1397_v18 = vmax.f32 %v949_v12, 0.0 }
 0x114   : > { %1588 = vst.msk [vmem:[%s2284_s26 + $0x2a0] sm:$0xff] %vm638_vm0, %v1460_v14  ;;  %1527 = vst.msk [vmem:[%s2284_s26 + $0xb8] sm:$0xff] %vm638_vm0, %v1399_v15  ;;  %v1461_v19 = vmax.f32 %v1205_v16, 0.0 }
 0x115   : > { %1591 = vst.msk [vmem:[%s2284_s26 + $0x2b8] sm:$0xff] %vm638_vm0, %v1463_v17  ;;  %1525 = vst.msk [vmem:[%s2284_s26 + $0xa8] sm:$0xff] %vm638_vm0, %v1397_v18  ;;  %v1922_v20 = vpop.f32.mrb[24].mxu0 }
 0x116   : > { %1589 = vst.msk [vmem:[%s2284_s26 + $0x2a8] sm:$0xff] %vm638_vm0, %v1461_v19  ;;  %v970_v21 = vadd.f32 %v1922_v20, %v2277_v1  ;;  %v1986_v22 = vpop.f32.mrb[24].mxu1  ;;  %v961_v23 = vpop.f32.mrb[25].mxu0 }
 0x117   : > { %v1226_v24 = vadd.f32 %v1986_v22, %v2277_v1  ;;  %v962_v25 = vadd.f32 %v2277_v1, %v961_v23  ;;  %v1217_v26 = vpop.f32.mrb[25].mxu1  ;;  %v1923_v27 = vpop.f32.mrb[26].mxu0 }
 0x118   : > { %v1402_v28 = vmax.f32 %v970_v21, 0.0  ;;  %v1218_v29 = vadd.f32 %v2277_v1, %v1217_v26  ;;  %v973_v30 = vadd.f32 %v1923_v27, %v2277_v1  ;;  %v1987_v31 = vpop.f32.mrb[26].mxu1  ;;  %v964_v32 = vpop.f32.mrb[27].mxu0 }
 0x119   : > { %v1466_v33 = vmax.f32 %v1226_v24, 0.0  ;;  %v1400_v34 = vmax.f32 %v962_v25, 0.0  ;;  %v1229_v35 = vadd.f32 %v1987_v31, %v2277_v1  ;;  %v965_v36 = vadd.f32 %v2277_v1, %v964_v32  ;;  %v1220_v37 = vpop.f32.mrb[27].mxu1 }
 0x11a   : > { %1530 = vst.msk [vmem:[%s2284_s26 + $0xd0] sm:$0xff] %vm638_vm0, %v1402_v28  ;;  %v1464_v38 = vmax.f32 %v1218_v29, 0.0  ;;  %v1403_v39 = vmax.f32 %v973_v30, 0.0  ;;  %v1221_v40 = vadd.f32 %v2277_v1, %v1220_v37 }
 0x11b   : > { %1594 = vst.msk [vmem:[%s2284_s26 + $0x2d0] sm:$0xff] %vm638_vm0, %v1466_v33  ;;  %1528 = vst.msk [vmem:[%s2284_s26 + $0xc0] sm:$0xff] %vm638_vm0, %v1400_v34  ;;  %v1467_v41 = vmax.f32 %v1229_v35, 0.0  ;;  %v1401_v42 = vmax.f32 %v965_v36, 0.0 }
 0x11c   : > { %1592 = vst.msk [vmem:[%s2284_s26 + $0x2c0] sm:$0xff] %vm638_vm0, %v1464_v38  ;;  %1531 = vst.msk [vmem:[%s2284_s26 + $0xd8] sm:$0xff] %vm638_vm0, %v1403_v39  ;;  %v1465_v43 = vmax.f32 %v1221_v40, 0.0 }
 0x11d   : > { %1595 = vst.msk [vmem:[%s2284_s26 + $0x2d8] sm:$0xff] %vm638_vm0, %v1467_v41  ;;  %1529 = vst.msk [vmem:[%s2284_s26 + $0xc8] sm:$0xff] %vm638_vm0, %v1401_v42  ;;  %v1926_v44 = vpop.f32.mrb[28].mxu0 }
 0x11e   : > { %1593 = vst.msk [vmem:[%s2284_s26 + $0x2c8] sm:$0xff] %vm638_vm0, %v1465_v43  ;;  %v986_v45 = vadd.f32 %v1926_v44, %v2277_v1  ;;  %v1990_v46 = vpop.f32.mrb[28].mxu1  ;;  %v977_v47 = vpop.f32.mrb[29].mxu0 }
 0x11f   : > { %v1242_v48 = vadd.f32 %v1990_v46, %v2277_v1  ;;  %v978_v49 = vadd.f32 %v2277_v1, %v977_v47  ;;  %v1233_v50 = vpop.f32.mrb[29].mxu1  ;;  %v1927_v51 = vpop.f32.mrb[30].mxu0 }
 0x120   : > { %v1406_v52 = vmax.f32 %v986_v45, 0.0  ;;  %v1234_v53 = vadd.f32 %v2277_v1, %v1233_v50  ;;  %v989_v54 = vadd.f32 %v1927_v51, %v2277_v1  ;;  %v1991_v55 = vpop.f32.mrb[30].mxu1  ;;  %v980_v56 = vpop.f32.mrb[31].mxu0 }
 0x121   : > { %v1470_v57 = vmax.f32 %v1242_v48, 0.0  ;;  %v1404_v58 = vmax.f32 %v978_v49, 0.0  ;;  %v1245_v59 = vadd.f32 %v1991_v55, %v2277_v1  ;;  %v981_v60 = vadd.f32 %v2277_v1, %v980_v56  ;;  %v1236_v61 = vpop.f32.mrb[31].mxu1 }
 0x122   : > { %1534 = vst.msk [vmem:[%s2284_s26 + $0xf0] sm:$0xff] %vm638_vm0, %v1406_v52  ;;  %v1468_v62 = vmax.f32 %v1234_v53, 0.0  ;;  %v1407_v63 = vmax.f32 %v989_v54, 0.0  ;;  %v1237_v0 = vadd.f32 %v2277_v1, %v1236_v61 }
 0x123   : > { %1598 = vst.msk [vmem:[%s2284_s26 + $0x2f0] sm:$0xff] %vm638_vm0, %v1470_v57  ;;  %1532 = vst.msk [vmem:[%s2284_s26 + $0xe0] sm:$0xff] %vm638_vm0, %v1404_v58  ;;  %v1471_v2 = vmax.f32 %v1245_v59, 0.0  ;;  %v1405_v3 = vmax.f32 %v981_v60, 0.0 }
 0x124   : > { %1596 = vst.msk [vmem:[%s2284_s26 + $0x2e0] sm:$0xff] %vm638_vm0, %v1468_v62  ;;  %1535 = vst.msk [vmem:[%s2284_s26 + $0xf8] sm:$0xff] %vm638_vm0, %v1407_v63  ;;  %v1469_v4 = vmax.f32 %v1237_v0, 0.0 }
 0x125   : > { %1599 = vst.msk [vmem:[%s2284_s26 + $0x2f8] sm:$0xff] %vm638_vm0, %v1471_v2  ;;  %1533 = vst.msk [vmem:[%s2284_s26 + $0xe8] sm:$0xff] %vm638_vm0, %v1405_v3  ;;  %v1930_v5 = vpop.f32.mrb[32].mxu0 }
 0x126   : > { %1597 = vst.msk [vmem:[%s2284_s26 + $0x2e8] sm:$0xff] %vm638_vm0, %v1469_v4  ;;  %v1002_v6 = vadd.f32 %v1930_v5, %v2277_v1  ;;  %v1994_v7 = vpop.f32.mrb[32].mxu1  ;;  %v993_v8 = vpop.f32.mrb[33].mxu0 }
 0x127   : > { %v1258_v9 = vadd.f32 %v1994_v7, %v2277_v1  ;;  %v994_v10 = vadd.f32 %v2277_v1, %v993_v8  ;;  %v1249_v11 = vpop.f32.mrb[33].mxu1  ;;  %v1931_v12 = vpop.f32.mrb[34].mxu0 }
 0x128   : > { %v1410_v13 = vmax.f32 %v1002_v6, 0.0  ;;  %v1250_v14 = vadd.f32 %v2277_v1, %v1249_v11  ;;  %v1005_v15 = vadd.f32 %v1931_v12, %v2277_v1  ;;  %v1995_v16 = vpop.f32.mrb[34].mxu1  ;;  %v996_v17 = vpop.f32.mrb[35].mxu0 }
 0x129   : > { %v1474_v18 = vmax.f32 %v1258_v9, 0.0  ;;  %v1408_v19 = vmax.f32 %v994_v10, 0.0  ;;  %v1261_v20 = vadd.f32 %v1995_v16, %v2277_v1  ;;  %v997_v21 = vadd.f32 %v2277_v1, %v996_v17  ;;  %v1252_v22 = vpop.f32.mrb[35].mxu1 }
 0x12a   : > { %1538 = vst.msk [vmem:[%s2284_s26 + $0x110] sm:$0xff] %vm638_vm0, %v1410_v13  ;;  %v1472_v23 = vmax.f32 %v1250_v14, 0.0  ;;  %v1411_v24 = vmax.f32 %v1005_v15, 0.0  ;;  %v1253_v25 = vadd.f32 %v2277_v1, %v1252_v22 }
 0x12b   : > { %1602 = vst.msk [vmem:[%s2284_s26 + $0x310] sm:$0xff] %vm638_vm0, %v1474_v18  ;;  %1536 = vst.msk [vmem:[%s2284_s26 + $0x100] sm:$0xff] %vm638_vm0, %v1408_v19  ;;  %v1475_v26 = vmax.f32 %v1261_v20, 0.0  ;;  %v1409_v27 = vmax.f32 %v997_v21, 0.0 }
 0x12c   : > { %1600 = vst.msk [vmem:[%s2284_s26 + $0x300] sm:$0xff] %vm638_vm0, %v1472_v23  ;;  %1539 = vst.msk [vmem:[%s2284_s26 + $0x118] sm:$0xff] %vm638_vm0, %v1411_v24  ;;  %v1473_v28 = vmax.f32 %v1253_v25, 0.0 }
 0x12d   : > { %1603 = vst.msk [vmem:[%s2284_s26 + $0x318] sm:$0xff] %vm638_vm0, %v1475_v26  ;;  %1537 = vst.msk [vmem:[%s2284_s26 + $0x108] sm:$0xff] %vm638_vm0, %v1409_v27  ;;  %v1934_v29 = vpop.f32.mrb[36].mxu0 }
 0x12e   : > { %1601 = vst.msk [vmem:[%s2284_s26 + $0x308] sm:$0xff] %vm638_vm0, %v1473_v28  ;;  %v1018_v30 = vadd.f32 %v1934_v29, %v2277_v1  ;;  %v1998_v31 = vpop.f32.mrb[36].mxu1  ;;  %v1009_v32 = vpop.f32.mrb[37].mxu0 }
 0x12f   : > { %v1274_v33 = vadd.f32 %v1998_v31, %v2277_v1  ;;  %v1010_v34 = vadd.f32 %v2277_v1, %v1009_v32  ;;  %v1265_v35 = vpop.f32.mrb[37].mxu1  ;;  %v1935_v36 = vpop.f32.mrb[38].mxu0 }
 0x130   : > { %v1414_v37 = vmax.f32 %v1018_v30, 0.0  ;;  %v1266_v38 = vadd.f32 %v2277_v1, %v1265_v35  ;;  %v1021_v39 = vadd.f32 %v1935_v36, %v2277_v1  ;;  %v1999_v40 = vpop.f32.mrb[38].mxu1  ;;  %v1012_v41 = vpop.f32.mrb[39].mxu0 }
 0x131   : > { %v1478_v42 = vmax.f32 %v1274_v33, 0.0  ;;  %v1412_v43 = vmax.f32 %v1010_v34, 0.0  ;;  %v1277_v44 = vadd.f32 %v1999_v40, %v2277_v1  ;;  %v1013_v45 = vadd.f32 %v2277_v1, %v1012_v41  ;;  %v1268_v46 = vpop.f32.mrb[39].mxu1 }
 0x132   : > { %1542 = vst.msk [vmem:[%s2284_s26 + $0x130] sm:$0xff] %vm638_vm0, %v1414_v37  ;;  %v1476_v47 = vmax.f32 %v1266_v38, 0.0  ;;  %v1415_v48 = vmax.f32 %v1021_v39, 0.0  ;;  %v1269_v49 = vadd.f32 %v2277_v1, %v1268_v46 }
 0x133   : > { %1606 = vst.msk [vmem:[%s2284_s26 + $0x330] sm:$0xff] %vm638_vm0, %v1478_v42  ;;  %1540 = vst.msk [vmem:[%s2284_s26 + $0x120] sm:$0xff] %vm638_vm0, %v1412_v43  ;;  %v1479_v50 = vmax.f32 %v1277_v44, 0.0  ;;  %v1413_v51 = vmax.f32 %v1013_v45, 0.0 }
 0x134   : > { %1604 = vst.msk [vmem:[%s2284_s26 + $0x320] sm:$0xff] %vm638_vm0, %v1476_v47  ;;  %1543 = vst.msk [vmem:[%s2284_s26 + $0x138] sm:$0xff] %vm638_vm0, %v1415_v48  ;;  %v1477_v52 = vmax.f32 %v1269_v49, 0.0 }
 0x135   : > { %1607 = vst.msk [vmem:[%s2284_s26 + $0x338] sm:$0xff] %vm638_vm0, %v1479_v50  ;;  %1541 = vst.msk [vmem:[%s2284_s26 + $0x128] sm:$0xff] %vm638_vm0, %v1413_v51  ;;  %v1938_v53 = vpop.f32.mrb[40].mxu0 }
 0x136   : > { %1605 = vst.msk [vmem:[%s2284_s26 + $0x328] sm:$0xff] %vm638_vm0, %v1477_v52  ;;  %v1034_v54 = vadd.f32 %v1938_v53, %v2277_v1  ;;  %v2002_v55 = vpop.f32.mrb[40].mxu1  ;;  %v1025_v56 = vpop.f32.mrb[41].mxu0 }
 0x137   : > { %v1290_v57 = vadd.f32 %v2002_v55, %v2277_v1  ;;  %v1026_v58 = vadd.f32 %v2277_v1, %v1025_v56  ;;  %v1281_v59 = vpop.f32.mrb[41].mxu1  ;;  %v1939_v60 = vpop.f32.mrb[42].mxu0 }
 0x138   : > { %v1418_v61 = vmax.f32 %v1034_v54, 0.0  ;;  %v1282_v62 = vadd.f32 %v2277_v1, %v1281_v59  ;;  %v1037_v63 = vadd.f32 %v1939_v60, %v2277_v1  ;;  %v2003_v0 = vpop.f32.mrb[42].mxu1  ;;  %v1028_v2 = vpop.f32.mrb[43].mxu0 }
 0x139   : > { %v1482_v3 = vmax.f32 %v1290_v57, 0.0  ;;  %v1416_v4 = vmax.f32 %v1026_v58, 0.0  ;;  %v1293_v5 = vadd.f32 %v2003_v0, %v2277_v1  ;;  %v1029_v6 = vadd.f32 %v2277_v1, %v1028_v2  ;;  %v1284_v7 = vpop.f32.mrb[43].mxu1 }
 0x13a   : > { %1546 = vst.msk [vmem:[%s2284_s26 + $0x150] sm:$0xff] %vm638_vm0, %v1418_v61  ;;  %v1480_v8 = vmax.f32 %v1282_v62, 0.0  ;;  %v1419_v9 = vmax.f32 %v1037_v63, 0.0  ;;  %v1285_v10 = vadd.f32 %v2277_v1, %v1284_v7 }
 0x13b   : > { %1610 = vst.msk [vmem:[%s2284_s26 + $0x350] sm:$0xff] %vm638_vm0, %v1482_v3  ;;  %1544 = vst.msk [vmem:[%s2284_s26 + $0x140] sm:$0xff] %vm638_vm0, %v1416_v4  ;;  %v1483_v11 = vmax.f32 %v1293_v5, 0.0  ;;  %v1417_v12 = vmax.f32 %v1029_v6, 0.0 }
 0x13c   : > { %1608 = vst.msk [vmem:[%s2284_s26 + $0x340] sm:$0xff] %vm638_vm0, %v1480_v8  ;;  %1547 = vst.msk [vmem:[%s2284_s26 + $0x158] sm:$0xff] %vm638_vm0, %v1419_v9  ;;  %v1481_v13 = vmax.f32 %v1285_v10, 0.0 }
 0x13d   : > { %1611 = vst.msk [vmem:[%s2284_s26 + $0x358] sm:$0xff] %vm638_vm0, %v1483_v11  ;;  %1545 = vst.msk [vmem:[%s2284_s26 + $0x148] sm:$0xff] %vm638_vm0, %v1417_v12  ;;  %v1942_v14 = vpop.f32.mrb[44].mxu0 }
 0x13e   : > { %1609 = vst.msk [vmem:[%s2284_s26 + $0x348] sm:$0xff] %vm638_vm0, %v1481_v13  ;;  %v1050_v15 = vadd.f32 %v1942_v14, %v2277_v1  ;;  %v2006_v16 = vpop.f32.mrb[44].mxu1  ;;  %v1041_v17 = vpop.f32.mrb[45].mxu0 }
 0x13f   : > { %v1306_v18 = vadd.f32 %v2006_v16, %v2277_v1  ;;  %v1042_v19 = vadd.f32 %v2277_v1, %v1041_v17  ;;  %v1297_v20 = vpop.f32.mrb[45].mxu1  ;;  %v1943_v21 = vpop.f32.mrb[46].mxu0 }
 0x140   : > { %v1422_v22 = vmax.f32 %v1050_v15, 0.0  ;;  %v1298_v23 = vadd.f32 %v2277_v1, %v1297_v20  ;;  %v1053_v24 = vadd.f32 %v1943_v21, %v2277_v1  ;;  %v2007_v25 = vpop.f32.mrb[46].mxu1  ;;  %v1044_v26 = vpop.f32.mrb[47].mxu0 }
 0x141   : > { %v1486_v27 = vmax.f32 %v1306_v18, 0.0  ;;  %v1420_v28 = vmax.f32 %v1042_v19, 0.0  ;;  %v1309_v29 = vadd.f32 %v2007_v25, %v2277_v1  ;;  %v1045_v30 = vadd.f32 %v2277_v1, %v1044_v26  ;;  %v1300_v31 = vpop.f32.mrb[47].mxu1 }
 0x142   : > { %1550 = vst.msk [vmem:[%s2284_s26 + $0x170] sm:$0xff] %vm638_vm0, %v1422_v22  ;;  %v1484_v32 = vmax.f32 %v1298_v23, 0.0  ;;  %v1423_v33 = vmax.f32 %v1053_v24, 0.0  ;;  %v1301_v34 = vadd.f32 %v2277_v1, %v1300_v31 }
 0x143   : > { %1614 = vst.msk [vmem:[%s2284_s26 + $0x370] sm:$0xff] %vm638_vm0, %v1486_v27  ;;  %1548 = vst.msk [vmem:[%s2284_s26 + $0x160] sm:$0xff] %vm638_vm0, %v1420_v28  ;;  %v1487_v35 = vmax.f32 %v1309_v29, 0.0  ;;  %v1421_v36 = vmax.f32 %v1045_v30, 0.0 }
 0x144   : > { %1612 = vst.msk [vmem:[%s2284_s26 + $0x360] sm:$0xff] %vm638_vm0, %v1484_v32  ;;  %1551 = vst.msk [vmem:[%s2284_s26 + $0x178] sm:$0xff] %vm638_vm0, %v1423_v33  ;;  %v1485_v37 = vmax.f32 %v1301_v34, 0.0 }
 0x145   : > { %1615 = vst.msk [vmem:[%s2284_s26 + $0x378] sm:$0xff] %vm638_vm0, %v1487_v35  ;;  %1549 = vst.msk [vmem:[%s2284_s26 + $0x168] sm:$0xff] %vm638_vm0, %v1421_v36  ;;  %v1946_v38 = vpop.f32.mrb[48].mxu0 }
 0x146   : > { %1613 = vst.msk [vmem:[%s2284_s26 + $0x368] sm:$0xff] %vm638_vm0, %v1485_v37  ;;  %v1066_v39 = vadd.f32 %v1946_v38, %v2277_v1  ;;  %v2010_v40 = vpop.f32.mrb[48].mxu1  ;;  %v1057_v41 = vpop.f32.mrb[49].mxu0 }
 0x147   : > { %v1322_v42 = vadd.f32 %v2010_v40, %v2277_v1  ;;  %v1058_v43 = vadd.f32 %v2277_v1, %v1057_v41  ;;  %v1313_v44 = vpop.f32.mrb[49].mxu1  ;;  %v1947_v45 = vpop.f32.mrb[50].mxu0 }
 0x148   : > { %v1426_v46 = vmax.f32 %v1066_v39, 0.0  ;;  %v1314_v47 = vadd.f32 %v2277_v1, %v1313_v44  ;;  %v1069_v48 = vadd.f32 %v1947_v45, %v2277_v1  ;;  %v2011_v49 = vpop.f32.mrb[50].mxu1  ;;  %v1060_v50 = vpop.f32.mrb[51].mxu0 }
 0x149   : > { %v1490_v51 = vmax.f32 %v1322_v42, 0.0  ;;  %v1424_v52 = vmax.f32 %v1058_v43, 0.0  ;;  %v1325_v53 = vadd.f32 %v2011_v49, %v2277_v1  ;;  %v1061_v54 = vadd.f32 %v2277_v1, %v1060_v50  ;;  %v1316_v55 = vpop.f32.mrb[51].mxu1 }
 0x14a   : > { %1554 = vst.msk [vmem:[%s2284_s26 + $0x190] sm:$0xff] %vm638_vm0, %v1426_v46  ;;  %v1488_v56 = vmax.f32 %v1314_v47, 0.0  ;;  %v1427_v57 = vmax.f32 %v1069_v48, 0.0  ;;  %v1317_v58 = vadd.f32 %v2277_v1, %v1316_v55 }
 0x14b   : > { %1618 = vst.msk [vmem:[%s2284_s26 + $0x390] sm:$0xff] %vm638_vm0, %v1490_v51  ;;  %1552 = vst.msk [vmem:[%s2284_s26 + $0x180] sm:$0xff] %vm638_vm0, %v1424_v52  ;;  %v1491_v59 = vmax.f32 %v1325_v53, 0.0  ;;  %v1425_v60 = vmax.f32 %v1061_v54, 0.0 }
 0x14c   : > { %1616 = vst.msk [vmem:[%s2284_s26 + $0x380] sm:$0xff] %vm638_vm0, %v1488_v56  ;;  %1555 = vst.msk [vmem:[%s2284_s26 + $0x198] sm:$0xff] %vm638_vm0, %v1427_v57  ;;  %v1489_v61 = vmax.f32 %v1317_v58, 0.0 }
 0x14d   : > { %1619 = vst.msk [vmem:[%s2284_s26 + $0x398] sm:$0xff] %vm638_vm0, %v1491_v59  ;;  %1553 = vst.msk [vmem:[%s2284_s26 + $0x188] sm:$0xff] %vm638_vm0, %v1425_v60  ;;  %v1950_v62 = vpop.f32.mrb[52].mxu0 }
 0x14e   : > { %1617 = vst.msk [vmem:[%s2284_s26 + $0x388] sm:$0xff] %vm638_vm0, %v1489_v61  ;;  %v1082_v63 = vadd.f32 %v1950_v62, %v2277_v1  ;;  %v2014_v0 = vpop.f32.mrb[52].mxu1  ;;  %v1073_v2 = vpop.f32.mrb[53].mxu0 }
 0x14f   : > { %v1338_v3 = vadd.f32 %v2014_v0, %v2277_v1  ;;  %v1074_v4 = vadd.f32 %v2277_v1, %v1073_v2  ;;  %v1329_v5 = vpop.f32.mrb[53].mxu1  ;;  %v1951_v6 = vpop.f32.mrb[54].mxu0 }
 0x150   : > { %v1430_v7 = vmax.f32 %v1082_v63, 0.0  ;;  %v1330_v8 = vadd.f32 %v2277_v1, %v1329_v5  ;;  %v1085_v9 = vadd.f32 %v1951_v6, %v2277_v1  ;;  %v2015_v10 = vpop.f32.mrb[54].mxu1  ;;  %v1076_v11 = vpop.f32.mrb[55].mxu0 }
 0x151   : > { %v1494_v12 = vmax.f32 %v1338_v3, 0.0  ;;  %v1428_v13 = vmax.f32 %v1074_v4, 0.0  ;;  %v1341_v14 = vadd.f32 %v2015_v10, %v2277_v1  ;;  %v1077_v15 = vadd.f32 %v2277_v1, %v1076_v11  ;;  %v1332_v16 = vpop.f32.mrb[55].mxu1 }
 0x152   : > { %1558 = vst.msk [vmem:[%s2284_s26 + $0x1b0] sm:$0xff] %vm638_vm0, %v1430_v7  ;;  %v1492_v17 = vmax.f32 %v1330_v8, 0.0  ;;  %v1431_v18 = vmax.f32 %v1085_v9, 0.0  ;;  %v1333_v19 = vadd.f32 %v2277_v1, %v1332_v16 }
 0x153   : > { %1622 = vst.msk [vmem:[%s2284_s26 + $0x3b0] sm:$0xff] %vm638_vm0, %v1494_v12  ;;  %1556 = vst.msk [vmem:[%s2284_s26 + $0x1a0] sm:$0xff] %vm638_vm0, %v1428_v13  ;;  %v1495_v20 = vmax.f32 %v1341_v14, 0.0  ;;  %v1429_v21 = vmax.f32 %v1077_v15, 0.0 }
 0x154   : > { %1620 = vst.msk [vmem:[%s2284_s26 + $0x3a0] sm:$0xff] %vm638_vm0, %v1492_v17  ;;  %1559 = vst.msk [vmem:[%s2284_s26 + $0x1b8] sm:$0xff] %vm638_vm0, %v1431_v18  ;;  %v1493_v22 = vmax.f32 %v1333_v19, 0.0 }
 0x155   : > { %1623 = vst.msk [vmem:[%s2284_s26 + $0x3b8] sm:$0xff] %vm638_vm0, %v1495_v20  ;;  %1557 = vst.msk [vmem:[%s2284_s26 + $0x1a8] sm:$0xff] %vm638_vm0, %v1429_v21  ;;  %v1954_v23 = vpop.f32.mrb[56].mxu0 }
 0x156   : > { %1621 = vst.msk [vmem:[%s2284_s26 + $0x3a8] sm:$0xff] %vm638_vm0, %v1493_v22  ;;  %v1098_v24 = vadd.f32 %v1954_v23, %v2277_v1  ;;  %v2018_v25 = vpop.f32.mrb[56].mxu1  ;;  %v1089_v26 = vpop.f32.mrb[57].mxu0 }
 0x157   : > { %v1354_v27 = vadd.f32 %v2018_v25, %v2277_v1  ;;  %v1090_v28 = vadd.f32 %v2277_v1, %v1089_v26  ;;  %v1345_v29 = vpop.f32.mrb[57].mxu1  ;;  %v1955_v30 = vpop.f32.mrb[58].mxu0 }
 0x158   : > { %v1434_v31 = vmax.f32 %v1098_v24, 0.0  ;;  %v1346_v32 = vadd.f32 %v2277_v1, %v1345_v29  ;;  %v1101_v33 = vadd.f32 %v1955_v30, %v2277_v1  ;;  %v2019_v34 = vpop.f32.mrb[58].mxu1  ;;  %v1092_v35 = vpop.f32.mrb[59].mxu0 }
 0x159   : > { %v1498_v36 = vmax.f32 %v1354_v27, 0.0  ;;  %v1432_v37 = vmax.f32 %v1090_v28, 0.0  ;;  %v1357_v38 = vadd.f32 %v2019_v34, %v2277_v1  ;;  %v1093_v39 = vadd.f32 %v2277_v1, %v1092_v35  ;;  %v1348_v40 = vpop.f32.mrb[59].mxu1 }
 0x15a   : > { %1562 = vst.msk [vmem:[%s2284_s26 + $0x1d0] sm:$0xff] %vm638_vm0, %v1434_v31  ;;  %v1496_v41 = vmax.f32 %v1346_v32, 0.0  ;;  %v1435_v42 = vmax.f32 %v1101_v33, 0.0  ;;  %v1349_v43 = vadd.f32 %v2277_v1, %v1348_v40 }
 0x15b   : > { %1626 = vst.msk [vmem:[%s2284_s26 + $0x3d0] sm:$0xff] %vm638_vm0, %v1498_v36  ;;  %1560 = vst.msk [vmem:[%s2284_s26 + $0x1c0] sm:$0xff] %vm638_vm0, %v1432_v37  ;;  %v1499_v44 = vmax.f32 %v1357_v38, 0.0  ;;  %v1433_v45 = vmax.f32 %v1093_v39, 0.0 }
 0x15c   : > { %1624 = vst.msk [vmem:[%s2284_s26 + $0x3c0] sm:$0xff] %vm638_vm0, %v1496_v41  ;;  %1563 = vst.msk [vmem:[%s2284_s26 + $0x1d8] sm:$0xff] %vm638_vm0, %v1435_v42  ;;  %v1497_v46 = vmax.f32 %v1349_v43, 0.0 }
 0x15d   : > { %1627 = vst.msk [vmem:[%s2284_s26 + $0x3d8] sm:$0xff] %vm638_vm0, %v1499_v44  ;;  %1561 = vst.msk [vmem:[%s2284_s26 + $0x1c8] sm:$0xff] %vm638_vm0, %v1433_v45  ;;  %v1958_v47 = vpop.f32.mrb[60].mxu0 }
 0x15e   : > { %1625 = vst.msk [vmem:[%s2284_s26 + $0x3c8] sm:$0xff] %vm638_vm0, %v1497_v46  ;;  %v1114_v48 = vadd.f32 %v1958_v47, %v2277_v1  ;;  %v2022_v49 = vpop.f32.mrb[60].mxu1  ;;  %v1105_v50 = vpop.f32.mrb[61].mxu0 }
 0x15f   : > { %v1370_v51 = vadd.f32 %v2022_v49, %v2277_v1  ;;  %v1106_v52 = vadd.f32 %v2277_v1, %v1105_v50  ;;  %v1361_v53 = vpop.f32.mrb[61].mxu1  ;;  %v1959_v54 = vpop.f32.mrb[62].mxu0 }
 0x160   : > { %v1438_v55 = vmax.f32 %v1114_v48, 0.0  ;;  %v1362_v56 = vadd.f32 %v2277_v1, %v1361_v53  ;;  %v1117_v57 = vadd.f32 %v1959_v54, %v2277_v1  ;;  %v2023_v58 = vpop.f32.mrb[62].mxu1  ;;  %v1108_v59 = vpop.f32.mrb[63].mxu0 }
 0x161   : > { %v1502_v60 = vmax.f32 %v1370_v51, 0.0  ;;  %v1436_v61 = vmax.f32 %v1106_v52, 0.0  ;;  %v1373_v62 = vadd.f32 %v2023_v58, %v2277_v1  ;;  %v1109_v63 = vadd.f32 %v2277_v1, %v1108_v59  ;;  %v1364_v0 = vpop.f32.mrb[63].mxu1 }
 0x162   : > { %1566 = vst.msk [vmem:[%s2284_s26 + $0x1f0] sm:$0xff] %vm638_vm0, %v1438_v55  ;;  %v1500_v2 = vmax.f32 %v1362_v56, 0.0  ;;  %v1439_v3 = vmax.f32 %v1117_v57, 0.0  ;;  %v1365_v4 = vadd.f32 %v2277_v1, %v1364_v0 }
 0x163   : > { %1630 = vst.msk [vmem:[%s2284_s26 + $0x3f0] sm:$0xff] %vm638_vm0, %v1502_v60  ;;  %1564 = vst.msk [vmem:[%s2284_s26 + $0x1e0] sm:$0xff] %vm638_vm0, %v1436_v61  ;;  %v1503_v5 = vmax.f32 %v1373_v62, 0.0  ;;  %v1437_v6 = vmax.f32 %v1109_v63, 0.0 }
 0x164   : > { %1628 = vst.msk [vmem:[%s2284_s26 + $0x3e0] sm:$0xff] %vm638_vm0, %v1500_v2  ;;  %1567 = vst.msk [vmem:[%s2284_s26 + $0x1f8] sm:$0xff] %vm638_vm0, %v1439_v3  ;;  %v1501_v7 = vmax.f32 %v1365_v4, 0.0 }
 0x165   : > { %1631 = vst.msk [vmem:[%s2284_s26 + $0x3f8] sm:$0xff] %vm638_vm0, %v1503_v5  ;;  %1565 = vst.msk [vmem:[%s2284_s26 + $0x1e8] sm:$0xff] %vm638_vm0, %v1437_v6 }
 0x166   : > { %1629 = vst.msk [vmem:[%s2284_s26 + $0x3e8] sm:$0xff] %vm638_vm0, %v1501_v7 }
 0x167 PF: > { %s13_s12 = sadd.s32 1, %s2105_s12  }
 0x168   : > { %p10_p4 = scmp.ge.s32.totalorder %s13_s12, 4  }
 0x16a   :  { %12 = sbr.rel (!%p10_p4) target bundleno = 1 (0x1), region = 62 }

// kernel: fwd.12
= control target key start
LH: loop header
LB: loop body
LE: loop exit
PB: predicated region body
PF: predicated region fallthrough
CT: control target
= control target key end

     0   :  { %vm485_vm0 = vcmask 261120   ;;  %s1024_s1 = inlined_call_operand.vmem [shape: bf16[256,32], index: 1, kind: input, shape index: {}]   ;;  %s1025_s0 = inlined_call_operand.vmem [shape: bf16[216,256], index: 0, kind: input, shape index: {}]   ;;  %s1026_s2 = inlined_call_operand.vmem [shape: f32[1,32], index: 2, kind: input, shape index: {}]   ;;  %s1027_s3 = inlined_call_operand.vmem [shape: f32[216,32], index: 3, kind: output, shape index: {}]  }
   0x1   :  { %v678_v0 = vld [vmem:[%s1024_s1 + $0x40] sm:$0xff]   ;;  %v680_v2 = vld [vmem:[%s1024_s1 + $0x48] sm:$0xff]   ;;  %v682_v4 = vld [vmem:[%s1024_s1 + $0x50] sm:$0xff]  }
   0x2   :  { %v679_v1 = vld [vmem:[%s1024_s1] sm:$0xff]   ;;  %562 = vmatprep.subr.bf16.mxu0 %v678_v0  ;;  %662 = vmatprep.subr.bf16.mxu1 %v678_v0  ;;  %v681_v3 = vld [vmem:[%s1024_s1 + $0x8] sm:$0xff]   ;;  %v683_v5 = vld [vmem:[%s1024_s1 + $0x10] sm:$0xff]  }
   0x3   :  { %563 = vmatpush3.bf16.msra.mxu0 %v679_v1  ;;  %670 = vmatpush3.bf16.msra.mxu1 %v679_v1  ;;  %v684_v6 = vld [vmem:[%s1024_s1 + $0x58] sm:$0xff]   ;;  %v686_v8 = vld [vmem:[%s1024_s1 + $0x60] sm:$0xff]   ;;  %v688_v10 = vld [vmem:[%s1024_s1 + $0x68] sm:$0xff]  }
   0x4   :  { %564 = vmatprep.subr.bf16.mxu0 %v680_v2  ;;  %663 = vmatprep.subr.bf16.mxu1 %v680_v2  ;;  %v685_v7 = vld [vmem:[%s1024_s1 + $0x18] sm:$0xff]   ;;  %v687_v9 = vld [vmem:[%s1024_s1 + $0x20] sm:$0xff]   ;;  %v689_v13 = vld [vmem:[%s1024_s1 + $0x28] sm:$0xff]  }
   0x5   :  { %v696_v11 = vld [vmem:[%s1025_s0 + $0x4] ss:$8 sps:$4 sm:$0xff]   ;;  %v699_v12 = vld [vmem:[%s1025_s0 + $0x74] ss:$8 sps:$4 sm:$0xff]   ;;  %v694_v18 = vld [vmem:[%s1025_s0] ss:$8 sps:$4 sm:$0xff]  }
   0x6   :  { %v690_v14 = vld [vmem:[%s1024_s1 + $0x70] sm:$0xff]   ;;  %346 = vmatprep.mubr.bf16.mxu0 %v696_v11  ;;  %402 = vmatprep.mubr.bf16.mxu1 %v699_v12  ;;  %v692_v16 = vld [vmem:[%s1024_s1 + $0x78] sm:$0xff]   ;;  %v702_v21 = vld [vmem:[%s1025_s0 + $0x84] ss:$8 sps:$4 sm:$0xff]  }
   0x7   :  { %565 = vmatpush3.bf16.msra.mxu0 %v681_v3  ;;  %671 = vmatpush3.bf16.msra.mxu1 %v681_v3  ;;  %v691_v15 = vld [vmem:[%s1024_s1 + $0x30] sm:$0xff]   ;;  %v693_v17 = vld [vmem:[%s1024_s1 + $0x38] sm:$0xff]   ;;  %v705_v23 = vld [vmem:[%s1025_s0 + $0x80] ss:$8 sps:$4 sm:$0xff]  }
   0x8   :  { %566 = vmatprep.subr.bf16.mxu0 %v682_v4  ;;  %664 = vmatprep.subr.bf16.mxu1 %v682_v4  ;;  %v697_v19 = vld [vmem:[%s1025_s0 + $0x70] ss:$8 sps:$4 sm:$0xff]   ;;  %v700_v20 = vld [vmem:[%s1025_s0 + $0x14] ss:$8 sps:$4 sm:$0xff]   ;;  %v706_v24 = vld [vmem:[%s1025_s0 + $0x24] ss:$8 sps:$4 sm:$0xff]  }
   0x9   :  { %v704_v22 = vld [vmem:[%s1025_s0 + $0x10] ss:$8 sps:$4 sm:$0xff]   ;;  %v708_v25 = vld [vmem:[%s1025_s0 + $0x94] ss:$8 sps:$4 sm:$0xff]   ;;  %v710_v26 = vld [vmem:[%s1025_s0 + $0x20] ss:$8 sps:$4 sm:$0xff]  }
   0xa   :  { %v711_v27 = vld [vmem:[%s1025_s0 + $0x90] ss:$8 sps:$4 sm:$0xff]   ;;  %v712_v28 = vld [vmem:[%s1025_s0 + $0x34] ss:$8 sps:$4 sm:$0xff]   ;;  %v714_v29 = vld [vmem:[%s1025_s0 + $0xa4] ss:$8 sps:$4 sm:$0xff]  }
   0xb   :  { %567 = vmatpush3.bf16.msra.mxu0 %v683_v5  ;;  %672 = vmatpush3.bf16.msra.mxu1 %v683_v5  ;;  %v716_v30 = vld [vmem:[%s1025_s0 + $0x30] ss:$8 sps:$4 sm:$0xff]   ;;  %v717_v31 = vld [vmem:[%s1025_s0 + $0xa0] ss:$8 sps:$4 sm:$0xff]   ;;  %v718_v32 = vld [vmem:[%s1025_s0 + $0x44] ss:$8 sps:$4 sm:$0xff]  }
   0xc   :  { %568 = vmatprep.subr.bf16.mxu0 %v684_v6  ;;  %665 = vmatprep.subr.bf16.mxu1 %v684_v6  ;;  %v720_v33 = vld [vmem:[%s1025_s0 + $0xb4] ss:$8 sps:$4 sm:$0xff]   ;;  %v722_v34 = vld [vmem:[%s1025_s0 + $0x40] ss:$8 sps:$4 sm:$0xff]   ;;  %v723_v35 = vld [vmem:[%s1025_s0 + $0xb0] ss:$8 sps:$4 sm:$0xff]  }
   0xd   :  { %v724_v36 = vld [vmem:[%s1025_s0 + $0x54] ss:$8 sps:$4 sm:$0xff]   ;;  %v726_v37 = vld [vmem:[%s1025_s0 + $0xc4] ss:$8 sps:$4 sm:$0xff]   ;;  %v728_v39 = vld [vmem:[%s1025_s0 + $0x50] ss:$8 sps:$4 sm:$0xff]  }
   0xe   :  { %v41_v38 = vld [vmem:[%s1025_s0 + $0xd0] sm:$0xff]  ;;  %v729_v40 = vld [vmem:[%s1025_s0 + $0xc0] ss:$8 sps:$4 sm:$0xff]   ;;  %v730_v41 = vld [vmem:[%s1025_s0 + $0x64] ss:$8 sps:$4 sm:$0xff]  }
   0xf   :  { %569 = vmatpush3.bf16.msra.mxu0 %v685_v7  ;;  %673 = vmatpush3.bf16.msra.mxu1 %v685_v7  ;;  %v545_v42 = vcombine.high %v41_v38, %v41_v38  ;;  %v733_v43 = vld [vmem:[%s1025_s0 + $0x60] ss:$8 sps:$4 sm:$0xff]   ;;  %v544_v44 = vcombine.low %v41_v38, %v41_v38 }
  0x10   :  { %570 = vmatprep.subr.bf16.mxu0 %v686_v8  ;;  %666 = vmatprep.subr.bf16.mxu1 %v686_v8  ;;  %v887_v47 = vld [vmem:[%s1026_s2] ss:$0 sm:$0xff] }
  0x13   :  { %571 = vmatpush3.bf16.msra.mxu0 %v687_v9  ;;  %674 = vmatpush3.bf16.msra.mxu1 %v687_v9 }
  0x14   :  { %572 = vmatprep.subr.bf16.mxu0 %v688_v10  ;;  %667 = vmatprep.subr.bf16.mxu1 %v688_v10 }
  0x17   :  { %573 = vmatpush3.bf16.msra.mxu0 %v689_v13  ;;  %675 = vmatpush3.bf16.msra.mxu1 %v689_v13 }
  0x18   :  { %574 = vmatprep.subr.bf16.mxu0 %v690_v14  ;;  %668 = vmatprep.subr.bf16.mxu1 %v690_v14 }
  0x1b   :  { %575 = vmatpush3.bf16.msra.mxu0 %v691_v15  ;;  %676 = vmatpush3.bf16.msra.mxu1 %v691_v15 }
  0x1c   :  { %576 = vmatprep.subr.bf16.mxu0 %v692_v16  ;;  %669 = vmatprep.subr.bf16.mxu1 %v692_v16 }
  0x1f   :  { %577 = vmatpush3.bf16.msra.mxu0 %v693_v17  ;;  %677 = vmatpush3.bf16.msra.mxu1 %v693_v17 }
  0x22   :  { %347 = vmatmul.mubr.bf16.vlgmr.msra.gmra.mrb[0].mxu0 %v694_v18  ;;  %403 = vmatmul.mubr.bf16.vlgmr.msra.gmra.mrb[0].mxu1 %v697_v19 }
  0x23   :  { %354 = vmatprep.mubr.bf16.mxu0 %v700_v20  ;;  %410 = vmatprep.mubr.bf16.mxu1 %v702_v21 }
  0x2a   :  { %355 = vmatmul.mubr.bf16.gmra.mrb[4].mxu0 %v704_v22  ;;  %411 = vmatmul.mubr.bf16.gmra.mrb[4].mxu1 %v705_v23 }
  0x2b   :  { %362 = vmatprep.mubr.bf16.mxu0 %v706_v24  ;;  %418 = vmatprep.mubr.bf16.mxu1 %v708_v25 }
  0x32   :  { %363 = vmatmul.mubr.bf16.gmra.mrb[8].mxu0 %v710_v26  ;;  %419 = vmatmul.mubr.bf16.gmra.mrb[8].mxu1 %v711_v27 }
  0x33   :  { %370 = vmatprep.mubr.bf16.mxu0 %v712_v28  ;;  %426 = vmatprep.mubr.bf16.mxu1 %v714_v29 }
  0x3a   :  { %371 = vmatmul.mubr.bf16.gmra.mrb[12].mxu0 %v716_v30  ;;  %427 = vmatmul.mubr.bf16.gmra.mrb[12].mxu1 %v717_v31 }
  0x3b   :  { %378 = vmatprep.mubr.bf16.mxu0 %v718_v32  ;;  %434 = vmatprep.mubr.bf16.mxu1 %v720_v33 }
  0x42   :  { %379 = vmatmul.mubr.bf16.gmra.mrb[16].mxu0 %v722_v34  ;;  %435 = vmatmul.mubr.bf16.gmra.mrb[16].mxu1 %v723_v35 }
  0x43   :  { %386 = vmatprep.mubr.bf16.mxu0 %v724_v36  ;;  %442 = vmatprep.mubr.bf16.mxu1 %v726_v37 }
  0x4a   :  { %387 = vmatmul.mubr.bf16.gmra.mrb[20].mxu0 %v728_v39  ;;  %443 = vmatmul.mubr.bf16.gmra.mrb[20].mxu1 %v729_v40 }
  0x4b   :  { %394 = vmatprep.mubr.bf16.mxu0 %v730_v41  ;;  %450 = vmatprep.mubr.bf16.mxu1 %v545_v42 }
  0x52   :  { %395 = vmatmul.mubr.bf16.gmra.mrb[24].mxu0 %v733_v43  ;;  %451 = vmatmul.mubr.bf16.gmra.mrb[24].mxu1 %v544_v44 }
  0xf5   :  { %v578_v45 = vpop.f32.mrb[0].mxu0  ;;  %v620_v46 = vpop.f32.mrb[0].mxu1 }
  0xf6   :  { %v579_v48 = vpop.f32.mrb[1].mxu0  ;;  %v621_v49 = vpop.f32.mrb[1].mxu1 }
  0xf7   :  { %v580_v50 = vadd.f32 %v579_v48, %v578_v45  ;;  %v622_v51 = vadd.f32 %v621_v49, %v620_v46  ;;  %v581_v52 = vpop.f32.mrb[2].mxu0  ;;  %v623_v53 = vpop.f32.mrb[2].mxu1 }
  0xf8   :  { %v582_v54 = vpop.f32.mrb[3].mxu0  ;;  %v624_v55 = vpop.f32.mrb[3].mxu1 }
  0xf9   :  { %v349_v56 = vadd.f32 %v580_v50, %v887_v47  ;;  %v405_v57 = vadd.f32 %v622_v51, %v887_v47  ;;  %v583_v58 = vadd.f32 %v582_v54, %v581_v52  ;;  %v625_v59 = vadd.f32 %v624_v55, %v623_v53 }
  0xfb   :  { %v458_v60 = vmax.f32 %v349_v56, 0.0  ;;  %v472_v61 = vmax.f32 %v405_v57, 0.0  ;;  %v352_v62 = vadd.f32 %v583_v58, %v887_v47  ;;  %v408_v63 = vadd.f32 %v625_v59, %v887_v47 }
  0xfd   :  { %486 = vst.msk [vmem:[%s1027_s3] sm:$0xff] %vm485_vm0, %v458_v60  ;;  %500 = vst.msk [vmem:[%s1027_s3 + $0x70] sm:$0xff] %vm485_vm0, %v472_v61  ;;  %v459_v0 = vmax.f32 %v352_v62, 0.0  ;;  %v473_v1 = vmax.f32 %v408_v63, 0.0  ;;  %v584_v2 = vpop.f32.mrb[4].mxu0  ;;  %v626_v3 = vpop.f32.mrb[4].mxu1 }
  0xfe   :  { %v585_v4 = vpop.f32.mrb[5].mxu0  ;;  %v627_v5 = vpop.f32.mrb[5].mxu1 }
  0xff   :  { %487 = vst.msk [vmem:[%s1027_s3 + $0x8] sm:$0xff] %vm485_vm0, %v459_v0  ;;  %501 = vst.msk [vmem:[%s1027_s3 + $0x78] sm:$0xff] %vm485_vm0, %v473_v1  ;;  %v586_v6 = vadd.f32 %v585_v4, %v584_v2  ;;  %v628_v7 = vadd.f32 %v627_v5, %v626_v3  ;;  %v587_v8 = vpop.f32.mrb[6].mxu0  ;;  %v629_v9 = vpop.f32.mrb[6].mxu1 }
 0x100   :  { %v588_v10 = vpop.f32.mrb[7].mxu0  ;;  %v630_v11 = vpop.f32.mrb[7].mxu1 }
 0x101   :  { %v357_v12 = vadd.f32 %v586_v6, %v887_v47  ;;  %v413_v13 = vadd.f32 %v628_v7, %v887_v47  ;;  %v589_v14 = vadd.f32 %v588_v10, %v587_v8  ;;  %v631_v15 = vadd.f32 %v630_v11, %v629_v9 }
 0x103   :  { %v460_v16 = vmax.f32 %v357_v12, 0.0  ;;  %v474_v17 = vmax.f32 %v413_v13, 0.0  ;;  %v360_v18 = vadd.f32 %v589_v14, %v887_v47  ;;  %v416_v19 = vadd.f32 %v631_v15, %v887_v47 }
 0x105   :  { %488 = vst.msk [vmem:[%s1027_s3 + $0x10] sm:$0xff] %vm485_vm0, %v460_v16  ;;  %502 = vst.msk [vmem:[%s1027_s3 + $0x80] sm:$0xff] %vm485_vm0, %v474_v17  ;;  %v461_v20 = vmax.f32 %v360_v18, 0.0  ;;  %v475_v21 = vmax.f32 %v416_v19, 0.0  ;;  %v590_v22 = vpop.f32.mrb[8].mxu0  ;;  %v632_v23 = vpop.f32.mrb[8].mxu1 }
 0x106   :  { %v591_v24 = vpop.f32.mrb[9].mxu0  ;;  %v633_v25 = vpop.f32.mrb[9].mxu1 }
 0x107   :  { %489 = vst.msk [vmem:[%s1027_s3 + $0x18] sm:$0xff] %vm485_vm0, %v461_v20  ;;  %503 = vst.msk [vmem:[%s1027_s3 + $0x88] sm:$0xff] %vm485_vm0, %v475_v21  ;;  %v592_v26 = vadd.f32 %v591_v24, %v590_v22  ;;  %v634_v27 = vadd.f32 %v633_v25, %v632_v23  ;;  %v593_v28 = vpop.f32.mrb[10].mxu0  ;;  %v635_v29 = vpop.f32.mrb[10].mxu1 }
 0x108   :  { %v594_v30 = vpop.f32.mrb[11].mxu0  ;;  %v636_v31 = vpop.f32.mrb[11].mxu1 }
 0x109   :  { %v365_v32 = vadd.f32 %v592_v26, %v887_v47  ;;  %v421_v33 = vadd.f32 %v634_v27, %v887_v47  ;;  %v595_v34 = vadd.f32 %v594_v30, %v593_v28  ;;  %v637_v35 = vadd.f32 %v636_v31, %v635_v29 }
 0x10b   :  { %v462_v36 = vmax.f32 %v365_v32, 0.0  ;;  %v476_v37 = vmax.f32 %v421_v33, 0.0  ;;  %v368_v38 = vadd.f32 %v595_v34, %v887_v47  ;;  %v424_v39 = vadd.f32 %v637_v35, %v887_v47 }
 0x10d   :  { %490 = vst.msk [vmem:[%s1027_s3 + $0x20] sm:$0xff] %vm485_vm0, %v462_v36  ;;  %504 = vst.msk [vmem:[%s1027_s3 + $0x90] sm:$0xff] %vm485_vm0, %v476_v37  ;;  %v463_v40 = vmax.f32 %v368_v38, 0.0  ;;  %v477_v41 = vmax.f32 %v424_v39, 0.0  ;;  %v596_v42 = vpop.f32.mrb[12].mxu0  ;;  %v638_v43 = vpop.f32.mrb[12].mxu1 }
 0x10e   :  { %v597_v44 = vpop.f32.mrb[13].mxu0  ;;  %v639_v45 = vpop.f32.mrb[13].mxu1 }
 0x10f   :  { %491 = vst.msk [vmem:[%s1027_s3 + $0x28] sm:$0xff] %vm485_vm0, %v463_v40  ;;  %505 = vst.msk [vmem:[%s1027_s3 + $0x98] sm:$0xff] %vm485_vm0, %v477_v41  ;;  %v598_v46 = vadd.f32 %v597_v44, %v596_v42  ;;  %v640_v48 = vadd.f32 %v639_v45, %v638_v43  ;;  %v599_v49 = vpop.f32.mrb[14].mxu0  ;;  %v641_v50 = vpop.f32.mrb[14].mxu1 }
 0x110   :  { %v600_v51 = vpop.f32.mrb[15].mxu0  ;;  %v642_v52 = vpop.f32.mrb[15].mxu1 }
 0x111   :  { %v373_v53 = vadd.f32 %v598_v46, %v887_v47  ;;  %v429_v54 = vadd.f32 %v640_v48, %v887_v47  ;;  %v601_v55 = vadd.f32 %v600_v51, %v599_v49  ;;  %v643_v56 = vadd.f32 %v642_v52, %v641_v50 }
 0x113   :  { %v464_v57 = vmax.f32 %v373_v53, 0.0  ;;  %v478_v58 = vmax.f32 %v429_v54, 0.0  ;;  %v376_v59 = vadd.f32 %v601_v55, %v887_v47  ;;  %v432_v60 = vadd.f32 %v643_v56, %v887_v47 }
 0x115   :  { %492 = vst.msk [vmem:[%s1027_s3 + $0x30] sm:$0xff] %vm485_vm0, %v464_v57  ;;  %506 = vst.msk [vmem:[%s1027_s3 + $0xa0] sm:$0xff] %vm485_vm0, %v478_v58  ;;  %v465_v61 = vmax.f32 %v376_v59, 0.0  ;;  %v479_v62 = vmax.f32 %v432_v60, 0.0  ;;  %v602_v63 = vpop.f32.mrb[16].mxu0  ;;  %v644_v0 = vpop.f32.mrb[16].mxu1 }
 0x116   :  { %v603_v1 = vpop.f32.mrb[17].mxu0  ;;  %v645_v2 = vpop.f32.mrb[17].mxu1 }
 0x117   :  { %493 = vst.msk [vmem:[%s1027_s3 + $0x38] sm:$0xff] %vm485_vm0, %v465_v61  ;;  %507 = vst.msk [vmem:[%s1027_s3 + $0xa8] sm:$0xff] %vm485_vm0, %v479_v62  ;;  %v604_v3 = vadd.f32 %v603_v1, %v602_v63  ;;  %v646_v4 = vadd.f32 %v645_v2, %v644_v0  ;;  %v605_v5 = vpop.f32.mrb[18].mxu0  ;;  %v647_v6 = vpop.f32.mrb[18].mxu1 }
 0x118   :  { %v606_v7 = vpop.f32.mrb[19].mxu0  ;;  %v648_v8 = vpop.f32.mrb[19].mxu1 }
 0x119   :  { %v381_v9 = vadd.f32 %v604_v3, %v887_v47  ;;  %v437_v10 = vadd.f32 %v646_v4, %v887_v47  ;;  %v607_v11 = vadd.f32 %v606_v7, %v605_v5  ;;  %v649_v12 = vadd.f32 %v648_v8, %v647_v6 }
 0x11b   :  { %v466_v13 = vmax.f32 %v381_v9, 0.0  ;;  %v480_v14 = vmax.f32 %v437_v10, 0.0  ;;  %v384_v15 = vadd.f32 %v607_v11, %v887_v47  ;;  %v440_v16 = vadd.f32 %v649_v12, %v887_v47 }
 0x11d   :  { %494 = vst.msk [vmem:[%s1027_s3 + $0x40] sm:$0xff] %vm485_vm0, %v466_v13  ;;  %508 = vst.msk [vmem:[%s1027_s3 + $0xb0] sm:$0xff] %vm485_vm0, %v480_v14  ;;  %v467_v17 = vmax.f32 %v384_v15, 0.0  ;;  %v481_v18 = vmax.f32 %v440_v16, 0.0  ;;  %v608_v19 = vpop.f32.mrb[20].mxu0  ;;  %v650_v20 = vpop.f32.mrb[20].mxu1 }
 0x11e   :  { %v609_v21 = vpop.f32.mrb[21].mxu0  ;;  %v651_v22 = vpop.f32.mrb[21].mxu1 }
 0x11f   :  { %495 = vst.msk [vmem:[%s1027_s3 + $0x48] sm:$0xff] %vm485_vm0, %v467_v17  ;;  %509 = vst.msk [vmem:[%s1027_s3 + $0xb8] sm:$0xff] %vm485_vm0, %v481_v18  ;;  %v610_v23 = vadd.f32 %v609_v21, %v608_v19  ;;  %v652_v24 = vadd.f32 %v651_v22, %v650_v20  ;;  %v611_v25 = vpop.f32.mrb[22].mxu0  ;;  %v653_v26 = vpop.f32.mrb[22].mxu1 }
 0x120   :  { %v612_v27 = vpop.f32.mrb[23].mxu0  ;;  %v654_v28 = vpop.f32.mrb[23].mxu1 }
 0x121   :  { %v389_v29 = vadd.f32 %v610_v23, %v887_v47  ;;  %v445_v30 = vadd.f32 %v652_v24, %v887_v47  ;;  %v613_v31 = vadd.f32 %v612_v27, %v611_v25  ;;  %v655_v32 = vadd.f32 %v654_v28, %v653_v26 }
 0x123   :  { %v468_v33 = vmax.f32 %v389_v29, 0.0  ;;  %v482_v34 = vmax.f32 %v445_v30, 0.0  ;;  %v392_v35 = vadd.f32 %v613_v31, %v887_v47  ;;  %v448_v36 = vadd.f32 %v655_v32, %v887_v47 }
 0x125   :  { %496 = vst.msk [vmem:[%s1027_s3 + $0x50] sm:$0xff] %vm485_vm0, %v468_v33  ;;  %510 = vst.msk [vmem:[%s1027_s3 + $0xc0] sm:$0xff] %vm485_vm0, %v482_v34  ;;  %v469_v37 = vmax.f32 %v392_v35, 0.0  ;;  %v483_v38 = vmax.f32 %v448_v36, 0.0  ;;  %v614_v39 = vpop.f32.mrb[24].mxu0  ;;  %v656_v40 = vpop.f32.mrb[24].mxu1 }
 0x126   :  { %v615_v41 = vpop.f32.mrb[25].mxu0  ;;  %v657_v42 = vpop.f32.mrb[25].mxu1 }
 0x127   :  { %497 = vst.msk [vmem:[%s1027_s3 + $0x58] sm:$0xff] %vm485_vm0, %v469_v37  ;;  %511 = vst.msk [vmem:[%s1027_s3 + $0xc8] sm:$0xff] %vm485_vm0, %v483_v38  ;;  %v616_v43 = vadd.f32 %v615_v41, %v614_v39  ;;  %v658_v44 = vadd.f32 %v657_v42, %v656_v40  ;;  %v617_v45 = vpop.f32.mrb[26].mxu0  ;;  %v659_v46 = vpop.f32.mrb[26].mxu1 }
 0x128   :  { %v618_v48 = vpop.f32.mrb[27].mxu0  ;;  %v660_v49 = vpop.f32.mrb[27].mxu1 }
 0x129   :  { %v397_v50 = vadd.f32 %v616_v43, %v887_v47  ;;  %v453_v51 = vadd.f32 %v658_v44, %v887_v47  ;;  %v619_v52 = vadd.f32 %v618_v48, %v617_v45 }
 0x12b   :  { %v470_v53 = vmax.f32 %v397_v50, 0.0  ;;  %v484_v54 = vmax.f32 %v453_v51, 0.0  ;;  %v400_v55 = vadd.f32 %v619_v52, %v887_v47 }
 0x12d   :  { %498 = vst.msk [vmem:[%s1027_s3 + $0x60] sm:$0xff] %vm485_vm0, %v470_v53  ;;  %512 = vst.msk [vmem:[%s1027_s3 + $0xd0] sm:$0xff] %vm485_vm0, %v484_v54  ;;  %v471_v56 = vmax.f32 %v400_v55, 0.0 }
 0x12f   :  { %499 = vst.msk [vmem:[%s1027_s3 + $0x68] sm:$0xff] %vm485_vm0, %v471_v56 }

// kernel: fwd.13
= control target key start
LH: loop header
LB: loop body
LE: loop exit
PB: predicated region body
PF: predicated region fallthrough
CT: control target
= control target key end

     0   :  { %vm417_vm0 = vcmask 523264   ;;  %s713_s1 = inlined_call_operand.vmem [shape: bf16[512,64], index: 1, kind: input, shape index: {}]   ;;  %s714_s0 = inlined_call_operand.vmem [shape: bf16[24,512], index: 0, kind: input, shape index: {}]   ;;  %s715_s2 = inlined_call_operand.vmem [shape: f32[1,64], index: 2, kind: input, shape index: {}]   ;;  %s716_s3 = inlined_call_operand.vmem [shape: f32[24,64], index: 3, kind: output, shape index: {}]  }
   0x1   :  { %v522_v0 = vld [vmem:[%s713_s1 + $0x40] sm:$0xff]   ;;  %v526_v4 = vld [vmem:[%s713_s1 + $0x48] sm:$0xff]   ;;  %v530_v8 = vld [vmem:[%s713_s1 + $0x50] sm:$0xff]  }
   0x2   :  { %v523_v1 = vld [vmem:[%s713_s1 + $0xc0] sm:$0xff]   ;;  %466 = vmatprep.subr.bf16.mxu0 %v522_v0  ;;  %v527_v5 = vld [vmem:[%s713_s1 + $0xc8] sm:$0xff]   ;;  %v531_v9 = vld [vmem:[%s713_s1 + $0xd0] sm:$0xff]  }
   0x3   :  { %v524_v2 = vld [vmem:[%s713_s1] sm:$0xff]   ;;  %494 = vmatprep.subr.bf16.mxu1 %v523_v1  ;;  %v528_v6 = vld [vmem:[%s713_s1 + $0x8] sm:$0xff]   ;;  %v532_v10 = vld [vmem:[%s713_s1 + $0x10] sm:$0xff]  }
   0x4   :  { %v525_v3 = vld [vmem:[%s713_s1 + $0x80] sm:$0xff]   ;;  %467 = vmatpush3.bf16.msra.mxu0 %v524_v2  ;;  %v529_v7 = vld [vmem:[%s713_s1 + $0x88] sm:$0xff]   ;;  %v533_v11 = vld [vmem:[%s713_s1 + $0x90] sm:$0xff]  }
   0x5   :  { %495 = vmatpush3.bf16.msra.mxu1 %v525_v3  ;;  %468 = vmatprep.subr.bf16.mxu0 %v526_v4  ;;  %v534_v12 = vld [vmem:[%s713_s1 + $0x58] sm:$0xff]   ;;  %v538_v16 = vld [vmem:[%s713_s1 + $0x60] sm:$0xff]   ;;  %v542_v20 = vld [vmem:[%s713_s1 + $0x68] sm:$0xff]  }
   0x6   :  { %496 = vmatprep.subr.bf16.mxu1 %v527_v5  ;;  %v535_v13 = vld [vmem:[%s713_s1 + $0xd8] sm:$0xff]   ;;  %v539_v17 = vld [vmem:[%s713_s1 + $0xe0] sm:$0xff]   ;;  %v543_v21 = vld [vmem:[%s713_s1 + $0xe8] sm:$0xff]  }
   0x7   :  { %v536_v14 = vld [vmem:[%s713_s1 + $0x18] sm:$0xff]   ;;  %v540_v18 = vld [vmem:[%s713_s1 + $0x20] sm:$0xff]   ;;  %v544_v22 = vld [vmem:[%s713_s1 + $0x28] sm:$0xff]  }
   0x8   :  { %469 = vmatpush3.bf16.msra.mxu0 %v528_v6  ;;  %v537_v15 = vld [vmem:[%s713_s1 + $0x98] sm:$0xff]   ;;  %v541_v19 = vld [vmem:[%s713_s1 + $0xa0] sm:$0xff]   ;;  %v545_v23 = vld [vmem:[%s713_s1 + $0xa8] sm:$0xff]  }
   0x9   :  { %497 = vmatpush3.bf16.msra.mxu1 %v529_v7  ;;  %470 = vmatprep.subr.bf16.mxu0 %v530_v8  ;;  %v546_v24 = vld [vmem:[%s713_s1 + $0x70] sm:$0xff]   ;;  %v550_v28 = vld [vmem:[%s713_s1 + $0x78] sm:$0xff]   ;;  %v19_v36 = vld [vmem:[%s714_s0 + $0x20] sm:$0xff] }
   0xa   :  { %498 = vmatprep.subr.bf16.mxu1 %v531_v9  ;;  %v547_v25 = vld [vmem:[%s713_s1 + $0xf0] sm:$0xff]   ;;  %v551_v29 = vld [vmem:[%s713_s1 + $0xf8] sm:$0xff]   ;;  %v431_v37 = vcombine.high %v19_v36, %v19_v36  ;;  %v20_v38 = vld [vmem:[%s714_s0 + $0x28] sm:$0xff]  ;;  %v430_v40 = vcombine.low %v19_v36, %v19_v36 }
   0xb   :  { %v548_v26 = vld [vmem:[%s713_s1 + $0x30] sm:$0xff]   ;;  %v552_v30 = vld [vmem:[%s713_s1 + $0x38] sm:$0xff]   ;;  %v433_v39 = vcombine.high %v20_v38, %v20_v38  ;;  %v432_v41 = vcombine.low %v20_v38, %v20_v38  ;;  %v425_v44 = vld [vmem:[%s715_s2] ss:$0 sm:$0xff] }
   0xc   :  { %471 = vmatpush3.bf16.msra.mxu0 %v532_v10  ;;  %v549_v27 = vld [vmem:[%s713_s1 + $0xb0] sm:$0xff]   ;;  %v553_v31 = vld [vmem:[%s713_s1 + $0xb8] sm:$0xff]  }
   0xd   :  { %499 = vmatpush3.bf16.msra.mxu1 %v533_v11  ;;  %472 = vmatprep.subr.bf16.mxu0 %v534_v12  ;;  %v554_v32 = vld [vmem:[%s714_s0] ss:$16 sps:$4 sm:$0xff]   ;;  %v556_v33 = vld [vmem:[%s714_s0 + $0x4] ss:$16 sps:$4 sm:$0xff]   ;;  %v557_v34 = vld [vmem:[%s714_s0 + $0x8] ss:$16 sps:$4 sm:$0xff]  }
   0xe   :  { %500 = vmatprep.subr.bf16.mxu1 %v535_v13  ;;  %v559_v35 = vld [vmem:[%s714_s0 + $0xc] ss:$16 sps:$4 sm:$0xff]   ;;  %350 = vmatprep.mubr.bf16.mxu0 %v556_v33 }
   0xf   :  { %398 = vmatprep.mubr.bf16.mxu1 %v559_v35 }
  0x10   :  { %473 = vmatpush3.bf16.msra.mxu0 %v536_v14 }
  0x11   :  { %501 = vmatpush3.bf16.msra.mxu1 %v537_v15  ;;  %474 = vmatprep.subr.bf16.mxu0 %v538_v16 }
  0x12   :  { %502 = vmatprep.subr.bf16.mxu1 %v539_v17 }
  0x14   :  { %475 = vmatpush3.bf16.msra.mxu0 %v540_v18 }
  0x15   :  { %503 = vmatpush3.bf16.msra.mxu1 %v541_v19  ;;  %476 = vmatprep.subr.bf16.mxu0 %v542_v20 }
  0x16   :  { %504 = vmatprep.subr.bf16.mxu1 %v543_v21 }
  0x18   :  { %477 = vmatpush3.bf16.msra.mxu0 %v544_v22 }
  0x19   :  { %505 = vmatpush3.bf16.msra.mxu1 %v545_v23  ;;  %478 = vmatprep.subr.bf16.mxu0 %v546_v24 }
  0x1a   :  { %506 = vmatprep.subr.bf16.mxu1 %v547_v25 }
  0x1c   :  { %479 = vmatpush3.bf16.msra.mxu0 %v548_v26 }
  0x1d   :  { %507 = vmatpush3.bf16.msra.mxu1 %v549_v27  ;;  %480 = vmatprep.subr.bf16.mxu0 %v550_v28 }
  0x1e   :  { %508 = vmatprep.subr.bf16.mxu1 %v551_v29 }
  0x20   :  { %481 = vmatpush3.bf16.msra.mxu0 %v552_v30 }
  0x21   :  { %509 = vmatpush3.bf16.msra.mxu1 %v553_v31 }
  0x23   :  { %351 = vmatmul.mubr.bf16.vlgmr.msra.gmra.mrb[0].mxu0 %v554_v32 }
  0x24   :  { %399 = vmatmul.mubr.bf16.vlgmr.msra.gmra.mrb[0].mxu1 %v557_v34  ;;  %358 = vmatprep.mubr.bf16.mxu0 %v431_v37 }
  0x25   :  { %406 = vmatprep.mubr.bf16.mxu1 %v433_v39 }
  0x2b   :  { %359 = vmatmul.mubr.bf16.gmra.mrb[4].mxu0 %v430_v40 }
  0x2c   :  { %407 = vmatmul.mubr.bf16.gmra.mrb[4].mxu1 %v432_v41 }
  0xf6   :  { %v482_v42 = vpop.f32.mrb[0].mxu0 }
  0xf7   :  { %v510_v43 = vpop.f32.mrb[0].mxu1  ;;  %v483_v45 = vpop.f32.mrb[1].mxu0 }
  0xf8   :  { %v484_v46 = vadd.f32 %v483_v45, %v482_v42  ;;  %v511_v47 = vpop.f32.mrb[1].mxu1  ;;  %v485_v48 = vpop.f32.mrb[2].mxu0 }
  0xf9   :  { %v512_v49 = vadd.f32 %v511_v47, %v510_v43  ;;  %v513_v50 = vpop.f32.mrb[2].mxu1  ;;  %v486_v51 = vpop.f32.mrb[3].mxu0 }
  0xfa   :  { %v353_v52 = vadd.f32 %v484_v46, %v425_v44  ;;  %v487_v53 = vadd.f32 %v486_v51, %v485_v48  ;;  %v514_v54 = vpop.f32.mrb[3].mxu1 }
  0xfb   :  { %v515_v55 = vadd.f32 %v514_v54, %v513_v50 }
  0xfc   :  { %v401_v56 = vadd.f32 %v512_v49, %v353_v52  ;;  %v356_v57 = vadd.f32 %v487_v53, %v425_v44 }
  0xfe   :  { %v414_v58 = vmax.f32 %v401_v56, 0.0  ;;  %v404_v59 = vadd.f32 %v515_v55, %v356_v57  ;;  %v488_v60 = vpop.f32.mrb[4].mxu0 }
  0xff   :  { %v516_v61 = vpop.f32.mrb[4].mxu1  ;;  %v489_v62 = vpop.f32.mrb[5].mxu0 }
 0x100   :  { %418 = vst.msk [vmem:[%s716_s3] sm:$0xff] %vm417_vm0, %v414_v58  ;;  %v415_v63 = vmax.f32 %v404_v59, 0.0  ;;  %v490_v0 = vadd.f32 %v489_v62, %v488_v60  ;;  %v517_v1 = vpop.f32.mrb[5].mxu1  ;;  %v491_v2 = vpop.f32.mrb[6].mxu0 }
 0x101   :  { %v518_v3 = vadd.f32 %v517_v1, %v516_v61  ;;  %v519_v4 = vpop.f32.mrb[6].mxu1  ;;  %v492_v5 = vpop.f32.mrb[7].mxu0 }
 0x102   :  { %419 = vst.msk [vmem:[%s716_s3 + $0x8] sm:$0xff] %vm417_vm0, %v415_v63  ;;  %v361_v6 = vadd.f32 %v490_v0, %v425_v44  ;;  %v520_v7 = vpop.f32.mrb[7].mxu1 }
 0x104   :  { %v409_v8 = vadd.f32 %v518_v3, %v361_v6 }
 0x106   :  { %v416_v9 = vmax.f32 %v409_v8, 0.0 }
 0x108   :  { %420 = vst.msk [vmem:[%s716_s3 + $0x10] sm:$0xff] %vm417_vm0, %v416_v9 }

// kernel: fwd.14
= control target key start
LH: loop header
LB: loop body
LE: loop exit
PB: predicated region body
PF: predicated region fallthrough
CT: control target
= control target key end

     0   :  { %vm125_vm0 = vcmask 523264   ;;  %s327_s1 = inlined_call_operand.vmem [shape: f32[256,64], index: 1, kind: input, shape index: {}]   ;;  %s328_s0 = inlined_call_operand.vmem [shape: f32[8,256], index: 0, kind: input, shape index: {}]   ;;  %s329_s2 = inlined_call_operand.vmem [shape: f32[1,64], index: 2, kind: input, shape index: {}]   ;;  %s330_s3 = inlined_call_operand.vmem [shape: f32[8,64], index: 3, kind: output, shape index: {}]  }
   0x1   :  { %v32_v0 = vld [vmem:[%s327_s1 + $0x80] sm:$0xff]  ;;  %v33_v1 = vld [vmem:[%s327_s1 + $0x88] sm:$0xff]  ;;  %v34_v5 = vld [vmem:[%s327_s1 + $0x90] sm:$0xff] }
   0x2   :  { %v16_v2 = vld [vmem:[%s327_s1] sm:$0xff]  ;;  %v167_v3 = vpack.c.bf16 %v33_v1, %v32_v0  ;;  %v17_v4 = vld [vmem:[%s327_s1 + $0x8] sm:$0xff]  ;;  %v35_v6 = vld [vmem:[%s327_s1 + $0x98] sm:$0xff] }
   0x3   :  { %v169_v7 = vpack.c.bf16 %v17_v4, %v16_v2  ;;  %v171_v8 = vpack.c.bf16 %v35_v6, %v34_v5  ;;  %v18_v9 = vld [vmem:[%s327_s1 + $0x10] sm:$0xff]  ;;  %v19_v10 = vld [vmem:[%s327_s1 + $0x18] sm:$0xff]  ;;  %v36_v11 = vld [vmem:[%s327_s1 + $0xa0] sm:$0xff] }
   0x4   :  { %168 = vmatprep.subr.bf16.mxu0 %v167_v3  ;;  %v37_v12 = vld [vmem:[%s327_s1 + $0xa8] sm:$0xff]  ;;  %v173_v13 = vpack.c.bf16 %v19_v10, %v18_v9  ;;  %v20_v15 = vld [vmem:[%s327_s1 + $0x20] sm:$0xff]  ;;  %v38_v17 = vld [vmem:[%s327_s1 + $0xb0] sm:$0xff] }
   0x5   :  { %170 = vmatpush3.bf16.msra.mxu0 %v169_v7  ;;  %v175_v14 = vpack.c.bf16 %v37_v12, %v36_v11  ;;  %v21_v16 = vld [vmem:[%s327_s1 + $0x28] sm:$0xff]  ;;  %v39_v18 = vld [vmem:[%s327_s1 + $0xb8] sm:$0xff]  ;;  %v22_v21 = vld [vmem:[%s327_s1 + $0x30] sm:$0xff] }
   0x6   :  { %172 = vmatprep.subr.bf16.mxu0 %v171_v8  ;;  %v177_v19 = vpack.c.bf16 %v21_v16, %v20_v15  ;;  %v179_v20 = vpack.c.bf16 %v39_v18, %v38_v17  ;;  %v23_v22 = vld [vmem:[%s327_s1 + $0x38] sm:$0xff]  ;;  %v40_v23 = vld [vmem:[%s327_s1 + $0xc0] sm:$0xff]  ;;  %v41_v24 = vld [vmem:[%s327_s1 + $0xc8] sm:$0xff] }
   0x7   :  { %v15_v25 = vld [vmem:[%s328_s0 + $0x8] sm:$0xff]  ;;  %v181_v26 = vpack.c.bf16 %v23_v22, %v22_v21  ;;  %v183_v27 = vpack.c.bf16 %v41_v24, %v40_v23  ;;  %v24_v28 = vld [vmem:[%s327_s1 + $0x40] sm:$0xff]  ;;  %v42_v30 = vld [vmem:[%s327_s1 + $0xd0] sm:$0xff] }
   0x8   :  { %119 = vmatprep.mubr.f32.mxu0 %v15_v25  ;;  %v25_v29 = vld [vmem:[%s327_s1 + $0x48] sm:$0xff]  ;;  %v43_v31 = vld [vmem:[%s327_s1 + $0xd8] sm:$0xff]  ;;  %v26_v34 = vld [vmem:[%s327_s1 + $0x50] sm:$0xff] }
   0x9   :  { %174 = vmatpush3.bf16.msra.mxu0 %v173_v13  ;;  %v185_v32 = vpack.c.bf16 %v25_v29, %v24_v28  ;;  %v187_v33 = vpack.c.bf16 %v43_v31, %v42_v30  ;;  %v27_v35 = vld [vmem:[%s327_s1 + $0x58] sm:$0xff]  ;;  %v44_v36 = vld [vmem:[%s327_s1 + $0xe0] sm:$0xff]  ;;  %v45_v37 = vld [vmem:[%s327_s1 + $0xe8] sm:$0xff] }
   0xa   :  { %176 = vmatprep.subr.bf16.mxu0 %v175_v14  ;;  %v189_v38 = vpack.c.bf16 %v27_v35, %v26_v34  ;;  %v191_v39 = vpack.c.bf16 %v45_v37, %v44_v36  ;;  %v28_v40 = vld [vmem:[%s327_s1 + $0x60] sm:$0xff]  ;;  %v29_v41 = vld [vmem:[%s327_s1 + $0x68] sm:$0xff]  ;;  %v46_v42 = vld [vmem:[%s327_s1 + $0xf0] sm:$0xff] }
   0xb   :  { %v47_v43 = vld [vmem:[%s327_s1 + $0xf8] sm:$0xff]  ;;  %v193_v44 = vpack.c.bf16 %v29_v41, %v28_v40  ;;  %v30_v46 = vld [vmem:[%s327_s1 + $0x70] sm:$0xff]  ;;  %v14_v49 = vld [vmem:[%s328_s0] sm:$0xff] }
   0xc   :  { %v195_v45 = vpack.c.bf16 %v47_v43, %v46_v42  ;;  %v31_v47 = vld [vmem:[%s327_s1 + $0x78] sm:$0xff]  ;;  %v131_v51 = vld [vmem:[%s329_s2] ss:$0 sm:$0xff] }
   0xd   :  { %178 = vmatpush3.bf16.msra.mxu0 %v177_v19  ;;  %v197_v48 = vpack.c.bf16 %v31_v47, %v30_v46 }
   0xe   :  { %180 = vmatprep.subr.bf16.mxu0 %v179_v20 }
  0x11   :  { %182 = vmatpush3.bf16.msra.mxu0 %v181_v26 }
  0x12   :  { %184 = vmatprep.subr.bf16.mxu0 %v183_v27 }
  0x15   :  { %186 = vmatpush3.bf16.msra.mxu0 %v185_v32 }
  0x16   :  { %188 = vmatprep.subr.bf16.mxu0 %v187_v33 }
  0x19   :  { %190 = vmatpush3.bf16.msra.mxu0 %v189_v38 }
  0x1a   :  { %192 = vmatprep.subr.bf16.mxu0 %v191_v39 }
  0x1d   :  { %194 = vmatpush3.bf16.msra.mxu0 %v193_v44 }
  0x1e   :  { %196 = vmatprep.subr.bf16.mxu0 %v195_v45 }
  0x21   :  { %198 = vmatpush3.bf16.msra.mxu0 %v197_v48 }
  0x24   :  { %120 = vmatmul.mubr.f32.vlgmr.msra.gmra.mrb[0].mxu0 %v14_v49 }
  0xf7   :  { %v164_v50 = vpop.f32.mrb[0].mxu0 }
  0xf8   :  { %v165_v52 = vpop.f32.mrb[1].mxu0 }
  0xf9   :  { %v166_v53 = vadd.f32 %v165_v52, %v164_v50 }
  0xfb   :  { %v122_v54 = vadd.f32 %v166_v53, %v131_v51 }
  0xfd   :  { %126 = vst.msk [vmem:[%s330_s3] sm:$0xff] %vm125_vm0, %v122_v54 }

// kernel: fwd.15
= control target key start
LH: loop header
LB: loop body
LE: loop exit
PB: predicated region body
PF: predicated region fallthrough
CT: control target
= control target key end

     0   :  { %vm27_vm0 = vcmask 1044480   ;;  %vm23_vm1 = vcmask 39936   ;;  %v119_v0 = vmov 0.0   ;;  %vm120_vm2 = vmmov 0   ;;  %s153_s1 = inlined_call_operand.vmem [shape: f32[5,64], index: 1, kind: input, shape index: {}]   ;;  %s154_s0 = inlined_call_operand.vmem [shape: f32[8,5], index: 0, kind: input, shape index: {}]   ;;  %s155_s2 = inlined_call_operand.vmem [shape: f32[1,64], index: 2, kind: input, shape index: {}]   ;;  %s156_s3 = inlined_call_operand.vmem [shape: f32[8,64], index: 3, kind: output, shape index: {}]  }
   0x1   :  { %112 = vmatprep.subr.mxu0 %v119_v0  ;;  %v15_v1 = vld [vmem:[%s153_s1] sm:$0x1f]  ;;  %114 = vmatprep.mubr.msk.f32.mxu0 %vm120_vm2, %v119_v0  ;;  %vm101_vm3 = vcmask 523264  }
   0x2   :  { %v14_v2 = vld [vmem:[%s154_s0] sm:$0xff]  ;;  %113 = vmatpush3.msk.msra.mxu0 %vm27_vm0, %v15_v1 }
   0x3   :  { %115 = vmatmul.mubr.msk.f32.vlgmr.msra.gmra.mrb[0].mxu0 %vm23_vm1, %v14_v2  ;;  %v107_v3 = vld [vmem:[%s155_s2] ss:$0 sm:$0xff] }
  0xd6   :  { %v97_v4 = vpop.f32.mrb[0].mxu0 }
  0xd7   :  { %v98_v5 = vadd.f32 %v107_v3, %v97_v4  ;;  %v116_v6 = vpop.f32.mrb[1].mxu0 }
  0xd9   :  { %102 = vst.msk [vmem:[%s156_s3] sm:$0xff] %vm101_vm3, %v98_v5 }

// kernel: fwd.16
= control target key start
LH: loop header
LB: loop body
LE: loop exit
PB: predicated region body
PF: predicated region fallthrough
CT: control target
= control target key end

     0   :  { %v158_v3 = vmov 0.0   ;;  %vm51_vm0 = vcmask 785408   ;;  %v41_v38 = vlaneseq  ;;  %s263_s1 = inlined_call_operand.vmem [shape: f32[96,256], index: 1, kind: input, shape index: {}]   ;;  %s264_s0 = inlined_call_operand.vmem [shape: f32[8,96], index: 0, kind: input, shape index: {}]   ;;  %s265_s2 = inlined_call_operand.vmem [shape: f32[1,256], index: 2, kind: input, shape index: {}]   ;;  %s266_s3 = inlined_call_operand.vmem [shape: f32[8,256], index: 3, kind: output, shape index: {}]  }
   0x1   :  { %v16_v0 = vld [vmem:[%s263_s1 + $0x8] sm:$0xff]  ;;  %v18_v1 = vld [vmem:[%s263_s1 + $0x18] sm:$0xff]  ;;  %v15_v2 = vld [vmem:[%s263_s1] sm:$0xff]  ;;  %119 = vmatprep.mubr.f32.mxu0 %v158_v3 }
   0x2   :  { %v133_v4 = vpack.c.bf16 %v18_v1, %v16_v0  ;;  %v17_v5 = vld [vmem:[%s263_s1 + $0x10] sm:$0xff]  ;;  %v20_v6 = vld [vmem:[%s263_s1 + $0x28] sm:$0xff]  ;;  %v22_v7 = vld [vmem:[%s263_s1 + $0x38] sm:$0xff]  ;;  %v42_v39 = vshrl.u32 %v41_v38, 7 }
   0x3   :  { %v135_v8 = vpack.c.bf16 %v17_v5, %v15_v2  ;;  %v137_v9 = vpack.c.bf16 %v22_v7, %v20_v6  ;;  %v19_v10 = vld [vmem:[%s263_s1 + $0x20] sm:$0xff]  ;;  %v21_v11 = vld [vmem:[%s263_s1 + $0x30] sm:$0xff]  ;;  %v24_v12 = vld [vmem:[%s263_s1 + $0x48] sm:$0xff] }
   0x4   :  { %134 = vmatprep.subr.bf16.mxu0 %v133_v4  ;;  %v26_v13 = vld [vmem:[%s263_s1 + $0x58] sm:$0xff]  ;;  %v139_v14 = vpack.c.bf16 %v21_v11, %v19_v10  ;;  %v23_v16 = vld [vmem:[%s263_s1 + $0x40] sm:$0xff]  ;;  %v25_v17 = vld [vmem:[%s263_s1 + $0x50] sm:$0xff]  ;;  %v43_v40 = vsub.s32 0, %v42_v39  ;;  %v47_v42 = vsub.s32 1, %v42_v39 }
   0x5   :  { %136 = vmatpush1.bf16.msra.mxu0 %v135_v8  ;;  %v141_v15 = vpack.c.bf16 %v26_v13, %v24_v12  ;;  %v28_v18 = vld [vmem:[%s263_s1 + $0x68] sm:$0xff]  ;;  %v30_v19 = vld [vmem:[%s263_s1 + $0x78] sm:$0xff]  ;;  %v143_v20 = vpack.c.bf16 %v25_v17, %v23_v16  ;;  %v27_v22 = vld [vmem:[%s263_s1 + $0x60] sm:$0xff] }
   0x6   :  { %138 = vmatprep.subr.bf16.mxu0 %v137_v9  ;;  %v145_v21 = vpack.c.bf16 %v30_v19, %v28_v18  ;;  %v29_v23 = vld [vmem:[%s263_s1 + $0x70] sm:$0xff]  ;;  %v32_v24 = vld [vmem:[%s263_s1 + $0x88] sm:$0xff]  ;;  %v34_v25 = vld [vmem:[%s263_s1 + $0x98] sm:$0xff] }
   0x7   :  { %v147_v26 = vpack.c.bf16 %v29_v23, %v27_v22  ;;  %v149_v27 = vpack.c.bf16 %v34_v25, %v32_v24  ;;  %v31_v28 = vld [vmem:[%s263_s1 + $0x80] sm:$0xff]  ;;  %v33_v29 = vld [vmem:[%s263_s1 + $0x90] sm:$0xff]  ;;  %v36_v30 = vld [vmem:[%s263_s1 + $0xa8] sm:$0xff] }
   0x8   :  { %v38_v31 = vld [vmem:[%s263_s1 + $0xb8] sm:$0xff]  ;;  %v151_v32 = vpack.c.bf16 %v33_v29, %v31_v28  ;;  %v35_v34 = vld [vmem:[%s263_s1 + $0xa0] sm:$0xff]  ;;  %v37_v35 = vld [vmem:[%s263_s1 + $0xb0] sm:$0xff] }
   0x9   :  { %140 = vmatpush1.bf16.msra.mxu0 %v139_v14  ;;  %v153_v33 = vpack.c.bf16 %v38_v31, %v36_v30  ;;  %v155_v36 = vpack.c.bf16 %v37_v35, %v35_v34  ;;  %v14_v37 = vld [vmem:[%s264_s0] sm:$0xff] }
   0xa   :  { %142 = vmatprep.subr.bf16.mxu0 %v141_v15  ;;  %v39_v41 = vld [vmem:[%s265_s2] sm:$0x3] }
   0xb   :  { %v44_v43 = vrot.slane %v39_v41, %v43_v40  ;;  %v48_v44 = vrot.slane %v39_v41, %v47_v42 }
   0xd   :  { %144 = vmatpush1.bf16.msra.mxu0 %v143_v20 }
   0xe   :  { %146 = vmatprep.subr.bf16.mxu0 %v145_v21 }
  0x11   :  { %148 = vmatpush1.bf16.msra.mxu0 %v147_v26 }
  0x12   :  { %150 = vmatprep.subr.bf16.mxu0 %v149_v27 }
  0x15   :  { %152 = vmatpush1.bf16.msra.mxu0 %v151_v32 }
  0x16   :  { %154 = vmatprep.subr.bf16.mxu0 %v153_v33 }
  0x19   :  { %156 = vmatpush1.bf16.msra.mxu0 %v155_v36 }
  0x1c   :  { %132 = vmatmul.mubr.msk.f32.vlgmr.msra.gmra.mrb[0].mxu0 %vm51_vm0, %v14_v37 }
  0xef   :  { %v121_v45 = vpop.f32.mrb[0].mxu0 }
  0xf0   :  { %v122_v46 = vadd.f32 %v121_v45, %v44_v43  ;;  %v123_v47 = vpop.f32.mrb[1].mxu0 }
  0xf1   :  { %v124_v48 = vadd.f32 %v123_v47, %v48_v44 }
  0xf2   :  { %126 = vst [vmem:[%s266_s3] sm:$0xff] %v122_v46 }
  0xf3   :  { %127 = vst [vmem:[%s266_s3 + $0x8] sm:$0xff] %v124_v48 }

// kernel: fwd.17
= control target key start
LH: loop header
LB: loop body
LE: loop exit
PB: predicated region body
PF: predicated region fallthrough
CT: control target
= control target key end

     0   :  { %14 = vsyncpa [#allocation5], 0  ;;  %s1358_s0 = inlined_call_operand.vmem [shape: f32[3,2,256], index: 0, kind: input, shape index: {}]   ;;  %s1359_s1 = inlined_call_operand.vmem [shape: f32[2,2,64], index: 1, kind: input, shape index: {}]   ;;  %s1360_s2 = inlined_call_operand.vmem [shape: f32[2,2,64], index: 2, kind: input, shape index: {}]   ;;  %s1361_s3 = inlined_call_operand.vmem [shape: f32[2,64,256], index: 3, kind: input, shape index: {}]   ;;  %s1362_s4 = inlined_call_operand.vmem [shape: f32[1,64,256], index: 4, kind: input, shape index: {}]   ;;  %s1363_s5 = inlined_call_operand.vmem [shape: f32[1,1,256], index: 5, kind: input, shape index: {}]   ;;  %s1364_s6 = inlined_call_operand.vmem [shape: f32[3,2,64], index: 6, kind: output, shape index: {0}]   ;;  %s1365_s7 = inlined_call_operand.hbm [shape: f32[2,2,64], index: 7, kind: output, shape index: {1}]   ;;  %s1366_s8 = inlined_call_operand.hbm [shape: f32[2,2,64], index: 8, kind: output, shape index: {2}]  }
   0x1   :  { %15 = vsyncpa [#allocation7], 0  ;;  %s1093_s27 = smov 0  }
   0x2 LB: > { %s1099_s28 = sadd.s32 4294967295, %s1039_s27   ;;  %p833_p0 = scmp.ge.s32.totalorder %s1039_s27, 1  ;;  %s1039_s27 = sphi %s1093_s27, %s21_s27  }
   0x3   : > { %p259_p1 = scmp.lt.s32.totalorder %s1039_s27, 4 }
   0x5   : > { %p260_p2 = pnand %p833_p0, %p259_p1 }
   0x6   : > { %p292_p3 = scmp.lt.s32.totalorder (!%p260_p2), %s1099_s28, 2  ;;  %p837_p4 = scmp.ne.s32.totalorder (!%p260_p2), %s1099_s28, 0 }
   0x7   : > { %263 = sbr.rel (%p260_p2) target bundleno = 1096 (0x448), region = 44 }
   0xe   : > { %s293_s29 = scalar_select %p292_p3, %s1099_s28, 2 }
   0xf   : > { %304 = sbr.rel (%p837_p4) target bundleno = 22 (0x16), region = 48  ;;  %v305_v0 = vld [vmem:[%s1359_s1] sm:$0x3] (!%p837_p4)  ;;  %vm307_vm0 = vcmask (!%p837_p4), 517120   ;;  %v306_v1 = vld [vmem:[%s1359_s1 + $0x2] sm:$0x3] (!%p837_p4) }
  0x10   : > { %s869_s30 = sshll.u32 %s293_s29, 2  ;;  %s836_s9 = sshll.u32 %s293_s29, 1  ;;  %308 = vst.msk [vmem:[#allocation2] sm:$0x3] (!%p837_p4), %vm307_vm0, %v305_v0  ;;  %309 = vst.msk [vmem:[#allocation2 + $0x2] sm:$0x3] (!%p837_p4), %vm307_vm0, %v306_v1 }
  0x11   : > { %s1108_s12 = scalar_lea.vmem %s1358_s0, %s869_s30  ;;  %s1113_s15 = scalar_lea.vmem %s1364_s6, %s836_s9  ;;  %v310_v2 = vld [vmem:[%s1360_s2] sm:$0x3] (!%p837_p4)  ;;  %v311_v3 = vld [vmem:[%s1360_s2 + $0x2] sm:$0x3] (!%p837_p4) }
  0x12   : > { %312 = vst.msk [vmem:[#allocation3] sm:$0x3] (!%p837_p4), %vm307_vm0, %v310_v2  ;;  %313 = vst.msk [vmem:[#allocation3 + $0x2] sm:$0x3] (!%p837_p4), %vm307_vm0, %v311_v3 }
  0x16 PF: > { %v318_v4 = vld [vmem:[%s1361_s3 + $0x8] sm:$0xff]  ;;  %v320_v5 = vld [vmem:[%s1361_s3 + $0x18] sm:$0xff]  ;;  %v317_v6 = vld [vmem:[%s1361_s3] sm:$0xff]  ;;  %v1041_v11 = vmov 0.0   ;;  %s1042_s16 = smov 64   ;;  %vm333_vm1 = vcmask 523264   ;;  %v414_v33 = vlaneseq }
  0x17   : > { %v870_v7 = vpack.c.bf16 %v320_v5, %v318_v4  ;;  %v319_v8 = vld [vmem:[%s1361_s3 + $0x10] sm:$0xff]  ;;  %v322_v9 = vld [vmem:[%s1361_s3 + $0x28] sm:$0xff]  ;;  %v324_v10 = vld [vmem:[%s1361_s3 + $0x38] sm:$0xff]  ;;  %401 = vmatprep.mubr.f32.mxu0 %v1041_v11  ;;  %573 = vmatprep.mubr.f32.mxu1 %v1041_v11  ;;  %v1043_v31 = vmov 1983009808   ;;  %vm464_vm2 = vcmask 517120  }
  0x18   : > { %v872_v12 = vpack.c.bf16 %v319_v8, %v317_v6  ;;  %v874_v13 = vpack.c.bf16 %v324_v10, %v322_v9  ;;  %v321_v14 = vld [vmem:[%s1361_s3 + $0x20] sm:$0xff]  ;;  %v323_v15 = vld [vmem:[%s1361_s3 + $0x30] sm:$0xff]  ;;  %v326_v16 = vld [vmem:[%s1361_s3 + $0x48] sm:$0xff]  ;;  %v412_v32 = vunpack.c.l.s4 %v1043_v31  ;;  %v1180_v35 = vshrl.u32 %v414_v33, 7  ;;  %p862_p5 = scmp.ne.s32.totalorder %s1099_s28, 2 }
  0x19   : > { %871 = vmatprep.subr.bf16.mxu0 %v870_v7  ;;  %v328_v17 = vld [vmem:[%s1361_s3 + $0x58] sm:$0xff]  ;;  %v876_v18 = vpack.c.bf16 %v323_v15, %v321_v14  ;;  %v325_v20 = vld [vmem:[%s1361_s3 + $0x40] sm:$0xff]  ;;  %v327_v21 = vld [vmem:[%s1361_s3 + $0x50] sm:$0xff] }
  0x1a   : > { %873 = vmatpush1.bf16.msra.mxu0 %v872_v12  ;;  %v878_v19 = vpack.c.bf16 %v328_v17, %v326_v16  ;;  %v330_v22 = vld [vmem:[%s1361_s3 + $0x68] sm:$0xff]  ;;  %v332_v23 = vld [vmem:[%s1361_s3 + $0x78] sm:$0xff]  ;;  %v841_v24 = vld.sshfl [vmem:[#allocation3] sm:$0x3 pattern:$0x76325410]  ;;  %v880_v25 = vpack.c.bf16 %v327_v21, %v325_v20  ;;  %v413_v34 = vunpack.c.0.s8 %v412_v32 }
  0x1b   : > { %875 = vmatprep.subr.bf16.mxu0 %v874_v13  ;;  %448 = vrot.lane.b32.xlu0 %v841_v24, %s1042_s16  ;;  %v882_v26 = vpack.c.bf16 %v332_v23, %v330_v22  ;;  %v329_v27 = vld [vmem:[%s1361_s3 + $0x60] sm:$0xff]  ;;  %v331_v28 = vld [vmem:[%s1361_s3 + $0x70] sm:$0xff]  ;;  %v479_v51 = vld [vmem:[%s1362_s4 + $0x8] sm:$0xff] }
  0x1c   : > { %v884_v29 = vpack.c.bf16 %v331_v28, %v329_v27  ;;  %v315_v30 = vld [vmem:[#allocation2] sm:$0x3]  ;;  %v416_v37 = vsub.s32 %v413_v34, %v1180_v35  ;;  %v583_v50 = vld [vmem:[#allocation3 + $0x2] sm:$0x3]  ;;  %v481_v52 = vld [vmem:[%s1362_s4 + $0x18] sm:$0xff] }
  0x1d   : > { %v314_v40 = vld [vmem:[%s1108_s12] sm:$0xf]  ;;  %v886_v54 = vpack.c.bf16 %v481_v52, %v479_v51  ;;  %v480_v55 = vld [vmem:[%s1362_s4 + $0x10] sm:$0xff]  ;;  %v483_v56 = vld [vmem:[%s1362_s4 + $0x28] sm:$0xff] }
  0x1e   : > { %877 = vmatpush1.bf16.msra.mxu0 %v876_v18  ;;  %v478_v53 = vld [vmem:[%s1362_s4] sm:$0xff]  ;;  %v485_v57 = vld [vmem:[%s1362_s4 + $0x38] sm:$0xff]  ;;  %v484_v61 = vld [vmem:[%s1362_s4 + $0x30] sm:$0xff] }
  0x1f   : > { %879 = vmatprep.subr.bf16.mxu0 %v878_v19  ;;  %v888_v58 = vpack.c.bf16 %v480_v55, %v478_v53  ;;  %v890_v59 = vpack.c.bf16 %v485_v57, %v483_v56  ;;  %v482_v60 = vld [vmem:[%s1362_s4 + $0x20] sm:$0xff]  ;;  %887 = vmatprep.subr.bf16.mxu1 %v886_v54  ;;  %v487_v63 = vld [vmem:[%s1362_s4 + $0x48] sm:$0xff]  ;;  %v489_v0 = vld [vmem:[%s1362_s4 + $0x58] sm:$0xff]  ;;  %v498_v53 = vsub.s32 0, %v1180_v35 }
  0x20   : > { %v892_v62 = vpack.c.bf16 %v484_v61, %v482_v60  ;;  %v486_v1 = vld [vmem:[%s1362_s4 + $0x40] sm:$0xff]  ;;  %v894_v2 = vpack.c.bf16 %v489_v0, %v487_v63  ;;  %v488_v3 = vld [vmem:[%s1362_s4 + $0x50] sm:$0xff]  ;;  %v491_v4 = vld [vmem:[%s1362_s4 + $0x68] sm:$0xff]  ;;  %v502_v60 = vsub.s32 1, %v1180_v35 }
  0x21   : > { %889 = vmatpush1.bf16.msra.mxu1 %v888_v58  ;;  %v493_v5 = vld [vmem:[%s1362_s4 + $0x78] sm:$0xff]  ;;  %v896_v6 = vpack.c.bf16 %v488_v3, %v486_v1  ;;  %v490_v8 = vld [vmem:[%s1362_s4 + $0x60] sm:$0xff]  ;;  %v492_v9 = vld [vmem:[%s1362_s4 + $0x70] sm:$0xff] }
  0x22   : > { %881 = vmatpush1.bf16.msra.mxu0 %v880_v25  ;;  %891 = vmatprep.subr.bf16.mxu1 %v890_v59  ;;  %v898_v7 = vpack.c.bf16 %v493_v5, %v491_v4  ;;  %v900_v12 = vpack.c.bf16 %v492_v9, %v490_v8  ;;  %v844_v15 = vld [vmem:[%s1361_s3 + $0x88] sm:$0xff]  ;;  %v846_v16 = vld [vmem:[%s1361_s3 + $0x98] sm:$0xff]  ;;  %v843_v28 = vld [vmem:[%s1361_s3 + $0x80] sm:$0xff] }
  0x23   : > { %883 = vmatprep.subr.bf16.mxu0 %v882_v26  ;;  %v902_v18 = vpack.c.bf16 %v846_v16, %v844_v15  ;;  %v850_v31 = vld [vmem:[%s1361_s3 + $0xb8] sm:$0xff]  ;;  %v581_v52 = vld [vmem:[#allocation2 + $0x2] sm:$0x3]  ;;  %v494_v54 = vld [vmem:[%s1363_s5] sm:$0x3] }
  0x24   : > { %v499_v55 = vrot.slane %v494_v54, %v498_v53  ;;  %v503_v61 = vrot.slane %v494_v54, %v502_v60 }
  0x25   : > { %893 = vmatpush1.bf16.msra.mxu1 %v892_v62 }
  0x26   : > { %885 = vmatpush1.bf16.msra.mxu0 %v884_v29  ;;  %895 = vmatprep.subr.bf16.mxu1 %v894_v2  ;;  %v845_v29 = vld [vmem:[%s1361_s3 + $0x90] sm:$0xff] }
  0x27   : > { %v904_v34 = vpack.c.bf16 %v845_v29, %v843_v28 }
  0x29   : > { %838 = vmatmul.mubr.msk.f32.vlgmr.msra.gmra.mrb[0].mxu0 %vm333_vm1, %v315_v30  ;;  %897 = vmatpush1.bf16.msra.mxu1 %v896_v6  ;;  %v848_v30 = vld [vmem:[%s1361_s3 + $0xa8] sm:$0xff] }
  0x2a   : > { %899 = vmatprep.subr.bf16.mxu1 %v898_v7 }
  0x2d   : > { %901 = vmatpush1.bf16.msra.mxu1 %v900_v12 }
  0x2e   : > { %903 = vmatprep.subr.bf16.mxu1 %v902_v18 }
  0x8d   : > { %v449_v10 = vpop.permute.xlu0 %448 }
  0xfc   : > { %v403_v36 = vpop.f32.mrb[0].mxu0 }
  0xfd   : > { %v405_v38 = vpop.f32.mrb[1].mxu0 }
  0xfe   : > { %v410_v39 = vcombine.low %v403_v36, %v405_v38  ;;  %v847_v38 = vld [vmem:[%s1361_s3 + $0xa0] sm:$0xff] }
 0x100   : > { %v417_v41 = vrot.slane %v410_v39, %v416_v37  ;;  %v849_v39 = vld [vmem:[%s1361_s3 + $0xb0] sm:$0xff] }
 0x102   : > { %v419_v42 = vadd.f32 %v417_v41, %v314_v40  ;;  %v852_v40 = vld [vmem:[%s1361_s3 + $0xc8] sm:$0xff]  ;;  %v854_v41 = vld [vmem:[%s1361_s3 + $0xd8] sm:$0xff] }
 0x104   : > { %430 = vrot.lane.b32.xlu1 %v419_v42, %s1042_s16  ;;  %v839_v43 = vmul.f32 -1.442695, %v419_v42  ;;  %v427_v44 = vrot.slane %v419_v42, 2  ;;  %v908_v42 = vpack.c.bf16 %v849_v39, %v847_v38 }
 0x106   : > { %949 = vpow2.f32 %v839_v43  ;;  %v910_v43 = vpack.c.bf16 %v854_v41, %v852_v40 }
 0x107   : > { %951 = vtanh.f32 %v427_v44  ;;  %v851_v44 = vld [vmem:[%s1361_s3 + $0xc0] sm:$0xff] }
 0x110   : > { %v950_v45 = vpop.eup %949 }
 0x111   : > { %v423_v46 = vadd.f32 1.0, %v950_v45  ;;  %v952_v47 = vpop.eup %951  ;;  %v853_v45 = vld [vmem:[%s1361_s3 + $0xd0] sm:$0xff] }
 0x113   : > { %953 = vrcp.f32 %v423_v46  ;;  %v856_v46 = vld [vmem:[%s1361_s3 + $0xe8] sm:$0xff] }
 0x11d   : > { %v954_v48 = vpop.eup %953 }
 0x11e   : > { %v452_v49 = vmul.f32 %v954_v48, %v952_v47  ;;  %v451_v13 = vmul.f32 %v954_v48, %v449_v10  ;;  %v858_v47 = vld [vmem:[%s1361_s3 + $0xf8] sm:$0xff] }
 0x11f   : > { %v914_v48 = vpack.c.bf16 %v858_v47, %v856_v46 }
 0x120   : > { %454 = vrot.lane.b32.xlu0 %v452_v49, %s1042_s16  ;;  %v855_v49 = vld [vmem:[%s1361_s3 + $0xe0] sm:$0xff] }
 0x124   : > { %691 = vrot.lane.b32.xlu0 %v583_v50, %s1042_s16  ;;  %v857_v50 = vld [vmem:[%s1361_s3 + $0xf0] sm:$0xff] }
 0x125   : > { %v916_v51 = vpack.c.bf16 %v857_v50, %v855_v49 }
 0x176   : > { %v431_v21 = vpop.permute.xlu1 %430 }
 0x177   : > { %v432_v22 = vrot.slane %v431_v21, 2 }
 0x179   : > { %v840_v23 = vmul.f32 -1.442695, %v432_v22 }
 0x192   : > { %v455_v14 = vpop.permute.xlu0 %454 }
 0x193   : > { %v457_v17 = vadd.f32 %v455_v14, %v451_v13 }
 0x195   : > { %955 = vtanh.f32 %v457_v17  ;;  %v473_v19 = vrot.slane %v457_v17, %v416_v37  ;;  %v906_v37 = vpack.c.bf16 %v850_v31, %v848_v30 }
 0x196   : > { %957 = vpow2.f32 %v840_v23  ;;  %v1243_v25 = vpop.permute.xlu0 %691 }
 0x197   : > { %474 = vrot.lane.b32.xlu0 %v473_v19, %s1042_s16 }
 0x19f   : > { %v956_v20 = vpop.eup %955 }
 0x1a0   : > { %460 = vrot.lane.b32.xlu1 %v956_v20, %s1042_s16  ;;  %v958_v24 = vpop.eup %957 }
 0x1a1   : > { %v437_v26 = vadd.f32 1.0, %v958_v24 }
 0x1a3   : > { %959 = vrcp.f32 %v437_v26 }
 0x1ad   : > { %v960_v32 = vpop.eup %959 }
 0x209   : > { %v475_v27 = vpop.permute.xlu0 %474 }
 0x20a   : > { %477 = vst.msk [vmem:[#allocation3] sm:$0x3] %vm464_vm2, %v475_v27 }
 0x211   : > { %v722_v17 = vld [vmem:[#allocation3] sm:$0x3] (!%p862_p5) }
 0x212   : > { %v461_v33 = vpop.permute.xlu1 %460  ;;  %724 = vst.msk [vmem:[#allocation6] sm:$0x3] (!%p862_p5), %vm464_vm2, %v722_v17 }
 0x213   : > { %v463_v36 = vmul.f32 %v960_v32, %v461_v33 }
 0x215   : > { %465 = vst.msk [vmem:[#allocation2] sm:$0x3] %vm464_vm2, %v463_v36  ;;  %842 = vmatmul.mubr.msk.f32.vlgmr.msra.gmra.mrb[0].mxu1 %vm333_vm1, %v463_v36 }
 0x216   : > { %905 = vmatpush1.bf16.msra.mxu1 %v904_v34  ;;  %668 = vmatprep.mubr.f32.mxu1 %v1041_v11  ;;  %v912_v11 = vpack.c.bf16 %v853_v45, %v851_v44 }
 0x217   : > { %907 = vmatprep.subr.bf16.mxu1 %v906_v37 }
 0x21a   : > { %909 = vmatpush1.bf16.msra.mxu1 %v908_v42 }
 0x21b   : > { %911 = vmatprep.subr.bf16.mxu1 %v910_v43 }
 0x21c   : > { %v718_v15 = vld [vmem:[#allocation2] sm:$0x3] (!%p862_p5) }
 0x21d   : > { %720 = vst.msk [vmem:[#allocation4] sm:$0x3] (!%p862_p5), %vm464_vm2, %v718_v15 }
 0x21e   : > { %913 = vmatpush1.bf16.msra.mxu1 %v912_v11 }
 0x21f   : > { %915 = vmatprep.subr.bf16.mxu1 %v914_v48 }
 0x222   : > { %917 = vmatpush1.bf16.msra.mxu1 %v916_v51 }
 0x225   : > { %859 = vmatmul.mubr.msk.f32.vlgmr.msra.gmra.mrb[0].mxu1 %vm333_vm1, %v581_v52 }
 0x2f8   : > { %v670_v56 = vpop.f32.mrb[0].mxu1 }
 0x2f9   : > { %v918_v57 = vadd.f32 %v670_v56, %v499_v55  ;;  %v672_v58 = vpop.f32.mrb[1].mxu1 }
 0x2fa   : > { %v919_v62 = vadd.f32 %v672_v58, %v503_v61 }
 0x2fb   : > { %v860_v59 = vmul.f32 -1.442695, %v918_v57 }
 0x2fc   : > { %v861_v4 = vmul.f32 -1.442695, %v919_v62 }
 0x2fd   : > { %961 = vpow2.f32 %v860_v59 }
 0x2fe   : > { %963 = vtanh.f32 %v919_v62 }
 0x307   : > { %v962_v63 = vpop.eup %961 }
 0x308   : > { %v680_v0 = vadd.f32 1.0, %v962_v63  ;;  %v964_v1 = vpop.eup %963 }
 0x30a   : > { %965 = vrcp.f32 %v680_v0 }
 0x30b   : > { %967 = vpow2.f32 %v861_v4 }
 0x314   : > { %v966_v2 = vpop.eup %965 }
 0x315   : > { %v695_v3 = vmul.f32 %v966_v2, %v964_v1  ;;  %v968_v5 = vpop.eup %967  ;;  %v694_v7 = vmul.f32 %v966_v2, %v1243_v25 }
 0x316   : > { %v687_v6 = vadd.f32 1.0, %v968_v5 }
 0x317   : > { %697 = vrot.lane.b32.xlu1 %v695_v3, %s1042_s16 }
 0x318   : > { %969 = vrcp.f32 %v687_v6 }
 0x322   : > { %v970_v9 = vpop.eup %969 }
 0x389   : > { %v698_v8 = vpop.permute.xlu1 %697 }
 0x38a   : > { %v700_v35 = vadd.f32 %v698_v8, %v694_v7 }
 0x38c   : > { %971 = vtanh.f32 %v700_v35  ;;  %709 = vrot.lane.b32.xlu0 %v700_v35, %s1042_s16 }
 0x396   : > { %v972_v10 = vpop.eup %971 }
 0x397   : > { %v702_v12 = vmul.f32 %v972_v10, %v970_v9 }
 0x399   : > { %704 = vrot.lane.b32.xlu1 %v702_v12, %s1042_s16 }
 0x3fe   : > { %v710_v13 = vpop.permute.xlu0 %709 }
 0x3ff   : > { %712 = vst.msk [vmem:[#allocation3 + $0x2] sm:$0x3] %vm464_vm2, %v710_v13 }
 0x406   : > { %717 = sbr.rel (%p862_p5) target bundleno = 1045 (0x415), region = 52  ;;  %v723_v18 = vld [vmem:[#allocation3 + $0x2] sm:$0x3] (!%p862_p5) }
 0x407   : > { %725 = vst.msk [vmem:[#allocation6 + $0x2] sm:$0x3] (!%p862_p5), %vm464_vm2, %v723_v18 }
 0x40b   : > { %v705_v14 = vpop.permute.xlu1 %704 }
 0x40c   : > { %707 = vst.msk [vmem:[#allocation2 + $0x2] sm:$0x3] %vm464_vm2, %v705_v14  ;;  %713 = vst.msk [vmem:[%s1113_s15] sm:$0x3] %vm464_vm2, %v705_v14 }
 0x413   : > { %v719_v16 = vld [vmem:[#allocation2 + $0x2] sm:$0x3] }
 0x414   : > { %721 = vst.msk [vmem:[#allocation4 + $0x2] sm:$0x3] %vm464_vm2, %v719_v16 }
 0x415 PF: > { %p930_p6 = scmp.eq.s32.totalorder %s1099_s28, 2  ;;  %s1044_s15 = smov [#allocation4]  }
 0x416   : > { %s739_s16 = sshll.u32 %s1044_s15, 4  ;;  %s740_s16 = int_to_ptr.vmem [resolvable:$true] %s739_s16 }
 0x417   : > { %s973_s13 = scalar_lea.vmem %s740_s16, 64  ;;  %p980_p10 = scmp.lt.s32.totalorder %s740_s16, %s740_s16 }
 0x418   : > { %p974_p7 = scmp.ne.s32.totalorder %s740_s16, %s973_s13  ;;  %p981_p11 = scmp.lt.s32.totalorder %s973_s13, %s973_s13 }
 0x41a   : > { %p975_p8 = pnand %p974_p7, %p930_p6  ;;  %p982_p12 = por %p981_p11, %p980_p10 }
 0x41c   : > { %p976_p9 = pneg %p975_p8 }
 0x41e   : > { %p983_p13 = pnand %p982_p12, %p976_p9 }
 0x420   : > { %986 = shalt.err (!%p983_p13)
}
 0x421   : > { %s987_s18 = scalar_lea.hbm %s1365_s7, 64 }
 0x422   : > { %p988_p0 = scmp.ne.s32.totalorder %s1365_s7, %s987_s18  ;;  %p993_p3 = scmp.lt.u32.totalorder %s987_s18, %s1365_s7 }
 0x424   : > { %p989_p1 = pnand %p988_p0, %p930_p6 }
 0x426   : > { %p990_p2 = pneg %p989_p1 }
 0x428   : > { %p995_p4 = pnand %p993_p3, %p990_p2 }
 0x42a   : > { %998 = shalt.err (!%p995_p4)
}
 0x42b   : > { %s1045_s12 = smov 32   ;;  %s1046_s23 = smov 2  }
 0x42c   : > { %923 = dma.vmem_to_hbm [thread:$0]  (%p930_p6), %s740_s16, 64, %s1365_s7, [#allocation5], %s1045_s12, %s1045_s12, %s1046_s23  }
 0x42d   : > { %s1047_s26 = smov [#allocation6]  }
 0x42e   : > { %s752_s29 = sshll.u32 %s1047_s26, 4  ;;  %s753_s29 = int_to_ptr.vmem [resolvable:$true] %s752_s29 }
 0x42f   : > { %s999_s30 = scalar_lea.vmem %s753_s29, 64  ;;  %p1006_p9 = scmp.lt.s32.totalorder %s753_s29, %s753_s29 }
 0x430   : > { %p1000_p5 = scmp.ne.s32.totalorder %s753_s29, %s999_s30  ;;  %p1007_p10 = scmp.lt.s32.totalorder %s999_s30, %s999_s30 }
 0x432   : > { %p1001_p7 = pnand %p1000_p5, %p930_p6  ;;  %p1008_p11 = por %p1007_p10, %p1006_p9 }
 0x434   : > { %p1002_p8 = pneg %p1001_p7 }
 0x436   : > { %p1009_p12 = pnand %p1008_p11, %p1002_p8 }
 0x438   : > { %1012 = shalt.err (!%p1009_p12)
}
 0x439   : > { %s1013_s11 = scalar_lea.hbm %s1366_s8, 64 }
 0x43a   : > { %p1014_p13 = scmp.ne.s32.totalorder %s1366_s8, %s1013_s11  ;;  %p1019_p2 = scmp.lt.u32.totalorder %s1013_s11, %s1366_s8 }
 0x43c   : > { %p1015_p0 = pnand %p1014_p13, %p930_p6 }
 0x43e   : > { %p1016_p1 = pneg %p1015_p0 }
 0x440   : > { %p1021_p3 = pnand %p1019_p2, %p1016_p1 }
 0x442   : > { %1024 = shalt.err (!%p1021_p3)
}
 0x443   : > { %925 = dma.vmem_to_hbm [thread:$0]  (%p930_p6), %s753_s29, 64, %s1366_s8, [#allocation7], %s1045_s12, %s1045_s12, %s1046_s23  }
 0x444   : > { %1030 = dma.done.wait (%p930_p6), [#allocation5], 64  }
 0x445   : > { %1032 = vsyncadd (%p930_p6), [#allocation5], 4294967232 }
 0x446   : > { %1034 = dma.done.wait (%p930_p6), [#allocation7], 64  }
 0x447   : > { %1036 = vsyncadd (%p930_p6), [#allocation7], 4294967232 }
 0x448 PF: > { %s21_s27 = sadd.s32 1, %s1039_s27  }
 0x449   : > { %p18_p4 = scmp.ge.s32.totalorder %s21_s27, 5  }
 0x44b   :  { %20 = sbr.rel (!%p18_p4) target bundleno = 2 (0x2), region = 102 }
 0x452   :  { %779 = vsyncpa [#allocation5], 1 }
 0x453   :  { %781 = vsyncpa [#allocation5 + $0x1], 1 }
 0x454   :  { %782 = vsyncpa [#allocation7], 1 }

// kernel: fwd.18
= control target key start
LH: loop header
LB: loop body
LE: loop exit
PB: predicated region body
PF: predicated region fallthrough
CT: control target
= control target key end

     0   :  { %v332_v0 = vmov 0.0|0.0   ;;  %vm333_vm0 = vmmov 0   ;;  %v334_v4 = vmov 0.0   ;;  %vm42_vm1 = vcmask 523264   ;;  %s443_s1 = inlined_call_operand.vmem [shape: f32[64,64], index: 1, kind: input, shape index: {}]   ;;  %s444_s0 = inlined_call_operand.vmem [shape: f32[6,64], index: 0, kind: input, shape index: {}]   ;;  %s445_s2 = inlined_call_operand.vmem [shape: f32[1,64], index: 2, kind: input, shape index: {}]   ;;  %s446_s5 = inlined_call_operand.vmem [shape: f32[64,34], index: 5, kind: input, shape index: {}]   ;;  %s447_s3 = inlined_call_operand.vmem [shape: f32[1,64], index: 3, kind: input, shape index: {}]   ;;  %s448_s4 = inlined_call_operand.vmem [shape: f32[1,64], index: 4, kind: input, shape index: {}]   ;;  %s449_s6 = inlined_call_operand.vmem [shape: f32[1,34], index: 6, kind: input, shape index: {}]   ;;  %s450_s7 = inlined_call_operand.vmem [shape: f32[6,34], index: 7, kind: output, shape index: {}]  }
   0x1   :  { %303 = vmatprep.subr.bf16.mxu0 %v332_v0  ;;  %v27_v1 = vld [vmem:[%s443_s1] sm:$0xff]  ;;  %v28_v2 = vld [vmem:[%s443_s1 + $0x8] sm:$0xff]  ;;  %v29_v3 = vld [vmem:[%s443_s1 + $0x10] sm:$0xff]  ;;  %281 = vmatprep.mubr.msk.f32.mxu0 %vm333_vm0, %v334_v4  ;;  %vm116_vm2 = vcmask 521216   ;;  %vm235_vm3 = vcmask 275456  }
   0x2   :  { %v304_v5 = vpack.c.bf16 %v28_v2, %v27_v1  ;;  %v30_v6 = vld [vmem:[%s443_s1 + $0x18] sm:$0xff]  ;;  %315 = vmatprep.subr.bf16.mxu1 %v332_v0  ;;  %300 = vmatprep.mubr.msk.f32.mxu1 %vm333_vm0, %v334_v4  ;;  %v31_v8 = vld [vmem:[%s443_s1 + $0x20] sm:$0xff]  ;;  %v32_v9 = vld [vmem:[%s443_s1 + $0x28] sm:$0xff] }
   0x3   :  { %v307_v7 = vpack.c.bf16 %v30_v6, %v29_v3  ;;  %v310_v10 = vpack.c.bf16 %v32_v9, %v31_v8  ;;  %v33_v11 = vld [vmem:[%s443_s1 + $0x30] sm:$0xff]  ;;  %v34_v12 = vld [vmem:[%s443_s1 + $0x38] sm:$0xff]  ;;  %v26_v14 = vld [vmem:[%s444_s0] sm:$0x3f] }
   0x4   :  { %305 = vmatpush3.bf16.msra.mxu0 %v304_v5  ;;  %v313_v13 = vpack.c.bf16 %v34_v12, %v33_v11  ;;  %v241_v15 = vld [vmem:[%s445_s2] ss:$0 sm:$0xff]  ;;  %v148_v26 = vld [vmem:[%s446_s5 + $0x8] sm:$0xff]  ;;  %v149_v28 = vld [vmem:[%s446_s5 + $0x10] sm:$0xff] }
   0x5   :  { %306 = vmatprep.subr.bf16.mxu0 %v332_v0  ;;  %v147_v25 = vld [vmem:[%s446_s5] sm:$0xff]  ;;  %v150_v29 = vld [vmem:[%s446_s5 + $0x18] sm:$0xff]  ;;  %v152_v32 = vld [vmem:[%s446_s5 + $0x28] sm:$0xff] }
   0x6   :  { %v316_v27 = vpack.c.bf16 %v148_v26, %v147_v25  ;;  %v319_v30 = vpack.c.bf16 %v150_v29, %v149_v28  ;;  %v151_v31 = vld [vmem:[%s446_s5 + $0x20] sm:$0xff]  ;;  %v153_v34 = vld [vmem:[%s446_s5 + $0x30] sm:$0xff]  ;;  %v154_v35 = vld [vmem:[%s446_s5 + $0x38] sm:$0xff] }
   0x7   :  { %v322_v33 = vpack.c.bf16 %v152_v32, %v151_v31  ;;  %v325_v36 = vpack.c.bf16 %v154_v35, %v153_v34  ;;  %v243_v41 = vld [vmem:[%s447_s3] ss:$0 sm:$0xff] }
   0x8   :  { %308 = vmatpush3.bf16.msra.mxu0 %v307_v7  ;;  %317 = vmatpush3.bf16.msra.mxu1 %v316_v27  ;;  %v244_v43 = vld [vmem:[%s448_s4] ss:$0 sm:$0xff] }
   0x9   :  { %309 = vmatprep.subr.bf16.mxu0 %v332_v0  ;;  %318 = vmatprep.subr.bf16.mxu1 %v332_v0  ;;  %v245_v46 = vld [vmem:[%s449_s6] ss:$0 sm:$0xff] }
   0xc   :  { %311 = vmatpush3.bf16.msra.mxu0 %v310_v10  ;;  %320 = vmatpush3.bf16.msra.mxu1 %v319_v30 }
   0xd   :  { %312 = vmatprep.subr.bf16.mxu0 %v332_v0  ;;  %321 = vmatprep.subr.bf16.mxu1 %v332_v0 }
  0x10   :  { %314 = vmatpush3.bf16.msra.mxu0 %v313_v13  ;;  %323 = vmatpush3.bf16.msra.mxu1 %v322_v33 }
  0x11   :  { %324 = vmatprep.subr.bf16.mxu1 %v332_v0 }
  0x13   :  { %282 = vmatmul.mubr.msk.f32.vlgmr.msra.gmra.mrb[0].mxu0 %vm42_vm1, %v26_v14 }
  0x14   :  { %326 = vmatpush3.bf16.msra.mxu1 %v325_v36 }
  0xe6   :  { %v112_v16 = vpop.f32.mrb[0].mxu0 }
  0xe7   :  { %v113_v17 = vadd.f32 %v241_v15, %v112_v16  ;;  %v283_v18 = vpop.f32.mrb[1].mxu0 }
  0xe9   :  { %v117_v19 = vsel %vm116_vm2, %v113_v17, 0.0 }
  0xea   :  { %118 = vadd.xlane.f32.xlu0 %v117_v19 }
 0x177   :  { %v119_v20 = vpop.xlane.xlu0 %118 }
 0x178   :  { %v121_v21 = vmul.f32 0.015625, %v119_v20 }
 0x17a   :  { %v122_v22 = vsub.f32 %v113_v17, %v121_v21 }
 0x17c   :  { %v123_v23 = vmul.f32 %v122_v22, %v122_v22 }
 0x17e   :  { %v124_v24 = vsel %vm116_vm2, %v123_v23, 0.0 }
 0x17f   :  { %125 = vadd.xlane.f32.xlu0 %v124_v24 }
 0x20c   :  { %v126_v37 = vpop.xlane.xlu0 %125 }
 0x20d   :  { %v127_v38 = vmul.f32 0.015625, %v126_v37 }
 0x20f   :  { %v128_v39 = vadd.f32 1e-05, %v127_v38 }
 0x211   :  { %330 = vrsqrt.f32 %v128_v39 }
 0x21b   :  { %v331_v40 = vpop.eup %330 }
 0x21c   :  { %v130_v42 = vmul.f32 %v331_v40, %v122_v22 }
 0x21e   :  { %v138_v44 = vmul.f32 %v243_v41, %v130_v42 }
 0x220   :  { %v146_v45 = vadd.f32 %v244_v43, %v138_v44 }
 0x222   :  { %301 = vmatmul.mubr.msk.f32.vlgmr.msra.gmra.mrb[0].mxu1 %vm42_vm1, %v146_v45 }
 0x2f5   :  { %v231_v47 = vpop.f32.mrb[0].mxu1 }
 0x2f6   :  { %v232_v48 = vadd.f32 %v245_v46, %v231_v47  ;;  %v302_v49 = vpop.f32.mrb[1].mxu1 }
 0x2f8   :  { %236 = vst.msk [vmem:[%s450_s7] sm:$0x3f] %vm235_vm3, %v232_v48 }

// kernel: tile.18
= control target key start
LH: loop header
LB: loop body
LE: loop exit
PB: predicated region body
PF: predicated region fallthrough
CT: control target
= control target key end

     0   :  { %s40_s0 = inlined_call_operand.vmem [shape: f32[64], index: 0, kind: input, shape index: {}]   ;;  %s41_s1 = inlined_call_operand.vmem [shape: f32[25,64], index: 1, kind: output, shape index: {}]  }
   0x1   :  { %v4_v0 = vld [vmem:[%s40_s0] ss:$0 sm:$0xff] }
   0x2   :  { %5 = vst [vmem:[%s41_s1] sm:$0xff] %v4_v0  ;;  %12 = vst [vmem:[%s41_s1 + $0x8] sm:$0xff] %v4_v0 }
   0x3   :  { %13 = vst [vmem:[%s41_s1 + $0x10] sm:$0xff] %v4_v0  ;;  %14 = vst [vmem:[%s41_s1 + $0x18] sm:$0xff] %v4_v0 }

// kernel: fwd.19
= control target key start
LH: loop header
LB: loop body
LE: loop exit
PB: predicated region body
PF: predicated region fallthrough
CT: control target
= control target key end

     0   :  { %v698_v1 = vmov 0   ;;  %vm251_vm0 = vcmask 261120   ;;  %v699_v27 = vmov 0.0   ;;  %vm700_vm1 = vmmov 0   ;;  %s923_s1 = inlined_call_operand.vmem [shape: bf16[32,1600], index: 1, kind: input, shape index: {}]   ;;  %s924_s0 = inlined_call_operand.vmem [shape: bf16[16,32], index: 0, kind: input, shape index: {}]   ;;  %s925_s2 = inlined_call_operand.vmem [shape: f32[1,1600], index: 2, kind: input, shape index: {}]   ;;  %s926_s3 = inlined_call_operand.vmem [shape: f32[16,1600], index: 3, kind: output, shape index: {}]  }
   0x1   :  { %v659_v0 = vld [vmem:[%s923_s1 + $0x4] ss:$52 sps:$4 sm:$0xff]   ;;  %287 = vmatprep.mubr.bf16.mxu0 %v698_v1  ;;  %330 = vmatprep.mubr.bf16.mxu1 %v698_v1  ;;  %v661_v2 = vld [vmem:[%s923_s1] ss:$52 sps:$4 sm:$0xff]   ;;  %v664_v4 = vld [vmem:[%s923_s1 + $0x68] ss:$52 sps:$4 sm:$0xff]   ;;  %v49_v29 = vlaneseq }
   0x2   :  { %255 = vmatprep.subr.bf16.mxu0 %v659_v0  ;;  %v662_v3 = vld [vmem:[%s923_s1 + $0x6c] ss:$52 sps:$4 sm:$0xff]   ;;  %v667_v6 = vld [vmem:[%s923_s1 + $0x8] ss:$52 sps:$4 sm:$0xff]   ;;  %v669_v8 = vld [vmem:[%s923_s1 + $0x10] ss:$52 sps:$4 sm:$0xff]  }
   0x3   :  { %256 = vmatpush1.bf16.msra.mxu0 %v661_v2  ;;  %v665_v5 = vld [vmem:[%s923_s1 + $0xc] ss:$52 sps:$4 sm:$0xff]   ;;  %v671_v9 = vld [vmem:[%s923_s1 + $0x14] ss:$52 sps:$4 sm:$0xff]   ;;  %v674_v11 = vld [vmem:[%s923_s1 + $0x70] ss:$52 sps:$4 sm:$0xff]  }
   0x4   :  { %257 = vmatprep.subr.bf16.mxu0 %v662_v3  ;;  %v668_v7 = vld [vmem:[%s924_s0] sm:$0xff]   ;;  %298 = vmatprep.subr.bf16.mxu1 %v665_v5  ;;  %v672_v10 = vld [vmem:[%s923_s1 + $0x74] ss:$52 sps:$4 sm:$0xff]   ;;  %v677_v12 = vld [vmem:[%s923_s1 + $0x7c] ss:$52 sps:$4 sm:$0xff]   ;;  %v809_v30 = vshrl.u32 %v49_v29, 7 }
   0x5   :  { %299 = vmatpush1.bf16.msra.mxu1 %v667_v6  ;;  %v678_v13 = vld [vmem:[%s923_s1 + $0x18] ss:$52 sps:$4 sm:$0xff]   ;;  %v680_v14 = vld [vmem:[%s923_s1 + $0x1c] ss:$52 sps:$4 sm:$0xff]   ;;  %v684_v18 = vld [vmem:[%s923_s1 + $0x80] ss:$52 sps:$4 sm:$0xff]  }
   0x6   :  { %300 = vmatprep.subr.bf16.mxu1 %v672_v10  ;;  %v675_v15 = vld [vmem:[%s923_s1 + $0x78] ss:$52 sps:$4 sm:$0xff]   ;;  %v681_v19 = vld [vmem:[%s923_s1 + $0x20] ss:$52 sps:$4 sm:$0xff]   ;;  %v690_v22 = vld [vmem:[%s923_s1 + $0x28] ss:$52 sps:$4 sm:$0xff]  }
   0x7   :  { %258 = vmatpush1.bf16.msra.mxu0 %v664_v4  ;;  %v683_v16 = vld [vmem:[%s923_s1 + $0x24] ss:$52 sps:$4 sm:$0xff]   ;;  %v692_v20 = vld [vmem:[%s923_s1 + $0x2c] ss:$52 sps:$4 sm:$0xff]   ;;  %v687_v23 = vld [vmem:[%s923_s1 + $0x88] ss:$52 sps:$4 sm:$0xff]  }
   0x8   :  { %341 = vmatprep.subr.bf16.mxu0 %v671_v9  ;;  %v686_v17 = vld [vmem:[%s923_s1 + $0x84] ss:$52 sps:$4 sm:$0xff]   ;;  %v689_v21 = vld [vmem:[%s923_s1 + $0x8c] ss:$52 sps:$4 sm:$0xff]   ;;  %v695_v24 = vld [vmem:[%s923_s1 + $0x94] ss:$52 sps:$4 sm:$0xff]  }
   0x9   :  { %301 = vmatpush1.bf16.msra.mxu1 %v674_v11  ;;  %v693_v25 = vld [vmem:[%s923_s1 + $0x90] ss:$52 sps:$4 sm:$0xff]   ;;  %v697_v28 = vld [vmem:[%s923_s1 + $0x98] ss:$52 sps:$4 sm:$0xff]   ;;  %v51_v31 = vsub.s32 0, %v809_v30  ;;  %v55_v33 = vsub.s32 1, %v809_v30 }
   0xa   :  { %638 = vmatmul.mubr.msk.bf16.vlgmr.msra.gmra.mrb[0].mxu0 %vm251_vm0, %v668_v7  ;;  %384 = vmatprep.subr.bf16.mxu1 %v680_v14  ;;  %v696_v26 = vld [vmem:[%s923_s1 + $0x30] ss:$52 sps:$4 sm:$0xff]   ;;  %v59_v34 = vsub.s32 2, %v809_v30  ;;  %v63_v36 = vsub.s32 3, %v809_v30  ;;  %v67_v43 = vsub.s32 4, %v809_v30  ;;  %v71_v46 = vsub.s32 5, %v809_v30 }
   0xb   :  { %342 = vmatpush1.bf16.msra.mxu0 %v669_v8  ;;  %373 = vmatprep.mubr.bf16.mxu0 %v698_v1  ;;  %v45_v32 = vld [vmem:[%s925_s2] sm:$0xff]  ;;  %v75_v55 = vsub.s32 6, %v809_v30  ;;  %v79_v60 = vsub.s32 7, %v809_v30  ;;  %vm592_vm2 = vcmask 523264  }
   0xc   :  { %343 = vmatprep.subr.bf16.mxu0 %v677_v12  ;;  %639 = vmatmul.mubr.msk.bf16.vlgmr.msra.gmra.mrb[0].mxu1 %vm251_vm0, %v668_v7  ;;  %v52_v35 = vrot.slane %v45_v32, %v51_v31  ;;  %v56_v37 = vrot.slane %v45_v32, %v55_v33  ;;  %v60_v39 = vrot.slane %v45_v32, %v59_v34 }
   0xd   :  { %385 = vmatpush1.bf16.msra.mxu1 %v678_v13  ;;  %416 = vmatprep.mubr.bf16.mxu1 %v698_v1  ;;  %v64_v42 = vrot.slane %v45_v32, %v63_v36  ;;  %v68_v59 = vrot.slane %v45_v32, %v67_v43  ;;  %v76_v6 = vrot.slane %v45_v32, %v75_v55  ;;  %v46_v13 = vld [vmem:[%s925_s2 + $0x8] sm:$0x1f] }
   0xe   :  { %386 = vmatprep.subr.bf16.mxu1 %v686_v17  ;;  %v80_v10 = vrot.slane %v45_v32, %v79_v60  ;;  %v100_v55 = vrot.slane %v46_v13, %v67_v43 }
   0xf   :  { %344 = vmatpush1.bf16.msra.mxu0 %v675_v15 }
  0x10   :  { %427 = vmatprep.subr.bf16.mxu0 %v683_v16 }
  0x11   :  { %387 = vmatpush1.bf16.msra.mxu1 %v684_v18 }
  0x12   :  { %640 = vmatmul.mubr.msk.bf16.vlgmr.msra.gmra.mrb[4].mxu0 %vm251_vm0, %v668_v7  ;;  %470 = vmatprep.subr.bf16.mxu1 %v692_v20 }
  0x13   :  { %428 = vmatpush1.bf16.msra.mxu0 %v681_v19  ;;  %459 = vmatprep.mubr.bf16.mxu0 %v698_v1 }
  0x14   :  { %429 = vmatprep.subr.bf16.mxu0 %v689_v21  ;;  %641 = vmatmul.mubr.msk.bf16.vlgmr.msra.gmra.mrb[4].mxu1 %vm251_vm0, %v668_v7 }
  0x15   :  { %471 = vmatpush1.bf16.msra.mxu1 %v690_v22  ;;  %502 = vmatprep.mubr.bf16.mxu1 %v698_v1  ;;  %v72_v1 = vrot.slane %v45_v32, %v71_v46  ;;  %v88_v32 = vrot.slane %v46_v13, %v55_v33 }
  0x16   :  { %472 = vmatprep.subr.bf16.mxu1 %v695_v24 }
  0x17   :  { %430 = vmatpush1.bf16.msra.mxu0 %v687_v23 }
  0x18   :  { %648 = vmatprep.subr.bf16.mxu0 %v699_v27 }
  0x19   :  { %473 = vmatpush1.bf16.msra.mxu1 %v693_v25  ;;  %v84_v25 = vrot.slane %v46_v13, %v51_v31 }
  0x1a   :  { %642 = vmatmul.mubr.msk.bf16.vlgmr.msra.gmra.mrb[8].mxu0 %vm251_vm0, %v668_v7 }
  0x1b   :  { %649 = vmatpush3.bf16.msra.mxu0 %v696_v26  ;;  %652 = vmatprep.mubr.msk.bf16.mxu0 %vm700_vm1, %v699_v27 }
  0x1c   :  { %650 = vmatprep.subr.bf16.mxu0 %v699_v27  ;;  %643 = vmatmul.mubr.msk.bf16.vlgmr.msra.gmra.mrb[8].mxu1 %vm251_vm0, %v668_v7 }
  0x1f   :  { %651 = vmatpush3.bf16.msra.mxu0 %v697_v28 }
  0x22   :  { %653 = vmatmul.mubr.msk.bf16.vlgmr.msra.gmra.mrb[12].mxu0 %vm251_vm0, %v668_v7 }
  0xdd   :  { %v289_v38 = vpop.f32.mrb[0].mxu0 }
  0xde   :  { %v290_v40 = vadd.f32 %v289_v38, %v52_v35  ;;  %v291_v41 = vpop.f32.mrb[1].mxu0 }
  0xdf   :  { %v292_v44 = vadd.f32 %v291_v41, %v56_v37  ;;  %v293_v45 = vpop.f32.mrb[2].mxu0  ;;  %v332_v50 = vpop.f32.mrb[0].mxu1 }
  0xe0   :  { %v554_v47 = vmax.f32 %v290_v40, 0.0  ;;  %v294_v48 = vadd.f32 %v293_v45, %v52_v35  ;;  %v295_v49 = vpop.f32.mrb[3].mxu0  ;;  %v333_v53 = vadd.f32 %v332_v50, %v60_v39  ;;  %v334_v54 = vpop.f32.mrb[1].mxu1 }
  0xe1   :  { %v555_v51 = vmax.f32 %v292_v44, 0.0  ;;  %v296_v52 = vadd.f32 %v295_v49, %v56_v37  ;;  %v335_v57 = vadd.f32 %v334_v54, %v64_v42  ;;  %v336_v58 = vpop.f32.mrb[2].mxu1 }
  0xe2   :  { %580 = vst [vmem:[%s926_s3] sm:$0xff] %v554_v47  ;;  %v567_v56 = vmax.f32 %v294_v48, 0.0  ;;  %v556_v62 = vmax.f32 %v333_v53, 0.0  ;;  %v337_v63 = vadd.f32 %v336_v58, %v60_v39  ;;  %v338_v0 = vpop.f32.mrb[3].mxu1  ;;  %v92_v39 = vrot.slane %v46_v13, %v59_v34 }
  0xe3   :  { %581 = vst [vmem:[%s926_s3 + $0x8] sm:$0xff] %v555_v51  ;;  %v568_v61 = vmax.f32 %v296_v52, 0.0  ;;  %v557_v2 = vmax.f32 %v335_v57, 0.0  ;;  %v339_v3 = vadd.f32 %v338_v0, %v64_v42  ;;  %v96_v42 = vrot.slane %v46_v13, %v63_v36 }
  0xe4   :  { %594 = vst [vmem:[%s926_s3 + $0x68] sm:$0xff] %v567_v56  ;;  %582 = vst [vmem:[%s926_s3 + $0x10] sm:$0xff] %v556_v62  ;;  %v569_v4 = vmax.f32 %v337_v63, 0.0 }
  0xe5   :  { %595 = vst [vmem:[%s926_s3 + $0x70] sm:$0xff] %v568_v61  ;;  %v375_v5 = vpop.f32.mrb[4].mxu0  ;;  %583 = vst [vmem:[%s926_s3 + $0x18] sm:$0xff] %v557_v2  ;;  %v570_v7 = vmax.f32 %v339_v3, 0.0 }
  0xe6   :  { %v376_v8 = vadd.f32 %v375_v5, %v68_v59  ;;  %v377_v9 = vpop.f32.mrb[5].mxu0  ;;  %596 = vst [vmem:[%s926_s3 + $0x78] sm:$0xff] %v569_v4 }
  0xe7   :  { %v378_v11 = vadd.f32 %v377_v9, %v72_v1  ;;  %v379_v12 = vpop.f32.mrb[6].mxu0  ;;  %597 = vst [vmem:[%s926_s3 + $0x80] sm:$0xff] %v570_v7  ;;  %v418_v17 = vpop.f32.mrb[4].mxu1 }
  0xe8   :  { %v558_v14 = vmax.f32 %v376_v8, 0.0  ;;  %v380_v15 = vadd.f32 %v379_v12, %v68_v59  ;;  %v381_v16 = vpop.f32.mrb[7].mxu0  ;;  %v419_v20 = vadd.f32 %v418_v17, %v76_v6  ;;  %v420_v21 = vpop.f32.mrb[5].mxu1 }
  0xe9   :  { %v559_v18 = vmax.f32 %v378_v11, 0.0  ;;  %v382_v19 = vadd.f32 %v381_v16, %v72_v1  ;;  %v421_v23 = vadd.f32 %v420_v21, %v80_v10  ;;  %v422_v24 = vpop.f32.mrb[6].mxu1 }
  0xea   :  { %584 = vst [vmem:[%s926_s3 + $0x20] sm:$0xff] %v558_v14  ;;  %v571_v22 = vmax.f32 %v380_v15, 0.0  ;;  %v560_v27 = vmax.f32 %v419_v20, 0.0  ;;  %v423_v28 = vadd.f32 %v422_v24, %v76_v6  ;;  %v424_v29 = vpop.f32.mrb[7].mxu1 }
  0xeb   :  { %585 = vst [vmem:[%s926_s3 + $0x28] sm:$0xff] %v559_v18  ;;  %v572_v26 = vmax.f32 %v382_v19, 0.0  ;;  %v561_v35 = vmax.f32 %v421_v23, 0.0  ;;  %v425_v37 = vadd.f32 %v424_v29, %v80_v10 }
  0xec   :  { %598 = vst [vmem:[%s926_s3 + $0x88] sm:$0xff] %v571_v22  ;;  %586 = vst [vmem:[%s926_s3 + $0x30] sm:$0xff] %v560_v27  ;;  %v573_v31 = vmax.f32 %v423_v28, 0.0 }
  0xed   :  { %599 = vst [vmem:[%s926_s3 + $0x90] sm:$0xff] %v572_v26  ;;  %v461_v38 = vpop.f32.mrb[8].mxu0  ;;  %587 = vst [vmem:[%s926_s3 + $0x38] sm:$0xff] %v561_v35  ;;  %v574_v33 = vmax.f32 %v425_v37, 0.0 }
  0xee   :  { %v462_v40 = vadd.f32 %v461_v38, %v84_v25  ;;  %v463_v41 = vpop.f32.mrb[9].mxu0  ;;  %600 = vst [vmem:[%s926_s3 + $0x98] sm:$0xff] %v573_v31 }
  0xef   :  { %v464_v44 = vadd.f32 %v463_v41, %v88_v32  ;;  %v465_v45 = vpop.f32.mrb[10].mxu0  ;;  %601 = vst [vmem:[%s926_s3 + $0xa0] sm:$0xff] %v574_v33  ;;  %v504_v48 = vpop.f32.mrb[8].mxu1 }
  0xf0   :  { %v562_v34 = vmax.f32 %v462_v40, 0.0  ;;  %v466_v46 = vadd.f32 %v465_v45, %v84_v25  ;;  %v467_v47 = vpop.f32.mrb[11].mxu0  ;;  %v505_v51 = vadd.f32 %v504_v48, %v92_v39  ;;  %v506_v52 = vpop.f32.mrb[9].mxu1 }
  0xf1   :  { %v563_v49 = vmax.f32 %v464_v44, 0.0  ;;  %v468_v50 = vadd.f32 %v467_v47, %v88_v32  ;;  %v507_v53 = vadd.f32 %v506_v52, %v96_v42  ;;  %v508_v54 = vpop.f32.mrb[10].mxu1 }
  0xf2   :  { %588 = vst [vmem:[%s926_s3 + $0x40] sm:$0xff] %v562_v34  ;;  %v575_v36 = vmax.f32 %v466_v46, 0.0  ;;  %v564_v57 = vmax.f32 %v505_v51, 0.0  ;;  %v509_v58 = vadd.f32 %v508_v54, %v92_v39  ;;  %v510_v59 = vpop.f32.mrb[11].mxu1 }
  0xf3   :  { %589 = vst [vmem:[%s926_s3 + $0x48] sm:$0xff] %v563_v49  ;;  %v576_v56 = vmax.f32 %v468_v50, 0.0  ;;  %v565_v60 = vmax.f32 %v507_v53, 0.0  ;;  %v511_v61 = vadd.f32 %v510_v59, %v96_v42 }
  0xf4   :  { %602 = vst [vmem:[%s926_s3 + $0xa8] sm:$0xff] %v575_v36  ;;  %590 = vst [vmem:[%s926_s3 + $0x50] sm:$0xff] %v564_v57  ;;  %v577_v30 = vmax.f32 %v509_v58, 0.0 }
  0xf5   :  { %603 = vst [vmem:[%s926_s3 + $0xb0] sm:$0xff] %v576_v56  ;;  %v547_v43 = vpop.f32.mrb[12].mxu0  ;;  %591 = vst [vmem:[%s926_s3 + $0x58] sm:$0xff] %v565_v60  ;;  %v578_v62 = vmax.f32 %v511_v61, 0.0 }
  0xf6   :  { %v548_v63 = vadd.f32 %v547_v43, %v100_v55  ;;  %v654_v0 = vpop.f32.mrb[13].mxu0  ;;  %604 = vst [vmem:[%s926_s3 + $0xb8] sm:$0xff] %v577_v30 }
  0xf7   :  { %v550_v1 = vpop.f32.mrb[14].mxu0  ;;  %605 = vst [vmem:[%s926_s3 + $0xc0] sm:$0xff] %v578_v62 }
  0xf8   :  { %v566_v2 = vmax.f32 %v548_v63, 0.0  ;;  %v551_v3 = vadd.f32 %v550_v1, %v100_v55  ;;  %v655_v4 = vpop.f32.mrb[15].mxu0 }
  0xfa   :  { %593 = vst.msk [vmem:[%s926_s3 + $0x60] sm:$0xff] %vm592_vm2, %v566_v2  ;;  %v579_v5 = vmax.f32 %v551_v3, 0.0 }
  0xfc   :  { %606 = vst.msk [vmem:[%s926_s3 + $0xc8] sm:$0xff] %vm592_vm2, %v579_v5 }

// kernel: tile.23
= control target key start
LH: loop header
LB: loop body
LE: loop exit
PB: predicated region body
PF: predicated region fallthrough
CT: control target
= control target key end

     0   :  { %s22_s0 = inlined_call_operand.vmem [shape: f32[32], index: 0, kind: input, shape index: {}]   ;;  %s23_s1 = inlined_call_operand.vmem [shape: f32[4,32], index: 1, kind: output, shape index: {}]  }
   0x1   :  { %v4_v0 = vld [vmem:[%s22_s0] ss:$0 sm:$0xff] }
   0x2   :  { %5 = vst [vmem:[%s23_s1] sm:$0xf] %v4_v0 }

// kernel: tile.24
= control target key start
LH: loop header
LB: loop body
LE: loop exit
PB: predicated region body
PF: predicated region fallthrough
CT: control target
= control target key end

     0   :  { %vm7_vm0 = vcmask 261120   ;;  %s37_s8 = smov 32   ;;  %s38_s9 = smov 64   ;;  %vm13_vm1 = vcmask 1048320   ;;  %vm19_vm2 = vcmask 785920   ;;  %vm25_vm3 = vcmask 523520   ;;  %s55_s0 = inlined_call_operand.vmem [shape: f32[4,32], index: 0, kind: input, shape index: {}]   ;;  %s56_s1 = inlined_call_operand.vmem [shape: f32[1,128], index: 1, kind: output, shape index: {}]  }
   0x1   :  { %v4_v0 = vld [vmem:[%s55_s0] sm:$0xf]  ;;  %s36_s0 = smov 96  }
   0x2   :  { %5 = vst [vmem:[#allocation1] sm:$0xf] %v4_v0 }
   0x9   :  { %v10_v1 = vld [vmem:[#allocation1 + $0x3] sm:$0x1]   ;;  %v22_v2 = vld [vmem:[#allocation1 + $0x1] sm:$0x1]   ;;  %v6_v3 = vld [vmem:[#allocation1] sm:$0x1]  }
   0xa   :  { %11 = vrot.lane.b32.xlu0 %v10_v1, %s36_s0  ;;  %23 = vrot.lane.b32.xlu1 %v22_v2, %s37_s8  ;;  %v16_v4 = vld [vmem:[#allocation1 + $0x2] sm:$0x1]   ;;  %8 = vst.msk [vmem:[#allocation0] sm:$0x1] %vm7_vm0, %v6_v3  }
   0xe   :  { %17 = vrot.lane.b32.xlu0 %v16_v4, %s38_s9 }
  0x7c   :  { %v12_v5 = vpop.permute.xlu0 %11   ;;  %v24_v6 = vpop.permute.xlu1 %23  }
  0x7d   :  { %14 = vst.msk [vmem:[#allocation0] sm:$0x1] %vm13_vm1, %v12_v5  }
  0x80   :  { %v18_v7 = vpop.permute.xlu0 %17  }
  0x81   :  { %20 = vst.msk [vmem:[#allocation0] sm:$0x1] %vm19_vm2, %v18_v7  }
  0x82   :  { %26 = vst.msk [vmem:[#allocation0] sm:$0x1] %vm25_vm3, %v24_v6  }
  0x89   :  { %v30_v8 = vld [vmem:[#allocation0] sm:$0x1] }
  0x8a   :  { %32 = vst [vmem:[%s56_s1] sm:$0x1] %v30_v8 }

// kernel: fwd.20
= control target key start
LH: loop header
LB: loop body
LE: loop exit
PB: predicated region body
PF: predicated region fallthrough
CT: control target
= control target key end

     0   :  { %v3791_v0 = vmov 0   ;;  %v3792_v39 = vmov 0.0   ;;  %vm3793_vm0 = vmmov 0   ;;  %vm1457_vm1 = vcmask 523264   ;;  %s5124_s1 = inlined_call_operand.vmem [shape: bf16[576,128], index: 1, kind: input, shape index: {}]   ;;  %s5125_s0 = inlined_call_operand.vmem [shape: bf16[592,576], index: 0, kind: input, shape index: {}]   ;;  %s5126_s2 = inlined_call_operand.vmem [shape: f32[1,128], index: 2, kind: input, shape index: {}]   ;;  %s5127_s3 = inlined_call_operand.vmem [shape: f32[592,128], index: 3, kind: output, shape index: {}]  }
   0x1   :  { %1569 = vmatprep.subr.bf16.mxu1 %v3791_v0  ;;  %1898 = vmatprep.subr.bf16.mxu0 %v3791_v0  ;;  %v3495_v1 = vld [vmem:[%s5124_s1] sm:$0xff]   ;;  %v3497_v3 = vld [vmem:[%s5124_s1 + $0x8] sm:$0xff]   ;;  %v3499_v5 = vld [vmem:[%s5124_s1 + $0x10] sm:$0xff]  }
   0x2   :  { %v3822_v2 = vld [vmem:[%s5124_s1 + $0x80] sm:$0xff]   ;;  %1570 = vmatpush1.bf16.msra.mxu1 %v3495_v1  ;;  %v3832_v4 = vld [vmem:[%s5124_s1 + $0x88] sm:$0xff]   ;;  %v3843_v6 = vld [vmem:[%s5124_s1 + $0x90] sm:$0xff]  }
   0x3   :  { %1899 = vmatpush1.bf16.msra.mxu0 %v3822_v2  ;;  %1571 = vmatprep.subr.bf16.mxu1 %v3791_v0  ;;  %v3501_v7 = vld [vmem:[%s5124_s1 + $0x18] sm:$0xff]   ;;  %v3503_v9 = vld [vmem:[%s5124_s1 + $0x20] sm:$0xff]   ;;  %v3505_v11 = vld [vmem:[%s5124_s1 + $0x28] sm:$0xff]  }
   0x4   :  { %1900 = vmatprep.subr.bf16.mxu0 %v3791_v0  ;;  %v3854_v8 = vld [vmem:[%s5124_s1 + $0x98] sm:$0xff]   ;;  %v3865_v10 = vld [vmem:[%s5124_s1 + $0xa0] sm:$0xff]   ;;  %v3876_v12 = vld [vmem:[%s5124_s1 + $0xa8] sm:$0xff]  }
   0x5   :  { %v3507_v13 = vld [vmem:[%s5124_s1 + $0x30] sm:$0xff]   ;;  %v3509_v15 = vld [vmem:[%s5124_s1 + $0x38] sm:$0xff]   ;;  %v3511_v17 = vld [vmem:[%s5124_s1 + $0x40] sm:$0xff]  }
   0x6   :  { %1572 = vmatpush1.bf16.msra.mxu1 %v3497_v3  ;;  %v3887_v14 = vld [vmem:[%s5124_s1 + $0xb0] sm:$0xff]   ;;  %v3898_v16 = vld [vmem:[%s5124_s1 + $0xb8] sm:$0xff]   ;;  %v3909_v18 = vld [vmem:[%s5124_s1 + $0xc0] sm:$0xff]  }
   0x7   :  { %1901 = vmatpush1.bf16.msra.mxu0 %v3832_v4  ;;  %1573 = vmatprep.subr.bf16.mxu1 %v3791_v0  ;;  %v3529_v19 = vld [vmem:[%s5125_s0 + $0x4] ss:$20 sps:$4 sm:$0xff]   ;;  %v3513_v20 = vld [vmem:[%s5124_s1 + $0x48] sm:$0xff]   ;;  %v3515_v23 = vld [vmem:[%s5124_s1 + $0x50] sm:$0xff]  }
   0x8   :  { %1902 = vmatprep.subr.bf16.mxu0 %v3791_v0  ;;  %v3532_v21 = vld [vmem:[%s5125_s0 + $0xc] ss:$20 sps:$4 sm:$0xff]   ;;  %1601 = vmatprep.mubr.bf16.mxu1 %v3529_v19  ;;  %v3937_v24 = vld [vmem:[%s5124_s1 + $0xd0] sm:$0xff]   ;;  %v3517_v25 = vld [vmem:[%s5124_s1 + $0x58] sm:$0xff]  }
   0x9   :  { %v3926_v22 = vld [vmem:[%s5124_s1 + $0xc8] sm:$0xff]   ;;  %1930 = vmatprep.mubr.bf16.mxu0 %v3532_v21  ;;  %v3948_v26 = vld [vmem:[%s5124_s1 + $0xd8] sm:$0xff]   ;;  %v3519_v27 = vld [vmem:[%s5124_s1 + $0x60] sm:$0xff]  }
   0xa   :  { %1574 = vmatpush1.bf16.msra.mxu1 %v3499_v5  ;;  %v3959_v28 = vld [vmem:[%s5124_s1 + $0xe0] sm:$0xff]   ;;  %v3521_v29 = vld [vmem:[%s5124_s1 + $0x68] sm:$0xff]   ;;  %v3523_v31 = vld [vmem:[%s5124_s1 + $0x70] sm:$0xff]  }
   0xb   :  { %1903 = vmatpush1.bf16.msra.mxu0 %v3843_v6  ;;  %1575 = vmatprep.subr.bf16.mxu1 %v3791_v0  ;;  %v3970_v30 = vld [vmem:[%s5124_s1 + $0xe8] sm:$0xff]   ;;  %v3981_v32 = vld [vmem:[%s5124_s1 + $0xf0] sm:$0xff]   ;;  %v3525_v33 = vld [vmem:[%s5124_s1 + $0x78] sm:$0xff]  }
   0xc   :  { %1904 = vmatprep.subr.bf16.mxu0 %v3791_v0  ;;  %v3992_v34 = vld [vmem:[%s5124_s1 + $0xf8] sm:$0xff]   ;;  %v3527_v35 = vld [vmem:[%s5125_s0] ss:$20 sps:$4 sm:$0xff]   ;;  %v3562_v41 = vld [vmem:[%s5124_s1 + $0x108] sm:$0xff]  }
   0xd   :  { %v3530_v36 = vld [vmem:[%s5125_s0 + $0x8] ss:$20 sps:$4 sm:$0xff]   ;;  %v3534_v37 = vld [vmem:[%s5125_s0 + $0x2c] ss:$20 sps:$4 sm:$0xff]   ;;  %v3539_v43 = vld [vmem:[%s5125_s0 + $0x30] ss:$20 sps:$4 sm:$0xff]  }
   0xe   :  { %1576 = vmatpush1.bf16.msra.mxu1 %v3501_v7  ;;  %v3533_v38 = vld [vmem:[%s5124_s1 + $0x100] sm:$0xff]   ;;  %v3536_v40 = vld [vmem:[%s5125_s0 + $0x34] ss:$20 sps:$4 sm:$0xff]   ;;  %v3542_v45 = vld [vmem:[%s5125_s0 + $0x5c] ss:$20 sps:$4 sm:$0xff]  }
   0xf   :  { %1905 = vmatpush1.bf16.msra.mxu0 %v3854_v8  ;;  %1577 = vmatprep.subr.bf16.mxu1 %v3791_v0  ;;  %v3538_v42 = vld [vmem:[%s5125_s0 + $0x28] ss:$20 sps:$4 sm:$0xff]   ;;  %v3589_v46 = vld [vmem:[%s5124_s1 + $0x110] sm:$0xff]   ;;  %v3545_v49 = vld [vmem:[%s5125_s0 + $0x58] ss:$20 sps:$4 sm:$0xff]  }
  0x10   :  { %1906 = vmatprep.subr.bf16.mxu0 %v3791_v0  ;;  %v3540_v44 = vld [vmem:[%s5125_s0 + $0x54] ss:$20 sps:$4 sm:$0xff]   ;;  %v3620_v47 = vld [vmem:[%s5124_s1 + $0x118] sm:$0xff]   ;;  %v3544_v48 = vld [vmem:[%s5125_s0 + $0x50] ss:$20 sps:$4 sm:$0xff]  }
  0x11   :  { %v3546_v50 = vld [vmem:[%s5125_s0 + $0x7c] ss:$20 sps:$4 sm:$0xff]   ;;  %v3548_v51 = vld [vmem:[%s5125_s0 + $0x84] ss:$20 sps:$4 sm:$0xff]   ;;  %v3551_v53 = vld [vmem:[%s5125_s0 + $0x80] ss:$20 sps:$4 sm:$0xff]  }
  0x12   :  { %1578 = vmatpush1.bf16.msra.mxu1 %v3503_v9  ;;  %v3550_v52 = vld [vmem:[%s5125_s0 + $0x78] ss:$20 sps:$4 sm:$0xff]   ;;  %v3556_v56 = vld [vmem:[%s5125_s0 + $0xa0] ss:$20 sps:$4 sm:$0xff]   ;;  %v3557_v57 = vld [vmem:[%s5125_s0 + $0xa8] ss:$20 sps:$4 sm:$0xff]  }
  0x13   :  { %1907 = vmatpush1.bf16.msra.mxu0 %v3865_v10  ;;  %1579 = vmatprep.subr.bf16.mxu1 %v3791_v0  ;;  %v3552_v54 = vld [vmem:[%s5125_s0 + $0xa4] ss:$20 sps:$4 sm:$0xff]   ;;  %v3554_v55 = vld [vmem:[%s5125_s0 + $0xac] ss:$20 sps:$4 sm:$0xff]   ;;  %v3560_v59 = vld [vmem:[%s5125_s0 + $0xd4] ss:$20 sps:$4 sm:$0xff]  }
  0x14   :  { %1908 = vmatprep.subr.bf16.mxu0 %v3791_v0  ;;  %v3558_v58 = vld [vmem:[%s5125_s0 + $0xcc] ss:$20 sps:$4 sm:$0xff]   ;;  %v3563_v60 = vld [vmem:[%s5125_s0 + $0xc8] ss:$20 sps:$4 sm:$0xff]   ;;  %v3564_v61 = vld [vmem:[%s5125_s0 + $0xd0] ss:$20 sps:$4 sm:$0xff]  }
  0x15   :  { %v3565_v62 = vld [vmem:[%s5125_s0 + $0xf4] ss:$20 sps:$4 sm:$0xff]   ;;  %v3567_v63 = vld [vmem:[%s5125_s0 + $0xfc] ss:$20 sps:$4 sm:$0xff]   ;;  %v3575_v5 = vld [vmem:[%s5125_s0 + $0x118] ss:$20 sps:$4 sm:$0xff]  }
  0x16   :  { %1580 = vmatpush1.bf16.msra.mxu1 %v3505_v11  ;;  %v3569_v1 = vld [vmem:[%s5125_s0 + $0xf0] ss:$20 sps:$4 sm:$0xff]   ;;  %v3581_v9 = vld [vmem:[%s5125_s0 + $0x140] ss:$20 sps:$4 sm:$0xff]  }
  0x17   :  { %1909 = vmatpush1.bf16.msra.mxu0 %v3876_v12  ;;  %1581 = vmatprep.subr.bf16.mxu1 %v3791_v0  ;;  %v3571_v3 = vld [vmem:[%s5125_s0 + $0x11c] ss:$20 sps:$4 sm:$0xff]   ;;  %v3577_v7 = vld [vmem:[%s5125_s0 + $0x144] ss:$20 sps:$4 sm:$0xff]   ;;  %v3583_v11 = vld [vmem:[%s5125_s0 + $0x16c] ss:$20 sps:$4 sm:$0xff]  }
  0x18   :  { %1910 = vmatprep.subr.bf16.mxu0 %v3791_v0  ;;  %v3598_v19 = vld [vmem:[%s5125_s0 + $0x1c4] ss:$20 sps:$4 sm:$0xff]   ;;  %v3601_v21 = vld [vmem:[%s5125_s0 + $0x1c0] ss:$20 sps:$4 sm:$0xff]  }
  0x1a   :  { %1582 = vmatpush1.bf16.msra.mxu1 %v3507_v13  ;;  %v3587_v13 = vld [vmem:[%s5125_s0 + $0x168] ss:$20 sps:$4 sm:$0xff]  }
  0x1b   :  { %1911 = vmatpush1.bf16.msra.mxu0 %v3887_v14  ;;  %1583 = vmatprep.subr.bf16.mxu1 %v3791_v0 }
  0x1c   :  { %1912 = vmatprep.subr.bf16.mxu0 %v3791_v0 }
  0x1e   :  { %1584 = vmatpush1.bf16.msra.mxu1 %v3509_v15  ;;  %v3592_v15 = vld [vmem:[%s5125_s0 + $0x19c] ss:$20 sps:$4 sm:$0xff]  }
  0x1f   :  { %1913 = vmatpush1.bf16.msra.mxu0 %v3898_v16  ;;  %1585 = vmatprep.subr.bf16.mxu1 %v3791_v0 }
  0x20   :  { %1914 = vmatprep.subr.bf16.mxu0 %v3791_v0 }
  0x22   :  { %1586 = vmatpush1.bf16.msra.mxu1 %v3511_v17  ;;  %v3595_v17 = vld [vmem:[%s5125_s0 + $0x198] ss:$20 sps:$4 sm:$0xff]  }
  0x23   :  { %1915 = vmatpush1.bf16.msra.mxu0 %v3909_v18  ;;  %1587 = vmatprep.subr.bf16.mxu1 %v3791_v0 }
  0x24   :  { %1916 = vmatprep.subr.bf16.mxu0 %v3791_v0 }
  0x26   :  { %1588 = vmatpush1.bf16.msra.mxu1 %v3513_v20  ;;  %v3600_v20 = vld [vmem:[%s5125_s0 + $0x1b8] ss:$20 sps:$4 sm:$0xff]  }
  0x27   :  { %1917 = vmatpush1.bf16.msra.mxu0 %v3926_v22  ;;  %1589 = vmatprep.subr.bf16.mxu1 %v3791_v0 }
  0x28   :  { %1918 = vmatprep.subr.bf16.mxu0 %v3791_v0 }
  0x2a   :  { %1590 = vmatpush1.bf16.msra.mxu1 %v3515_v23  ;;  %v3604_v23 = vld [vmem:[%s5125_s0 + $0x1ec] ss:$20 sps:$4 sm:$0xff]  }
  0x2b   :  { %1919 = vmatpush1.bf16.msra.mxu0 %v3937_v24  ;;  %1591 = vmatprep.subr.bf16.mxu1 %v3791_v0 }
  0x2c   :  { %1920 = vmatprep.subr.bf16.mxu0 %v3791_v0 }
  0x2e   :  { %1592 = vmatpush1.bf16.msra.mxu1 %v3517_v25  ;;  %v3607_v25 = vld [vmem:[%s5125_s0 + $0x1e8] ss:$20 sps:$4 sm:$0xff]  }
  0x2f   :  { %1921 = vmatpush1.bf16.msra.mxu0 %v3948_v26  ;;  %1593 = vmatprep.subr.bf16.mxu1 %v3791_v0 }
  0x30   :  { %1922 = vmatprep.subr.bf16.mxu0 %v3791_v0 }
  0x32   :  { %1594 = vmatpush1.bf16.msra.mxu1 %v3519_v27  ;;  %v3610_v27 = vld [vmem:[%s5125_s0 + $0x214] ss:$20 sps:$4 sm:$0xff]  }
  0x33   :  { %1923 = vmatpush1.bf16.msra.mxu0 %v3959_v28  ;;  %1595 = vmatprep.subr.bf16.mxu1 %v3791_v0 }
  0x34   :  { %1924 = vmatprep.subr.bf16.mxu0 %v3791_v0 }
  0x36   :  { %1596 = vmatpush1.bf16.msra.mxu1 %v3521_v29  ;;  %v3613_v29 = vld [vmem:[%s5125_s0 + $0x210] ss:$20 sps:$4 sm:$0xff]  }
  0x37   :  { %1925 = vmatpush1.bf16.msra.mxu0 %v3970_v30  ;;  %1597 = vmatprep.subr.bf16.mxu1 %v3791_v0 }
  0x38   :  { %1926 = vmatprep.subr.bf16.mxu0 %v3791_v0 }
  0x3a   :  { %1598 = vmatpush1.bf16.msra.mxu1 %v3523_v31  ;;  %v3616_v31 = vld [vmem:[%s5125_s0 + $0x23c] ss:$20 sps:$4 sm:$0xff]  }
  0x3b   :  { %1927 = vmatpush1.bf16.msra.mxu0 %v3981_v32  ;;  %1599 = vmatprep.subr.bf16.mxu1 %v3791_v0 }
  0x3c   :  { %1928 = vmatprep.subr.bf16.mxu0 %v3791_v0 }
  0x3e   :  { %1600 = vmatpush1.bf16.msra.mxu1 %v3525_v33  ;;  %v3619_v33 = vld [vmem:[%s5125_s0 + $0x238] ss:$20 sps:$4 sm:$0xff]  }
  0x3f   :  { %1929 = vmatpush1.bf16.msra.mxu0 %v3992_v34  ;;  %3164 = vmatprep.subr.bf16.mxu1 %v3791_v0 }
  0x40   :  { %3008 = vmatprep.subr.bf16.mxu0 %v3792_v39 }
  0x41   :  { %1602 = vmatmul.mubr.bf16.vlgmr.msra.gmra.mrb[0].mxu1 %v3527_v35  ;;  %v3623_v35 = vld [vmem:[%s5125_s0 + $0x264] ss:$20 sps:$4 sm:$0xff]  }
  0x42   :  { %1931 = vmatmul.mubr.bf16.vlgmr.msra.gmra.mrb[0].mxu0 %v3530_v36  ;;  %1609 = vmatprep.mubr.bf16.mxu1 %v3534_v37  ;;  %v3625_v36 = vld [vmem:[%s5125_s0 + $0x258] ss:$20 sps:$4 sm:$0xff]   ;;  %v3626_v37 = vld [vmem:[%s5125_s0 + $0x260] ss:$20 sps:$4 sm:$0xff]  }
  0x43   :  { %3009 = vmatpush3.bf16.msra.mxu0 %v3533_v38  ;;  %3180 = vmatpush1.bf16.msra.mxu1 %v3822_v2  ;;  %v3570_v2 = vld [vmem:[%s5125_s0 + $0xf8] ss:$20 sps:$4 sm:$0xff]  }
  0x44   :  { %1938 = vmatprep.mubr.bf16.mxu0 %v3536_v40  ;;  %3165 = vmatprep.subr.bf16.mxu1 %v3791_v0  ;;  %v3627_v38 = vld [vmem:[%s5125_s0 + $0x284] ss:$20 sps:$4 sm:$0xff]   ;;  %v3629_v40 = vld [vmem:[%s5125_s0 + $0x28c] ss:$20 sps:$4 sm:$0xff]  }
  0x45   :  { %3010 = vmatprep.subr.bf16.mxu0 %v3792_v39 }
  0x47   :  { %3181 = vmatpush1.bf16.msra.mxu1 %v3832_v4  ;;  %3011 = vmatpush3.bf16.msra.mxu0 %v3562_v41  ;;  %v3573_v4 = vld [vmem:[%s5125_s0 + $0x124] ss:$20 sps:$4 sm:$0xff]   ;;  %v3631_v41 = vld [vmem:[%s5125_s0 + $0x280] ss:$20 sps:$4 sm:$0xff]  }
  0x48   :  { %3166 = vmatprep.subr.bf16.mxu1 %v3791_v0  ;;  %3012 = vmatprep.subr.bf16.mxu0 %v3792_v39 }
  0x49   :  { %1610 = vmatmul.mubr.bf16.gmra.mrb[4].mxu1 %v3538_v42  ;;  %v3632_v42 = vld [vmem:[%s5125_s0 + $0x288] ss:$20 sps:$4 sm:$0xff]  }
  0x4a   :  { %1939 = vmatmul.mubr.bf16.gmra.mrb[4].mxu0 %v3539_v43  ;;  %1617 = vmatprep.mubr.bf16.mxu1 %v3540_v44  ;;  %v3633_v43 = vld [vmem:[%s5125_s0 + $0x2ac] ss:$20 sps:$4 sm:$0xff]   ;;  %v3635_v44 = vld [vmem:[%s5125_s0 + $0x2b4] ss:$20 sps:$4 sm:$0xff]  }
  0x4b   :  { %1946 = vmatprep.mubr.bf16.mxu0 %v3542_v45  ;;  %3182 = vmatpush1.bf16.msra.mxu1 %v3843_v6  ;;  %v3576_v6 = vld [vmem:[%s5125_s0 + $0x120] ss:$20 sps:$4 sm:$0xff]   ;;  %v3637_v45 = vld [vmem:[%s5125_s0 + $0x2a8] ss:$20 sps:$4 sm:$0xff]  }
  0x4c   :  { %3167 = vmatprep.subr.bf16.mxu1 %v3791_v0  ;;  %3013 = vmatpush3.bf16.msra.mxu0 %v3589_v46  ;;  %v3638_v46 = vld [vmem:[%s5125_s0 + $0x2b0] ss:$20 sps:$4 sm:$0xff]  }
  0x4d   :  { %3014 = vmatprep.subr.bf16.mxu0 %v3792_v39 }
  0x4f   :  { %3183 = vmatpush1.bf16.msra.mxu1 %v3854_v8  ;;  %v3579_v8 = vld [vmem:[%s5125_s0 + $0x14c] ss:$20 sps:$4 sm:$0xff]  }
  0x50   :  { %3168 = vmatprep.subr.bf16.mxu1 %v3791_v0  ;;  %3015 = vmatpush3.bf16.msra.mxu0 %v3620_v47  ;;  %v3639_v47 = vld [vmem:[%s5125_s0 + $0x2d4] ss:$20 sps:$4 sm:$0xff]  }
  0x51   :  { %1618 = vmatmul.mubr.bf16.gmra.mrb[8].mxu1 %v3544_v48  ;;  %v3641_v48 = vld [vmem:[%s5125_s0 + $0x2dc] ss:$20 sps:$4 sm:$0xff]  }
  0x52   :  { %1947 = vmatmul.mubr.bf16.gmra.mrb[8].mxu0 %v3545_v49  ;;  %1625 = vmatprep.mubr.bf16.mxu1 %v3546_v50  ;;  %v3643_v49 = vld [vmem:[%s5125_s0 + $0x2d0] ss:$20 sps:$4 sm:$0xff]   ;;  %v3644_v50 = vld [vmem:[%s5125_s0 + $0x2d8] ss:$20 sps:$4 sm:$0xff]  }
  0x53   :  { %1954 = vmatprep.mubr.bf16.mxu0 %v3548_v51  ;;  %3184 = vmatpush1.bf16.msra.mxu1 %v3865_v10  ;;  %v3582_v10 = vld [vmem:[%s5125_s0 + $0x148] ss:$20 sps:$4 sm:$0xff]  }
  0x54   :  { %3169 = vmatprep.subr.bf16.mxu1 %v3791_v0  ;;  %v3645_v51 = vld [vmem:[%s5125_s0 + $0x2fc] ss:$20 sps:$4 sm:$0xff]  }
  0x57   :  { %3185 = vmatpush1.bf16.msra.mxu1 %v3876_v12  ;;  %v3585_v12 = vld [vmem:[%s5125_s0 + $0x174] ss:$20 sps:$4 sm:$0xff]  }
  0x58   :  { %3170 = vmatprep.subr.bf16.mxu1 %v3791_v0 }
  0x59   :  { %1626 = vmatmul.mubr.bf16.gmra.mrb[12].mxu1 %v3550_v52  ;;  %v3647_v52 = vld [vmem:[%s5125_s0 + $0x2f8] ss:$20 sps:$4 sm:$0xff]  }
  0x5a   :  { %1955 = vmatmul.mubr.bf16.gmra.mrb[12].mxu0 %v3551_v53  ;;  %1633 = vmatprep.mubr.bf16.mxu1 %v3552_v54  ;;  %v3648_v53 = vld [vmem:[%s5125_s0 + $0x10] ss:$20 sps:$4 sm:$0xff]  }
  0x5b   :  { %1962 = vmatprep.mubr.bf16.mxu0 %v3554_v55  ;;  %3186 = vmatpush1.bf16.msra.mxu1 %v3887_v14  ;;  %v3588_v14 = vld [vmem:[%s5125_s0 + $0x170] ss:$20 sps:$4 sm:$0xff]   ;;  %v3651_v55 = vld [vmem:[%s5125_s0 + $0x320] ss:$20 sps:$4 sm:$0xff]  }
  0x5c   :  { %3171 = vmatprep.subr.bf16.mxu1 %v3791_v0  ;;  %v3649_v54 = vld [vmem:[%s5125_s0 + $0x324] ss:$20 sps:$4 sm:$0xff]  }
  0x5f   :  { %3187 = vmatpush1.bf16.msra.mxu1 %v3898_v16  ;;  %v3594_v16 = vld [vmem:[%s5125_s0 + $0x190] ss:$20 sps:$4 sm:$0xff]  }
  0x60   :  { %3172 = vmatprep.subr.bf16.mxu1 %v3791_v0 }
  0x61   :  { %1634 = vmatmul.mubr.bf16.gmra.mrb[16].mxu1 %v3556_v56  ;;  %v3652_v56 = vld [vmem:[%s5125_s0 + $0x38] ss:$20 sps:$4 sm:$0xff]  }
  0x62   :  { %1963 = vmatmul.mubr.bf16.gmra.mrb[16].mxu0 %v3557_v57  ;;  %1641 = vmatprep.mubr.bf16.mxu1 %v3558_v58  ;;  %v3653_v57 = vld [vmem:[%s5125_s0 + $0x34c] ss:$20 sps:$4 sm:$0xff]   ;;  %v3655_v58 = vld [vmem:[%s5125_s0 + $0x348] ss:$20 sps:$4 sm:$0xff]  }
  0x63   :  { %1970 = vmatprep.mubr.bf16.mxu0 %v3560_v59  ;;  %3188 = vmatpush1.bf16.msra.mxu1 %v3909_v18  ;;  %v3596_v18 = vld [vmem:[%s5125_s0 + $0x1bc] ss:$20 sps:$4 sm:$0xff]   ;;  %v3656_v59 = vld [vmem:[%s5125_s0 + $0x60] ss:$20 sps:$4 sm:$0xff]  }
  0x64   :  { %3173 = vmatprep.subr.bf16.mxu1 %v3791_v0 }
  0x67   :  { %3189 = vmatpush1.bf16.msra.mxu1 %v3926_v22  ;;  %v3602_v22 = vld [vmem:[%s5125_s0 + $0x1e4] ss:$20 sps:$4 sm:$0xff]  }
  0x68   :  { %3174 = vmatprep.subr.bf16.mxu1 %v3791_v0 }
  0x69   :  { %1642 = vmatmul.mubr.bf16.gmra.mrb[20].mxu1 %v3563_v60  ;;  %v3657_v60 = vld [vmem:[%s5125_s0 + $0x374] ss:$20 sps:$4 sm:$0xff]  }
  0x6a   :  { %1971 = vmatmul.mubr.bf16.gmra.mrb[20].mxu0 %v3564_v61  ;;  %1649 = vmatprep.mubr.bf16.mxu1 %v3565_v62  ;;  %v3659_v61 = vld [vmem:[%s5125_s0 + $0x370] ss:$20 sps:$4 sm:$0xff]   ;;  %v3660_v62 = vld [vmem:[%s5125_s0 + $0x88] ss:$20 sps:$4 sm:$0xff]  }
  0x6b   :  { %1978 = vmatprep.mubr.bf16.mxu0 %v3567_v63  ;;  %3190 = vmatpush1.bf16.msra.mxu1 %v3937_v24  ;;  %v3606_v24 = vld [vmem:[%s5125_s0 + $0x1e0] ss:$20 sps:$4 sm:$0xff]   ;;  %v3661_v63 = vld [vmem:[%s5125_s0 + $0x39c] ss:$20 sps:$4 sm:$0xff]  }
  0x6c   :  { %3175 = vmatprep.subr.bf16.mxu1 %v3791_v0 }
  0x6f   :  { %3191 = vmatpush1.bf16.msra.mxu1 %v3948_v26  ;;  %v3608_v26 = vld [vmem:[%s5125_s0 + $0x20c] ss:$20 sps:$4 sm:$0xff]  }
  0x70   :  { %3176 = vmatprep.subr.bf16.mxu1 %v3791_v0 }
  0x71   :  { %1650 = vmatmul.mubr.bf16.gmra.mrb[24].mxu1 %v3569_v1  ;;  %v3663_v1 = vld [vmem:[%s5125_s0 + $0x398] ss:$20 sps:$4 sm:$0xff]  }
  0x72   :  { %1979 = vmatmul.mubr.bf16.gmra.mrb[24].mxu0 %v3570_v2  ;;  %1657 = vmatprep.mubr.bf16.mxu1 %v3571_v3  ;;  %v3664_v2 = vld [vmem:[%s5125_s0 + $0xb0] ss:$20 sps:$4 sm:$0xff]  }
  0x73   :  { %1986 = vmatprep.mubr.bf16.mxu0 %v3573_v4  ;;  %3192 = vmatpush1.bf16.msra.mxu1 %v3959_v28  ;;  %v3612_v28 = vld [vmem:[%s5125_s0 + $0x208] ss:$20 sps:$4 sm:$0xff]   ;;  %v3665_v3 = vld [vmem:[%s5125_s0 + $0x3c4] ss:$20 sps:$4 sm:$0xff]   ;;  %v3667_v4 = vld [vmem:[%s5125_s0 + $0x3c0] ss:$20 sps:$4 sm:$0xff]  }
  0x74   :  { %3177 = vmatprep.subr.bf16.mxu1 %v3791_v0 }
  0x77   :  { %3193 = vmatpush1.bf16.msra.mxu1 %v3970_v30  ;;  %v3614_v30 = vld [vmem:[%s5125_s0 + $0x234] ss:$20 sps:$4 sm:$0xff]  }
  0x78   :  { %3178 = vmatprep.subr.bf16.mxu1 %v3791_v0 }
  0x79   :  { %1658 = vmatmul.mubr.bf16.gmra.mrb[28].mxu1 %v3575_v5  ;;  %v3668_v5 = vld [vmem:[%s5125_s0 + $0xd8] ss:$20 sps:$4 sm:$0xff]  }
  0x7a   :  { %1987 = vmatmul.mubr.bf16.gmra.mrb[28].mxu0 %v3576_v6  ;;  %1665 = vmatprep.mubr.bf16.mxu1 %v3577_v7  ;;  %v3669_v6 = vld [vmem:[%s5125_s0 + $0x3ec] ss:$20 sps:$4 sm:$0xff]   ;;  %v3671_v7 = vld [vmem:[%s5125_s0 + $0x3e8] ss:$20 sps:$4 sm:$0xff]  }
  0x7b   :  { %1994 = vmatprep.mubr.bf16.mxu0 %v3579_v8  ;;  %3194 = vmatpush1.bf16.msra.mxu1 %v3981_v32  ;;  %v3618_v32 = vld [vmem:[%s5125_s0 + $0x230] ss:$20 sps:$4 sm:$0xff]   ;;  %v3672_v8 = vld [vmem:[%s5125_s0 + $0x100] ss:$20 sps:$4 sm:$0xff]  }
  0x7c   :  { %3179 = vmatprep.subr.bf16.mxu1 %v3791_v0  ;;  %v3590_v0 = vld [vmem:[%s5125_s0 + $0x194] ss:$20 sps:$4 sm:$0xff]  }
  0x7f   :  { %3195 = vmatpush1.bf16.msra.mxu1 %v3992_v34  ;;  %v3621_v34 = vld [vmem:[%s5125_s0 + $0x25c] ss:$20 sps:$4 sm:$0xff]  }
  0x81   :  { %1666 = vmatmul.mubr.bf16.gmra.mrb[32].mxu1 %v3581_v9  ;;  %v3673_v9 = vld [vmem:[%s5125_s0 + $0x414] ss:$20 sps:$4 sm:$0xff]  }
  0x82   :  { %1995 = vmatmul.mubr.bf16.gmra.mrb[32].mxu0 %v3582_v10  ;;  %1673 = vmatprep.mubr.bf16.mxu1 %v3583_v11  ;;  %v3675_v10 = vld [vmem:[%s5125_s0 + $0x410] ss:$20 sps:$4 sm:$0xff]   ;;  %v3676_v11 = vld [vmem:[%s5125_s0 + $0x128] ss:$20 sps:$4 sm:$0xff]  }
  0x83   :  { %2002 = vmatprep.mubr.bf16.mxu0 %v3585_v12  ;;  %v3677_v12 = vld [vmem:[%s5125_s0 + $0x43c] ss:$20 sps:$4 sm:$0xff]  }
  0x89   :  { %1674 = vmatmul.mubr.bf16.gmra.mrb[36].mxu1 %v3587_v13 }
  0x8a   :  { %2003 = vmatmul.mubr.bf16.gmra.mrb[36].mxu0 %v3588_v14  ;;  %1681 = vmatprep.mubr.bf16.mxu1 %v3590_v0  ;;  %v3679_v0 = vld [vmem:[%s5125_s0 + $0x438] ss:$20 sps:$4 sm:$0xff]  }
  0x8b   :  { %2010 = vmatprep.mubr.bf16.mxu0 %v3592_v15  ;;  %v3680_v15 = vld [vmem:[%s5125_s0 + $0x150] ss:$20 sps:$4 sm:$0xff]  }
  0x91   :  { %1682 = vmatmul.mubr.bf16.gmra.mrb[40].mxu1 %v3594_v16 }
  0x92   :  { %2011 = vmatmul.mubr.bf16.gmra.mrb[40].mxu0 %v3595_v17  ;;  %1689 = vmatprep.mubr.bf16.mxu1 %v3596_v18  ;;  %v3681_v17 = vld [vmem:[%s5125_s0 + $0x464] ss:$20 sps:$4 sm:$0xff]  }
  0x93   :  { %2018 = vmatprep.mubr.bf16.mxu0 %v3598_v19 }
  0x99   :  { %1690 = vmatmul.mubr.bf16.gmra.mrb[44].mxu1 %v3600_v20 }
  0x9a   :  { %2019 = vmatmul.mubr.bf16.gmra.mrb[44].mxu0 %v3601_v21  ;;  %1697 = vmatprep.mubr.bf16.mxu1 %v3602_v22  ;;  %v3683_v21 = vld [vmem:[%s5125_s0 + $0x460] ss:$20 sps:$4 sm:$0xff]   ;;  %v3684_v22 = vld [vmem:[%s5125_s0 + $0x178] ss:$20 sps:$4 sm:$0xff]  }
  0x9b   :  { %2026 = vmatprep.mubr.bf16.mxu0 %v3604_v23 }
  0xa1   :  { %1698 = vmatmul.mubr.bf16.gmra.mrb[48].mxu1 %v3606_v24  ;;  %v3685_v24 = vld [vmem:[%s5125_s0 + $0x48c] ss:$20 sps:$4 sm:$0xff]  }
  0xa2   :  { %2027 = vmatmul.mubr.bf16.gmra.mrb[48].mxu0 %v3607_v25  ;;  %1705 = vmatprep.mubr.bf16.mxu1 %v3608_v26 }
  0xa3   :  { %2034 = vmatprep.mubr.bf16.mxu0 %v3610_v27 }
  0xa9   :  { %1706 = vmatmul.mubr.bf16.gmra.mrb[52].mxu1 %v3612_v28  ;;  %v3687_v28 = vld [vmem:[%s5125_s0 + $0x488] ss:$20 sps:$4 sm:$0xff]  }
  0xaa   :  { %2035 = vmatmul.mubr.bf16.gmra.mrb[52].mxu0 %v3613_v29  ;;  %1713 = vmatprep.mubr.bf16.mxu1 %v3614_v30  ;;  %v3688_v29 = vld [vmem:[%s5125_s0 + $0x1a0] ss:$20 sps:$4 sm:$0xff]  }
  0xab   :  { %2042 = vmatprep.mubr.bf16.mxu0 %v3616_v31  ;;  %v3689_v31 = vld [vmem:[%s5125_s0 + $0x4b4] ss:$20 sps:$4 sm:$0xff]  }
  0xb1   :  { %1714 = vmatmul.mubr.bf16.gmra.mrb[56].mxu1 %v3618_v32 }
  0xb2   :  { %2043 = vmatmul.mubr.bf16.gmra.mrb[56].mxu0 %v3619_v33  ;;  %1721 = vmatprep.mubr.bf16.mxu1 %v3621_v34 }
  0xb3   :  { %2050 = vmatprep.mubr.bf16.mxu0 %v3623_v35  ;;  %v3691_v35 = vld [vmem:[%s5125_s0 + $0x4b0] ss:$20 sps:$4 sm:$0xff]  }
  0xb9   :  { %1722 = vmatmul.mubr.bf16.gmra.mrb[60].mxu1 %v3625_v36  ;;  %v3692_v36 = vld [vmem:[%s5125_s0 + $0x1c8] ss:$20 sps:$4 sm:$0xff]  }
  0xba   :  { %2051 = vmatmul.mubr.bf16.gmra.mrb[60].mxu0 %v3626_v37  ;;  %1729 = vmatprep.mubr.bf16.mxu1 %v3627_v38  ;;  %v3693_v38 = vld [vmem:[%s5125_s0 + $0x4dc] ss:$20 sps:$4 sm:$0xff]  }
  0xbb   :  { %2058 = vmatprep.mubr.bf16.mxu0 %v3629_v40 }
  0xc1   :  { %1730 = vmatmul.mubr.bf16.gmra.mrb[64].mxu1 %v3631_v41 }
  0xc2   :  { %2059 = vmatmul.mubr.bf16.gmra.mrb[64].mxu0 %v3632_v42  ;;  %1737 = vmatprep.mubr.bf16.mxu1 %v3633_v43  ;;  %v3695_v43 = vld [vmem:[%s5125_s0 + $0x4d8] ss:$20 sps:$4 sm:$0xff]  }
  0xc3   :  { %2066 = vmatprep.mubr.bf16.mxu0 %v3635_v44  ;;  %v3696_v44 = vld [vmem:[%s5125_s0 + $0x1f0] ss:$20 sps:$4 sm:$0xff]  }
  0xc9   :  { %1738 = vmatmul.mubr.bf16.gmra.mrb[68].mxu1 %v3637_v45 }
  0xca   :  { %2067 = vmatmul.mubr.bf16.gmra.mrb[68].mxu0 %v3638_v46  ;;  %1745 = vmatprep.mubr.bf16.mxu1 %v3639_v47  ;;  %v3697_v46 = vld [vmem:[%s5125_s0 + $0x504] ss:$20 sps:$4 sm:$0xff]  }
  0xcb   :  { %2074 = vmatprep.mubr.bf16.mxu0 %v3641_v48 }
  0xd1   :  { %1746 = vmatmul.mubr.bf16.gmra.mrb[72].mxu1 %v3643_v49 }
  0xd2   :  { %2075 = vmatmul.mubr.bf16.gmra.mrb[72].mxu0 %v3644_v50  ;;  %1753 = vmatprep.mubr.bf16.mxu1 %v3645_v51  ;;  %v3699_v50 = vld [vmem:[%s5125_s0 + $0x500] ss:$20 sps:$4 sm:$0xff]   ;;  %v3700_v51 = vld [vmem:[%s5125_s0 + $0x218] ss:$20 sps:$4 sm:$0xff]  }
  0xd3   :  { %3016 = vmatprep.mubr.msk.bf16.mxu0 %vm3793_vm0, %v3792_v39 }
  0xd9   :  { %1754 = vmatmul.mubr.bf16.gmra.mrb[76].mxu1 %v3647_v52 }
  0xda   :  { %3017 = vmatmul.mubr.msk.bf16.vlgmr.msra.gmra.mrb[0].mxu0 %vm1457_vm1, %v3648_v53  ;;  %1761 = vmatprep.mubr.bf16.mxu1 %v3649_v54  ;;  %v3701_v53 = vld [vmem:[%s5125_s0 + $0x52c] ss:$20 sps:$4 sm:$0xff]  }
  0xdb   :  { %3020 = vmatprep.mubr.msk.bf16.mxu0 %vm3793_vm0, %v3792_v39 }
  0xe1   :  { %1762 = vmatmul.mubr.bf16.gmra.mrb[80].mxu1 %v3651_v55 }
  0xe2   :  { %3021 = vmatmul.mubr.msk.bf16.gmra.mrb[4].mxu0 %vm1457_vm1, %v3652_v56  ;;  %1769 = vmatprep.mubr.bf16.mxu1 %v3653_v57  ;;  %v3703_v57 = vld [vmem:[%s5125_s0 + $0x528] ss:$20 sps:$4 sm:$0xff]  }
  0xe3   :  { %3024 = vmatprep.mubr.msk.bf16.mxu0 %vm3793_vm0, %v3792_v39 }
  0xe9   :  { %1770 = vmatmul.mubr.bf16.gmra.mrb[84].mxu1 %v3655_v58  ;;  %v3704_v58 = vld [vmem:[%s5125_s0 + $0x240] ss:$20 sps:$4 sm:$0xff]  }
  0xea   :  { %3025 = vmatmul.mubr.msk.bf16.gmra.mrb[8].mxu0 %vm1457_vm1, %v3656_v59  ;;  %1777 = vmatprep.mubr.bf16.mxu1 %v3657_v60  ;;  %v3705_v60 = vld [vmem:[%s5125_s0 + $0x554] ss:$20 sps:$4 sm:$0xff]  }
  0xeb   :  { %3028 = vmatprep.mubr.msk.bf16.mxu0 %vm3793_vm0, %v3792_v39 }
  0xf1   :  { %1778 = vmatmul.mubr.bf16.gmra.mrb[88].mxu1 %v3659_v61 }
  0xf2   :  { %3029 = vmatmul.mubr.msk.bf16.gmra.mrb[12].mxu0 %vm1457_vm1, %v3660_v62  ;;  %1785 = vmatprep.mubr.bf16.mxu1 %v3661_v63 }
  0xf3   :  { %3032 = vmatprep.mubr.msk.bf16.mxu0 %vm3793_vm0, %v3792_v39 }
  0xf9   :  { %1786 = vmatmul.mubr.bf16.gmra.mrb[92].mxu1 %v3663_v1  ;;  %v3707_v1 = vld [vmem:[%s5125_s0 + $0x550] ss:$20 sps:$4 sm:$0xff]  }
  0xfa   :  { %3033 = vmatmul.mubr.msk.bf16.gmra.mrb[16].mxu0 %vm1457_vm1, %v3664_v2  ;;  %1793 = vmatprep.mubr.bf16.mxu1 %v3665_v3  ;;  %v3708_v2 = vld [vmem:[%s5125_s0 + $0x268] ss:$20 sps:$4 sm:$0xff]  }
  0xfb   :  { %3036 = vmatprep.mubr.msk.bf16.mxu0 %vm3793_vm0, %v3792_v39 }
 0x101   :  { %1794 = vmatmul.mubr.bf16.gmra.mrb[96].mxu1 %v3667_v4  ;;  %v3709_v4 = vld [vmem:[%s5125_s0 + $0x57c] ss:$20 sps:$4 sm:$0xff]  }
 0x102   :  { %3037 = vmatmul.mubr.msk.bf16.gmra.mrb[20].mxu0 %vm1457_vm1, %v3668_v5  ;;  %1801 = vmatprep.mubr.bf16.mxu1 %v3669_v6 }
 0x103   :  { %3040 = vmatprep.mubr.msk.bf16.mxu0 %vm3793_vm0, %v3792_v39 }
 0x109   :  { %1802 = vmatmul.mubr.bf16.gmra.mrb[100].mxu1 %v3671_v7 }
 0x10a   :  { %3041 = vmatmul.mubr.msk.bf16.gmra.mrb[24].mxu0 %vm1457_vm1, %v3672_v8  ;;  %1809 = vmatprep.mubr.bf16.mxu1 %v3673_v9  ;;  %v3711_v8 = vld [vmem:[%s5125_s0 + $0x578] ss:$20 sps:$4 sm:$0xff]   ;;  %v3712_v9 = vld [vmem:[%s5125_s0 + $0x290] ss:$20 sps:$4 sm:$0xff]  }
 0x10b   :  { %3044 = vmatprep.mubr.msk.bf16.mxu0 %vm3793_vm0, %v3792_v39 }
 0x111   :  { %1810 = vmatmul.mubr.bf16.gmra.mrb[104].mxu1 %v3675_v10 }
 0x112   :  { %3045 = vmatmul.mubr.msk.bf16.gmra.mrb[28].mxu0 %vm1457_vm1, %v3676_v11  ;;  %1817 = vmatprep.mubr.bf16.mxu1 %v3677_v12  ;;  %v3713_v11 = vld [vmem:[%s5125_s0 + $0x5a4] ss:$20 sps:$4 sm:$0xff]  }
 0x113   :  { %3048 = vmatprep.mubr.msk.bf16.mxu0 %vm3793_vm0, %v3792_v39 }
 0x114   :  { %v4367_v13 = vpop.f32.mrb[0].mxu1 }
 0x115   :  { %v1605_v14 = vpop.f32.mrb[1].mxu1 }
 0x116   :  { %v4375_v16 = vpop.f32.mrb[2].mxu1 }
 0x117   :  { %v1608_v18 = vpop.f32.mrb[3].mxu1 }
 0x119   :  { %1818 = vmatmul.mubr.bf16.gmra.mrb[108].mxu1 %v3679_v0 }
 0x11a   :  { %3049 = vmatmul.mubr.msk.bf16.gmra.mrb[32].mxu0 %vm1457_vm1, %v3680_v15  ;;  %1825 = vmatprep.mubr.bf16.mxu1 %v3681_v17  ;;  %v3715_v15 = vld [vmem:[%s5125_s0 + $0x5a0] ss:$20 sps:$4 sm:$0xff]   ;;  %v3716_v17 = vld [vmem:[%s5125_s0 + $0x2b8] ss:$20 sps:$4 sm:$0xff]  }
 0x11b   :  { %3052 = vmatprep.mubr.msk.bf16.mxu0 %vm3793_vm0, %v3792_v39 }
 0x11c   :  { %v4383_v19 = vpop.f32.mrb[4].mxu1 }
 0x11d   :  { %v1613_v20 = vpop.f32.mrb[5].mxu1 }
 0x11e   :  { %v4391_v23 = vpop.f32.mrb[6].mxu1  ;;  %v3719_v20 = vld [vmem:[%s5125_s0 + $0x304] ss:$20 sps:$4 sm:$0xff]  }
 0x11f   :  { %v1616_v25 = vpop.f32.mrb[7].mxu1 }
 0x121   :  { %1826 = vmatmul.mubr.bf16.gmra.mrb[112].mxu1 %v3683_v21 }
 0x122   :  { %3053 = vmatmul.mubr.msk.bf16.gmra.mrb[36].mxu0 %vm1457_vm1, %v3684_v22  ;;  %1833 = vmatprep.mubr.bf16.mxu1 %v3685_v24  ;;  %v3717_v24 = vld [vmem:[%s5125_s0 + $0x300] ss:$20 sps:$4 sm:$0xff]  }
 0x123   :  { %3056 = vmatprep.mubr.msk.bf16.mxu0 %vm3793_vm0, %v3792_v39 }
 0x124   :  { %v4399_v26 = vpop.f32.mrb[8].mxu1 }
 0x125   :  { %v1621_v27 = vpop.f32.mrb[9].mxu1 }
 0x126   :  { %v4407_v30 = vpop.f32.mrb[10].mxu1  ;;  %v3720_v27 = vld [vmem:[%s5125_s0 + $0x2e0] ss:$20 sps:$4 sm:$0xff]  }
 0x127   :  { %v1624_v32 = vpop.f32.mrb[11].mxu1 }
 0x129   :  { %1834 = vmatmul.mubr.bf16.gmra.mrb[116].mxu1 %v3687_v28 }
 0x12a   :  { %3057 = vmatmul.mubr.msk.bf16.gmra.mrb[40].mxu0 %vm1457_vm1, %v3688_v29  ;;  %1841 = vmatprep.mubr.bf16.mxu1 %v3689_v31  ;;  %v3721_v29 = vld [vmem:[%s5125_s0 + $0x32c] ss:$20 sps:$4 sm:$0xff]  }
 0x12b   :  { %3060 = vmatprep.mubr.msk.bf16.mxu0 %vm3793_vm0, %v3792_v39 }
 0x12c   :  { %v4415_v33 = vpop.f32.mrb[12].mxu1 }
 0x12d   :  { %v1629_v34 = vpop.f32.mrb[13].mxu1 }
 0x12e   :  { %v4423_v37 = vpop.f32.mrb[14].mxu1 }
 0x12f   :  { %v1632_v40 = vpop.f32.mrb[15].mxu1 }
 0x130   :  { %v3725_v40 = vld [vmem:[%s5125_s0 + $0x354] ss:$20 sps:$4 sm:$0xff]  }
 0x131   :  { %1842 = vmatmul.mubr.bf16.gmra.mrb[120].mxu1 %v3691_v35  ;;  %v3723_v35 = vld [vmem:[%s5125_s0 + $0x328] ss:$20 sps:$4 sm:$0xff]  }
 0x132   :  { %3061 = vmatmul.mubr.msk.bf16.gmra.mrb[44].mxu0 %vm1457_vm1, %v3692_v36  ;;  %1849 = vmatprep.mubr.bf16.mxu1 %v3693_v38  ;;  %v3724_v36 = vld [vmem:[%s5125_s0 + $0x308] ss:$20 sps:$4 sm:$0xff]  }
 0x133   :  { %3064 = vmatprep.mubr.msk.bf16.mxu0 %vm3793_vm0, %v3792_v39 }
 0x134   :  { %v4431_v41 = vpop.f32.mrb[16].mxu1 }
 0x135   :  { %v1637_v42 = vpop.f32.mrb[17].mxu1 }
 0x136   :  { %v4439_v45 = vpop.f32.mrb[18].mxu1 }
 0x137   :  { %v1640_v47 = vpop.f32.mrb[19].mxu1 }
 0x138   :  { %v3728_v47 = vld [vmem:[%s5125_s0 + $0x330] ss:$20 sps:$4 sm:$0xff]  }
 0x139   :  { %1850 = vmatmul.mubr.bf16.gmra.mrb[124].mxu1 %v3695_v43 }
 0x13a   :  { %3065 = vmatmul.mubr.msk.bf16.gmra.mrb[48].mxu0 %vm1457_vm1, %v3696_v44  ;;  %1857 = vmatprep.mubr.bf16.mxu1 %v3697_v46  ;;  %v3727_v46 = vld [vmem:[%s5125_s0 + $0x350] ss:$20 sps:$4 sm:$0xff]  }
 0x13b   :  { %3068 = vmatprep.mubr.msk.bf16.mxu0 %vm3793_vm0, %v3792_v39 }
 0x13c   :  { %v4447_v48 = vpop.f32.mrb[20].mxu1 }
 0x13d   :  { %v1645_v49 = vpop.f32.mrb[21].mxu1 }
 0x13e   :  { %v4455_v52 = vpop.f32.mrb[22].mxu1 }
 0x13f   :  { %v1648_v54 = vpop.f32.mrb[23].mxu1 }
 0x141   :  { %1858 = vmatmul.mubr.bf16.gmra.mrb[128].mxu1 %v3699_v50  ;;  %v3729_v50 = vld [vmem:[%s5125_s0 + $0x37c] ss:$20 sps:$4 sm:$0xff]  }
 0x142   :  { %3069 = vmatmul.mubr.msk.bf16.gmra.mrb[52].mxu0 %vm1457_vm1, %v3700_v51  ;;  %1865 = vmatprep.mubr.bf16.mxu1 %v3701_v53 }
 0x143   :  { %3072 = vmatprep.mubr.msk.bf16.mxu0 %vm3793_vm0, %v3792_v39 }
 0x144   :  { %v4463_v55 = vpop.f32.mrb[24].mxu1 }
 0x145   :  { %v1653_v56 = vpop.f32.mrb[25].mxu1 }
 0x146   :  { %v4471_v59 = vpop.f32.mrb[26].mxu1  ;;  %v3731_v56 = vld [vmem:[%s5125_s0 + $0x378] ss:$20 sps:$4 sm:$0xff]  }
 0x147   :  { %v1656_v61 = vpop.f32.mrb[27].mxu1 }
 0x149   :  { %1866 = vmatmul.mubr.bf16.gmra.mrb[132].mxu1 %v3703_v57  ;;  %v3732_v57 = vld [vmem:[%s5125_s0 + $0x358] ss:$20 sps:$4 sm:$0xff]  }
 0x14a   :  { %3073 = vmatmul.mubr.msk.bf16.gmra.mrb[56].mxu0 %vm1457_vm1, %v3704_v58  ;;  %1873 = vmatprep.mubr.bf16.mxu1 %v3705_v60  ;;  %v3733_v60 = vld [vmem:[%s5125_s0 + $0x3a4] ss:$20 sps:$4 sm:$0xff]  }
 0x14b   :  { %3076 = vmatprep.mubr.msk.bf16.mxu0 %vm3793_vm0, %v3792_v39 }
 0x14c   :  { %v4479_v62 = vpop.f32.mrb[28].mxu1 }
 0x14d   :  { %v1661_v63 = vpop.f32.mrb[29].mxu1 }
 0x14e   :  { %v4487_v3 = vpop.f32.mrb[30].mxu1 }
 0x14f   :  { %v1664_v5 = vpop.f32.mrb[31].mxu1 }
 0x151   :  { %1874 = vmatmul.mubr.bf16.gmra.mrb[136].mxu1 %v3707_v1 }
 0x152   :  { %3077 = vmatmul.mubr.msk.bf16.gmra.mrb[60].mxu0 %vm1457_vm1, %v3708_v2  ;;  %1881 = vmatprep.mubr.bf16.mxu1 %v3709_v4  ;;  %v3735_v2 = vld [vmem:[%s5125_s0 + $0x3a0] ss:$20 sps:$4 sm:$0xff]  }
 0x153   :  { %3080 = vmatprep.mubr.msk.bf16.mxu0 %vm3793_vm0, %v3792_v39  ;;  %v3736_v4 = vld [vmem:[%s5125_s0 + $0x380] ss:$20 sps:$4 sm:$0xff]  }
 0x154   :  { %v4495_v6 = vpop.f32.mrb[32].mxu1 }
 0x155   :  { %v1669_v7 = vpop.f32.mrb[33].mxu1 }
 0x156   :  { %v4503_v10 = vpop.f32.mrb[34].mxu1  ;;  %v3737_v7 = vld [vmem:[%s5125_s0 + $0x3cc] ss:$20 sps:$4 sm:$0xff]  }
 0x157   :  { %v1672_v12 = vpop.f32.mrb[35].mxu1 }
 0x158   :  { %v3739_v12 = vld [vmem:[%s5125_s0 + $0x3c8] ss:$20 sps:$4 sm:$0xff]  }
 0x159   :  { %1882 = vmatmul.mubr.bf16.gmra.mrb[140].mxu1 %v3711_v8 }
 0x15a   :  { %3081 = vmatmul.mubr.msk.bf16.gmra.mrb[64].mxu0 %vm1457_vm1, %v3712_v9  ;;  %1889 = vmatprep.mubr.bf16.mxu1 %v3713_v11 }
 0x15b   :  { %3084 = vmatprep.mubr.msk.bf16.mxu0 %vm3793_vm0, %v3792_v39 }
 0x15c   :  { %v4511_v14 = vpop.f32.mrb[36].mxu1 }
 0x15d   :  { %v1677_v0 = vpop.f32.mrb[37].mxu1 }
 0x15e   :  { %v4519_v18 = vpop.f32.mrb[38].mxu1  ;;  %v3740_v0 = vld [vmem:[%s5125_s0 + $0x3a8] ss:$20 sps:$4 sm:$0xff]  }
 0x15f   :  { %v1680_v21 = vpop.f32.mrb[39].mxu1 }
 0x161   :  { %1890 = vmatmul.mubr.bf16.gmra.mrb[144].mxu1 %v3715_v15 }
 0x162   :  { %3085 = vmatmul.mubr.msk.bf16.gmra.mrb[68].mxu0 %vm1457_vm1, %v3716_v17  ;;  %2082 = vmatprep.mubr.bf16.mxu1 %v3719_v20  ;;  %v3741_v17 = vld [vmem:[%s5125_s0 + $0x3f4] ss:$20 sps:$4 sm:$0xff]  }
 0x163   :  { %3088 = vmatprep.mubr.msk.bf16.mxu0 %vm3793_vm0, %v3792_v39 }
 0x164   :  { %v4527_v22 = vpop.f32.mrb[40].mxu1 }
 0x165   :  { %v1685_v25 = vpop.f32.mrb[41].mxu1 }
 0x166   :  { %v4535_v28 = vpop.f32.mrb[42].mxu1  ;;  %v3743_v25 = vld [vmem:[%s5125_s0 + $0x3f0] ss:$20 sps:$4 sm:$0xff]  }
 0x167   :  { %v1688_v31 = vpop.f32.mrb[43].mxu1 }
 0x168   :  { %v3745_v31 = vld [vmem:[%s5125_s0 + $0x41c] ss:$20 sps:$4 sm:$0xff]  }
 0x169   :  { %2083 = vmatmul.mubr.bf16.vlgmr.msra.gmra.mrb[76].mxu1 %v3717_v24 }
 0x16a   :  { %3089 = vmatmul.mubr.msk.bf16.gmra.mrb[72].mxu0 %vm1457_vm1, %v3720_v27  ;;  %2090 = vmatprep.mubr.bf16.mxu1 %v3721_v29  ;;  %v3744_v27 = vld [vmem:[%s5125_s0 + $0x3d0] ss:$20 sps:$4 sm:$0xff]  }
 0x16b   :  { %3092 = vmatprep.mubr.msk.bf16.mxu0 %vm3793_vm0, %v3792_v39 }
 0x16c   :  { %v4543_v32 = vpop.f32.mrb[44].mxu1 }
 0x16d   :  { %v1693_v34 = vpop.f32.mrb[45].mxu1 }
 0x16e   :  { %v4551_v38 = vpop.f32.mrb[46].mxu1 }
 0x16f   :  { %v1696_v42 = vpop.f32.mrb[47].mxu1 }
 0x170   :  { %v3748_v42 = vld [vmem:[%s5125_s0 + $0x3f8] ss:$20 sps:$4 sm:$0xff]  }
 0x171   :  { %2091 = vmatmul.mubr.bf16.gmra.mrb[80].mxu1 %v3723_v35 }
 0x172   :  { %3093 = vmatmul.mubr.msk.bf16.gmra.mrb[76].mxu0 %vm1457_vm1, %v3724_v36  ;;  %2098 = vmatprep.mubr.bf16.mxu1 %v3725_v40  ;;  %v3747_v40 = vld [vmem:[%s5125_s0 + $0x418] ss:$20 sps:$4 sm:$0xff]  }
 0x173   :  { %3096 = vmatprep.mubr.msk.bf16.mxu0 %vm3793_vm0, %v3792_v39 }
 0x174   :  { %v4559_v43 = vpop.f32.mrb[48].mxu1 }
 0x175   :  { %v1701_v44 = vpop.f32.mrb[49].mxu1 }
 0x176   :  { %v4567_v49 = vpop.f32.mrb[50].mxu1 }
 0x177   :  { %v1704_v51 = vpop.f32.mrb[51].mxu1 }
 0x179   :  { %2099 = vmatmul.mubr.bf16.gmra.mrb[84].mxu1 %v3727_v46  ;;  %v3749_v46 = vld [vmem:[%s5125_s0 + $0x444] ss:$20 sps:$4 sm:$0xff]  }
 0x17a   :  { %3097 = vmatmul.mubr.msk.bf16.gmra.mrb[80].mxu0 %vm1457_vm1, %v3728_v47  ;;  %2106 = vmatprep.mubr.bf16.mxu1 %v3729_v50 }
 0x17b   :  { %3100 = vmatprep.mubr.msk.bf16.mxu0 %vm3793_vm0, %v3792_v39 }
 0x17c   :  { %v4575_v53 = vpop.f32.mrb[52].mxu1 }
 0x17d   :  { %v1709_v54 = vpop.f32.mrb[53].mxu1 }
 0x17e   :  { %v4583_v58 = vpop.f32.mrb[54].mxu1  ;;  %v3751_v54 = vld [vmem:[%s5125_s0 + $0x440] ss:$20 sps:$4 sm:$0xff]  }
 0x17f   :  { %v1712_v61 = vpop.f32.mrb[55].mxu1 }
 0x181   :  { %2107 = vmatmul.mubr.bf16.gmra.mrb[88].mxu1 %v3731_v56  ;;  %v3752_v56 = vld [vmem:[%s5125_s0 + $0x420] ss:$20 sps:$4 sm:$0xff]  }
 0x182   :  { %3101 = vmatmul.mubr.msk.bf16.gmra.mrb[84].mxu0 %vm1457_vm1, %v3732_v57  ;;  %2114 = vmatprep.mubr.bf16.mxu1 %v3733_v60  ;;  %v3753_v60 = vld [vmem:[%s5125_s0 + $0x46c] ss:$20 sps:$4 sm:$0xff]  }
 0x183   :  { %3104 = vmatprep.mubr.msk.bf16.mxu0 %vm3793_vm0, %v3792_v39 }
 0x184   :  { %v4591_v63 = vpop.f32.mrb[56].mxu1 }
 0x185   :  { %v1717_v1 = vpop.f32.mrb[57].mxu1 }
 0x186   :  { %v4599_v5 = vpop.f32.mrb[58].mxu1  ;;  %v4671_v1 = vld [vmem:[%s5126_s2] ss:$0 sm:$0xff] }
 0x187   :  { %v1720_v8 = vpop.f32.mrb[59].mxu1 }
 0x188   :  { %v1607_v8 = vadd.f32 %v4671_v1, %v4375_v16 }
 0x189   :  { %2115 = vmatmul.mubr.bf16.gmra.mrb[92].mxu1 %v3735_v2  ;;  %v1604_v2 = vadd.f32 %v4671_v1, %v4367_v13 }
 0x18a   :  { %3105 = vmatmul.mubr.msk.bf16.gmra.mrb[88].mxu0 %vm1457_vm1, %v3736_v4  ;;  %2122 = vmatprep.mubr.bf16.mxu1 %v3737_v7  ;;  %v3755_v7 = vld [vmem:[%s5125_s0 + $0x468] ss:$20 sps:$4 sm:$0xff]  }
 0x18b   :  { %3108 = vmatprep.mubr.msk.bf16.mxu0 %vm3793_vm0, %v3792_v39 }
 0x18c   :  { %v4607_v9 = vpop.f32.mrb[60].mxu1 }
 0x18d   :  { %v1725_v11 = vpop.f32.mrb[61].mxu1 }
 0x18e   :  { %v4615_v15 = vpop.f32.mrb[62].mxu1 }
 0x18f   :  { %v1728_v20 = vpop.f32.mrb[63].mxu1 }
 0x191   :  { %2123 = vmatmul.mubr.bf16.gmra.mrb[96].mxu1 %v3739_v12 }
 0x192   :  { %3109 = vmatmul.mubr.msk.bf16.gmra.mrb[92].mxu0 %vm1457_vm1, %v3740_v0  ;;  %2130 = vmatprep.mubr.bf16.mxu1 %v3741_v17  ;;  %v3756_v0 = vld [vmem:[%s5125_s0 + $0x448] ss:$20 sps:$4 sm:$0xff]  }
 0x193   :  { %3112 = vmatprep.mubr.msk.bf16.mxu0 %vm3793_vm0, %v3792_v39  ;;  %v3757_v17 = vld [vmem:[%s5125_s0 + $0x494] ss:$20 sps:$4 sm:$0xff]  }
 0x194   :  { %v4623_v21 = vpop.f32.mrb[64].mxu1 }
 0x195   :  { %v1733_v24 = vpop.f32.mrb[65].mxu1 }
 0x196   :  { %v4631_v29 = vpop.f32.mrb[66].mxu1 }
 0x197   :  { %v1736_v34 = vpop.f32.mrb[67].mxu1 }
 0x198   :  { %v3759_v34 = vld [vmem:[%s5125_s0 + $0x490] ss:$20 sps:$4 sm:$0xff]  }
 0x199   :  { %2131 = vmatmul.mubr.bf16.gmra.mrb[100].mxu1 %v3743_v25 }
 0x19a   :  { %3113 = vmatmul.mubr.msk.bf16.gmra.mrb[96].mxu0 %vm1457_vm1, %v3744_v27  ;;  %2138 = vmatprep.mubr.bf16.mxu1 %v3745_v31  ;;  %v1612_v27 = vadd.f32 %v4671_v1, %v4383_v19  ;;  %v3761_v19 = vld [vmem:[%s5125_s0 + $0x4bc] ss:$20 sps:$4 sm:$0xff]  }
 0x19b   :  { %3116 = vmatprep.mubr.msk.bf16.mxu0 %vm3793_vm0, %v3792_v39 }
 0x19c   :  { %v4639_v35 = vpop.f32.mrb[68].mxu1 }
 0x19d   :  { %v1741_v36 = vpop.f32.mrb[69].mxu1 }
 0x19e   :  { %v4647_v44 = vpop.f32.mrb[70].mxu1  ;;  %v1615_v36 = vadd.f32 %v4671_v1, %v4391_v23 }
 0x19f   :  { %v1744_v47 = vpop.f32.mrb[71].mxu1 }
 0x1a1   :  { %2139 = vmatmul.mubr.bf16.gmra.mrb[104].mxu1 %v3747_v40 }
 0x1a2   :  { %3117 = vmatmul.mubr.msk.bf16.gmra.mrb[100].mxu0 %vm1457_vm1, %v3748_v42  ;;  %2146 = vmatprep.mubr.bf16.mxu1 %v3749_v46  ;;  %v3760_v46 = vld [vmem:[%s5125_s0 + $0x470] ss:$20 sps:$4 sm:$0xff]  }
 0x1a3   :  { %3120 = vmatprep.mubr.msk.bf16.mxu0 %vm3793_vm0, %v3792_v39 }
 0x1a4   :  { %v4655_v50 = vpop.f32.mrb[72].mxu1 }
 0x1a5   :  { %v1749_v51 = vpop.f32.mrb[73].mxu1 }
 0x1a6   :  { %v4663_v57 = vpop.f32.mrb[74].mxu1 }
 0x1a7   :  { %v1752_v61 = vpop.f32.mrb[75].mxu1 }
 0x1a9   :  { %2147 = vmatmul.mubr.bf16.gmra.mrb[108].mxu1 %v3751_v54 }
 0x1aa   :  { %3121 = vmatmul.mubr.msk.bf16.gmra.mrb[104].mxu0 %vm1457_vm1, %v3752_v56  ;;  %2154 = vmatprep.mubr.bf16.mxu1 %v3753_v60  ;;  %v1620_v60 = vadd.f32 %v4671_v1, %v4399_v26  ;;  %v3765_v26 = vld [vmem:[%s5125_s0 + $0x4e4] ss:$20 sps:$4 sm:$0xff]  }
 0x1ab   :  { %3124 = vmatprep.mubr.msk.bf16.mxu0 %vm3793_vm0, %v3792_v39 }
 0x1ad   :  { %v2261_v4 = vpop.f32.mrb[0].mxu0 }
 0x1ae   :  { %v3197_v11 = vadd.f32 %v2261_v4, %v1604_v2  ;;  %v3018_v12 = vpop.f32.mrb[1].mxu0  ;;  %v3763_v2 = vld [vmem:[%s5125_s0 + $0x4b8] ss:$20 sps:$4 sm:$0xff]   ;;  %v1623_v4 = vadd.f32 %v4671_v1, %v4407_v30 }
 0x1af   :  { %v2264_v20 = vpop.f32.mrb[2].mxu0 }
 0x1b0   :  { %v2556_v13 = vmax.f32 %v3197_v11, 0.0  ;;  %v3199_v24 = vadd.f32 %v2264_v20, %v1607_v8  ;;  %v3019_v25 = vpop.f32.mrb[3].mxu0  ;;  %v3764_v11 = vld [vmem:[%s5125_s0 + $0x498] ss:$20 sps:$4 sm:$0xff]  }
 0x1b1   :  { %2155 = vmatmul.mubr.bf16.gmra.mrb[112].mxu1 %v3755_v7  ;;  %v3767_v25 = vld [vmem:[%s5125_s0 + $0x4e0] ss:$20 sps:$4 sm:$0xff]  }
 0x1b2   :  { %2630 = vst [vmem:[%s5127_s3] sm:$0xff] %v2556_v13  ;;  %v2557_v16 = vmax.f32 %v3199_v24, 0.0  ;;  %3125 = vmatmul.mubr.msk.bf16.gmra.mrb[108].mxu0 %vm1457_vm1, %v3756_v0  ;;  %2162 = vmatprep.mubr.bf16.mxu1 %v3757_v17  ;;  %v1628_v13 = vadd.f32 %v4671_v1, %v4415_v33  ;;  %v3769_v33 = vld [vmem:[%s5125_s0 + $0x50c] ss:$20 sps:$4 sm:$0xff]  }
 0x1b3   :  { %3128 = vmatprep.mubr.msk.bf16.mxu0 %vm3793_vm0, %v3792_v39 }
 0x1b4   :  { %2631 = vst [vmem:[%s5127_s3 + $0x8] sm:$0xff] %v2557_v16  ;;  %v1631_v16 = vadd.f32 %v4671_v1, %v4423_v37 }
 0x1b5   :  { %v2269_v31 = vpop.f32.mrb[4].mxu0 }
 0x1b6   :  { %v3201_v40 = vadd.f32 %v2269_v31, %v1612_v27  ;;  %v3022_v42 = vpop.f32.mrb[5].mxu0 }
 0x1b7   :  { %v2272_v47 = vpop.f32.mrb[6].mxu0 }
 0x1b8   :  { %v2558_v51 = vmax.f32 %v3201_v40, 0.0  ;;  %v3203_v54 = vadd.f32 %v2272_v47, %v1615_v36  ;;  %v3023_v56 = vpop.f32.mrb[7].mxu0 }
 0x1b9   :  { %2163 = vmatmul.mubr.bf16.gmra.mrb[116].mxu1 %v3759_v34  ;;  %v3768_v34 = vld [vmem:[%s5125_s0 + $0x4c0] ss:$20 sps:$4 sm:$0xff]  }
 0x1ba   :  { %2632 = vst [vmem:[%s5127_s3 + $0x10] sm:$0xff] %v2558_v51  ;;  %v2559_v23 = vmax.f32 %v3203_v54, 0.0  ;;  %3129 = vmatmul.mubr.msk.bf16.gmra.mrb[112].mxu0 %vm1457_vm1, %v3760_v46  ;;  %2170 = vmatprep.mubr.bf16.mxu1 %v3761_v19  ;;  %v1636_v19 = vadd.f32 %v4671_v1, %v4431_v41  ;;  %v3771_v51 = vld [vmem:[%s5125_s0 + $0x508] ss:$20 sps:$4 sm:$0xff]   ;;  %v1639_v54 = vadd.f32 %v4671_v1, %v4439_v45 }
 0x1bb   :  { %3132 = vmatprep.mubr.msk.bf16.mxu0 %vm3793_vm0, %v3792_v39  ;;  %v3773_v41 = vld [vmem:[%s5125_s0 + $0x534] ss:$20 sps:$4 sm:$0xff]  }
 0x1bc   :  { %2633 = vst [vmem:[%s5127_s3 + $0x18] sm:$0xff] %v2559_v23 }
 0x1bd   :  { %v2277_v61 = vpop.f32.mrb[8].mxu0 }
 0x1be   :  { %v3205_v7 = vadd.f32 %v2277_v61, %v1620_v60  ;;  %v3026_v8 = vpop.f32.mrb[9].mxu0  ;;  %v3772_v60 = vld [vmem:[%s5125_s0 + $0x4e8] ss:$20 sps:$4 sm:$0xff]  }
 0x1bf   :  { %v2280_v12 = vpop.f32.mrb[10].mxu0  ;;  %v1644_v8 = vadd.f32 %v4671_v1, %v4447_v48  ;;  %v3777_v48 = vld [vmem:[%s5125_s0 + $0x55c] ss:$20 sps:$4 sm:$0xff]  }
 0x1c0   :  { %v2560_v0 = vmax.f32 %v3205_v7, 0.0  ;;  %v3207_v17 = vadd.f32 %v2280_v12, %v1623_v4  ;;  %v3027_v20 = vpop.f32.mrb[11].mxu0  ;;  %v1647_v12 = vadd.f32 %v4671_v1, %v4455_v52 }
 0x1c1   :  { %2171 = vmatmul.mubr.bf16.gmra.mrb[120].mxu1 %v3763_v2  ;;  %v3776_v20 = vld [vmem:[%s5125_s0 + $0x510] ss:$20 sps:$4 sm:$0xff]  }
 0x1c2   :  { %2634 = vst [vmem:[%s5127_s3 + $0x20] sm:$0xff] %v2560_v0  ;;  %v2561_v30 = vmax.f32 %v3207_v17, 0.0  ;;  %3133 = vmatmul.mubr.msk.bf16.gmra.mrb[116].mxu0 %vm1457_vm1, %v3764_v11  ;;  %2178 = vmatprep.mubr.bf16.mxu1 %v3765_v26  ;;  %v3775_v26 = vld [vmem:[%s5125_s0 + $0x530] ss:$20 sps:$4 sm:$0xff]  }
 0x1c3   :  { %3136 = vmatprep.mubr.msk.bf16.mxu0 %vm3793_vm0, %v3792_v39 }
 0x1c4   :  { %2635 = vst [vmem:[%s5127_s3 + $0x28] sm:$0xff] %v2561_v30 }
 0x1c5   :  { %v2285_v24 = vpop.f32.mrb[12].mxu0 }
 0x1c6   :  { %v3209_v27 = vadd.f32 %v2285_v24, %v1628_v13  ;;  %v3030_v31 = vpop.f32.mrb[13].mxu0 }
 0x1c7   :  { %v2288_v36 = vpop.f32.mrb[14].mxu0  ;;  %v3779_v31 = vld [vmem:[%s5125_s0 + $0x558] ss:$20 sps:$4 sm:$0xff]  }
 0x1c8   :  { %v2562_v40 = vmax.f32 %v3209_v27, 0.0  ;;  %v3211_v42 = vadd.f32 %v2288_v36, %v1631_v16  ;;  %v3031_v46 = vpop.f32.mrb[15].mxu0  ;;  %v1652_v16 = vadd.f32 %v4671_v1, %v4463_v55  ;;  %v3781_v55 = vld [vmem:[%s5125_s0 + $0x584] ss:$20 sps:$4 sm:$0xff]  }
 0x1c9   :  { %2179 = vmatmul.mubr.bf16.gmra.mrb[124].mxu1 %v3767_v25 }
 0x1ca   :  { %2636 = vst [vmem:[%s5127_s3 + $0x30] sm:$0xff] %v2562_v40  ;;  %v2563_v37 = vmax.f32 %v3211_v42, 0.0  ;;  %3137 = vmatmul.mubr.msk.bf16.gmra.mrb[120].mxu0 %vm1457_vm1, %v3768_v34  ;;  %2186 = vmatprep.mubr.bf16.mxu1 %v3769_v33  ;;  %v1655_v34 = vadd.f32 %v4671_v1, %v4471_v59  ;;  %v3780_v40 = vld [vmem:[%s5125_s0 + $0x538] ss:$20 sps:$4 sm:$0xff]  }
 0x1cb   :  { %3140 = vmatprep.mubr.msk.bf16.mxu0 %vm3793_vm0, %v3792_v39 }
 0x1cc   :  { %2637 = vst [vmem:[%s5127_s3 + $0x38] sm:$0xff] %v2563_v37 }
 0x1cd   :  { %v2293_v47 = vpop.f32.mrb[16].mxu0 }
 0x1ce   :  { %v3213_v56 = vadd.f32 %v2293_v47, %v1636_v19  ;;  %v3034_v23 = vpop.f32.mrb[17].mxu0  ;;  %v1660_v47 = vadd.f32 %v4671_v1, %v4479_v62  ;;  %v3785_v62 = vld [vmem:[%s5125_s0 + $0x5ac] ss:$20 sps:$4 sm:$0xff]  }
 0x1cf   :  { %v2296_v61 = vpop.f32.mrb[18].mxu0 }
 0x1d0   :  { %v2564_v2 = vmax.f32 %v3213_v56, 0.0  ;;  %v3215_v4 = vadd.f32 %v2296_v61, %v1639_v54  ;;  %v3035_v7 = vpop.f32.mrb[19].mxu0  ;;  %v3783_v54 = vld [vmem:[%s5125_s0 + $0x580] ss:$20 sps:$4 sm:$0xff]   ;;  %v1663_v56 = vadd.f32 %v4671_v1, %v4487_v3 }
 0x1d1   :  { %2187 = vmatmul.mubr.bf16.gmra.mrb[128].mxu1 %v3771_v51 }
 0x1d2   :  { %2638 = vst [vmem:[%s5127_s3 + $0x40] sm:$0xff] %v2564_v2  ;;  %v2565_v45 = vmax.f32 %v3215_v4, 0.0  ;;  %3141 = vmatmul.mubr.msk.bf16.gmra.mrb[124].mxu0 %vm1457_vm1, %v3772_v60  ;;  %2194 = vmatprep.mubr.bf16.mxu1 %v3773_v41  ;;  %v3784_v41 = vld [vmem:[%s5125_s0 + $0x560] ss:$20 sps:$4 sm:$0xff]  }
 0x1d3   :  { %3144 = vmatprep.mubr.msk.bf16.mxu0 %vm3793_vm0, %v3792_v39 }
 0x1d4   :  { %2639 = vst [vmem:[%s5127_s3 + $0x48] sm:$0xff] %v2565_v45  ;;  %v1668_v45 = vadd.f32 %v4671_v1, %v4495_v6 }
 0x1d5   :  { %v2301_v11 = vpop.f32.mrb[20].mxu0 }
 0x1d6   :  { %v3217_v0 = vadd.f32 %v2301_v11, %v1644_v8  ;;  %v3038_v17 = vpop.f32.mrb[21].mxu0  ;;  %v3787_v11 = vld [vmem:[%s5125_s0 + $0x5a8] ss:$20 sps:$4 sm:$0xff]  }
 0x1d7   :  { %v2304_v30 = vpop.f32.mrb[22].mxu0  ;;  %v3788_v17 = vld [vmem:[%s5125_s0 + $0x588] ss:$20 sps:$4 sm:$0xff]  }
 0x1d8   :  { %v2566_v13 = vmax.f32 %v3217_v0, 0.0  ;;  %v3219_v24 = vadd.f32 %v2304_v30, %v1647_v12  ;;  %v3039_v25 = vpop.f32.mrb[23].mxu0 }
 0x1d9   :  { %2195 = vmatmul.mubr.bf16.gmra.mrb[132].mxu1 %v3775_v26  ;;  %v1671_v26 = vadd.f32 %v4671_v1, %v4503_v10  ;;  %v1676_v10 = vadd.f32 %v4671_v1, %v4511_v14  ;;  %v1679_v25 = vadd.f32 %v4671_v1, %v4519_v18  ;;  %v1684_v18 = vadd.f32 %v4671_v1, %v4527_v22 }
 0x1da   :  { %2640 = vst [vmem:[%s5127_s3 + $0x50] sm:$0xff] %v2566_v13  ;;  %v2567_v52 = vmax.f32 %v3219_v24, 0.0  ;;  %3145 = vmatmul.mubr.msk.bf16.gmra.mrb[128].mxu0 %vm1457_vm1, %v3776_v20  ;;  %2202 = vmatprep.mubr.bf16.mxu1 %v3777_v48  ;;  %v1692_v22 = vadd.f32 %v4671_v1, %v4543_v32  ;;  %v1700_v32 = vadd.f32 %v4671_v1, %v4559_v43 }
 0x1db   :  { %3148 = vmatprep.mubr.msk.bf16.mxu0 %vm3793_vm0, %v3792_v39  ;;  %v1708_v43 = vadd.f32 %v4671_v1, %v4575_v53  ;;  %v1716_v53 = vadd.f32 %v4671_v1, %v4591_v63  ;;  %v1724_v63 = vadd.f32 %v4671_v1, %v4607_v9  ;;  %v1732_v9 = vadd.f32 %v4671_v1, %v4623_v21 }
 0x1dc   :  { %2641 = vst [vmem:[%s5127_s3 + $0x58] sm:$0xff] %v2567_v52  ;;  %v1740_v21 = vadd.f32 %v4671_v1, %v4639_v35  ;;  %v1748_v35 = vadd.f32 %v4671_v1, %v4655_v50 }
 0x1dd   :  { %v2309_v27 = vpop.f32.mrb[24].mxu0 }
 0x1de   :  { %v3221_v33 = vadd.f32 %v2309_v27, %v1652_v16  ;;  %v3042_v36 = vpop.f32.mrb[25].mxu0  ;;  %v3789_v27 = vld [vmem:[%s5125_s0 + $0x5b0] ss:$20 sps:$4 sm:$0xff]  }
 0x1df   :  { %v2312_v42 = vpop.f32.mrb[26].mxu0 }
 0x1e0   :  { %v2568_v46 = vmax.f32 %v3221_v33, 0.0  ;;  %v3223_v37 = vadd.f32 %v2312_v42, %v1655_v34  ;;  %v3043_v19 = vpop.f32.mrb[27].mxu0 }
 0x1e1   :  { %2203 = vmatmul.mubr.bf16.gmra.mrb[136].mxu1 %v3779_v31 }
 0x1e2   :  { %2642 = vst [vmem:[%s5127_s3 + $0x60] sm:$0xff] %v2568_v46  ;;  %v2569_v59 = vmax.f32 %v3223_v37, 0.0  ;;  %3149 = vmatmul.mubr.msk.bf16.gmra.mrb[132].mxu0 %vm1457_vm1, %v3780_v40  ;;  %2210 = vmatprep.mubr.bf16.mxu1 %v3781_v55  ;;  %v1687_v40 = vadd.f32 %v4671_v1, %v4535_v28  ;;  %v1695_v28 = vadd.f32 %v4671_v1, %v4551_v38 }
 0x1e3   :  { %3152 = vmatprep.mubr.msk.bf16.mxu0 %vm3793_vm0, %v3792_v39  ;;  %v1703_v38 = vadd.f32 %v4671_v1, %v4567_v49  ;;  %v1711_v49 = vadd.f32 %v4671_v1, %v4583_v58  ;;  %v1719_v58 = vadd.f32 %v4671_v1, %v4599_v5  ;;  %v1727_v5 = vadd.f32 %v4671_v1, %v4615_v15 }
 0x1e4   :  { %2643 = vst [vmem:[%s5127_s3 + $0x68] sm:$0xff] %v2569_v59  ;;  %v1735_v15 = vadd.f32 %v4671_v1, %v4631_v29  ;;  %v1743_v29 = vadd.f32 %v4671_v1, %v4647_v44 }
 0x1e5   :  { %v2317_v51 = vpop.f32.mrb[28].mxu0 }
 0x1e6   :  { %v3225_v23 = vadd.f32 %v2317_v51, %v1660_v47  ;;  %v3046_v60 = vpop.f32.mrb[29].mxu0 }
 0x1e7   :  { %v2320_v61 = vpop.f32.mrb[30].mxu0 }
 0x1e8   :  { %v2570_v2 = vmax.f32 %v3225_v23, 0.0  ;;  %v3227_v4 = vadd.f32 %v2320_v61, %v1663_v56  ;;  %v3047_v7 = vpop.f32.mrb[31].mxu0 }
 0x1e9   :  { %2211 = vmatmul.mubr.bf16.gmra.mrb[140].mxu1 %v3783_v54 }
 0x1ea   :  { %2644 = vst [vmem:[%s5127_s3 + $0x70] sm:$0xff] %v2570_v2  ;;  %v2571_v3 = vmax.f32 %v3227_v4, 0.0  ;;  %3153 = vmatmul.mubr.msk.bf16.gmra.mrb[136].mxu0 %vm1457_vm1, %v3784_v41  ;;  %2218 = vmatprep.mubr.bf16.mxu1 %v3785_v62 }
 0x1eb   :  { %3156 = vmatprep.mubr.msk.bf16.mxu0 %vm3793_vm0, %v3792_v39 }
 0x1ec   :  { %2645 = vst [vmem:[%s5127_s3 + $0x78] sm:$0xff] %v2571_v3 }
 0x1ed   :  { %v2325_v8 = vpop.f32.mrb[32].mxu0 }
 0x1ee   :  { %v3229_v12 = vadd.f32 %v2325_v8, %v1668_v45  ;;  %v3050_v0 = vpop.f32.mrb[33].mxu0 }
 0x1ef   :  { %v2328_v20 = vpop.f32.mrb[34].mxu0 }
 0x1f0   :  { %v2572_v6 = vmax.f32 %v3229_v12, 0.0  ;;  %v3231_v48 = vadd.f32 %v2328_v20, %v1671_v26  ;;  %v3051_v30 = vpop.f32.mrb[35].mxu0 }
 0x1f1   :  { %2219 = vmatmul.mubr.bf16.gmra.mrb[144].mxu1 %v3787_v11 }
 0x1f2   :  { %2646 = vst [vmem:[%s5127_s3 + $0x80] sm:$0xff] %v2572_v6  ;;  %v2573_v13 = vmax.f32 %v3231_v48, 0.0  ;;  %3157 = vmatmul.mubr.msk.bf16.gmra.mrb[140].mxu0 %vm1457_vm1, %v3788_v17 }
 0x1f3   :  { %3160 = vmatprep.mubr.msk.bf16.mxu0 %vm3793_vm0, %v3792_v39 }
 0x1f4   :  { %2647 = vst [vmem:[%s5127_s3 + $0x88] sm:$0xff] %v2573_v13 }
 0x1f5   :  { %v2333_v24 = vpop.f32.mrb[36].mxu0 }
 0x1f6   :  { %v3233_v52 = vadd.f32 %v2333_v24, %v1676_v10  ;;  %v3054_v16 = vpop.f32.mrb[37].mxu0 }
 0x1f7   :  { %v2336_v31 = vpop.f32.mrb[38].mxu0 }
 0x1f8   :  { %v2574_v34 = vmax.f32 %v3233_v52, 0.0  ;;  %v3235_v39 = vadd.f32 %v2336_v31, %v1679_v25  ;;  %v3055_v33 = vpop.f32.mrb[39].mxu0 }
 0x1fa   :  { %2648 = vst [vmem:[%s5127_s3 + $0x90] sm:$0xff] %v2574_v34  ;;  %v2575_v14 = vmax.f32 %v3235_v39, 0.0  ;;  %3161 = vmatmul.mubr.msk.bf16.gmra.mrb[144].mxu0 %vm1457_vm1, %v3789_v27 }
 0x1fc   :  { %2649 = vst [vmem:[%s5127_s3 + $0x98] sm:$0xff] %v2575_v14 }
 0x1fd   :  { %v2341_v36 = vpop.f32.mrb[40].mxu0 }
 0x1fe   :  { %v3237_v55 = vadd.f32 %v2341_v36, %v1684_v18  ;;  %v3058_v42 = vpop.f32.mrb[41].mxu0 }
 0x1ff   :  { %v2344_v46 = vpop.f32.mrb[42].mxu0 }
 0x200   :  { %v2576_v37 = vmax.f32 %v3237_v55, 0.0  ;;  %v3239_v19 = vadd.f32 %v2344_v46, %v1687_v40  ;;  %v3059_v59 = vpop.f32.mrb[43].mxu0 }
 0x202   :  { %2650 = vst [vmem:[%s5127_s3 + $0xa0] sm:$0xff] %v2576_v37  ;;  %v2577_v47 = vmax.f32 %v3239_v19, 0.0 }
 0x204   :  { %2651 = vst [vmem:[%s5127_s3 + $0xa8] sm:$0xff] %v2577_v47 }
 0x205   :  { %v2349_v51 = vpop.f32.mrb[44].mxu0 }
 0x206   :  { %v3241_v54 = vadd.f32 %v2349_v51, %v1692_v22  ;;  %v3062_v56 = vpop.f32.mrb[45].mxu0 }
 0x207   :  { %v2352_v23 = vpop.f32.mrb[46].mxu0 }
 0x208   :  { %v2578_v60 = vmax.f32 %v3241_v54, 0.0  ;;  %v3243_v41 = vadd.f32 %v2352_v23, %v1695_v28  ;;  %v3063_v62 = vpop.f32.mrb[47].mxu0 }
 0x20a   :  { %2652 = vst [vmem:[%s5127_s3 + $0xb0] sm:$0xff] %v2578_v60  ;;  %v2579_v61 = vmax.f32 %v3243_v41, 0.0 }
 0x20c   :  { %2653 = vst [vmem:[%s5127_s3 + $0xb8] sm:$0xff] %v2579_v61 }
 0x20d   :  { %v2357_v2 = vpop.f32.mrb[48].mxu0 }
 0x20e   :  { %v3245_v4 = vadd.f32 %v2357_v2, %v1700_v32  ;;  %v3066_v7 = vpop.f32.mrb[49].mxu0 }
 0x20f   :  { %v2360_v3 = vpop.f32.mrb[50].mxu0 }
 0x210   :  { %v2580_v45 = vmax.f32 %v3245_v4, 0.0  ;;  %v3247_v8 = vadd.f32 %v2360_v3, %v1703_v38  ;;  %v3067_v11 = vpop.f32.mrb[51].mxu0  ;;  %v1751_v4 = vadd.f32 %v4671_v1, %v4663_v57 }
 0x212   :  { %2654 = vst [vmem:[%s5127_s3 + $0xc0] sm:$0xff] %v2580_v45  ;;  %v2581_v26 = vmax.f32 %v3247_v8, 0.0 }
 0x214   :  { %2655 = vst [vmem:[%s5127_s3 + $0xc8] sm:$0xff] %v2581_v26 }
 0x215   :  { %v2365_v12 = vpop.f32.mrb[52].mxu0 }
 0x216   :  { %v3249_v0 = vadd.f32 %v2365_v12, %v1708_v43  ;;  %v3070_v17 = vpop.f32.mrb[53].mxu0 }
 0x217   :  { %v2368_v20 = vpop.f32.mrb[54].mxu0 }
 0x218   :  { %v2582_v6 = vmax.f32 %v3249_v0, 0.0  ;;  %v3251_v48 = vadd.f32 %v2368_v20, %v1711_v49  ;;  %v3071_v30 = vpop.f32.mrb[55].mxu0 }
 0x21a   :  { %2656 = vst [vmem:[%s5127_s3 + $0xd0] sm:$0xff] %v2582_v6  ;;  %v2583_v13 = vmax.f32 %v3251_v48, 0.0 }
 0x21c   :  { %2657 = vst [vmem:[%s5127_s3 + $0xd8] sm:$0xff] %v2583_v13 }
 0x21d   :  { %v2373_v10 = vpop.f32.mrb[56].mxu0 }
 0x21e   :  { %v3253_v24 = vadd.f32 %v2373_v10, %v1716_v53  ;;  %v3074_v25 = vpop.f32.mrb[57].mxu0 }
 0x21f   :  { %v2376_v52 = vpop.f32.mrb[58].mxu0 }
 0x220   :  { %v2584_v16 = vmax.f32 %v3253_v24, 0.0  ;;  %v3255_v27 = vadd.f32 %v2376_v52, %v1719_v58  ;;  %v3075_v31 = vpop.f32.mrb[59].mxu0 }
 0x222   :  { %2658 = vst [vmem:[%s5127_s3 + $0xe0] sm:$0xff] %v2584_v16  ;;  %v2585_v34 = vmax.f32 %v3255_v27, 0.0 }
 0x224   :  { %2659 = vst [vmem:[%s5127_s3 + $0xe8] sm:$0xff] %v2585_v34 }
 0x225   :  { %v2381_v39 = vpop.f32.mrb[60].mxu0 }
 0x226   :  { %v3257_v33 = vadd.f32 %v2381_v39, %v1724_v63  ;;  %v3078_v14 = vpop.f32.mrb[61].mxu0 }
 0x227   :  { %v2384_v18 = vpop.f32.mrb[62].mxu0 }
 0x228   :  { %v2586_v36 = vmax.f32 %v3257_v33, 0.0  ;;  %v3259_v40 = vadd.f32 %v2384_v18, %v1727_v5  ;;  %v3079_v55 = vpop.f32.mrb[63].mxu0 }
 0x22a   :  { %2660 = vst [vmem:[%s5127_s3 + $0xf0] sm:$0xff] %v2586_v36  ;;  %v2587_v42 = vmax.f32 %v3259_v40, 0.0 }
 0x22c   :  { %2661 = vst [vmem:[%s5127_s3 + $0xf8] sm:$0xff] %v2587_v42 }
 0x22d   :  { %v2389_v46 = vpop.f32.mrb[64].mxu0 }
 0x22e   :  { %v3261_v37 = vadd.f32 %v2389_v46, %v1732_v9  ;;  %v3082_v19 = vpop.f32.mrb[65].mxu0 }
 0x22f   :  { %v2392_v59 = vpop.f32.mrb[66].mxu0 }
 0x230   :  { %v2588_v47 = vmax.f32 %v3261_v37, 0.0  ;;  %v3263_v22 = vadd.f32 %v2392_v59, %v1735_v15  ;;  %v3083_v51 = vpop.f32.mrb[67].mxu0 }
 0x232   :  { %2662 = vst [vmem:[%s5127_s3 + $0x100] sm:$0xff] %v2588_v47  ;;  %v2589_v28 = vmax.f32 %v3263_v22, 0.0 }
 0x234   :  { %2663 = vst [vmem:[%s5127_s3 + $0x108] sm:$0xff] %v2589_v28 }
 0x235   :  { %v2397_v54 = vpop.f32.mrb[68].mxu0 }
 0x236   :  { %v3265_v56 = vadd.f32 %v2397_v54, %v1740_v21  ;;  %v3086_v23 = vpop.f32.mrb[69].mxu0 }
 0x237   :  { %v2400_v60 = vpop.f32.mrb[70].mxu0 }
 0x238   :  { %v2590_v41 = vmax.f32 %v3265_v56, 0.0  ;;  %v3267_v62 = vadd.f32 %v2400_v60, %v1743_v29  ;;  %v3087_v61 = vpop.f32.mrb[71].mxu0 }
 0x23a   :  { %2664 = vst [vmem:[%s5127_s3 + $0x110] sm:$0xff] %v2590_v41  ;;  %v2591_v32 = vmax.f32 %v3267_v62, 0.0 }
 0x23c   :  { %2665 = vst [vmem:[%s5127_s3 + $0x118] sm:$0xff] %v2591_v32  ;;  %v2084_v2 = vpop.f32.mrb[76].mxu1 }
 0x23d   :  { %v2405_v44 = vpop.f32.mrb[72].mxu0  ;;  %v2086_v38 = vpop.f32.mrb[77].mxu1  ;;  %v3272_v49 = vadd.f32 %v4671_v1, %v2084_v2 }
 0x23e   :  { %v3269_v7 = vadd.f32 %v2405_v44, %v1748_v35  ;;  %v3090_v3 = vpop.f32.mrb[73].mxu0  ;;  %v2087_v45 = vpop.f32.mrb[78].mxu1 }
 0x23f   :  { %v2408_v8 = vpop.f32.mrb[74].mxu0  ;;  %v2089_v11 = vpop.f32.mrb[79].mxu1  ;;  %v3274_v20 = vadd.f32 %v4671_v1, %v2087_v45 }
 0x240   :  { %v2592_v26 = vmax.f32 %v3269_v7, 0.0  ;;  %v3271_v43 = vadd.f32 %v2408_v8, %v1751_v4  ;;  %v3091_v12 = vpop.f32.mrb[75].mxu0 }
 0x242   :  { %2666 = vst [vmem:[%s5127_s3 + $0x120] sm:$0xff] %v2592_v26  ;;  %v2593_v50 = vmax.f32 %v3271_v43, 0.0 }
 0x244   :  { %2667 = vst [vmem:[%s5127_s3 + $0x128] sm:$0xff] %v2593_v50  ;;  %v2092_v57 = vpop.f32.mrb[80].mxu1 }
 0x245   :  { %v2413_v0 = vpop.f32.mrb[76].mxu0  ;;  %v2094_v17 = vpop.f32.mrb[81].mxu1  ;;  %v3276_v52 = vadd.f32 %v4671_v1, %v2092_v57 }
 0x246   :  { %v3273_v6 = vadd.f32 %v3272_v49, %v2413_v0  ;;  %v3094_v48 = vpop.f32.mrb[77].mxu0  ;;  %v2095_v30 = vpop.f32.mrb[82].mxu1 }
 0x247   :  { %v2416_v13 = vpop.f32.mrb[78].mxu0  ;;  %v2097_v53 = vpop.f32.mrb[83].mxu1  ;;  %v3278_v34 = vadd.f32 %v4671_v1, %v2095_v30 }
 0x248   :  { %v2594_v10 = vmax.f32 %v3273_v6, 0.0  ;;  %v3275_v58 = vadd.f32 %v3274_v20, %v2416_v13  ;;  %v3095_v24 = vpop.f32.mrb[79].mxu0 }
 0x24a   :  { %2668 = vst [vmem:[%s5127_s3 + $0x130] sm:$0xff] %v2594_v10  ;;  %v2595_v25 = vmax.f32 %v3275_v58, 0.0 }
 0x24c   :  { %2669 = vst [vmem:[%s5127_s3 + $0x138] sm:$0xff] %v2595_v25  ;;  %v2100_v16 = vpop.f32.mrb[84].mxu1 }
 0x24d   :  { %v2421_v27 = vpop.f32.mrb[80].mxu0  ;;  %v2102_v31 = vpop.f32.mrb[85].mxu1  ;;  %v3280_v42 = vadd.f32 %v4671_v1, %v2100_v16 }
 0x24e   :  { %v3277_v63 = vadd.f32 %v3276_v52, %v2421_v27  ;;  %v3098_v39 = vpop.f32.mrb[81].mxu0  ;;  %v2103_v5 = vpop.f32.mrb[86].mxu1 }
 0x24f   :  { %v2424_v33 = vpop.f32.mrb[82].mxu0  ;;  %v2105_v14 = vpop.f32.mrb[87].mxu1  ;;  %v3282_v37 = vadd.f32 %v4671_v1, %v2103_v5 }
 0x250   :  { %v2596_v18 = vmax.f32 %v3277_v63, 0.0  ;;  %v3279_v36 = vadd.f32 %v3278_v34, %v2424_v33  ;;  %v3099_v40 = vpop.f32.mrb[83].mxu0 }
 0x252   :  { %2670 = vst [vmem:[%s5127_s3 + $0x140] sm:$0xff] %v2596_v18  ;;  %v2597_v55 = vmax.f32 %v3279_v36, 0.0 }
 0x254   :  { %2671 = vst [vmem:[%s5127_s3 + $0x148] sm:$0xff] %v2597_v55  ;;  %v2108_v9 = vpop.f32.mrb[88].mxu1 }
 0x255   :  { %v2429_v46 = vpop.f32.mrb[84].mxu0  ;;  %v2110_v15 = vpop.f32.mrb[89].mxu1  ;;  %v3284_v56 = vadd.f32 %v4671_v1, %v2108_v9 }
 0x256   :  { %v3281_v19 = vadd.f32 %v3280_v42, %v2429_v46  ;;  %v3102_v59 = vpop.f32.mrb[85].mxu0  ;;  %v2111_v47 = vpop.f32.mrb[90].mxu1 }
 0x257   :  { %v2432_v22 = vpop.f32.mrb[86].mxu0  ;;  %v2113_v51 = vpop.f32.mrb[91].mxu1  ;;  %v3286_v62 = vadd.f32 %v4671_v1, %v2111_v47 }
 0x258   :  { %v2598_v28 = vmax.f32 %v3281_v19, 0.0  ;;  %v3283_v21 = vadd.f32 %v3282_v37, %v2432_v22  ;;  %v3103_v54 = vpop.f32.mrb[87].mxu0 }
 0x25a   :  { %2672 = vst [vmem:[%s5127_s3 + $0x150] sm:$0xff] %v2598_v28  ;;  %v2599_v29 = vmax.f32 %v3283_v21, 0.0 }
 0x25c   :  { %2673 = vst [vmem:[%s5127_s3 + $0x158] sm:$0xff] %v2599_v29  ;;  %v2116_v23 = vpop.f32.mrb[92].mxu1 }
 0x25d   :  { %v2437_v60 = vpop.f32.mrb[88].mxu0  ;;  %v2118_v41 = vpop.f32.mrb[93].mxu1  ;;  %v3288_v45 = vadd.f32 %v4671_v1, %v2116_v23 }
 0x25e   :  { %v3285_v61 = vadd.f32 %v3284_v56, %v2437_v60  ;;  %v3106_v32 = vpop.f32.mrb[89].mxu0  ;;  %v2119_v35 = vpop.f32.mrb[94].mxu1 }
 0x25f   :  { %v2440_v2 = vpop.f32.mrb[90].mxu0  ;;  %v2121_v44 = vpop.f32.mrb[95].mxu1  ;;  %v3290_v43 = vadd.f32 %v4671_v1, %v2119_v35 }
 0x260   :  { %v2600_v38 = vmax.f32 %v3285_v61, 0.0  ;;  %v3287_v4 = vadd.f32 %v3286_v62, %v2440_v2  ;;  %v3107_v7 = vpop.f32.mrb[91].mxu0 }
 0x262   :  { %2674 = vst [vmem:[%s5127_s3 + $0x160] sm:$0xff] %v2600_v38  ;;  %v2601_v3 = vmax.f32 %v3287_v4, 0.0 }
 0x264   :  { %2675 = vst [vmem:[%s5127_s3 + $0x168] sm:$0xff] %v2601_v3  ;;  %v2124_v8 = vpop.f32.mrb[96].mxu1 }
 0x265   :  { %v2445_v11 = vpop.f32.mrb[92].mxu0  ;;  %v2126_v26 = vpop.f32.mrb[97].mxu1  ;;  %v3292_v30 = vadd.f32 %v4671_v1, %v2124_v8 }
 0x266   :  { %v3289_v12 = vadd.f32 %v3288_v45, %v2445_v11  ;;  %v3110_v50 = vpop.f32.mrb[93].mxu0  ;;  %v2127_v49 = vpop.f32.mrb[98].mxu1 }
 0x267   :  { %v2448_v57 = vpop.f32.mrb[94].mxu0  ;;  %v2129_v0 = vpop.f32.mrb[99].mxu1  ;;  %v3294_v58 = vadd.f32 %v4671_v1, %v2127_v49 }
 0x268   :  { %v2602_v17 = vmax.f32 %v3289_v12, 0.0  ;;  %v3291_v20 = vadd.f32 %v3290_v43, %v2448_v57  ;;  %v3111_v6 = vpop.f32.mrb[95].mxu0 }
 0x26a   :  { %2676 = vst [vmem:[%s5127_s3 + $0x170] sm:$0xff] %v2602_v17  ;;  %v2603_v48 = vmax.f32 %v3291_v20, 0.0 }
 0x26c   :  { %2677 = vst [vmem:[%s5127_s3 + $0x178] sm:$0xff] %v2603_v48  ;;  %v2132_v13 = vpop.f32.mrb[100].mxu1 }
 0x26d   :  { %v2453_v53 = vpop.f32.mrb[96].mxu0  ;;  %v2134_v10 = vpop.f32.mrb[101].mxu1  ;;  %v3296_v5 = vadd.f32 %v4671_v1, %v2132_v13 }
 0x26e   :  { %v3293_v24 = vadd.f32 %v3292_v30, %v2453_v53  ;;  %v3114_v25 = vpop.f32.mrb[97].mxu0  ;;  %v2135_v52 = vpop.f32.mrb[102].mxu1 }
 0x26f   :  { %v2456_v16 = vpop.f32.mrb[98].mxu0  ;;  %v2137_v27 = vpop.f32.mrb[103].mxu1  ;;  %v3298_v36 = vadd.f32 %v4671_v1, %v2135_v52 }
 0x270   :  { %v2604_v31 = vmax.f32 %v3293_v24, 0.0  ;;  %v3295_v34 = vadd.f32 %v3294_v58, %v2456_v16  ;;  %v3115_v63 = vpop.f32.mrb[99].mxu0 }
 0x272   :  { %2678 = vst [vmem:[%s5127_s3 + $0x180] sm:$0xff] %v2604_v31  ;;  %v2605_v39 = vmax.f32 %v3295_v34, 0.0 }
 0x274   :  { %2679 = vst [vmem:[%s5127_s3 + $0x188] sm:$0xff] %v2605_v39  ;;  %v2140_v33 = vpop.f32.mrb[104].mxu1 }
 0x275   :  { %v2461_v14 = vpop.f32.mrb[100].mxu0  ;;  %v2142_v18 = vpop.f32.mrb[105].mxu1  ;;  %v3300_v47 = vadd.f32 %v4671_v1, %v2140_v33 }
 0x276   :  { %v3297_v40 = vadd.f32 %v3296_v5, %v2461_v14  ;;  %v3118_v55 = vpop.f32.mrb[101].mxu0  ;;  %v2143_v42 = vpop.f32.mrb[106].mxu1 }
 0x277   :  { %v2464_v9 = vpop.f32.mrb[102].mxu0  ;;  %v2145_v46 = vpop.f32.mrb[107].mxu1  ;;  %v3302_v21 = vadd.f32 %v4671_v1, %v2143_v42 }
 0x278   :  { %v2606_v15 = vmax.f32 %v3297_v40, 0.0  ;;  %v3299_v37 = vadd.f32 %v3298_v36, %v2464_v9  ;;  %v3119_v19 = vpop.f32.mrb[103].mxu0 }
 0x27a   :  { %2680 = vst [vmem:[%s5127_s3 + $0x190] sm:$0xff] %v2606_v15  ;;  %v2607_v59 = vmax.f32 %v3299_v37, 0.0 }
 0x27c   :  { %2681 = vst [vmem:[%s5127_s3 + $0x198] sm:$0xff] %v2607_v59  ;;  %v2148_v22 = vpop.f32.mrb[108].mxu1 }
 0x27d   :  { %v2469_v51 = vpop.f32.mrb[104].mxu0  ;;  %v2150_v28 = vpop.f32.mrb[109].mxu1  ;;  %v3304_v35 = vadd.f32 %v4671_v1, %v2148_v22 }
 0x27e   :  { %v3301_v54 = vadd.f32 %v3300_v47, %v2469_v51  ;;  %v3122_v29 = vpop.f32.mrb[105].mxu0  ;;  %v2151_v56 = vpop.f32.mrb[110].mxu1 }
 0x27f   :  { %v2472_v23 = vpop.f32.mrb[106].mxu0  ;;  %v2153_v60 = vpop.f32.mrb[111].mxu1  ;;  %v3306_v4 = vadd.f32 %v4671_v1, %v2151_v56 }
 0x280   :  { %v2608_v41 = vmax.f32 %v3301_v54, 0.0  ;;  %v3303_v62 = vadd.f32 %v3302_v21, %v2472_v23  ;;  %v3123_v61 = vpop.f32.mrb[107].mxu0 }
 0x282   :  { %2682 = vst [vmem:[%s5127_s3 + $0x1a0] sm:$0xff] %v2608_v41  ;;  %v2609_v32 = vmax.f32 %v3303_v62, 0.0 }
 0x284   :  { %2683 = vst [vmem:[%s5127_s3 + $0x1a8] sm:$0xff] %v2609_v32  ;;  %v2156_v2 = vpop.f32.mrb[112].mxu1 }
 0x285   :  { %v2477_v44 = vpop.f32.mrb[108].mxu0  ;;  %v2158_v38 = vpop.f32.mrb[113].mxu1  ;;  %v3308_v49 = vadd.f32 %v4671_v1, %v2156_v2 }
 0x286   :  { %v3305_v7 = vadd.f32 %v3304_v35, %v2477_v44  ;;  %v3126_v3 = vpop.f32.mrb[109].mxu0  ;;  %v2159_v45 = vpop.f32.mrb[114].mxu1 }
 0x287   :  { %v2480_v8 = vpop.f32.mrb[110].mxu0  ;;  %v2161_v11 = vpop.f32.mrb[115].mxu1  ;;  %v3310_v20 = vadd.f32 %v4671_v1, %v2159_v45 }
 0x288   :  { %v2610_v26 = vmax.f32 %v3305_v7, 0.0  ;;  %v3307_v43 = vadd.f32 %v3306_v4, %v2480_v8  ;;  %v3127_v12 = vpop.f32.mrb[111].mxu0 }
 0x28a   :  { %2684 = vst [vmem:[%s5127_s3 + $0x1b0] sm:$0xff] %v2610_v26  ;;  %v2611_v50 = vmax.f32 %v3307_v43, 0.0  ;;  %v5083_v43 = vld [vmem:[%s5126_s2] ss:$0 sm:$0xff] }
 0x28c   :  { %2685 = vst [vmem:[%s5127_s3 + $0x1b8] sm:$0xff] %v2611_v50  ;;  %v2164_v57 = vpop.f32.mrb[116].mxu1 }
 0x28d   :  { %v2485_v0 = vpop.f32.mrb[112].mxu0  ;;  %v2166_v17 = vpop.f32.mrb[117].mxu1  ;;  %v3312_v52 = vadd.f32 %v4671_v1, %v2164_v57 }
 0x28e   :  { %v3309_v6 = vadd.f32 %v3308_v49, %v2485_v0  ;;  %v3130_v48 = vpop.f32.mrb[113].mxu0  ;;  %v2167_v30 = vpop.f32.mrb[118].mxu1 }
 0x28f   :  { %v2488_v13 = vpop.f32.mrb[114].mxu0  ;;  %v2169_v53 = vpop.f32.mrb[119].mxu1  ;;  %v3314_v34 = vadd.f32 %v4671_v1, %v2167_v30 }
 0x290   :  { %v2612_v10 = vmax.f32 %v3309_v6, 0.0  ;;  %v3311_v58 = vadd.f32 %v3310_v20, %v2488_v13  ;;  %v3131_v24 = vpop.f32.mrb[115].mxu0 }
 0x292   :  { %2686 = vst [vmem:[%s5127_s3 + $0x1c0] sm:$0xff] %v2612_v10  ;;  %v2613_v25 = vmax.f32 %v3311_v58, 0.0 }
 0x294   :  { %2687 = vst [vmem:[%s5127_s3 + $0x1c8] sm:$0xff] %v2613_v25  ;;  %v2172_v16 = vpop.f32.mrb[120].mxu1 }
 0x295   :  { %v2493_v27 = vpop.f32.mrb[116].mxu0  ;;  %v2174_v31 = vpop.f32.mrb[121].mxu1  ;;  %v3316_v42 = vadd.f32 %v4671_v1, %v2172_v16 }
 0x296   :  { %v3313_v63 = vadd.f32 %v3312_v52, %v2493_v27  ;;  %v3134_v39 = vpop.f32.mrb[117].mxu0  ;;  %v2175_v5 = vpop.f32.mrb[122].mxu1 }
 0x297   :  { %v2496_v33 = vpop.f32.mrb[118].mxu0  ;;  %v2177_v14 = vpop.f32.mrb[123].mxu1  ;;  %v3318_v37 = vadd.f32 %v4671_v1, %v2175_v5 }
 0x298   :  { %v2614_v18 = vmax.f32 %v3313_v63, 0.0  ;;  %v3315_v36 = vadd.f32 %v3314_v34, %v2496_v33  ;;  %v3135_v40 = vpop.f32.mrb[119].mxu0 }
 0x29a   :  { %2688 = vst [vmem:[%s5127_s3 + $0x1d0] sm:$0xff] %v2614_v18  ;;  %v2615_v55 = vmax.f32 %v3315_v36, 0.0 }
 0x29c   :  { %2689 = vst [vmem:[%s5127_s3 + $0x1d8] sm:$0xff] %v2615_v55  ;;  %v2180_v9 = vpop.f32.mrb[124].mxu1 }
 0x29d   :  { %v2501_v46 = vpop.f32.mrb[120].mxu0  ;;  %v2182_v15 = vpop.f32.mrb[125].mxu1  ;;  %v3320_v56 = vadd.f32 %v4671_v1, %v2180_v9 }
 0x29e   :  { %v3317_v19 = vadd.f32 %v3316_v42, %v2501_v46  ;;  %v3138_v59 = vpop.f32.mrb[121].mxu0  ;;  %v2183_v47 = vpop.f32.mrb[126].mxu1 }
 0x29f   :  { %v2504_v22 = vpop.f32.mrb[122].mxu0  ;;  %v2185_v51 = vpop.f32.mrb[127].mxu1  ;;  %v3322_v62 = vadd.f32 %v4671_v1, %v2183_v47 }
 0x2a0   :  { %v2616_v28 = vmax.f32 %v3317_v19, 0.0  ;;  %v3319_v21 = vadd.f32 %v3318_v37, %v2504_v22  ;;  %v3139_v54 = vpop.f32.mrb[123].mxu0 }
 0x2a2   :  { %2690 = vst [vmem:[%s5127_s3 + $0x1e0] sm:$0xff] %v2616_v28  ;;  %v2617_v29 = vmax.f32 %v3319_v21, 0.0 }
 0x2a4   :  { %2691 = vst [vmem:[%s5127_s3 + $0x1e8] sm:$0xff] %v2617_v29  ;;  %v2188_v23 = vpop.f32.mrb[128].mxu1 }
 0x2a5   :  { %v2509_v60 = vpop.f32.mrb[124].mxu0  ;;  %v2190_v41 = vpop.f32.mrb[129].mxu1  ;;  %v3324_v45 = vadd.f32 %v4671_v1, %v2188_v23 }
 0x2a6   :  { %v3321_v61 = vadd.f32 %v3320_v56, %v2509_v60  ;;  %v3142_v32 = vpop.f32.mrb[125].mxu0  ;;  %v2191_v35 = vpop.f32.mrb[130].mxu1 }
 0x2a7   :  { %v2512_v2 = vpop.f32.mrb[126].mxu0  ;;  %v2193_v44 = vpop.f32.mrb[131].mxu1  ;;  %v3326_v12 = vadd.f32 %v5083_v43, %v2191_v35 }
 0x2a8   :  { %v2618_v38 = vmax.f32 %v3321_v61, 0.0  ;;  %v3323_v4 = vadd.f32 %v3322_v62, %v2512_v2  ;;  %v3143_v7 = vpop.f32.mrb[127].mxu0 }
 0x2aa   :  { %2692 = vst [vmem:[%s5127_s3 + $0x1f0] sm:$0xff] %v2618_v38  ;;  %v2619_v3 = vmax.f32 %v3323_v4, 0.0 }
 0x2ac   :  { %2693 = vst [vmem:[%s5127_s3 + $0x1f8] sm:$0xff] %v2619_v3  ;;  %v2196_v8 = vpop.f32.mrb[132].mxu1 }
 0x2ad   :  { %v2517_v11 = vpop.f32.mrb[128].mxu0  ;;  %v2198_v26 = vpop.f32.mrb[133].mxu1  ;;  %v3328_v30 = vadd.f32 %v5083_v43, %v2196_v8 }
 0x2ae   :  { %v3325_v50 = vadd.f32 %v3324_v45, %v2517_v11  ;;  %v3146_v49 = vpop.f32.mrb[129].mxu0  ;;  %v2199_v57 = vpop.f32.mrb[134].mxu1 }
 0x2af   :  { %v2520_v0 = vpop.f32.mrb[130].mxu0  ;;  %v2201_v17 = vpop.f32.mrb[135].mxu1  ;;  %v3330_v58 = vadd.f32 %v5083_v43, %v2199_v57 }
 0x2b0   :  { %v2620_v1 = vmax.f32 %v3325_v50, 0.0  ;;  %v3327_v20 = vadd.f32 %v3326_v12, %v2520_v0  ;;  %v3147_v6 = vpop.f32.mrb[131].mxu0 }
 0x2b2   :  { %2694 = vst [vmem:[%s5127_s3 + $0x200] sm:$0xff] %v2620_v1  ;;  %v2621_v48 = vmax.f32 %v3327_v20, 0.0 }
 0x2b4   :  { %2695 = vst [vmem:[%s5127_s3 + $0x208] sm:$0xff] %v2621_v48  ;;  %v2204_v13 = vpop.f32.mrb[136].mxu1 }
 0x2b5   :  { %v2525_v53 = vpop.f32.mrb[132].mxu0  ;;  %v2206_v10 = vpop.f32.mrb[137].mxu1  ;;  %v3332_v5 = vadd.f32 %v5083_v43, %v2204_v13 }
 0x2b6   :  { %v3329_v24 = vadd.f32 %v3328_v30, %v2525_v53  ;;  %v3150_v25 = vpop.f32.mrb[133].mxu0  ;;  %v2207_v52 = vpop.f32.mrb[138].mxu1 }
 0x2b7   :  { %v2528_v16 = vpop.f32.mrb[134].mxu0  ;;  %v2209_v27 = vpop.f32.mrb[139].mxu1  ;;  %v3334_v36 = vadd.f32 %v5083_v43, %v2207_v52 }
 0x2b8   :  { %v2622_v31 = vmax.f32 %v3329_v24, 0.0  ;;  %v3331_v34 = vadd.f32 %v3330_v58, %v2528_v16  ;;  %v3151_v63 = vpop.f32.mrb[135].mxu0 }
 0x2ba   :  { %2696 = vst [vmem:[%s5127_s3 + $0x210] sm:$0xff] %v2622_v31  ;;  %v2623_v39 = vmax.f32 %v3331_v34, 0.0 }
 0x2bc   :  { %2697 = vst [vmem:[%s5127_s3 + $0x218] sm:$0xff] %v2623_v39  ;;  %v2212_v33 = vpop.f32.mrb[140].mxu1 }
 0x2bd   :  { %v2533_v14 = vpop.f32.mrb[136].mxu0  ;;  %v2214_v18 = vpop.f32.mrb[141].mxu1  ;;  %v3336_v47 = vadd.f32 %v5083_v43, %v2212_v33 }
 0x2be   :  { %v3333_v40 = vadd.f32 %v3332_v5, %v2533_v14  ;;  %v3154_v55 = vpop.f32.mrb[137].mxu0  ;;  %v2215_v42 = vpop.f32.mrb[142].mxu1 }
 0x2bf   :  { %v2536_v9 = vpop.f32.mrb[138].mxu0  ;;  %v2217_v46 = vpop.f32.mrb[143].mxu1  ;;  %v3338_v21 = vadd.f32 %v5083_v43, %v2215_v42 }
 0x2c0   :  { %v2624_v15 = vmax.f32 %v3333_v40, 0.0  ;;  %v3335_v37 = vadd.f32 %v3334_v36, %v2536_v9  ;;  %v3155_v19 = vpop.f32.mrb[139].mxu0 }
 0x2c2   :  { %2698 = vst [vmem:[%s5127_s3 + $0x220] sm:$0xff] %v2624_v15  ;;  %v2625_v59 = vmax.f32 %v3335_v37, 0.0 }
 0x2c4   :  { %2699 = vst [vmem:[%s5127_s3 + $0x228] sm:$0xff] %v2625_v59  ;;  %v2220_v22 = vpop.f32.mrb[144].mxu1 }
 0x2c5   :  { %v2541_v51 = vpop.f32.mrb[140].mxu0  ;;  %v2222_v28 = vpop.f32.mrb[145].mxu1  ;;  %v3340_v35 = vadd.f32 %v5083_v43, %v2220_v22 }
 0x2c6   :  { %v3337_v54 = vadd.f32 %v3336_v47, %v2541_v51  ;;  %v3158_v29 = vpop.f32.mrb[141].mxu0  ;;  %v2223_v56 = vpop.f32.mrb[146].mxu1 }
 0x2c7   :  { %v2544_v23 = vpop.f32.mrb[142].mxu0  ;;  %v2225_v60 = vpop.f32.mrb[147].mxu1  ;;  %v3342_v44 = vadd.f32 %v5083_v43, %v2223_v56 }
 0x2c8   :  { %v2626_v41 = vmax.f32 %v3337_v54, 0.0  ;;  %v3339_v62 = vadd.f32 %v3338_v21, %v2544_v23  ;;  %v3159_v61 = vpop.f32.mrb[143].mxu0 }
 0x2ca   :  { %2700 = vst [vmem:[%s5127_s3 + $0x230] sm:$0xff] %v2626_v41  ;;  %v2627_v32 = vmax.f32 %v3339_v62, 0.0 }
 0x2cc   :  { %2701 = vst [vmem:[%s5127_s3 + $0x238] sm:$0xff] %v2627_v32 }
 0x2cd   :  { %v2549_v2 = vpop.f32.mrb[144].mxu0 }
 0x2ce   :  { %v3341_v38 = vadd.f32 %v3340_v35, %v2549_v2  ;;  %v3162_v4 = vpop.f32.mrb[145].mxu0 }
 0x2cf   :  { %v2552_v7 = vpop.f32.mrb[146].mxu0 }
 0x2d0   :  { %v2628_v3 = vmax.f32 %v3341_v38, 0.0  ;;  %v3343_v45 = vadd.f32 %v3342_v44, %v2552_v7  ;;  %v3163_v8 = vpop.f32.mrb[147].mxu0 }
 0x2d2   :  { %2702 = vst [vmem:[%s5127_s3 + $0x240] sm:$0xff] %v2628_v3  ;;  %v2629_v11 = vmax.f32 %v3343_v45, 0.0 }
 0x2d4   :  { %2703 = vst [vmem:[%s5127_s3 + $0x248] sm:$0xff] %v2629_v11 }

// kernel: fwd.21
= control target key start
LH: loop header
LB: loop body
LE: loop exit
PB: predicated region body
PF: predicated region fallthrough
CT: control target
= control target key end

     0   :  { %s5252_s12 = smov 0   ;;  %s6444_s0 = inlined_call_operand.vmem [shape: bf16[3072,288], index: 0, kind: input, shape index: {}]   ;;  %s6445_s1 = inlined_call_operand.vmem [shape: bf16[288,4], index: 1, kind: input, shape index: {}]   ;;  %s6446_s2 = inlined_call_operand.vmem [shape: f32[1,4], index: 2, kind: input, shape index: {}]   ;;  %s6447_s3 = inlined_call_operand.vmem [shape: f32[3072,4], index: 3, kind: output, shape index: {}]  }
   0x1 LB: > { %s3781_s13 = sadd.s32 4294967295, %s5229_s12   ;;  %p3785_p0 = scmp.ge.s32.totalorder %s5229_s12, 1  ;;  %s5229_s12 = sphi %s5252_s12, %s13_s12  }
   0x2   : > { %p139_p1 = scmp.lt.s32.totalorder %s5229_s12, 4 }
   0x4   : > { %p140_p2 = pnand %p3785_p0, %p139_p1 }
   0x6   : > { %143 = sbr.rel (%p140_p2) target bundleno = 731 (0x2db), region = 32 }
   0xd   : > { %v4435_v0 = vld [vmem:[%s6445_s1] sm:$0xff]   ;;  %v5231_v1 = vmov 0   ;;  %s3786_s16 = sshll.u32 %s3781_s13, 7  ;;  %v4436_v2 = vld [vmem:[%s6445_s1 + $0x8] sm:$0xff]   ;;  %v4437_v3 = vld [vmem:[%s6445_s1 + $0x10] sm:$0xff]   ;;  %vm1545_vm0 = vcmask 261120  }
   0xe   : > { %1738 = vmatprep.subr.bf16.mxu0 %v5231_v1  ;;  %4393 = vmatprep.subr.bf16.mxu1 %v5231_v1  ;;  %p165_p3 = scmp.lt.s32.totalorder %s3786_s16, 383  ;;  %v4438_v4 = vld [vmem:[%s6445_s1 + $0x18] sm:$0xff]   ;;  %v4439_v5 = vld [vmem:[%s6445_s1 + $0x20] sm:$0xff]   ;;  %v4440_v7 = vld [vmem:[%s6445_s1 + $0x28] sm:$0xff]   ;;  %vm3596_vm1 = vcmask 31744  }
   0xf   : > { %1739 = vmatpush1.bf16.msra.mxu0 %v4435_v0  ;;  %4409 = vmatpush1.bf16.msra.mxu1 %v4435_v0  ;;  %v4441_v9 = vld [vmem:[%s6445_s1 + $0x30] sm:$0xff]   ;;  %v4442_v10 = vld [vmem:[%s6445_s1 + $0x38] sm:$0xff]   ;;  %v4443_v11 = vld [vmem:[%s6445_s1 + $0x40] sm:$0xff]  }
  0x10   : > { %1740 = vmatprep.subr.bf16.mxu0 %v5231_v1  ;;  %4394 = vmatprep.subr.bf16.mxu1 %v5231_v1  ;;  %s6489_s16 = smov (!%p165_p3, %s3786_s16), 383  ;;  %v4444_v12 = vld [vmem:[%s6445_s1 + $0x48] sm:$0xff]   ;;  %v4445_v13 = vld [vmem:[%s6445_s1 + $0x50] sm:$0xff]   ;;  %v4446_v14 = vld [vmem:[%s6445_s1 + $0x58] sm:$0xff]  }
  0x11   : > { %s4425_s23 = smul.u32 12, %s6489_s16  ;;  %v4447_v15 = vld [vmem:[%s6445_s1 + $0x60] sm:$0xff]   ;;  %v4448_v16 = vld [vmem:[%s6445_s1 + $0x68] sm:$0xff]   ;;  %v4449_v17 = vld [vmem:[%s6445_s1 + $0x70] sm:$0xff]   ;;  %s3789_s6 = sshll.u32 %s6489_s16, 3 }
  0x12   : > { %v4450_v18 = vld [vmem:[%s6445_s1 + $0x78] sm:$0xff]   ;;  %v4457_v19 = vld [vmem:[%s6445_s1 + $0x80] sm:$0xff]   ;;  %v4506_v24 = vld [vmem:[%s6445_s1 + $0x88] sm:$0xff]   ;;  %s5787_s8 = scalar_lea.vmem %s6447_s3, %s3789_s6 }
  0x13   : > { %1741 = vmatpush1.bf16.msra.mxu0 %v4436_v2  ;;  %4410 = vmatpush1.bf16.msra.mxu1 %v4436_v2  ;;  %s5289_s28 = scalar_lea.vmem %s6444_s0, %s4425_s23 }
  0x14   : > { %1742 = vmatprep.subr.bf16.mxu0 %v5231_v1  ;;  %4395 = vmatprep.subr.bf16.mxu1 %v5231_v1  ;;  %v4453_v6 = vld [vmem:[%s5289_s28 + $0x4] ss:$12 sps:$4 sm:$0xff]   ;;  %v4451_v20 = vld [vmem:[%s5289_s28] ss:$12 sps:$4 sm:$0xff]   ;;  %v4458_v22 = vld [vmem:[%s5289_s28 + $0x1c] ss:$12 sps:$4 sm:$0xff]  }
  0x15   : > { %v4456_v8 = vld [vmem:[%s5289_s28 + $0x484] ss:$12 sps:$4 sm:$0xff]   ;;  %1770 = vmatprep.mubr.bf16.mxu0 %v4453_v6  ;;  %v4454_v21 = vld [vmem:[%s5289_s28 + $0x480] ss:$12 sps:$4 sm:$0xff]   ;;  %v4460_v23 = vld [vmem:[%s5289_s28 + $0x49c] ss:$12 sps:$4 sm:$0xff]  }
  0x16   : > { %2154 = vmatprep.mubr.bf16.mxu1 %v4456_v8  ;;  %v4462_v25 = vld [vmem:[%s5289_s28 + $0x18] ss:$12 sps:$4 sm:$0xff]   ;;  %v4464_v27 = vld [vmem:[%s5289_s28 + $0x34] ss:$12 sps:$4 sm:$0xff]   ;;  %v4468_v29 = vld [vmem:[%s5289_s28 + $0x30] ss:$12 sps:$4 sm:$0xff]  }
  0x17   : > { %1743 = vmatpush1.bf16.msra.mxu0 %v4437_v3  ;;  %4411 = vmatpush1.bf16.msra.mxu1 %v4437_v3  ;;  %v4463_v26 = vld [vmem:[%s5289_s28 + $0x498] ss:$12 sps:$4 sm:$0xff]   ;;  %v4466_v28 = vld [vmem:[%s5289_s28 + $0x4b4] ss:$12 sps:$4 sm:$0xff]   ;;  %v4469_v30 = vld [vmem:[%s5289_s28 + $0x4b0] ss:$12 sps:$4 sm:$0xff]  }
  0x18   : > { %1744 = vmatprep.subr.bf16.mxu0 %v5231_v1  ;;  %4396 = vmatprep.subr.bf16.mxu1 %v5231_v1  ;;  %v4470_v31 = vld [vmem:[%s5289_s28 + $0x4c] ss:$12 sps:$4 sm:$0xff]   ;;  %v4474_v33 = vld [vmem:[%s5289_s28 + $0x48] ss:$12 sps:$4 sm:$0xff]   ;;  %v4476_v35 = vld [vmem:[%s5289_s28 + $0x64] ss:$12 sps:$4 sm:$0xff]  }
  0x19   : > { %v4472_v32 = vld [vmem:[%s5289_s28 + $0x4cc] ss:$12 sps:$4 sm:$0xff]   ;;  %v4475_v34 = vld [vmem:[%s5289_s28 + $0x4c8] ss:$12 sps:$4 sm:$0xff]   ;;  %v4478_v36 = vld [vmem:[%s5289_s28 + $0x4e4] ss:$12 sps:$4 sm:$0xff]  }
  0x1a   : > { %v4480_v37 = vld [vmem:[%s5289_s28 + $0x60] ss:$12 sps:$4 sm:$0xff]   ;;  %v4482_v39 = vld [vmem:[%s5289_s28 + $0x7c] ss:$12 sps:$4 sm:$0xff]   ;;  %v4486_v41 = vld [vmem:[%s5289_s28 + $0x78] ss:$12 sps:$4 sm:$0xff]  }
  0x1b   : > { %1745 = vmatpush1.bf16.msra.mxu0 %v4438_v4  ;;  %4412 = vmatpush1.bf16.msra.mxu1 %v4438_v4  ;;  %v4481_v38 = vld [vmem:[%s5289_s28 + $0x4e0] ss:$12 sps:$4 sm:$0xff]   ;;  %v4484_v40 = vld [vmem:[%s5289_s28 + $0x4fc] ss:$12 sps:$4 sm:$0xff]   ;;  %v4487_v42 = vld [vmem:[%s5289_s28 + $0x4f8] ss:$12 sps:$4 sm:$0xff]  }
  0x1c   : > { %1746 = vmatprep.subr.bf16.mxu0 %v5231_v1  ;;  %4397 = vmatprep.subr.bf16.mxu1 %v5231_v1  ;;  %v4488_v43 = vld [vmem:[%s5289_s28 + $0x94] ss:$12 sps:$4 sm:$0xff]   ;;  %v4492_v45 = vld [vmem:[%s5289_s28 + $0x90] ss:$12 sps:$4 sm:$0xff]   ;;  %v4494_v47 = vld [vmem:[%s5289_s28 + $0xac] ss:$12 sps:$4 sm:$0xff]  }
  0x1d   : > { %v4490_v44 = vld [vmem:[%s5289_s28 + $0x514] ss:$12 sps:$4 sm:$0xff]   ;;  %v4493_v46 = vld [vmem:[%s5289_s28 + $0x510] ss:$12 sps:$4 sm:$0xff]   ;;  %v4496_v48 = vld [vmem:[%s5289_s28 + $0x52c] ss:$12 sps:$4 sm:$0xff]  }
  0x1e   : > { %v4498_v49 = vld [vmem:[%s5289_s28 + $0xa8] ss:$12 sps:$4 sm:$0xff]   ;;  %v4500_v51 = vld [vmem:[%s5289_s28 + $0xc4] ss:$12 sps:$4 sm:$0xff]   ;;  %v4504_v53 = vld [vmem:[%s5289_s28 + $0xc0] ss:$12 sps:$4 sm:$0xff]  }
  0x1f   : > { %1747 = vmatpush1.bf16.msra.mxu0 %v4439_v5  ;;  %4413 = vmatpush1.bf16.msra.mxu1 %v4439_v5  ;;  %v4499_v50 = vld [vmem:[%s5289_s28 + $0x528] ss:$12 sps:$4 sm:$0xff]   ;;  %v4502_v52 = vld [vmem:[%s5289_s28 + $0x544] ss:$12 sps:$4 sm:$0xff]   ;;  %v4505_v54 = vld [vmem:[%s5289_s28 + $0x540] ss:$12 sps:$4 sm:$0xff]  }
  0x20   : > { %1748 = vmatprep.subr.bf16.mxu0 %v5231_v1  ;;  %4398 = vmatprep.subr.bf16.mxu1 %v5231_v1  ;;  %v4507_v55 = vld [vmem:[%s5289_s28 + $0xdc] ss:$12 sps:$4 sm:$0xff]   ;;  %v4511_v57 = vld [vmem:[%s5289_s28 + $0xd8] ss:$12 sps:$4 sm:$0xff]   ;;  %v4513_v59 = vld [vmem:[%s5289_s28 + $0xf4] ss:$12 sps:$4 sm:$0xff]  }
  0x21   : > { %v4509_v56 = vld [vmem:[%s5289_s28 + $0x55c] ss:$12 sps:$4 sm:$0xff]   ;;  %v4512_v58 = vld [vmem:[%s5289_s28 + $0x558] ss:$12 sps:$4 sm:$0xff]   ;;  %v4515_v60 = vld [vmem:[%s5289_s28 + $0x574] ss:$12 sps:$4 sm:$0xff]  }
  0x22   : > { %v4517_v61 = vld [vmem:[%s5289_s28 + $0xf0] ss:$12 sps:$4 sm:$0xff]   ;;  %v4519_v63 = vld [vmem:[%s5289_s28 + $0x10c] ss:$12 sps:$4 sm:$0xff]   ;;  %v4524_v2 = vld [vmem:[%s5289_s28 + $0x588] ss:$12 sps:$4 sm:$0xff]  }
  0x23   : > { %1749 = vmatpush1.bf16.msra.mxu0 %v4440_v7  ;;  %4414 = vmatpush1.bf16.msra.mxu1 %v4440_v7  ;;  %v4518_v62 = vld [vmem:[%s5289_s28 + $0x570] ss:$12 sps:$4 sm:$0xff]   ;;  %v4521_v0 = vld [vmem:[%s5289_s28 + $0x58c] ss:$12 sps:$4 sm:$0xff]  }
  0x24   : > { %1750 = vmatprep.subr.bf16.mxu0 %v5231_v1  ;;  %4399 = vmatprep.subr.bf16.mxu1 %v5231_v1  ;;  %v4525_v3 = vld [vmem:[%s5289_s28 + $0x124] ss:$12 sps:$4 sm:$0xff]   ;;  %v4529_v5 = vld [vmem:[%s5289_s28 + $0x120] ss:$12 sps:$4 sm:$0xff]   ;;  %v4531_v7 = vld [vmem:[%s5289_s28 + $0x13c] ss:$12 sps:$4 sm:$0xff]  }
  0x25   : > { %v4527_v4 = vld [vmem:[%s5289_s28 + $0x5a4] ss:$12 sps:$4 sm:$0xff]   ;;  %v4530_v6 = vld [vmem:[%s5289_s28 + $0x5a0] ss:$12 sps:$4 sm:$0xff]   ;;  %v4533_v8 = vld [vmem:[%s5289_s28 + $0x5bc] ss:$12 sps:$4 sm:$0xff]  }
  0x27   : > { %1751 = vmatpush1.bf16.msra.mxu0 %v4441_v9  ;;  %4415 = vmatpush1.bf16.msra.mxu1 %v4441_v9  ;;  %v4535_v9 = vld [vmem:[%s5289_s28 + $0x138] ss:$12 sps:$4 sm:$0xff]  }
  0x28   : > { %1752 = vmatprep.subr.bf16.mxu0 %v5231_v1  ;;  %4400 = vmatprep.subr.bf16.mxu1 %v5231_v1 }
  0x2b   : > { %1753 = vmatpush1.bf16.msra.mxu0 %v4442_v10  ;;  %4416 = vmatpush1.bf16.msra.mxu1 %v4442_v10  ;;  %v4536_v10 = vld [vmem:[%s5289_s28 + $0x5b8] ss:$12 sps:$4 sm:$0xff]  }
  0x2c   : > { %1754 = vmatprep.subr.bf16.mxu0 %v5231_v1  ;;  %4401 = vmatprep.subr.bf16.mxu1 %v5231_v1 }
  0x2f   : > { %1755 = vmatpush1.bf16.msra.mxu0 %v4443_v11  ;;  %4417 = vmatpush1.bf16.msra.mxu1 %v4443_v11  ;;  %v4537_v11 = vld [vmem:[%s5289_s28 + $0x154] ss:$12 sps:$4 sm:$0xff]  }
  0x30   : > { %1756 = vmatprep.subr.bf16.mxu0 %v5231_v1  ;;  %4402 = vmatprep.subr.bf16.mxu1 %v5231_v1 }
  0x33   : > { %1757 = vmatpush1.bf16.msra.mxu0 %v4444_v12  ;;  %4418 = vmatpush1.bf16.msra.mxu1 %v4444_v12  ;;  %v4539_v12 = vld [vmem:[%s5289_s28 + $0x5d4] ss:$12 sps:$4 sm:$0xff]  }
  0x34   : > { %1758 = vmatprep.subr.bf16.mxu0 %v5231_v1  ;;  %4403 = vmatprep.subr.bf16.mxu1 %v5231_v1 }
  0x37   : > { %1759 = vmatpush1.bf16.msra.mxu0 %v4445_v13  ;;  %4419 = vmatpush1.bf16.msra.mxu1 %v4445_v13  ;;  %v4541_v13 = vld [vmem:[%s5289_s28 + $0x150] ss:$12 sps:$4 sm:$0xff]  }
  0x38   : > { %1760 = vmatprep.subr.bf16.mxu0 %v5231_v1  ;;  %4404 = vmatprep.subr.bf16.mxu1 %v5231_v1 }
  0x3b   : > { %1761 = vmatpush1.bf16.msra.mxu0 %v4446_v14  ;;  %4420 = vmatpush1.bf16.msra.mxu1 %v4446_v14  ;;  %v4542_v14 = vld [vmem:[%s5289_s28 + $0x5d0] ss:$12 sps:$4 sm:$0xff]  }
  0x3c   : > { %1762 = vmatprep.subr.bf16.mxu0 %v5231_v1  ;;  %4405 = vmatprep.subr.bf16.mxu1 %v5231_v1 }
  0x3f   : > { %1763 = vmatpush1.bf16.msra.mxu0 %v4447_v15  ;;  %4421 = vmatpush1.bf16.msra.mxu1 %v4447_v15  ;;  %v4543_v15 = vld [vmem:[%s5289_s28 + $0x16c] ss:$12 sps:$4 sm:$0xff]  }
  0x40   : > { %1764 = vmatprep.subr.bf16.mxu0 %v5231_v1  ;;  %4406 = vmatprep.subr.bf16.mxu1 %v5231_v1 }
  0x43   : > { %1765 = vmatpush1.bf16.msra.mxu0 %v4448_v16  ;;  %4422 = vmatpush1.bf16.msra.mxu1 %v4448_v16  ;;  %v4545_v16 = vld [vmem:[%s5289_s28 + $0x5ec] ss:$12 sps:$4 sm:$0xff]  }
  0x44   : > { %1766 = vmatprep.subr.bf16.mxu0 %v5231_v1  ;;  %4407 = vmatprep.subr.bf16.mxu1 %v5231_v1 }
  0x47   : > { %1767 = vmatpush1.bf16.msra.mxu0 %v4449_v17  ;;  %4423 = vmatpush1.bf16.msra.mxu1 %v4449_v17  ;;  %v4547_v17 = vld [vmem:[%s5289_s28 + $0x168] ss:$12 sps:$4 sm:$0xff]  }
  0x48   : > { %1768 = vmatprep.subr.bf16.mxu0 %v5231_v1  ;;  %4408 = vmatprep.subr.bf16.mxu1 %v5231_v1  ;;  %v4523_v1 = vld [vmem:[%s5289_s28 + $0x108] ss:$12 sps:$4 sm:$0xff]  }
  0x4b   : > { %1769 = vmatpush1.bf16.msra.mxu0 %v4450_v18  ;;  %4424 = vmatpush1.bf16.msra.mxu1 %v4450_v18  ;;  %v4548_v18 = vld [vmem:[%s5289_s28 + $0x5e8] ss:$12 sps:$4 sm:$0xff]  }
  0x4c   : > { %4261 = vmatprep.subr.bf16.mxu1 %v4457_v19 }
  0x4e   : > { %1771 = vmatmul.mubr.bf16.vlgmr.msra.gmra.mrb[0].mxu0 %v4451_v20  ;;  %2155 = vmatmul.mubr.bf16.vlgmr.msra.gmra.mrb[0].mxu1 %v4454_v21  ;;  %v4551_v20 = vld [vmem:[%s5289_s28 + $0x8] ss:$12 sps:$4 sm:$0xff]   ;;  %v4552_v21 = vld [vmem:[%s5289_s28 + $0x180] ss:$12 sps:$4 sm:$0xff]  }
  0x4f   : > { %4262 = vmatpush3.bf16.msra.mxu1 %v4457_v19  ;;  %1778 = vmatprep.mubr.bf16.mxu0 %v4458_v22  ;;  %v4549_v19 = vld [vmem:[%s5289_s28 + $0x184] ss:$12 sps:$4 sm:$0xff]   ;;  %v4553_v22 = vld [vmem:[%s5289_s28 + $0x20] ss:$12 sps:$4 sm:$0xff]  }
  0x50   : > { %2162 = vmatprep.mubr.bf16.mxu1 %v4460_v23  ;;  %4263 = vmatprep.subr.bf16.mxu1 %v4506_v24  ;;  %v4554_v23 = vld [vmem:[%s5289_s28 + $0x19c] ss:$12 sps:$4 sm:$0xff]  }
  0x53   : > { %4264 = vmatpush3.bf16.msra.mxu1 %v4506_v24  ;;  %v4556_v24 = vld [vmem:[%s5289_s28 + $0x38] ss:$12 sps:$4 sm:$0xff]  }
  0x56   : > { %1779 = vmatmul.mubr.bf16.gmra.mrb[4].mxu0 %v4462_v25  ;;  %2163 = vmatmul.mubr.bf16.gmra.mrb[4].mxu1 %v4463_v26  ;;  %v4557_v25 = vld [vmem:[%s5289_s28 + $0x198] ss:$12 sps:$4 sm:$0xff]   ;;  %v4558_v26 = vld [vmem:[%s5289_s28 + $0x50] ss:$12 sps:$4 sm:$0xff]  }
  0x57   : > { %1786 = vmatprep.mubr.bf16.mxu0 %v4464_v27  ;;  %2170 = vmatprep.mubr.bf16.mxu1 %v4466_v28  ;;  %v4559_v27 = vld [vmem:[%s5289_s28 + $0x1b4] ss:$12 sps:$4 sm:$0xff]  }
  0x58   : > { %v4561_v28 = vld [vmem:[%s5289_s28 + $0x68] ss:$12 sps:$4 sm:$0xff]  }
  0x5e   : > { %1787 = vmatmul.mubr.bf16.gmra.mrb[8].mxu0 %v4468_v29  ;;  %2171 = vmatmul.mubr.bf16.gmra.mrb[8].mxu1 %v4469_v30  ;;  %v4562_v29 = vld [vmem:[%s5289_s28 + $0x1b0] ss:$12 sps:$4 sm:$0xff]   ;;  %v4563_v30 = vld [vmem:[%s5289_s28 + $0x80] ss:$12 sps:$4 sm:$0xff]  }
  0x5f   : > { %1794 = vmatprep.mubr.bf16.mxu0 %v4470_v31  ;;  %2178 = vmatprep.mubr.bf16.mxu1 %v4472_v32  ;;  %v4564_v31 = vld [vmem:[%s5289_s28 + $0x1cc] ss:$12 sps:$4 sm:$0xff]  }
  0x60   : > { %v4566_v32 = vld [vmem:[%s5289_s28 + $0x98] ss:$12 sps:$4 sm:$0xff]  }
  0x66   : > { %1795 = vmatmul.mubr.bf16.gmra.mrb[12].mxu0 %v4474_v33  ;;  %2179 = vmatmul.mubr.bf16.gmra.mrb[12].mxu1 %v4475_v34  ;;  %v4567_v33 = vld [vmem:[%s5289_s28 + $0x1c8] ss:$12 sps:$4 sm:$0xff]   ;;  %v4568_v34 = vld [vmem:[%s5289_s28 + $0xb0] ss:$12 sps:$4 sm:$0xff]  }
  0x67   : > { %1802 = vmatprep.mubr.bf16.mxu0 %v4476_v35  ;;  %2186 = vmatprep.mubr.bf16.mxu1 %v4478_v36  ;;  %v4569_v35 = vld [vmem:[%s5289_s28 + $0x1e4] ss:$12 sps:$4 sm:$0xff]   ;;  %v4571_v36 = vld [vmem:[%s5289_s28 + $0xc8] ss:$12 sps:$4 sm:$0xff]  }
  0x6e   : > { %1803 = vmatmul.mubr.bf16.gmra.mrb[16].mxu0 %v4480_v37  ;;  %2187 = vmatmul.mubr.bf16.gmra.mrb[16].mxu1 %v4481_v38  ;;  %v4572_v37 = vld [vmem:[%s5289_s28 + $0x1e0] ss:$12 sps:$4 sm:$0xff]  }
  0x6f   : > { %1810 = vmatprep.mubr.bf16.mxu0 %v4482_v39  ;;  %2194 = vmatprep.mubr.bf16.mxu1 %v4484_v40  ;;  %v4573_v38 = vld [vmem:[%s5289_s28 + $0xe0] ss:$12 sps:$4 sm:$0xff]   ;;  %v4574_v39 = vld [vmem:[%s5289_s28 + $0x1fc] ss:$12 sps:$4 sm:$0xff]   ;;  %v4576_v40 = vld [vmem:[%s5289_s28 + $0xf8] ss:$12 sps:$4 sm:$0xff]  }
  0x76   : > { %1811 = vmatmul.mubr.bf16.gmra.mrb[20].mxu0 %v4486_v41  ;;  %2195 = vmatmul.mubr.bf16.gmra.mrb[20].mxu1 %v4487_v42  ;;  %v4577_v41 = vld [vmem:[%s5289_s28 + $0x1f8] ss:$12 sps:$4 sm:$0xff]   ;;  %v4578_v42 = vld [vmem:[%s5289_s28 + $0x110] ss:$12 sps:$4 sm:$0xff]  }
  0x77   : > { %1818 = vmatprep.mubr.bf16.mxu0 %v4488_v43  ;;  %2202 = vmatprep.mubr.bf16.mxu1 %v4490_v44  ;;  %v4579_v43 = vld [vmem:[%s5289_s28 + $0x214] ss:$12 sps:$4 sm:$0xff]  }
  0x78   : > { %v4581_v44 = vld [vmem:[%s5289_s28 + $0x128] ss:$12 sps:$4 sm:$0xff]  }
  0x7e   : > { %1819 = vmatmul.mubr.bf16.gmra.mrb[24].mxu0 %v4492_v45  ;;  %2203 = vmatmul.mubr.bf16.gmra.mrb[24].mxu1 %v4493_v46  ;;  %v4582_v45 = vld [vmem:[%s5289_s28 + $0x210] ss:$12 sps:$4 sm:$0xff]   ;;  %v4583_v46 = vld [vmem:[%s5289_s28 + $0x140] ss:$12 sps:$4 sm:$0xff]  }
  0x7f   : > { %1826 = vmatprep.mubr.bf16.mxu0 %v4494_v47  ;;  %2210 = vmatprep.mubr.bf16.mxu1 %v4496_v48  ;;  %v4584_v47 = vld [vmem:[%s5289_s28 + $0x22c] ss:$12 sps:$4 sm:$0xff]  }
  0x80   : > { %v4586_v48 = vld [vmem:[%s5289_s28 + $0x158] ss:$12 sps:$4 sm:$0xff]  }
  0x86   : > { %1827 = vmatmul.mubr.bf16.gmra.mrb[28].mxu0 %v4498_v49  ;;  %2211 = vmatmul.mubr.bf16.gmra.mrb[28].mxu1 %v4499_v50  ;;  %v4587_v49 = vld [vmem:[%s5289_s28 + $0x228] ss:$12 sps:$4 sm:$0xff]   ;;  %v4588_v50 = vld [vmem:[%s5289_s28 + $0x170] ss:$12 sps:$4 sm:$0xff]  }
  0x87   : > { %1834 = vmatprep.mubr.bf16.mxu0 %v4500_v51  ;;  %2218 = vmatprep.mubr.bf16.mxu1 %v4502_v52  ;;  %v4589_v51 = vld [vmem:[%s5289_s28 + $0x244] ss:$12 sps:$4 sm:$0xff]   ;;  %v4591_v52 = vld [vmem:[%s5289_s28 + $0x188] ss:$12 sps:$4 sm:$0xff]  }
  0x8e   : > { %1835 = vmatmul.mubr.bf16.gmra.mrb[32].mxu0 %v4504_v53  ;;  %2219 = vmatmul.mubr.bf16.gmra.mrb[32].mxu1 %v4505_v54  ;;  %v4592_v53 = vld [vmem:[%s5289_s28 + $0x240] ss:$12 sps:$4 sm:$0xff]  }
  0x8f   : > { %1842 = vmatprep.mubr.bf16.mxu0 %v4507_v55  ;;  %2226 = vmatprep.mubr.bf16.mxu1 %v4509_v56  ;;  %v4593_v54 = vld [vmem:[%s5289_s28 + $0x1a0] ss:$12 sps:$4 sm:$0xff]   ;;  %v4594_v55 = vld [vmem:[%s5289_s28 + $0x25c] ss:$12 sps:$4 sm:$0xff]   ;;  %v4596_v56 = vld [vmem:[%s5289_s28 + $0x1b8] ss:$12 sps:$4 sm:$0xff]  }
  0x96   : > { %1843 = vmatmul.mubr.bf16.gmra.mrb[36].mxu0 %v4511_v57  ;;  %2227 = vmatmul.mubr.bf16.gmra.mrb[36].mxu1 %v4512_v58  ;;  %v4597_v57 = vld [vmem:[%s5289_s28 + $0x258] ss:$12 sps:$4 sm:$0xff]   ;;  %v4598_v58 = vld [vmem:[%s5289_s28 + $0x1d0] ss:$12 sps:$4 sm:$0xff]  }
  0x97   : > { %1850 = vmatprep.mubr.bf16.mxu0 %v4513_v59  ;;  %2234 = vmatprep.mubr.bf16.mxu1 %v4515_v60  ;;  %v4599_v59 = vld [vmem:[%s5289_s28 + $0x274] ss:$12 sps:$4 sm:$0xff]  }
  0x98   : > { %v4601_v60 = vld [vmem:[%s5289_s28 + $0x1e8] ss:$12 sps:$4 sm:$0xff]  }
  0x9e   : > { %1851 = vmatmul.mubr.bf16.gmra.mrb[40].mxu0 %v4517_v61  ;;  %2235 = vmatmul.mubr.bf16.gmra.mrb[40].mxu1 %v4518_v62  ;;  %v4602_v61 = vld [vmem:[%s5289_s28 + $0x270] ss:$12 sps:$4 sm:$0xff]   ;;  %v4603_v62 = vld [vmem:[%s5289_s28 + $0x200] ss:$12 sps:$4 sm:$0xff]  }
  0x9f   : > { %1858 = vmatprep.mubr.bf16.mxu0 %v4519_v63  ;;  %2242 = vmatprep.mubr.bf16.mxu1 %v4521_v0  ;;  %v4604_v63 = vld [vmem:[%s5289_s28 + $0x28c] ss:$12 sps:$4 sm:$0xff]  }
  0xa0   : > { %v4606_v0 = vld [vmem:[%s5289_s28 + $0x218] ss:$12 sps:$4 sm:$0xff]  }
  0xa6   : > { %1859 = vmatmul.mubr.bf16.gmra.mrb[44].mxu0 %v4523_v1  ;;  %2243 = vmatmul.mubr.bf16.gmra.mrb[44].mxu1 %v4524_v2 }
  0xa7   : > { %1866 = vmatprep.mubr.bf16.mxu0 %v4525_v3  ;;  %2250 = vmatprep.mubr.bf16.mxu1 %v4527_v4 }
  0xae   : > { %1867 = vmatmul.mubr.bf16.gmra.mrb[48].mxu0 %v4529_v5  ;;  %2251 = vmatmul.mubr.bf16.gmra.mrb[48].mxu1 %v4530_v6  ;;  %v4607_v5 = vld [vmem:[%s5289_s28 + $0x288] ss:$12 sps:$4 sm:$0xff]   ;;  %v4608_v6 = vld [vmem:[%s5289_s28 + $0x230] ss:$12 sps:$4 sm:$0xff]  }
  0xaf   : > { %1874 = vmatprep.mubr.bf16.mxu0 %v4531_v7  ;;  %2258 = vmatprep.mubr.bf16.mxu1 %v4533_v8 }
  0xb6   : > { %1875 = vmatmul.mubr.bf16.gmra.mrb[52].mxu0 %v4535_v9  ;;  %2259 = vmatmul.mubr.bf16.gmra.mrb[52].mxu1 %v4536_v10  ;;  %v4609_v9 = vld [vmem:[%s5289_s28 + $0x2a4] ss:$12 sps:$4 sm:$0xff]   ;;  %v4611_v10 = vld [vmem:[%s5289_s28 + $0x248] ss:$12 sps:$4 sm:$0xff]  }
  0xb7   : > { %1882 = vmatprep.mubr.bf16.mxu0 %v4537_v11  ;;  %2266 = vmatprep.mubr.bf16.mxu1 %v4539_v12 }
  0xbe   : > { %1883 = vmatmul.mubr.bf16.gmra.mrb[56].mxu0 %v4541_v13  ;;  %2267 = vmatmul.mubr.bf16.gmra.mrb[56].mxu1 %v4542_v14 }
  0xbf   : > { %1890 = vmatprep.mubr.bf16.mxu0 %v4543_v15  ;;  %2274 = vmatprep.mubr.bf16.mxu1 %v4545_v16 }
  0xc6   : > { %1891 = vmatmul.mubr.bf16.gmra.mrb[60].mxu0 %v4547_v17  ;;  %2275 = vmatmul.mubr.bf16.gmra.mrb[60].mxu1 %v4548_v18  ;;  %v4612_v17 = vld [vmem:[%s5289_s28 + $0x2a0] ss:$12 sps:$4 sm:$0xff]  }
  0xc7   : > { %1898 = vmatprep.mubr.bf16.mxu0 %v4549_v19  ;;  %4265 = vmatprep.mubr.msk.bf16.mxu1 %vm1545_vm0, %v4551_v20  ;;  %v4613_v18 = vld [vmem:[%s5289_s28 + $0x260] ss:$12 sps:$4 sm:$0xff]  }
  0xce   : > { %1899 = vmatmul.mubr.bf16.gmra.mrb[64].mxu0 %v4552_v21  ;;  %4266 = vmatmul.mubr.msk.bf16.vlgmr.msra.gmra.mrb[64].mxu1 %vm1545_vm0, %v4553_v22  ;;  %v4614_v21 = vld [vmem:[%s5289_s28 + $0x2bc] ss:$12 sps:$4 sm:$0xff]   ;;  %v4616_v22 = vld [vmem:[%s5289_s28 + $0x278] ss:$12 sps:$4 sm:$0xff]  }
  0xcf   : > { %1906 = vmatprep.mubr.bf16.mxu0 %v4554_v23  ;;  %4269 = vmatprep.mubr.msk.bf16.mxu1 %vm1545_vm0, %v4556_v24 }
  0xd6   : > { %1907 = vmatmul.mubr.bf16.gmra.mrb[68].mxu0 %v4557_v25  ;;  %4270 = vmatmul.mubr.msk.bf16.gmra.mrb[68].mxu1 %vm1545_vm0, %v4558_v26 }
  0xd7   : > { %1914 = vmatprep.mubr.bf16.mxu0 %v4559_v27  ;;  %4273 = vmatprep.mubr.msk.bf16.mxu1 %vm1545_vm0, %v4561_v28 }
  0xde   : > { %1915 = vmatmul.mubr.bf16.gmra.mrb[72].mxu0 %v4562_v29  ;;  %4274 = vmatmul.mubr.msk.bf16.gmra.mrb[72].mxu1 %vm1545_vm0, %v4563_v30  ;;  %v4617_v29 = vld [vmem:[%s5289_s28 + $0x2b8] ss:$12 sps:$4 sm:$0xff]   ;;  %v4618_v30 = vld [vmem:[%s5289_s28 + $0x290] ss:$12 sps:$4 sm:$0xff]  }
  0xdf   : > { %1922 = vmatprep.mubr.bf16.mxu0 %v4564_v31  ;;  %4277 = vmatprep.mubr.msk.bf16.mxu1 %vm1545_vm0, %v4566_v32 }
  0xe6   : > { %1923 = vmatmul.mubr.bf16.gmra.mrb[76].mxu0 %v4567_v33  ;;  %4278 = vmatmul.mubr.msk.bf16.gmra.mrb[76].mxu1 %vm1545_vm0, %v4568_v34  ;;  %v4619_v33 = vld [vmem:[%s5289_s28 + $0x2d4] ss:$12 sps:$4 sm:$0xff]  }
  0xe7   : > { %1930 = vmatprep.mubr.bf16.mxu0 %v4569_v35  ;;  %4281 = vmatprep.mubr.msk.bf16.mxu1 %vm1545_vm0, %v4571_v36  ;;  %v4621_v34 = vld [vmem:[%s5289_s28 + $0x2a8] ss:$12 sps:$4 sm:$0xff]  }
  0xee   : > { %1931 = vmatmul.mubr.bf16.gmra.mrb[80].mxu0 %v4572_v37  ;;  %4282 = vmatmul.mubr.msk.bf16.gmra.mrb[80].mxu1 %vm1545_vm0, %v4573_v38 }
  0xef   : > { %1938 = vmatprep.mubr.bf16.mxu0 %v4574_v39  ;;  %4285 = vmatprep.mubr.msk.bf16.mxu1 %vm1545_vm0, %v4576_v40 }
  0xf6   : > { %1939 = vmatmul.mubr.bf16.gmra.mrb[84].mxu0 %v4577_v41  ;;  %4286 = vmatmul.mubr.msk.bf16.gmra.mrb[84].mxu1 %vm1545_vm0, %v4578_v42  ;;  %v4622_v41 = vld [vmem:[%s5289_s28 + $0x2d0] ss:$12 sps:$4 sm:$0xff]   ;;  %v4623_v42 = vld [vmem:[%s5289_s28 + $0x2c0] ss:$12 sps:$4 sm:$0xff]  }
  0xf7   : > { %1946 = vmatprep.mubr.bf16.mxu0 %v4579_v43  ;;  %4289 = vmatprep.mubr.msk.bf16.mxu1 %vm1545_vm0, %v4581_v44 }
  0xfe   : > { %1947 = vmatmul.mubr.bf16.gmra.mrb[88].mxu0 %v4582_v45  ;;  %4290 = vmatmul.mubr.msk.bf16.gmra.mrb[88].mxu1 %vm1545_vm0, %v4583_v46  ;;  %v4624_v45 = vld [vmem:[%s5289_s28 + $0x2ec] ss:$12 sps:$4 sm:$0xff]  }
  0xff   : > { %1954 = vmatprep.mubr.bf16.mxu0 %v4584_v47  ;;  %4293 = vmatprep.mubr.msk.bf16.mxu1 %vm1545_vm0, %v4586_v48  ;;  %v4626_v46 = vld [vmem:[%s5289_s28 + $0x2d8] ss:$12 sps:$4 sm:$0xff]  }
 0x106   : > { %1955 = vmatmul.mubr.bf16.gmra.mrb[92].mxu0 %v4587_v49  ;;  %4294 = vmatmul.mubr.msk.bf16.gmra.mrb[92].mxu1 %vm1545_vm0, %v4588_v50 }
 0x107   : > { %1962 = vmatprep.mubr.bf16.mxu0 %v4589_v51  ;;  %4297 = vmatprep.mubr.msk.bf16.mxu1 %vm1545_vm0, %v4591_v52 }
 0x10e   : > { %1963 = vmatmul.mubr.bf16.gmra.mrb[96].mxu0 %v4592_v53  ;;  %4298 = vmatmul.mubr.msk.bf16.gmra.mrb[96].mxu1 %vm1545_vm0, %v4593_v54  ;;  %v4627_v53 = vld [vmem:[%s5289_s28 + $0x2e8] ss:$12 sps:$4 sm:$0xff]   ;;  %v4628_v54 = vld [vmem:[%s5289_s28 + $0x2f0] ss:$12 sps:$4 sm:$0xff]  }
 0x10f   : > { %1970 = vmatprep.mubr.bf16.mxu0 %v4594_v55  ;;  %4301 = vmatprep.mubr.msk.bf16.mxu1 %vm1545_vm0, %v4596_v56 }
 0x116   : > { %1971 = vmatmul.mubr.bf16.gmra.mrb[100].mxu0 %v4597_v57  ;;  %4302 = vmatmul.mubr.msk.bf16.gmra.mrb[100].mxu1 %vm1545_vm0, %v4598_v58  ;;  %v4629_v57 = vld [vmem:[%s5289_s28 + $0x304] ss:$12 sps:$4 sm:$0xff]   ;;  %v4631_v58 = vld [vmem:[%s5289_s28 + $0x308] ss:$12 sps:$4 sm:$0xff]  }
 0x117   : > { %1978 = vmatprep.mubr.bf16.mxu0 %v4599_v59  ;;  %4305 = vmatprep.mubr.msk.bf16.mxu1 %vm1545_vm0, %v4601_v60 }
 0x11e   : > { %1979 = vmatmul.mubr.bf16.gmra.mrb[104].mxu0 %v4602_v61  ;;  %4306 = vmatmul.mubr.msk.bf16.gmra.mrb[104].mxu1 %vm1545_vm0, %v4603_v62 }
 0x11f   : > { %1986 = vmatprep.mubr.bf16.mxu0 %v4604_v63  ;;  %4309 = vmatprep.mubr.msk.bf16.mxu1 %vm1545_vm0, %v4606_v0 }
 0x121   : > { %v5487_v1 = vpop.f32.mrb[0].mxu0  ;;  %v5489_v2 = vpop.f32.mrb[0].mxu1 }
 0x122   : > { %v1774_v3 = vpop.f32.mrb[1].mxu0  ;;  %v2158_v4 = vpop.f32.mrb[1].mxu1 }
 0x123   : > { %v5493_v7 = vpop.f32.mrb[2].mxu0  ;;  %v5495_v8 = vpop.f32.mrb[2].mxu1  ;;  %v4632_v3 = vld [vmem:[%s5289_s28 + $0x300] ss:$12 sps:$4 sm:$0xff]  }
 0x124   : > { %v1777_v11 = vpop.f32.mrb[3].mxu0  ;;  %v2161_v12 = vpop.f32.mrb[3].mxu1  ;;  %v4633_v4 = vld [vmem:[%s5289_s28 + $0x320] ss:$12 sps:$4 sm:$0xff]  }
 0x126   : > { %1987 = vmatmul.mubr.bf16.gmra.mrb[108].mxu0 %v4607_v5  ;;  %4310 = vmatmul.mubr.msk.bf16.gmra.mrb[108].mxu1 %vm1545_vm0, %v4608_v6 }
 0x127   : > { %1994 = vmatprep.mubr.bf16.mxu0 %v4609_v9  ;;  %4313 = vmatprep.mubr.msk.bf16.mxu1 %vm1545_vm0, %v4611_v10  ;;  %v4634_v9 = vld [vmem:[%s5289_s28 + $0x31c] ss:$12 sps:$4 sm:$0xff]   ;;  %v4636_v10 = vld [vmem:[%s5289_s28 + $0x338] ss:$12 sps:$4 sm:$0xff]  }
 0x129   : > { %v5501_v13 = vpop.f32.mrb[4].mxu0  ;;  %v5503_v14 = vpop.f32.mrb[4].mxu1 }
 0x12a   : > { %v1782_v15 = vpop.f32.mrb[5].mxu0  ;;  %v2166_v16 = vpop.f32.mrb[5].mxu1 }
 0x12b   : > { %v5507_v19 = vpop.f32.mrb[6].mxu0  ;;  %v5509_v20 = vpop.f32.mrb[6].mxu1 }
 0x12c   : > { %v1785_v23 = vpop.f32.mrb[7].mxu0  ;;  %v2169_v24 = vpop.f32.mrb[7].mxu1 }
 0x12e   : > { %1995 = vmatmul.mubr.bf16.gmra.mrb[112].mxu0 %v4612_v17  ;;  %4314 = vmatmul.mubr.msk.bf16.gmra.mrb[112].mxu1 %vm1545_vm0, %v4613_v18 }
 0x12f   : > { %2002 = vmatprep.mubr.bf16.mxu0 %v4614_v21  ;;  %4317 = vmatprep.mubr.msk.bf16.mxu1 %vm1545_vm0, %v4616_v22  ;;  %v4637_v21 = vld [vmem:[%s5289_s28 + $0x318] ss:$12 sps:$4 sm:$0xff]   ;;  %v4638_v22 = vld [vmem:[%s5289_s28 + $0x350] ss:$12 sps:$4 sm:$0xff]  }
 0x131   : > { %v5515_v25 = vpop.f32.mrb[8].mxu0  ;;  %v5517_v26 = vpop.f32.mrb[8].mxu1 }
 0x132   : > { %v1790_v27 = vpop.f32.mrb[9].mxu0  ;;  %v2174_v28 = vpop.f32.mrb[9].mxu1 }
 0x133   : > { %v5521_v31 = vpop.f32.mrb[10].mxu0  ;;  %v5523_v32 = vpop.f32.mrb[10].mxu1  ;;  %v4639_v27 = vld [vmem:[%s5289_s28 + $0x334] ss:$12 sps:$4 sm:$0xff]  }
 0x134   : > { %v1793_v35 = vpop.f32.mrb[11].mxu0  ;;  %v2177_v36 = vpop.f32.mrb[11].mxu1  ;;  %v4641_v28 = vld [vmem:[%s5289_s28 + $0x368] ss:$12 sps:$4 sm:$0xff]  }
 0x136   : > { %2003 = vmatmul.mubr.bf16.gmra.mrb[116].mxu0 %v4617_v29  ;;  %4318 = vmatmul.mubr.msk.bf16.gmra.mrb[116].mxu1 %vm1545_vm0, %v4618_v30 }
 0x137   : > { %2010 = vmatprep.mubr.bf16.mxu0 %v4619_v33  ;;  %4321 = vmatprep.mubr.msk.bf16.mxu1 %vm1545_vm0, %v4621_v34 }
 0x139   : > { %v5529_v37 = vpop.f32.mrb[12].mxu0  ;;  %v5531_v38 = vpop.f32.mrb[12].mxu1 }
 0x13a   : > { %v1798_v39 = vpop.f32.mrb[13].mxu0  ;;  %v2182_v40 = vpop.f32.mrb[13].mxu1 }
 0x13b   : > { %v5535_v43 = vpop.f32.mrb[14].mxu0  ;;  %v5537_v44 = vpop.f32.mrb[14].mxu1  ;;  %v4642_v39 = vld [vmem:[%s5289_s28 + $0x330] ss:$12 sps:$4 sm:$0xff]   ;;  %v4643_v40 = vld [vmem:[%s5289_s28 + $0x380] ss:$12 sps:$4 sm:$0xff]  }
 0x13c   : > { %v1801_v47 = vpop.f32.mrb[15].mxu0  ;;  %v2185_v48 = vpop.f32.mrb[15].mxu1 }
 0x13e   : > { %2011 = vmatmul.mubr.bf16.gmra.mrb[120].mxu0 %v4622_v41  ;;  %4322 = vmatmul.mubr.msk.bf16.gmra.mrb[120].mxu1 %vm1545_vm0, %v4623_v42 }
 0x13f   : > { %2018 = vmatprep.mubr.bf16.mxu0 %v4624_v45  ;;  %4325 = vmatprep.mubr.msk.bf16.mxu1 %vm1545_vm0, %v4626_v46  ;;  %v4644_v45 = vld [vmem:[%s5289_s28 + $0x34c] ss:$12 sps:$4 sm:$0xff]  }
 0x140   : > { %v4646_v46 = vld [vmem:[%s5289_s28 + $0x398] ss:$12 sps:$4 sm:$0xff]  }
 0x141   : > { %v5543_v49 = vpop.f32.mrb[16].mxu0  ;;  %v5545_v50 = vpop.f32.mrb[16].mxu1 }
 0x142   : > { %v1806_v51 = vpop.f32.mrb[17].mxu0  ;;  %v2190_v52 = vpop.f32.mrb[17].mxu1 }
 0x143   : > { %v5549_v55 = vpop.f32.mrb[18].mxu0  ;;  %v5551_v56 = vpop.f32.mrb[18].mxu1 }
 0x144   : > { %v1809_v59 = vpop.f32.mrb[19].mxu0  ;;  %v2193_v60 = vpop.f32.mrb[19].mxu1 }
 0x146   : > { %2019 = vmatmul.mubr.bf16.gmra.mrb[124].mxu0 %v4627_v53  ;;  %4326 = vmatmul.mubr.msk.bf16.gmra.mrb[124].mxu1 %vm1545_vm0, %v4628_v54 }
 0x147   : > { %2026 = vmatprep.mubr.bf16.mxu0 %v4629_v57  ;;  %4329 = vmatprep.mubr.msk.bf16.mxu1 %vm1545_vm0, %v4631_v58  ;;  %v4647_v57 = vld [vmem:[%s5289_s28 + $0x348] ss:$12 sps:$4 sm:$0xff]   ;;  %v4648_v58 = vld [vmem:[%s5289_s28 + $0x3b0] ss:$12 sps:$4 sm:$0xff]  }
 0x149   : > { %v5557_v61 = vpop.f32.mrb[20].mxu0  ;;  %v5559_v62 = vpop.f32.mrb[20].mxu1 }
 0x14a   : > { %v1814_v63 = vpop.f32.mrb[21].mxu0  ;;  %v2198_v0 = vpop.f32.mrb[21].mxu1 }
 0x14b   : > { %v5563_v5 = vpop.f32.mrb[22].mxu0  ;;  %v5565_v6 = vpop.f32.mrb[22].mxu1  ;;  %v4649_v63 = vld [vmem:[%s5289_s28 + $0x364] ss:$12 sps:$4 sm:$0xff]   ;;  %v4651_v0 = vld [vmem:[%s5289_s28 + $0x3c8] ss:$12 sps:$4 sm:$0xff]  }
 0x14c   : > { %v1817_v11 = vpop.f32.mrb[23].mxu0  ;;  %v2201_v12 = vpop.f32.mrb[23].mxu1 }
 0x14e   : > { %2027 = vmatmul.mubr.bf16.gmra.mrb[128].mxu0 %v4632_v3  ;;  %4330 = vmatmul.mubr.msk.bf16.gmra.mrb[128].mxu1 %vm1545_vm0, %v4633_v4 }
 0x14f   : > { %2034 = vmatprep.mubr.bf16.mxu0 %v4634_v9  ;;  %4333 = vmatprep.mubr.msk.bf16.mxu1 %vm1545_vm0, %v4636_v10 }
 0x151   : > { %v5571_v15 = vpop.f32.mrb[24].mxu0  ;;  %v5573_v16 = vpop.f32.mrb[24].mxu1 }
 0x152   : > { %6448 = vst [vmem:[#allocation2_spill] sm:$0xff] %v5573_v16  ;;  %v1822_v17 = vpop.f32.mrb[25].mxu0  ;;  %v2206_v18 = vpop.f32.mrb[25].mxu1 }
 0x153   : > { %v5577_v23 = vpop.f32.mrb[26].mxu0  ;;  %v5579_v24 = vpop.f32.mrb[26].mxu1  ;;  %v4652_v17 = vld [vmem:[%s5289_s28 + $0x360] ss:$12 sps:$4 sm:$0xff]  }
 0x154   : > { %6449 = vst [vmem:[#allocation3_spill] sm:$0xff] %v5579_v24  ;;  %v1825_v29 = vpop.f32.mrb[27].mxu0  ;;  %v2209_v30 = vpop.f32.mrb[27].mxu1  ;;  %v4653_v18 = vld [vmem:[%s5289_s28 + $0x3e0] ss:$12 sps:$4 sm:$0xff]  }
 0x156   : > { %2035 = vmatmul.mubr.bf16.gmra.mrb[132].mxu0 %v4637_v21  ;;  %4334 = vmatmul.mubr.msk.bf16.gmra.mrb[132].mxu1 %vm1545_vm0, %v4638_v22 }
 0x157   : > { %2042 = vmatprep.mubr.bf16.mxu0 %v4639_v27  ;;  %4337 = vmatprep.mubr.msk.bf16.mxu1 %vm1545_vm0, %v4641_v28  ;;  %v4654_v27 = vld [vmem:[%s5289_s28 + $0x37c] ss:$12 sps:$4 sm:$0xff]   ;;  %v4656_v28 = vld [vmem:[%s5289_s28 + $0x3f8] ss:$12 sps:$4 sm:$0xff]  }
 0x159   : > { %v5585_v33 = vpop.f32.mrb[28].mxu0  ;;  %v5587_v34 = vpop.f32.mrb[28].mxu1 }
 0x15a   : > { %6450 = vst [vmem:[#allocation4_spill] sm:$0xff] %v5587_v34  ;;  %v1830_v35 = vpop.f32.mrb[29].mxu0  ;;  %v2214_v36 = vpop.f32.mrb[29].mxu1 }
 0x15b   : > { %v5591_v41 = vpop.f32.mrb[30].mxu0  ;;  %v5593_v42 = vpop.f32.mrb[30].mxu1 }
 0x15c   : > { %6451 = vst [vmem:[#allocation5_spill] sm:$0xff] %v5593_v42  ;;  %v1833_v47 = vpop.f32.mrb[31].mxu0  ;;  %v2217_v48 = vpop.f32.mrb[31].mxu1 }
 0x15e   : > { %2043 = vmatmul.mubr.bf16.gmra.mrb[136].mxu0 %v4642_v39  ;;  %4338 = vmatmul.mubr.msk.bf16.gmra.mrb[136].mxu1 %vm1545_vm0, %v4643_v40 }
 0x15f   : > { %2050 = vmatprep.mubr.bf16.mxu0 %v4644_v45  ;;  %4341 = vmatprep.mubr.msk.bf16.mxu1 %vm1545_vm0, %v4646_v46  ;;  %v4657_v45 = vld [vmem:[%s5289_s28 + $0x378] ss:$12 sps:$4 sm:$0xff]   ;;  %v4658_v46 = vld [vmem:[%s5289_s28 + $0x410] ss:$12 sps:$4 sm:$0xff]  }
 0x161   : > { %v5599_v51 = vpop.f32.mrb[32].mxu0  ;;  %v5601_v52 = vpop.f32.mrb[32].mxu1 }
 0x162   : > { %6452 = vst [vmem:[#allocation6_spill] sm:$0xff] %v5601_v52  ;;  %v1838_v53 = vpop.f32.mrb[33].mxu0  ;;  %v2222_v54 = vpop.f32.mrb[33].mxu1  ;;  %v4689_v52 = vld [vmem:[%s5289_s28 + $0x424] ss:$12 sps:$4 sm:$0xff]  }
 0x163   : > { %v5605_v59 = vpop.f32.mrb[34].mxu0  ;;  %v5607_v60 = vpop.f32.mrb[34].mxu1  ;;  %v4659_v53 = vld [vmem:[%s5289_s28 + $0x394] ss:$12 sps:$4 sm:$0xff]  }
 0x164   : > { %6453 = vst [vmem:[#allocation7_spill] sm:$0xff] %v5607_v60  ;;  %v1841_v3 = vpop.f32.mrb[35].mxu0  ;;  %v2225_v4 = vpop.f32.mrb[35].mxu1  ;;  %v4661_v54 = vld [vmem:[%s5289_s28 + $0x428] ss:$12 sps:$4 sm:$0xff]  }
 0x166   : > { %2051 = vmatmul.mubr.bf16.gmra.mrb[140].mxu0 %v4647_v57  ;;  %4342 = vmatmul.mubr.msk.bf16.gmra.mrb[140].mxu1 %vm1545_vm0, %v4648_v58 }
 0x167   : > { %2058 = vmatprep.mubr.bf16.mxu0 %v4649_v63  ;;  %4345 = vmatprep.mubr.msk.bf16.mxu1 %vm1545_vm0, %v4651_v0 }
 0x169   : > { %v5613_v9 = vpop.f32.mrb[36].mxu0  ;;  %v5615_v10 = vpop.f32.mrb[36].mxu1 }
 0x16a   : > { %6454 = vst [vmem:[#allocation8_spill] sm:$0xff] %v5615_v10  ;;  %v1846_v11 = vpop.f32.mrb[37].mxu0  ;;  %v2230_v12 = vpop.f32.mrb[37].mxu1 }
 0x16b   : > { %v5619_v21 = vpop.f32.mrb[38].mxu0  ;;  %v5621_v22 = vpop.f32.mrb[38].mxu1  ;;  %v4662_v11 = vld [vmem:[%s5289_s28 + $0x390] ss:$12 sps:$4 sm:$0xff]   ;;  %v4663_v12 = vld [vmem:[%s5289_s28 + $0x440] ss:$12 sps:$4 sm:$0xff]  }
 0x16c   : > { %6455 = vst [vmem:[#allocation9_spill] sm:$0xff] %v5621_v22  ;;  %v1849_v29 = vpop.f32.mrb[39].mxu0  ;;  %v2233_v30 = vpop.f32.mrb[39].mxu1 }
 0x16e   : > { %2059 = vmatmul.mubr.bf16.gmra.mrb[144].mxu0 %v4652_v17  ;;  %4346 = vmatmul.mubr.msk.bf16.gmra.mrb[144].mxu1 %vm1545_vm0, %v4653_v18 }
 0x16f   : > { %2066 = vmatprep.mubr.bf16.mxu0 %v4654_v27  ;;  %4349 = vmatprep.mubr.msk.bf16.mxu1 %vm1545_vm0, %v4656_v28  ;;  %v4664_v27 = vld [vmem:[%s5289_s28 + $0x3ac] ss:$12 sps:$4 sm:$0xff]  }
 0x170   : > { %v4666_v28 = vld [vmem:[%s5289_s28 + $0x458] ss:$12 sps:$4 sm:$0xff]  }
 0x171   : > { %v5627_v35 = vpop.f32.mrb[40].mxu0  ;;  %v5629_v36 = vpop.f32.mrb[40].mxu1 }
 0x172   : > { %6456 = vst [vmem:[#allocation10_spill] sm:$0xff] %v5629_v36  ;;  %v1854_v39 = vpop.f32.mrb[41].mxu0  ;;  %v2238_v40 = vpop.f32.mrb[41].mxu1 }
 0x173   : > { %v5633_v47 = vpop.f32.mrb[42].mxu0  ;;  %v5635_v48 = vpop.f32.mrb[42].mxu1 }
 0x174   : > { %6457 = vst [vmem:[#allocation11_spill] sm:$0xff] %v5635_v48  ;;  %v1857_v57 = vpop.f32.mrb[43].mxu0  ;;  %v2241_v58 = vpop.f32.mrb[43].mxu1 }
 0x176   : > { %2067 = vmatmul.mubr.bf16.gmra.mrb[148].mxu0 %v4657_v45  ;;  %4350 = vmatmul.mubr.msk.bf16.gmra.mrb[148].mxu1 %vm1545_vm0, %v4658_v46 }
 0x177   : > { %2074 = vmatprep.mubr.bf16.mxu0 %v4659_v53  ;;  %4353 = vmatprep.mubr.msk.bf16.mxu1 %vm1545_vm0, %v4661_v54  ;;  %v4667_v53 = vld [vmem:[%s5289_s28 + $0x3a8] ss:$12 sps:$4 sm:$0xff]   ;;  %v4668_v54 = vld [vmem:[%s5289_s28 + $0x470] ss:$12 sps:$4 sm:$0xff]  }
 0x179   : > { %v5641_v63 = vpop.f32.mrb[44].mxu0  ;;  %v5643_v0 = vpop.f32.mrb[44].mxu1 }
 0x17a   : > { %6458 = vst [vmem:[#allocation12_spill] sm:$0xff] %v5643_v0  ;;  %v1862_v3 = vpop.f32.mrb[45].mxu0  ;;  %v2246_v4 = vpop.f32.mrb[45].mxu1 }
 0x17b   : > { %v5647_v17 = vpop.f32.mrb[46].mxu0  ;;  %v5649_v18 = vpop.f32.mrb[46].mxu1  ;;  %v4669_v3 = vld [vmem:[%s5289_s28 + $0x3c4] ss:$12 sps:$4 sm:$0xff]   ;;  %v4671_v4 = vld [vmem:[%s5289_s28 + $0x488] ss:$12 sps:$4 sm:$0xff]  }
 0x17c   : > { %6459 = vst [vmem:[#allocation13_spill] sm:$0xff] %v5649_v18  ;;  %v1865_v29 = vpop.f32.mrb[47].mxu0  ;;  %v2249_v30 = vpop.f32.mrb[47].mxu1  ;;  %v4682_v18 = vld [vmem:[%s5289_s28 + $0x3f0] ss:$12 sps:$4 sm:$0xff]  }
 0x17e   : > { %2075 = vmatmul.mubr.bf16.gmra.mrb[152].mxu0 %v4662_v11  ;;  %4354 = vmatmul.mubr.msk.bf16.gmra.mrb[152].mxu1 %vm1545_vm0, %v4663_v12 }
 0x17f   : > { %2082 = vmatprep.mubr.bf16.mxu0 %v4664_v27  ;;  %4357 = vmatprep.mubr.msk.bf16.mxu1 %vm1545_vm0, %v4666_v28 }
 0x181   : > { %v5655_v39 = vpop.f32.mrb[48].mxu0  ;;  %v5657_v40 = vpop.f32.mrb[48].mxu1 }
 0x182   : > { %6460 = vst [vmem:[#allocation14_spill] sm:$0xff] %v5657_v40  ;;  %v1870_v45 = vpop.f32.mrb[49].mxu0  ;;  %v2254_v46 = vpop.f32.mrb[49].mxu1 }
 0x183   : > { %v5661_v57 = vpop.f32.mrb[50].mxu0  ;;  %v5663_v58 = vpop.f32.mrb[50].mxu1  ;;  %v4672_v45 = vld [vmem:[%s5289_s28 + $0x3c0] ss:$12 sps:$4 sm:$0xff]  }
 0x184   : > { %6461 = vst [vmem:[#allocation15_spill] sm:$0xff] %v5663_v58  ;;  %v1873_v11 = vpop.f32.mrb[51].mxu0  ;;  %v2257_v12 = vpop.f32.mrb[51].mxu1  ;;  %v4673_v46 = vld [vmem:[%s5289_s28 + $0x4a0] ss:$12 sps:$4 sm:$0xff]  }
 0x186   : > { %2083 = vmatmul.mubr.bf16.gmra.mrb[156].mxu0 %v4667_v53  ;;  %4358 = vmatmul.mubr.msk.bf16.gmra.mrb[156].mxu1 %vm1545_vm0, %v4668_v54  ;;  %v4674_v53 = vld [vmem:[%s5289_s28 + $0x3dc] ss:$12 sps:$4 sm:$0xff]   ;;  %v4676_v54 = vld [vmem:[%s5289_s28 + $0x4b8] ss:$12 sps:$4 sm:$0xff]  }
 0x187   : > { %2090 = vmatprep.mubr.bf16.mxu0 %v4669_v3  ;;  %4361 = vmatprep.mubr.msk.bf16.mxu1 %vm1545_vm0, %v4671_v4 }
 0x189   : > { %v5669_v27 = vpop.f32.mrb[52].mxu0  ;;  %v5671_v28 = vpop.f32.mrb[52].mxu1 }
 0x18a   : > { %6462 = vst [vmem:[#allocation16_spill] sm:$0xff] %v5671_v28  ;;  %v1878_v29 = vpop.f32.mrb[53].mxu0  ;;  %v2262_v30 = vpop.f32.mrb[53].mxu1  ;;  %v4677_v28 = vld [vmem:[%s5289_s28 + $0x3d8] ss:$12 sps:$4 sm:$0xff]  }
 0x18b   : > { %v5675_v58 = vpop.f32.mrb[54].mxu0  ;;  %v5677_v11 = vpop.f32.mrb[54].mxu1 }
 0x18c   : > { %6463 = vst [vmem:[#allocation17_spill] sm:$0xff] %v5677_v11  ;;  %v1881_v3 = vpop.f32.mrb[55].mxu0  ;;  %v2265_v4 = vpop.f32.mrb[55].mxu1  ;;  %v4678_v11 = vld [vmem:[%s5289_s28 + $0x4d0] ss:$12 sps:$4 sm:$0xff]  }
 0x18e   : > { %2091 = vmatmul.mubr.bf16.gmra.mrb[160].mxu0 %v4672_v45  ;;  %4362 = vmatmul.mubr.msk.bf16.gmra.mrb[160].mxu1 %vm1545_vm0, %v4673_v46  ;;  %v4679_v45 = vld [vmem:[%s5289_s28 + $0x3f4] ss:$12 sps:$4 sm:$0xff]  }
 0x18f   : > { %2098 = vmatprep.mubr.bf16.mxu0 %v4674_v53  ;;  %4365 = vmatprep.mubr.msk.bf16.mxu1 %vm1545_vm0, %v4676_v54  ;;  %v4681_v46 = vld [vmem:[%s5289_s28 + $0x4e8] ss:$12 sps:$4 sm:$0xff]  }
 0x191   : > { %v5683_v12 = vpop.f32.mrb[56].mxu0  ;;  %v5685_v29 = vpop.f32.mrb[56].mxu1 }
 0x192   : > { %6464 = vst [vmem:[#allocation18_spill] sm:$0xff] %v5685_v29  ;;  %v1886_v30 = vpop.f32.mrb[57].mxu0  ;;  %v2270_v40 = vpop.f32.mrb[57].mxu1 }
 0x193   : > { %v5689_v48 = vpop.f32.mrb[58].mxu0  ;;  %v5691_v3 = vpop.f32.mrb[58].mxu1 }
 0x194   : > { %6465 = vst [vmem:[#allocation19_spill] sm:$0xff] %v5691_v3  ;;  %v1889_v53 = vpop.f32.mrb[59].mxu0  ;;  %v2273_v54 = vpop.f32.mrb[59].mxu1  ;;  %v4683_v3 = vld [vmem:[%s5289_s28 + $0x500] ss:$12 sps:$4 sm:$0xff]  }
 0x195   : > { %v4684_v53 = vld [vmem:[%s5289_s28 + $0x40c] ss:$12 sps:$4 sm:$0xff]  }
 0x196   : > { %2099 = vmatmul.mubr.bf16.gmra.mrb[164].mxu0 %v4677_v28  ;;  %4366 = vmatmul.mubr.msk.bf16.gmra.mrb[164].mxu1 %vm1545_vm0, %v4678_v11  ;;  %v4686_v54 = vld [vmem:[%s5289_s28 + $0x518] ss:$12 sps:$4 sm:$0xff]  }
 0x197   : > { %2106 = vmatprep.mubr.bf16.mxu0 %v4679_v45  ;;  %4369 = vmatprep.mubr.msk.bf16.mxu1 %vm1545_vm0, %v4681_v46  ;;  %v5712_v45 = vld [vmem:[%s6446_s2] ss:$0 sm:$0xff] }
 0x198   : > { %v1773_v46 = vadd.f32 %v5712_v45, %v5487_v1  ;;  %v4691_v1 = vld [vmem:[%s5289_s28 + $0x548] ss:$12 sps:$4 sm:$0xff]  }
 0x199   : > { %v5697_v40 = vpop.f32.mrb[60].mxu0  ;;  %v5699_v4 = vpop.f32.mrb[60].mxu1 }
 0x19a   : > { %6466 = vst [vmem:[#allocation20_spill] sm:$0xff] %v5699_v4  ;;  %v1894_v30 = vpop.f32.mrb[61].mxu0  ;;  %v2278_v29 = vpop.f32.mrb[61].mxu1  ;;  %v4688_v4 = vld [vmem:[%s5289_s28 + $0x530] ss:$12 sps:$4 sm:$0xff]  }
 0x19b   : > { %v5703_v36 = vpop.f32.mrb[62].mxu0  ;;  %v5705_v0 = vpop.f32.mrb[62].mxu1  ;;  %v1781_v29 = vadd.f32 %v5712_v45, %v5501_v13 }
 0x19c   : > { %6467 = vst [vmem:[#allocation21_spill] sm:$0xff] %v5705_v0  ;;  %v1897_v28 = vpop.f32.mrb[63].mxu0  ;;  %v2281_v11 = vpop.f32.mrb[63].mxu1 }
 0x19d   : > { %v1784_v11 = vadd.f32 %v5712_v45, %v5507_v19 }
 0x19e   : > { %2107 = vmatmul.mubr.bf16.gmra.mrb[168].mxu0 %v4682_v18  ;;  %4370 = vmatmul.mubr.msk.bf16.gmra.mrb[168].mxu1 %vm1545_vm0, %v4683_v3 }
 0x19f   : > { %2114 = vmatprep.mubr.bf16.mxu0 %v4684_v53  ;;  %4373 = vmatprep.mubr.msk.bf16.mxu1 %vm1545_vm0, %v4686_v54  ;;  %v4687_v53 = vld [vmem:[%s5289_s28 + $0x408] ss:$12 sps:$4 sm:$0xff]   ;;  %v1776_v54 = vadd.f32 %v5712_v45, %v5493_v7 }
 0x1a1   : > { %v5720_v30 = vpop.f32.mrb[64].mxu0  ;;  %v4267_v28 = vpop.f32.mrb[64].mxu1 }
 0x1a2   : > { %v2326_v18 = vadd.f32 %v4267_v28, %v1781_v29  ;;  %v1902_v0 = vpop.f32.mrb[65].mxu0  ;;  %v2317_v3 = vpop.f32.mrb[65].mxu1  ;;  %v1797_v29 = vadd.f32 %v5712_v45, %v5529_v37  ;;  %v1792_v37 = vadd.f32 %v5712_v45, %v5521_v31 }
 0x1a3   : > { %v2318_v22 = vadd.f32 %v2317_v3, %v1773_v46  ;;  %v5728_v60 = vpop.f32.mrb[66].mxu0  ;;  %v4268_v13 = vpop.f32.mrb[66].mxu1  ;;  %v4693_v46 = vld [vmem:[%s5289_s28 + $0x560] ss:$12 sps:$4 sm:$0xff]   ;;  %v4696_v3 = vld [vmem:[%s5289_s28 + $0x578] ss:$12 sps:$4 sm:$0xff]  }
 0x1a4   : > { %v4067_v10 = vmul.f32 -1.442695, %v2326_v18  ;;  %v2329_v24 = vadd.f32 %v4268_v13, %v1784_v11  ;;  %v1905_v42 = vpop.f32.mrb[67].mxu0  ;;  %v2320_v16 = vpop.f32.mrb[67].mxu1 }
 0x1a5   : > { %v4065_v34 = vmul.f32 -1.442695, %v2318_v22  ;;  %v2321_v19 = vadd.f32 %v2320_v16, %v1776_v54  ;;  %v1789_v16 = vadd.f32 %v5712_v45, %v5515_v25  ;;  %v4694_v25 = vld [vmem:[%s5289_s28 + $0x43c] ss:$12 sps:$4 sm:$0xff]  }
 0x1a6   : > { %4709 = vpow2.f32 %v4067_v10  ;;  %v4068_v0 = vmul.f32 -1.442695, %v2329_v24  ;;  %2115 = vmatmul.mubr.bf16.gmra.mrb[172].mxu0 %v4687_v53  ;;  %4374 = vmatmul.mubr.msk.bf16.gmra.mrb[172].mxu1 %vm1545_vm0, %v4688_v4  ;;  %v4692_v4 = vld [vmem:[%s5289_s28 + $0x420] ss:$12 sps:$4 sm:$0xff]  }
 0x1a7   : > { %4711 = vpow2.f32 %v4065_v34  ;;  %v4066_v7 = vmul.f32 -1.442695, %v2321_v19  ;;  %2122 = vmatprep.mubr.bf16.mxu0 %v4689_v52  ;;  %4377 = vmatprep.mubr.msk.bf16.mxu1 %vm1545_vm0, %v4691_v1  ;;  %v1800_v34 = vadd.f32 %v5712_v45, %v5535_v43 }
 0x1a8   : > { %4713 = vpow2.f32 %v4068_v0 }
 0x1a9   : > { %4715 = vpow2.f32 %v4066_v7  ;;  %v5738_v24 = vpop.f32.mrb[68].mxu0  ;;  %v4271_v42 = vpop.f32.mrb[68].mxu1 }
 0x1aa   : > { %v2342_v10 = vadd.f32 %v4271_v42, %v1797_v29  ;;  %v1910_v52 = vpop.f32.mrb[69].mxu0  ;;  %v2333_v22 = vpop.f32.mrb[69].mxu1  ;;  %v1813_v29 = vadd.f32 %v5712_v45, %v5557_v61 }
 0x1ab   : > { %v2334_v28 = vadd.f32 %v2333_v22, %v1789_v16  ;;  %v5746_v11 = vpop.f32.mrb[70].mxu0  ;;  %v4272_v18 = vpop.f32.mrb[70].mxu1  ;;  %v4697_v16 = vld [vmem:[%s5289_s28 + $0x438] ss:$12 sps:$4 sm:$0xff]  }
 0x1ac   : > { %v4071_v53 = vmul.f32 -1.442695, %v2342_v10  ;;  %v2345_v54 = vadd.f32 %v4272_v18, %v1800_v34  ;;  %v1913_v13 = vpop.f32.mrb[71].mxu0  ;;  %v2336_v1 = vpop.f32.mrb[71].mxu1  ;;  %v1805_v34 = vadd.f32 %v5712_v45, %v5543_v49  ;;  %v1816_v49 = vadd.f32 %v5712_v45, %v5563_v5 }
 0x1ad   : > { %v4069_v43 = vmul.f32 -1.442695, %v2334_v28  ;;  %v2337_v19 = vadd.f32 %v2336_v1, %v1792_v37  ;;  %v1808_v37 = vadd.f32 %v5712_v45, %v5549_v55 }
 0x1ae   : > { %4717 = vpow2.f32 %v4071_v53  ;;  %v4072_v0 = vmul.f32 -1.442695, %v2345_v54  ;;  %2123 = vmatmul.mubr.bf16.gmra.mrb[176].mxu0 %v4692_v4  ;;  %4378 = vmatmul.mubr.msk.bf16.gmra.mrb[176].mxu1 %vm1545_vm0, %v4693_v46  ;;  %v4698_v4 = vld [vmem:[%s5289_s28 + $0x590] ss:$12 sps:$4 sm:$0xff]  }
 0x1af   : > { %4719 = vpow2.f32 %v4069_v43  ;;  %v4070_v31 = vmul.f32 -1.442695, %v2337_v19  ;;  %2130 = vmatprep.mubr.bf16.mxu0 %v4694_v25  ;;  %4381 = vmatprep.mubr.msk.bf16.mxu1 %vm1545_vm0, %v4696_v3  ;;  %v4699_v3 = vld [vmem:[%s5289_s28 + $0x454] ss:$12 sps:$4 sm:$0xff]  }
 0x1b0   : > { %v4710_v7 = vpop.eup %4709  ;;  %4721 = vpow2.f32 %v4072_v0  ;;  %v4701_v19 = vld [vmem:[%s5289_s28 + $0x5a8] ss:$12 sps:$4 sm:$0xff]  }
 0x1b1   : > { %v4712_v42 = vpop.eup %4711  ;;  %v3214_v10 = vadd.f32 1.0, %v4710_v7  ;;  %4723 = vpow2.f32 %v4070_v31  ;;  %v5757_v52 = vpop.f32.mrb[72].mxu0 }
 0x1b2   : > { %v4275_v22 = vpop.f32.mrb[72].mxu1  ;;  %v4714_v46 = vpop.eup %4713  ;;  %v3212_v28 = vadd.f32 1.0, %v4712_v42 }
 0x1b3   : > { %v2358_v61 = vadd.f32 %v4275_v22, %v1813_v29  ;;  %v1918_v18 = vpop.f32.mrb[73].mxu0  ;;  %v2349_v25 = vpop.f32.mrb[73].mxu1  ;;  %4725 = vrcp.f32 %v3214_v10  ;;  %v3215_v54 = vadd.f32 1.0, %v4714_v46  ;;  %v1829_v46 = vadd.f32 %v5712_v45, %v5585_v33 }
 0x1b4   : > { %v4716_v53 = vpop.eup %4715  ;;  %v2350_v13 = vadd.f32 %v2349_v25, %v1805_v34  ;;  %v5765_v1 = vpop.f32.mrb[74].mxu0  ;;  %4727 = vrcp.f32 %v3212_v28  ;;  %v4702_v28 = vld [vmem:[%s5289_s28 + $0x450] ss:$12 sps:$4 sm:$0xff]   ;;  %v4703_v25 = vld [vmem:[%s5289_s28 + $0x5c0] ss:$12 sps:$4 sm:$0xff]   ;;  %v1824_v33 = vadd.f32 %v5712_v45, %v5577_v23 }
 0x1b5   : > { %v4276_v43 = vpop.f32.mrb[74].mxu1  ;;  %v3213_v0 = vadd.f32 1.0, %v4716_v53  ;;  %v4075_v31 = vmul.f32 -1.442695, %v2358_v61  ;;  %v1921_v55 = vpop.f32.mrb[75].mxu0  ;;  %4729 = vrcp.f32 %v3215_v54 }
 0x1b6   : > { %v2352_v7 = vpop.f32.mrb[75].mxu1  ;;  %v4073_v29 = vmul.f32 -1.442695, %v2350_v13  ;;  %v2361_v42 = vadd.f32 %v4276_v43, %v1816_v49  ;;  %2131 = vmatmul.mubr.bf16.gmra.mrb[180].mxu0 %v4697_v16  ;;  %4382 = vmatmul.mubr.msk.bf16.gmra.mrb[180].mxu1 %vm1545_vm0, %v4698_v4  ;;  %v1821_v16 = vadd.f32 %v5712_v45, %v5571_v15  ;;  %v4704_v43 = vld [vmem:[%s5289_s28 + $0x46c] ss:$12 sps:$4 sm:$0xff]   ;;  %v1832_v15 = vadd.f32 %v5712_v45, %v5591_v41 }
 0x1b7   : > { %v2353_v22 = vadd.f32 %v2352_v7, %v1808_v37  ;;  %4731 = vrcp.f32 %v3213_v0  ;;  %2138 = vmatprep.mubr.bf16.mxu0 %v4699_v3  ;;  %4385 = vmatprep.mubr.msk.bf16.mxu1 %vm1545_vm0, %v4701_v19  ;;  %v4706_v7 = vld [vmem:[%s5289_s28 + $0x5d8] ss:$12 sps:$4 sm:$0xff]  }
 0x1b8   : > { %4733 = vpow2.f32 %v4075_v31  ;;  %v4076_v5 = vmul.f32 -1.442695, %v2361_v42  ;;  %v4718_v10 = vpop.eup %4717 }
 0x1b9   : > { %v4074_v34 = vmul.f32 -1.442695, %v2353_v22  ;;  %4735 = vpow2.f32 %v4073_v29  ;;  %v4720_v37 = vpop.eup %4719  ;;  %v3218_v4 = vadd.f32 1.0, %v4718_v10  ;;  %v5776_v61 = vpop.f32.mrb[76].mxu0 }
 0x1ba   : > { %4737 = vpow2.f32 %v4076_v5  ;;  %v4279_v18 = vpop.f32.mrb[76].mxu1  ;;  %v4722_v3 = vpop.eup %4721  ;;  %v3216_v53 = vadd.f32 1.0, %v4720_v37 }
 0x1bb   : > { %4739 = vpow2.f32 %v4074_v34  ;;  %v2374_v49 = vadd.f32 %v4279_v18, %v1829_v46  ;;  %v1926_v54 = vpop.f32.mrb[77].mxu0  ;;  %v2365_v13 = vpop.f32.mrb[77].mxu1  ;;  %v3219_v0 = vadd.f32 1.0, %v4722_v3 }
 0x1bc   : > { %v4724_v19 = vpop.eup %4723  ;;  %4741 = vrcp.f32 %v3218_v4  ;;  %v2366_v31 = vadd.f32 %v2365_v13, %v1821_v16  ;;  %v5789_v23 = vpop.f32.mrb[78].mxu0  ;;  %v4707_v54 = vld [vmem:[%s5289_s28 + $0x468] ss:$12 sps:$4 sm:$0xff]  }
 0x1bd   : > { %v4280_v55 = vpop.f32.mrb[78].mxu1  ;;  %4743 = vrcp.f32 %v3216_v53  ;;  %v3217_v29 = vadd.f32 1.0, %v4724_v19  ;;  %v4079_v42 = vmul.f32 -1.442695, %v2374_v49  ;;  %v1929_v22 = vpop.f32.mrb[79].mxu0 }
 0x1be   : > { %v2368_v5 = vpop.f32.mrb[79].mxu1  ;;  %v4726_v41 = vpop.eup %4725  ;;  %4745 = vrcp.f32 %v3219_v0  ;;  %v4077_v34 = vmul.f32 -1.442695, %v2366_v31  ;;  %v2377_v10 = vadd.f32 %v4280_v55, %v1832_v15  ;;  %2139 = vmatmul.mubr.bf16.gmra.mrb[184].mxu0 %v4702_v28  ;;  %4386 = vmatmul.mubr.msk.bf16.gmra.mrb[184].mxu1 %vm1545_vm0, %v4703_v25  ;;  %v1837_v25 = vadd.f32 %v5712_v45, %v5599_v51  ;;  %v4708_v0 = vld [vmem:[%s5289_s28 + $0x5f0] ss:$12 sps:$4 sm:$0xff]  }
 0x1bf   : > { %v2369_v46 = vadd.f32 %v2368_v5, %v1824_v33  ;;  %v4728_v37 = vpop.eup %4727  ;;  %3599 = vst.msk [vmem:[%s5787_s8 + $0x10] sm:$0xff] %vm3596_vm1, %v4726_v41  ;;  %4747 = vrcp.f32 %v3217_v29  ;;  %2146 = vmatprep.mubr.bf16.mxu0 %v4704_v43  ;;  %4389 = vmatprep.mubr.msk.bf16.mxu1 %vm1545_vm0, %v4706_v7  ;;  %v1845_v33 = vadd.f32 %v5712_v45, %v5613_v9 }
 0x1c0   : > { %v4730_v16 = vpop.eup %4729  ;;  %3597 = vst.msk [vmem:[%s5787_s8] sm:$0xff] %vm3596_vm1, %v4728_v37  ;;  %4749 = vpow2.f32 %v4079_v42  ;;  %v4080_v4 = vmul.f32 -1.442695, %v2377_v10  ;;  %v1848_v55 = vadd.f32 %v5712_v45, %v5619_v21  ;;  %v1840_v5 = vadd.f32 %v5712_v45, %v5605_v59 }
 0x1c1   : > { %v4078_v18 = vmul.f32 -1.442695, %v2369_v46  ;;  %v4732_v3 = vpop.eup %4731  ;;  %3600 = vst.msk [vmem:[%s5787_s8 + $0x18] sm:$0xff] %vm3596_vm1, %v4730_v16  ;;  %4751 = vpow2.f32 %v4077_v34  ;;  %v5806_v53 = vpop.f32.mrb[80].mxu0 }
 0x1c2   : > { %v4734_v28 = vpop.eup %4733  ;;  %3598 = vst.msk [vmem:[%s5787_s8 + $0x8] sm:$0xff] %vm3596_vm1, %v4732_v3  ;;  %4753 = vpow2.f32 %v4080_v4  ;;  %v4283_v49 = vpop.f32.mrb[80].mxu1 }
 0x1c3   : > { %v4736_v13 = vpop.eup %4735  ;;  %v3222_v43 = vadd.f32 1.0, %v4734_v28  ;;  %4755 = vpow2.f32 %v4078_v18  ;;  %v2390_v19 = vadd.f32 %v4283_v49, %v1845_v33  ;;  %v1934_v9 = vpop.f32.mrb[81].mxu0 }
 0x1c4   : > { %v2381_v15 = vpop.f32.mrb[81].mxu1  ;;  %v4738_v31 = vpop.eup %4737  ;;  %v3220_v7 = vadd.f32 1.0, %v4736_v13 }
 0x1c5   : > { %v2382_v51 = vadd.f32 %v2381_v15, %v1837_v25  ;;  %v5812_v29 = vpop.f32.mrb[82].mxu0  ;;  %v4284_v42 = vpop.f32.mrb[82].mxu1  ;;  %4757 = vrcp.f32 %v3222_v43  ;;  %v3223_v41 = vadd.f32 1.0, %v4738_v31  ;;  %v4083_v34 = vmul.f32 -1.442695, %v2390_v19 }
 0x1c6   : > { %v4740_v22 = vpop.eup %4739  ;;  %v1937_v10 = vpop.f32.mrb[83].mxu0  ;;  %4759 = vrcp.f32 %v3220_v7  ;;  %v2393_v4 = vadd.f32 %v4284_v42, %v1848_v55  ;;  %2147 = vmatmul.mubr.bf16.gmra.mrb[188].mxu0 %v4707_v54  ;;  %4390 = vmatmul.mubr.msk.bf16.gmra.mrb[188].mxu1 %vm1545_vm0, %v4708_v0  ;;  %v1861_v25 = vadd.f32 %v5712_v45, %v5641_v63  ;;  %v1853_v43 = vadd.f32 %v5712_v45, %v5627_v35 }
 0x1c7   : > { %v2384_v46 = vpop.f32.mrb[83].mxu1  ;;  %v4742_v37 = vpop.eup %4741  ;;  %v3221_v21 = vadd.f32 1.0, %v4740_v22  ;;  %v4081_v16 = vmul.f32 -1.442695, %v2382_v51  ;;  %4761 = vrcp.f32 %v3223_v41  ;;  %v1864_v7 = vadd.f32 %v5712_v45, %v5647_v17 }
 0x1c8   : > { %v4744_v18 = vpop.eup %4743  ;;  %3603 = vst.msk [vmem:[%s5787_s8 + $0x30] sm:$0xff] %vm3596_vm1, %v4742_v37  ;;  %v2385_v3 = vadd.f32 %v2384_v46, %v1840_v5  ;;  %v4084_v33 = vmul.f32 -1.442695, %v2393_v4  ;;  %v1856_v41 = vadd.f32 %v5712_v45, %v5633_v47 }
 0x1c9   : > { %v4746_v59 = vpop.eup %4745  ;;  %3601 = vst.msk [vmem:[%s5787_s8 + $0x20] sm:$0xff] %vm3596_vm1, %v4744_v18  ;;  %4763 = vrcp.f32 %v3221_v21  ;;  %v5829_v54 = vpop.f32.mrb[84].mxu0 }
 0x1ca   : > { %v4748_v28 = vpop.eup %4747  ;;  %3604 = vst.msk [vmem:[%s5787_s8 + $0x38] sm:$0xff] %vm3596_vm1, %v4746_v59  ;;  %4765 = vpow2.f32 %v4083_v34  ;;  %v4082_v49 = vmul.f32 -1.442695, %v2385_v3  ;;  %v4287_v19 = vpop.f32.mrb[84].mxu1 }
 0x1cb   : > { %v4750_v13 = vpop.eup %4749  ;;  %3602 = vst.msk [vmem:[%s5787_s8 + $0x28] sm:$0xff] %vm3596_vm1, %v4748_v28  ;;  %4767 = vpow2.f32 %v4081_v16  ;;  %v2406_v0 = vadd.f32 %v4287_v19, %v1861_v25  ;;  %v1942_v31 = vpop.f32.mrb[85].mxu0 }
 0x1cc   : > { %v4752_v9 = vpop.eup %4751  ;;  %v3226_v15 = vadd.f32 1.0, %v4750_v13  ;;  %4769 = vpow2.f32 %v4084_v33  ;;  %v2397_v63 = vpop.f32.mrb[85].mxu1  ;;  %v1877_v33 = vadd.f32 %v5712_v45, %v5669_v27 }
 0x1cd   : > { %v4754_v55 = vpop.eup %4753  ;;  %v3224_v51 = vadd.f32 1.0, %v4752_v9  ;;  %4771 = vpow2.f32 %v4082_v49  ;;  %v2398_v42 = vadd.f32 %v2397_v63, %v1853_v43  ;;  %v5833_v35 = vpop.f32.mrb[86].mxu0  ;;  %v4087_v10 = vmul.f32 -1.442695, %v2406_v0 }
 0x1ce   : > { %v4288_v22 = vpop.f32.mrb[86].mxu1  ;;  %v4756_v5 = vpop.eup %4755  ;;  %4773 = vrcp.f32 %v3226_v15  ;;  %v3227_v34 = vadd.f32 1.0, %v4754_v55  ;;  %v1869_v49 = vadd.f32 %v5712_v45, %v5655_v39  ;;  %v1880_v9 = vadd.f32 %v5712_v45, %v5675_v58 }
 0x1cf   : > { %v1945_v46 = vpop.f32.mrb[87].mxu0  ;;  %v2400_v37 = vpop.f32.mrb[87].mxu1  ;;  %4775 = vrcp.f32 %v3224_v51  ;;  %v3225_v21 = vadd.f32 1.0, %v4756_v5  ;;  %v4085_v17 = vmul.f32 -1.442695, %v2398_v42  ;;  %v2409_v16 = vadd.f32 %v4288_v22, %v1864_v7 }
 0x1d0   : > { %v4758_v4 = vpop.eup %4757  ;;  %4777 = vrcp.f32 %v3227_v34  ;;  %v2401_v18 = vadd.f32 %v2400_v37, %v1856_v41  ;;  %v1872_v39 = vadd.f32 %v5712_v45, %v5661_v57 }
 0x1d1   : > { %v4760_v3 = vpop.eup %4759  ;;  %3607 = vst.msk [vmem:[%s5787_s8 + $0x50] sm:$0xff] %vm3596_vm1, %v4758_v4  ;;  %4779 = vrcp.f32 %v3225_v21  ;;  %v4088_v47 = vmul.f32 -1.442695, %v2409_v16  ;;  %v5847_v13 = vpop.f32.mrb[88].mxu0 }
 0x1d2   : > { %v4762_v59 = vpop.eup %4761  ;;  %3605 = vst.msk [vmem:[%s5787_s8 + $0x40] sm:$0xff] %vm3596_vm1, %v4760_v3  ;;  %4781 = vpow2.f32 %v4087_v10  ;;  %v4086_v28 = vmul.f32 -1.442695, %v2401_v18  ;;  %v4291_v43 = vpop.f32.mrb[88].mxu1  ;;  %v1893_v3 = vadd.f32 %v5712_v45, %v5697_v40 }
 0x1d3   : > { %v4764_v25 = vpop.eup %4763  ;;  %3608 = vst.msk [vmem:[%s5787_s8 + $0x58] sm:$0xff] %vm3596_vm1, %v4762_v59  ;;  %4783 = vpow2.f32 %v4085_v17  ;;  %v2422_v27 = vadd.f32 %v4291_v43, %v1877_v33  ;;  %v1950_v15 = vpop.f32.mrb[89].mxu0  ;;  %v1885_v33 = vadd.f32 %v5712_v45, %v5683_v12 }
 0x1d4   : > { %v4766_v19 = vpop.eup %4765  ;;  %3606 = vst.msk [vmem:[%s5787_s8 + $0x48] sm:$0xff] %vm3596_vm1, %v4764_v25  ;;  %4785 = vpow2.f32 %v4088_v47  ;;  %v2413_v0 = vpop.f32.mrb[89].mxu1 }
 0x1d5   : > { %v4768_v31 = vpop.eup %4767  ;;  %v3230_v63 = vadd.f32 1.0, %v4766_v19  ;;  %4787 = vpow2.f32 %v4086_v28  ;;  %v2414_v55 = vadd.f32 %v2413_v0, %v1869_v49  ;;  %v5855_v7 = vpop.f32.mrb[90].mxu0  ;;  %v4091_v46 = vmul.f32 -1.442695, %v2422_v27 }
 0x1d6   : > { %v4292_v51 = vpop.f32.mrb[90].mxu1  ;;  %v4770_v42 = vpop.eup %4769  ;;  %v3228_v22 = vadd.f32 1.0, %v4768_v31  ;;  %v1896_v27 = vadd.f32 %v5712_v45, %v5703_v36 }
 0x1d7   : > { %v2425_v58 = vadd.f32 %v4292_v51, %v1880_v9  ;;  %v1953_v5 = vpop.f32.mrb[91].mxu0  ;;  %v2416_v41 = vpop.f32.mrb[91].mxu1  ;;  %4789 = vrcp.f32 %v3230_v63  ;;  %v3231_v10 = vadd.f32 1.0, %v4770_v42  ;;  %v4089_v17 = vmul.f32 -1.442695, %v2414_v55 }
 0x1d8   : > { %v4772_v34 = vpop.eup %4771  ;;  %v2417_v37 = vadd.f32 %v2416_v41, %v1872_v39  ;;  %4791 = vrcp.f32 %v3228_v22  ;;  %v1888_v63 = vadd.f32 %v5712_v45, %v5689_v48 }
 0x1d9   : > { %v4774_v57 = vpop.eup %4773  ;;  %v3229_v21 = vadd.f32 1.0, %v4772_v34  ;;  %4793 = vrcp.f32 %v3231_v10  ;;  %v4092_v4 = vmul.f32 -1.442695, %v2425_v58  ;;  %v5867_v28 = vpop.f32.mrb[92].mxu0 }
 0x1da   : > { %v4776_v16 = vpop.eup %4775  ;;  %3611 = vst.msk [vmem:[%s5787_s8 + $0x70] sm:$0xff] %vm3596_vm1, %v4774_v57  ;;  %v4090_v47 = vmul.f32 -1.442695, %v2417_v37  ;;  %v4295_v25 = vpop.f32.mrb[92].mxu1  ;;  %v1909_v57 = vadd.f32 %v5712_v45, %v5738_v24 }
 0x1db   : > { %v4778_v18 = vpop.eup %4777  ;;  %3609 = vst.msk [vmem:[%s5787_s8 + $0x60] sm:$0xff] %vm3596_vm1, %v4776_v16  ;;  %4795 = vrcp.f32 %v3229_v21  ;;  %v2438_v43 = vadd.f32 %v4295_v25, %v1893_v3  ;;  %v1958_v40 = vpop.f32.mrb[93].mxu0  ;;  %v1901_v16 = vadd.f32 %v5712_v45, %v5720_v30  ;;  %v1904_v25 = vadd.f32 %v5712_v45, %v5728_v60 }
 0x1dc   : > { %v4780_v59 = vpop.eup %4779  ;;  %3612 = vst.msk [vmem:[%s5787_s8 + $0x78] sm:$0xff] %vm3596_vm1, %v4778_v18  ;;  %4797 = vpow2.f32 %v4091_v46  ;;  %v2429_v19 = vpop.f32.mrb[93].mxu1  ;;  %v1912_v30 = vadd.f32 %v5712_v45, %v5746_v11 }
 0x1dd   : > { %v4782_v49 = vpop.eup %4781  ;;  %3610 = vst.msk [vmem:[%s5787_s8 + $0x68] sm:$0xff] %vm3596_vm1, %v4780_v59  ;;  %4799 = vpow2.f32 %v4089_v17  ;;  %v2430_v12 = vadd.f32 %v2429_v19, %v1885_v33  ;;  %v5873_v0 = vpop.f32.mrb[94].mxu0  ;;  %v4095_v5 = vmul.f32 -1.442695, %v2438_v43 }
 0x1de   : > { %v4784_v9 = vpop.eup %4783  ;;  %v3234_v15 = vadd.f32 1.0, %v4782_v49  ;;  %4801 = vpow2.f32 %v4092_v4  ;;  %v4296_v31 = vpop.f32.mrb[94].mxu1 }
 0x1df   : > { %v4786_v39 = vpop.eup %4785  ;;  %v3232_v55 = vadd.f32 1.0, %v4784_v9  ;;  %4803 = vpow2.f32 %v4090_v47  ;;  %v1961_v51 = vpop.f32.mrb[95].mxu0  ;;  %v2441_v36 = vadd.f32 %v4296_v31, %v1896_v27  ;;  %v4093_v34 = vmul.f32 -1.442695, %v2430_v12 }
 0x1e0   : > { %v2432_v42 = vpop.f32.mrb[95].mxu1  ;;  %v4788_v22 = vpop.eup %4787  ;;  %4805 = vrcp.f32 %v3234_v15  ;;  %v3235_v58 = vadd.f32 1.0, %v4786_v39 }
 0x1e1   : > { %4807 = vrcp.f32 %v3232_v55  ;;  %v3233_v41 = vadd.f32 1.0, %v4788_v22  ;;  %v2433_v10 = vadd.f32 %v2432_v42, %v1888_v63  ;;  %v4790_v46 = vpop.eup %4789  ;;  %v4096_v37 = vmul.f32 -1.442695, %v2441_v36  ;;  %v5885_v4 = vpop.f32.mrb[96].mxu0 }
 0x1e2   : > { %4809 = vrcp.f32 %v3235_v58  ;;  %v4792_v48 = vpop.eup %4791  ;;  %3615 = vst.msk [vmem:[%s5787_s8 + $0x90] sm:$0xff] %vm3596_vm1, %v4790_v46  ;;  %v4299_v18 = vpop.f32.mrb[96].mxu1 }
 0x1e3   : > { %4811 = vrcp.f32 %v3233_v41  ;;  %v4094_v21 = vmul.f32 -1.442695, %v2433_v10  ;;  %v4794_v17 = vpop.eup %4793  ;;  %3613 = vst.msk [vmem:[%s5787_s8 + $0x80] sm:$0xff] %vm3596_vm1, %v4792_v48  ;;  %v2454_v24 = vadd.f32 %v4299_v18, %v1909_v57  ;;  %v1966_v47 = vpop.f32.mrb[97].mxu0 }
 0x1e4   : > { %4813 = vpow2.f32 %v4095_v5  ;;  %3616 = vst.msk [vmem:[%s5787_s8 + $0x98] sm:$0xff] %vm3596_vm1, %v4794_v17  ;;  %v2445_v59 = vpop.f32.mrb[97].mxu1  ;;  %v5895_v43 = vpop.f32.mrb[98].mxu0  ;;  %v1925_v5 = vadd.f32 %v5712_v45, %v5776_v61  ;;  %v1920_v47 = vadd.f32 %v5712_v45, %v5765_v1  ;;  %v1941_v1 = vadd.f32 %v5712_v45, %v5829_v54 }
 0x1e5   : > { %v4796_v3 = vpop.eup %4795  ;;  %4815 = vpow2.f32 %v4093_v34  ;;  %v2446_v49 = vadd.f32 %v2445_v59, %v1901_v16  ;;  %v4300_v40 = vpop.f32.mrb[98].mxu1  ;;  %v4099_v55 = vmul.f32 -1.442695, %v2454_v24  ;;  %v1917_v34 = vadd.f32 %v5712_v45, %v5757_v52 }
 0x1e6   : > { %v4798_v33 = vpop.eup %4797  ;;  %3614 = vst.msk [vmem:[%s5787_s8 + $0x88] sm:$0xff] %vm3596_vm1, %v4796_v3  ;;  %4817 = vpow2.f32 %v4096_v37  ;;  %v1969_v27 = vpop.f32.mrb[99].mxu0  ;;  %v2457_v39 = vadd.f32 %v4300_v40, %v1912_v30  ;;  %v1928_v16 = vadd.f32 %v5712_v45, %v5789_v23 }
 0x1e7   : > { %v4800_v19 = vpop.eup %4799  ;;  %v3238_v9 = vadd.f32 1.0, %v4798_v33  ;;  %4819 = vpow2.f32 %v4094_v21  ;;  %v2448_v15 = vpop.f32.mrb[99].mxu1  ;;  %v4097_v22 = vmul.f32 -1.442695, %v2446_v49 }
 0x1e8   : > { %v4802_v12 = vpop.eup %4801  ;;  %v3236_v31 = vadd.f32 1.0, %v4800_v19  ;;  %v2449_v60 = vadd.f32 %v2448_v15, %v1904_v25  ;;  %v4100_v36 = vmul.f32 -1.442695, %v2457_v39 }
 0x1e9   : > { %v4804_v63 = vpop.eup %4803  ;;  %4821 = vrcp.f32 %v3238_v9  ;;  %v3239_v11 = vadd.f32 1.0, %v4802_v12  ;;  %v5905_v46 = vpop.f32.mrb[100].mxu0 }
 0x1ea   : > { %v4806_v51 = vpop.eup %4805  ;;  %4823 = vrcp.f32 %v3236_v31  ;;  %v3237_v42 = vadd.f32 1.0, %v4804_v63  ;;  %v4098_v10 = vmul.f32 -1.442695, %v2449_v60  ;;  %v4303_v37 = vpop.f32.mrb[100].mxu1  ;;  %v1933_v63 = vadd.f32 %v5712_v45, %v5806_v53 }
 0x1eb   : > { %v4808_v58 = vpop.eup %4807  ;;  %3619 = vst.msk [vmem:[%s5787_s8 + $0xb0] sm:$0xff] %vm3596_vm1, %v4806_v51  ;;  %4825 = vrcp.f32 %v3239_v11  ;;  %v2470_v61 = vadd.f32 %v4303_v37, %v1925_v5  ;;  %v1974_v57 = vpop.f32.mrb[101].mxu0  ;;  %v1936_v53 = vadd.f32 %v5712_v45, %v5812_v29 }
 0x1ec   : > { %v4810_v41 = vpop.eup %4809  ;;  %3617 = vst.msk [vmem:[%s5787_s8 + $0xa0] sm:$0xff] %vm3596_vm1, %v4808_v58  ;;  %4827 = vrcp.f32 %v3237_v42  ;;  %v2461_v21 = vpop.f32.mrb[101].mxu1 }
 0x1ed   : > { %v4812_v48 = vpop.eup %4811  ;;  %3620 = vst.msk [vmem:[%s5787_s8 + $0xb8] sm:$0xff] %vm3596_vm1, %v4810_v41  ;;  %4829 = vpow2.f32 %v4099_v55  ;;  %v2462_v52 = vadd.f32 %v2461_v21, %v1917_v34  ;;  %v5913_v18 = vpop.f32.mrb[102].mxu0  ;;  %v4103_v9 = vmul.f32 -1.442695, %v2470_v61 }
 0x1ee   : > { %v4814_v17 = vpop.eup %4813  ;;  %3618 = vst.msk [vmem:[%s5787_s8 + $0xa8] sm:$0xff] %vm3596_vm1, %v4812_v48  ;;  %4831 = vpow2.f32 %v4097_v22  ;;  %v4304_v3 = vpop.f32.mrb[102].mxu1  ;;  %v1944_v22 = vadd.f32 %v5712_v45, %v5833_v35 }
 0x1ef   : > { %v4816_v24 = vpop.eup %4815  ;;  %v3242_v59 = vadd.f32 1.0, %v4814_v17  ;;  %4833 = vpow2.f32 %v4100_v36  ;;  %v1977_v33 = vpop.f32.mrb[103].mxu0  ;;  %v2473_v23 = vadd.f32 %v4304_v3, %v1928_v16  ;;  %v4101_v12 = vmul.f32 -1.442695, %v2462_v52 }
 0x1f0   : > { %v2464_v25 = vpop.f32.mrb[103].mxu1  ;;  %v4818_v30 = vpop.eup %4817  ;;  %v3240_v49 = vadd.f32 1.0, %v4816_v24  ;;  %4835 = vpow2.f32 %v4098_v10  ;;  %v1957_v33 = vadd.f32 %v5712_v45, %v5867_v28  ;;  %v1960_v28 = vadd.f32 %v5712_v45, %v5873_v0 }
 0x1f1   : > { %v4820_v40 = vpop.eup %4819  ;;  %4837 = vrcp.f32 %v3242_v59  ;;  %v3243_v19 = vadd.f32 1.0, %v4818_v30  ;;  %v2465_v27 = vadd.f32 %v2464_v25, %v1920_v47  ;;  %v4104_v39 = vmul.f32 -1.442695, %v2473_v23  ;;  %v5923_v55 = vpop.f32.mrb[104].mxu0 }
 0x1f2   : > { %4839 = vrcp.f32 %v3240_v49  ;;  %v3241_v15 = vadd.f32 1.0, %v4820_v40  ;;  %v4307_v51 = vpop.f32.mrb[104].mxu1  ;;  %v1982_v58 = vpop.f32.mrb[105].mxu0  ;;  %v1949_v23 = vadd.f32 %v5712_v45, %v5847_v13  ;;  %v1952_v13 = vadd.f32 %v5712_v45, %v5855_v7 }
 0x1f3   : > { %v4822_v31 = vpop.eup %4821  ;;  %4841 = vrcp.f32 %v3243_v19  ;;  %v4102_v11 = vmul.f32 -1.442695, %v2465_v27  ;;  %v2486_v54 = vadd.f32 %v4307_v51, %v1941_v1  ;;  %v2477_v5 = vpop.f32.mrb[105].mxu1 }
 0x1f4   : > { %v4824_v60 = vpop.eup %4823  ;;  %3623 = vst.msk [vmem:[%s5787_s8 + $0xd0] sm:$0xff] %vm3596_vm1, %v4822_v31  ;;  %4843 = vrcp.f32 %v3241_v15  ;;  %v2478_v41 = vadd.f32 %v2477_v5, %v1933_v63  ;;  %v5933_v34 = vpop.f32.mrb[106].mxu0 }
 0x1f5   : > { %v4826_v42 = vpop.eup %4825  ;;  %3621 = vst.msk [vmem:[%s5787_s8 + $0xc0] sm:$0xff] %vm3596_vm1, %v4824_v60  ;;  %4845 = vpow2.f32 %v4103_v9  ;;  %v4308_v10 = vpop.f32.mrb[106].mxu1  ;;  %v4107_v35 = vmul.f32 -1.442695, %v2486_v54 }
 0x1f6   : > { %v4828_v36 = vpop.eup %4827  ;;  %3624 = vst.msk [vmem:[%s5787_s8 + $0xd8] sm:$0xff] %vm3596_vm1, %v4826_v42  ;;  %4847 = vpow2.f32 %v4101_v12  ;;  %v2489_v48 = vadd.f32 %v4308_v10, %v1944_v22  ;;  %v1985_v61 = vpop.f32.mrb[107].mxu0  ;;  %v4105_v47 = vmul.f32 -1.442695, %v2478_v41 }
 0x1f7   : > { %v4830_v37 = vpop.eup %4829  ;;  %3622 = vst.msk [vmem:[%s5787_s8 + $0xc8] sm:$0xff] %vm3596_vm1, %v4828_v36  ;;  %4849 = vpow2.f32 %v4104_v39  ;;  %v2480_v57 = vpop.f32.mrb[107].mxu1 }
 0x1f8   : > { %v4832_v21 = vpop.eup %4831  ;;  %v3246_v17 = vadd.f32 1.0, %v4830_v37  ;;  %4851 = vpow2.f32 %v4102_v11  ;;  %v2481_v29 = vadd.f32 %v2480_v57, %v1936_v53  ;;  %v4108_v30 = vmul.f32 -1.442695, %v2489_v48  ;;  %v5962_v57 = vld [vmem:[%s6446_s2] ss:$0 sm:$0xff] }
 0x1f9   : > { %v4834_v16 = vpop.eup %4833  ;;  %v3244_v52 = vadd.f32 1.0, %v4832_v21  ;;  %4853 = vpow2.f32 %v4107_v35  ;;  %v5943_v19 = vpop.f32.mrb[108].mxu0  ;;  %v1973_v37 = vadd.f32 %v5712_v45, %v5905_v46  ;;  %v1965_v21 = vadd.f32 %v5962_v57, %v5885_v4 }
 0x1fa   : > { %v4836_v3 = vpop.eup %4835  ;;  %4855 = vrcp.f32 %v3246_v17  ;;  %v3247_v24 = vadd.f32 1.0, %v4834_v16  ;;  %v4106_v40 = vmul.f32 -1.442695, %v2481_v29  ;;  %v4311_v9 = vpop.f32.mrb[108].mxu1  ;;  %v1976_v46 = vadd.f32 %v5962_v57, %v5913_v18 }
 0x1fb   : > { %v4838_v59 = vpop.eup %4837  ;;  %4857 = vrcp.f32 %v3244_v52  ;;  %v3245_v25 = vadd.f32 1.0, %v4836_v3  ;;  %v2502_v15 = vadd.f32 %v4311_v9, %v1957_v33  ;;  %v1990_v12 = vpop.f32.mrb[109].mxu0  ;;  %v1968_v33 = vadd.f32 %v5962_v57, %v5895_v43 }
 0x1fc   : > { %v4840_v49 = vpop.eup %4839  ;;  %3627 = vst.msk [vmem:[%s5787_s8 + $0xf0] sm:$0xff] %vm3596_vm1, %v4838_v59  ;;  %4859 = vrcp.f32 %v3247_v24  ;;  %v2493_v31 = vpop.f32.mrb[109].mxu1 }
 0x1fd   : > { %v4842_v27 = vpop.eup %4841  ;;  %3625 = vst.msk [vmem:[%s5787_s8 + $0xe0] sm:$0xff] %vm3596_vm1, %v4840_v49  ;;  %4861 = vrcp.f32 %v3245_v25  ;;  %v2494_v39 = vadd.f32 %v2493_v31, %v1949_v23  ;;  %v5953_v60 = vpop.f32.mrb[110].mxu0  ;;  %v4111_v0 = vmul.f32 -1.442695, %v2502_v15 }
 0x1fe   : > { %v4844_v1 = vpop.eup %4843  ;;  %3628 = vst.msk [vmem:[%s5787_s8 + $0xf8] sm:$0xff] %vm3596_vm1, %v4842_v27  ;;  %4863 = vpow2.f32 %v4105_v47  ;;  %v4312_v63 = vpop.f32.mrb[110].mxu1 }
 0x1ff   : > { %v4846_v11 = vpop.eup %4845  ;;  %3626 = vst.msk [vmem:[%s5787_s8 + $0xe8] sm:$0xff] %vm3596_vm1, %v4844_v1  ;;  %4865 = vpow2.f32 %v4108_v30  ;;  %v2505_v51 = vadd.f32 %v4312_v63, %v1960_v28  ;;  %v1993_v42 = vpop.f32.mrb[111].mxu0  ;;  %v4109_v48 = vmul.f32 -1.442695, %v2494_v39  ;;  %v1989_v63 = vadd.f32 %v5962_v57, %v5943_v19 }
 0x200   : > { %v2496_v22 = vpop.f32.mrb[111].mxu1  ;;  %v4848_v54 = vpop.eup %4847  ;;  %v3250_v58 = vadd.f32 1.0, %v4846_v11  ;;  %4867 = vpow2.f32 %v4106_v40 }
 0x201   : > { %v2497_v5 = vadd.f32 %v2496_v22, %v1952_v13  ;;  %v4850_v7 = vpop.eup %4849  ;;  %v3248_v36 = vadd.f32 1.0, %v4848_v54  ;;  %4869 = vpow2.f32 %v4111_v0  ;;  %v4112_v29 = vmul.f32 -1.442695, %v2505_v51  ;;  %v5966_v16 = vpop.f32.mrb[112].mxu0 }
 0x202   : > { %v4852_v53 = vpop.eup %4851  ;;  %4871 = vrcp.f32 %v3250_v58  ;;  %v3251_v41 = vadd.f32 1.0, %v4850_v7  ;;  %v4315_v52 = vpop.f32.mrb[112].mxu1  ;;  %v1981_v51 = vadd.f32 %v5962_v57, %v5923_v55  ;;  %v1992_v7 = vadd.f32 %v5962_v57, %v5953_v60 }
 0x203   : > { %v4854_v10 = vpop.eup %4853  ;;  %4873 = vrcp.f32 %v3248_v36  ;;  %v3249_v35 = vadd.f32 1.0, %v4852_v53  ;;  %v4110_v3 = vmul.f32 -1.442695, %v2497_v5  ;;  %v2518_v24 = vadd.f32 %v4315_v52, %v1973_v37  ;;  %v1998_v47 = vpop.f32.mrb[113].mxu0 }
 0x204   : > { %v4856_v61 = vpop.eup %4855  ;;  %4875 = vrcp.f32 %v3251_v41  ;;  %v3254_v17 = vadd.f32 1.0, %v4854_v10  ;;  %v2509_v59 = vpop.f32.mrb[113].mxu1  ;;  %v1984_v55 = vadd.f32 %v5962_v57, %v5933_v34 }
 0x205   : > { %v4858_v45 = vpop.eup %4857  ;;  %3631 = vst.msk [vmem:[%s5787_s8 + $0x110] sm:$0xff] %vm3596_vm1, %v4856_v61  ;;  %4877 = vrcp.f32 %v3249_v35  ;;  %v2510_v25 = vadd.f32 %v2509_v59, %v1965_v21  ;;  %v5976_v30 = vpop.f32.mrb[114].mxu0  ;;  %v4115_v18 = vmul.f32 -1.442695, %v2518_v24 }
 0x206   : > { %v4860_v4 = vpop.eup %4859  ;;  %3629 = vst.msk [vmem:[%s5787_s8 + $0x100] sm:$0xff] %vm3596_vm1, %v4858_v45  ;;  %4879 = vrcp.f32 %v3254_v17  ;;  %v4316_v49 = vpop.f32.mrb[114].mxu1 }
 0x207   : > { %v4862_v23 = vpop.eup %4861  ;;  %3632 = vst.msk [vmem:[%s5787_s8 + $0x118] sm:$0xff] %vm3596_vm1, %v4860_v4  ;;  %4881 = vpow2.f32 %v4109_v48  ;;  %v2521_v40 = vadd.f32 %v4316_v49, %v1976_v46  ;;  %v2001_v9 = vpop.f32.mrb[115].mxu0  ;;  %v4113_v11 = vmul.f32 -1.442695, %v2510_v25  ;;  %v1997_v4 = vadd.f32 %v5962_v57, %v5966_v16 }
 0x208   : > { %v2512_v27 = vpop.f32.mrb[115].mxu1  ;;  %v4864_v28 = vpop.eup %4863  ;;  %3630 = vst.msk [vmem:[%s5787_s8 + $0x108] sm:$0xff] %vm3596_vm1, %v4862_v23  ;;  %4883 = vpow2.f32 %v4112_v29 }
 0x209   : > { %v2513_v15 = vadd.f32 %v2512_v27, %v1968_v33  ;;  %v4866_v12 = vpop.eup %4865  ;;  %v3252_v43 = vadd.f32 1.0, %v4864_v28  ;;  %4885 = vpow2.f32 %v4110_v3  ;;  %v4116_v22 = vmul.f32 -1.442695, %v2521_v40  ;;  %v2004_v54 = vpop.f32.mrb[116].mxu0 }
 0x20a   : > { %v4868_v31 = vpop.eup %4867  ;;  %v3255_v1 = vadd.f32 1.0, %v4866_v12  ;;  %4887 = vpow2.f32 %v4115_v18  ;;  %v4319_v58 = vpop.f32.mrb[116].mxu1  ;;  %v2005_v33 = vadd.f32 %v5962_v57, %v2004_v54 }
 0x20b   : > { %v4870_v13 = vpop.eup %4869  ;;  %4889 = vrcp.f32 %v3252_v43  ;;  %v3253_v39 = vadd.f32 1.0, %v4868_v31  ;;  %v4114_v19 = vmul.f32 -1.442695, %v2513_v15  ;;  %v2534_v36 = vadd.f32 %v4319_v58, %v1989_v63  ;;  %v2006_v53 = vpop.f32.mrb[117].mxu0 }
 0x20c   : > { %v4872_v0 = vpop.eup %4871  ;;  %4891 = vrcp.f32 %v3255_v1  ;;  %v3258_v42 = vadd.f32 1.0, %v4870_v13  ;;  %v2525_v41 = vpop.f32.mrb[117].mxu1  ;;  %v2000_v1 = vadd.f32 %v5962_v57, %v5976_v30 }
 0x20d   : > { %v4874_v5 = vpop.eup %4873  ;;  %3635 = vst.msk [vmem:[%s5787_s8 + $0x130] sm:$0xff] %vm3596_vm1, %v4872_v0  ;;  %4893 = vrcp.f32 %v3253_v39  ;;  %v2526_v37 = vadd.f32 %v2525_v41, %v1981_v51  ;;  %v2007_v35 = vpop.f32.mrb[118].mxu0  ;;  %v4119_v60 = vmul.f32 -1.442695, %v2534_v36 }
 0x20e   : > { %v4876_v10 = vpop.eup %4875  ;;  %3633 = vst.msk [vmem:[%s5787_s8 + $0x120] sm:$0xff] %vm3596_vm1, %v4874_v5  ;;  %4895 = vrcp.f32 %v3258_v42  ;;  %v4320_v48 = vpop.f32.mrb[118].mxu1  ;;  %v2008_v23 = vadd.f32 %v5962_v57, %v2007_v35 }
 0x20f   : > { %v4878_v61 = vpop.eup %4877  ;;  %3636 = vst.msk [vmem:[%s5787_s8 + $0x138] sm:$0xff] %vm3596_vm1, %v4876_v10  ;;  %4897 = vpow2.f32 %v4113_v11  ;;  %v2537_v21 = vadd.f32 %v4320_v48, %v1992_v7  ;;  %v2009_v17 = vpop.f32.mrb[119].mxu0  ;;  %v4117_v45 = vmul.f32 -1.442695, %v2526_v37 }
 0x210   : > { %v2528_v29 = vpop.f32.mrb[119].mxu1  ;;  %v4880_v52 = vpop.eup %4879  ;;  %3634 = vst.msk [vmem:[%s5787_s8 + $0x128] sm:$0xff] %vm3596_vm1, %v4878_v61  ;;  %4899 = vpow2.f32 %v4116_v22 }
 0x211   : > { %v2529_v46 = vadd.f32 %v2528_v29, %v1984_v55  ;;  %v4882_v34 = vpop.eup %4881  ;;  %3639 = vst.msk [vmem:[%s5787_s8 + $0x150] sm:$0xff] %vm3596_vm1, %v4880_v52  ;;  %4901 = vpow2.f32 %v4114_v19  ;;  %v4120_v18 = vmul.f32 -1.442695, %v2537_v21  ;;  %v2012_v40 = vpop.f32.mrb[120].mxu0 }
 0x212   : > { %v4884_v3 = vpop.eup %4883  ;;  %v3256_v24 = vadd.f32 1.0, %v4882_v34  ;;  %4903 = vpow2.f32 %v4119_v60  ;;  %v4323_v9 = vpop.f32.mrb[120].mxu1  ;;  %v2013_v55 = vadd.f32 %v5962_v57, %v2012_v40 }
 0x213   : > { %v4886_v47 = vpop.eup %4885  ;;  %v3259_v59 = vadd.f32 1.0, %v4884_v3  ;;  %4905 = vpow2.f32 %v4117_v45  ;;  %v4118_v15 = vmul.f32 -1.442695, %v2529_v46  ;;  %v2550_v12 = vadd.f32 %v4323_v9, %v2005_v33  ;;  %v2014_v43 = vpop.f32.mrb[121].mxu0 }
 0x214   : > { %v4888_v25 = vpop.eup %4887  ;;  %4907 = vrcp.f32 %v3256_v24  ;;  %v3257_v49 = vadd.f32 1.0, %v4886_v47  ;;  %v2541_v16 = vpop.f32.mrb[121].mxu1 }
 0x215   : > { %v4890_v27 = vpop.eup %4889  ;;  %4909 = vrcp.f32 %v3259_v59  ;;  %v3262_v28 = vadd.f32 1.0, %v4888_v25  ;;  %v2542_v13 = vadd.f32 %v2541_v16, %v1997_v4  ;;  %v2015_v39 = vpop.f32.mrb[122].mxu0  ;;  %v4123_v0 = vmul.f32 -1.442695, %v2550_v12 }
 0x216   : > { %v4892_v31 = vpop.eup %4891  ;;  %3637 = vst.msk [vmem:[%s5787_s8 + $0x140] sm:$0xff] %vm3596_vm1, %v4890_v27  ;;  %4911 = vrcp.f32 %v3257_v49  ;;  %v4324_v63 = vpop.f32.mrb[122].mxu1  ;;  %v2016_v37 = vadd.f32 %v5962_v57, %v2015_v39 }
 0x217   : > { %v4894_v11 = vpop.eup %4893  ;;  %3640 = vst.msk [vmem:[%s5787_s8 + $0x158] sm:$0xff] %vm3596_vm1, %v4892_v31  ;;  %4913 = vrcp.f32 %v3262_v28  ;;  %v2553_v51 = vadd.f32 %v4324_v63, %v2008_v23  ;;  %v2017_v42 = vpop.f32.mrb[123].mxu0  ;;  %v4121_v58 = vmul.f32 -1.442695, %v2542_v13 }
 0x218   : > { %v2544_v22 = vpop.f32.mrb[123].mxu1  ;;  %v4896_v54 = vpop.eup %4895  ;;  %3638 = vst.msk [vmem:[%s5787_s8 + $0x148] sm:$0xff] %vm3596_vm1, %v4894_v11  ;;  %4915 = vpow2.f32 %v4120_v18 }
 0x219   : > { %v2545_v5 = vadd.f32 %v2544_v22, %v2000_v1  ;;  %v4898_v7 = vpop.eup %4897  ;;  %3643 = vst.msk [vmem:[%s5787_s8 + $0x170] sm:$0xff] %vm3596_vm1, %v4896_v54  ;;  %4917 = vpow2.f32 %v4118_v15  ;;  %v2020_v35 = vpop.f32.mrb[124].mxu0  ;;  %v4124_v21 = vmul.f32 -1.442695, %v2553_v51 }
 0x21a   : > { %v4900_v30 = vpop.eup %4899  ;;  %v3260_v19 = vadd.f32 1.0, %v4898_v7  ;;  %4919 = vpow2.f32 %v4123_v0  ;;  %v4327_v48 = vpop.f32.mrb[124].mxu1  ;;  %v2021_v17 = vadd.f32 %v5962_v57, %v2020_v35 }
 0x21b   : > { %v4902_v36 = vpop.eup %4901  ;;  %v3263_v53 = vadd.f32 1.0, %v4900_v30  ;;  %4921 = vpow2.f32 %v4121_v58  ;;  %v2022_v29 = vpop.f32.mrb[125].mxu0  ;;  %v4122_v34 = vmul.f32 -1.442695, %v2545_v5 }
 0x21c   : > { %v4904_v41 = vpop.eup %4903  ;;  %4923 = vrcp.f32 %v3260_v19  ;;  %v3261_v10 = vadd.f32 1.0, %v4902_v36  ;;  %v2557_v52 = vpop.f32.mrb[125].mxu1  ;;  %v2566_v4 = vadd.f32 %v4327_v48, %v2021_v17 }
 0x21d   : > { %v4906_v61 = vpop.eup %4905  ;;  %4925 = vrcp.f32 %v3263_v53  ;;  %v3266_v60 = vadd.f32 1.0, %v4904_v41  ;;  %v2558_v3 = vadd.f32 %v2557_v52, %v2013_v55  ;;  %v2023_v24 = vpop.f32.mrb[126].mxu0 }
 0x21e   : > { %v4908_v45 = vpop.eup %4907  ;;  %4927 = vrcp.f32 %v3261_v10  ;;  %v3264_v46 = vadd.f32 1.0, %v4906_v61  ;;  %v4328_v47 = vpop.f32.mrb[126].mxu1  ;;  %v2024_v33 = vadd.f32 %v5962_v57, %v2023_v24  ;;  %v4127_v27 = vmul.f32 -1.442695, %v2566_v4 }
 0x21f   : > { %v4910_v59 = vpop.eup %4909  ;;  %3641 = vst.msk [vmem:[%s5787_s8 + $0x160] sm:$0xff] %vm3596_vm1, %v4908_v45  ;;  %4929 = vrcp.f32 %v3266_v60  ;;  %v2025_v25 = vpop.f32.mrb[127].mxu0  ;;  %v4125_v18 = vmul.f32 -1.442695, %v2558_v3 }
 0x220   : > { %v2560_v49 = vpop.f32.mrb[127].mxu1  ;;  %v4912_v23 = vpop.eup %4911  ;;  %3644 = vst.msk [vmem:[%s5787_s8 + $0x178] sm:$0xff] %vm3596_vm1, %v4910_v59  ;;  %4931 = vrcp.f32 %v3264_v46  ;;  %v2569_v28 = vadd.f32 %v4328_v47, %v2024_v33 }
 0x221   : > { %v2561_v40 = vadd.f32 %v2560_v49, %v2016_v37  ;;  %v4914_v9 = vpop.eup %4913  ;;  %3642 = vst.msk [vmem:[%s5787_s8 + $0x168] sm:$0xff] %vm3596_vm1, %v4912_v23  ;;  %4933 = vpow2.f32 %v4124_v21  ;;  %v2028_v1 = vpop.f32.mrb[128].mxu0 }
 0x222   : > { %v4916_v15 = vpop.eup %4915  ;;  %3647 = vst.msk [vmem:[%s5787_s8 + $0x190] sm:$0xff] %vm3596_vm1, %v4914_v9  ;;  %4935 = vpow2.f32 %v4122_v34  ;;  %v4331_v13 = vpop.f32.mrb[128].mxu1  ;;  %v4128_v11 = vmul.f32 -1.442695, %v2569_v28  ;;  %v2029_v0 = vadd.f32 %v5962_v57, %v2028_v1 }
 0x223   : > { %v4918_v12 = vpop.eup %4917  ;;  %v3267_v43 = vadd.f32 1.0, %v4916_v15  ;;  %4937 = vpow2.f32 %v4127_v27  ;;  %v2030_v51 = vpop.f32.mrb[129].mxu0  ;;  %v4126_v58 = vmul.f32 -1.442695, %v2561_v40 }
 0x224   : > { %v4920_v16 = vpop.eup %4919  ;;  %v3265_v31 = vadd.f32 1.0, %v4918_v12  ;;  %4939 = vpow2.f32 %v4125_v18  ;;  %v2573_v42 = vpop.f32.mrb[129].mxu1 }
 0x225   : > { %v4922_v39 = vpop.eup %4921  ;;  %4941 = vrcp.f32 %v3267_v43  ;;  %v3270_v63 = vadd.f32 1.0, %v4920_v16  ;;  %v2031_v5 = vpop.f32.mrb[130].mxu0  ;;  %v2574_v19 = vadd.f32 %v2573_v42, %v2029_v0 }
 0x226   : > { %v4924_v22 = vpop.eup %4923  ;;  %4943 = vrcp.f32 %v3265_v31  ;;  %v3268_v54 = vadd.f32 1.0, %v4922_v39  ;;  %v4332_v7 = vpop.f32.mrb[130].mxu1  ;;  %v2032_v36 = vadd.f32 %v5962_v57, %v2031_v5 }
 0x227   : > { %v4926_v30 = vpop.eup %4925  ;;  %3645 = vst.msk [vmem:[%s5787_s8 + $0x180] sm:$0xff] %vm3596_vm1, %v4924_v22  ;;  %4945 = vrcp.f32 %v3270_v63  ;;  %v2033_v53 = vpop.f32.mrb[131].mxu0  ;;  %v4129_v37 = vmul.f32 -1.442695, %v2574_v19 }
 0x228   : > { %v2576_v41 = vpop.f32.mrb[131].mxu1  ;;  %v4928_v10 = vpop.eup %4927  ;;  %3648 = vst.msk [vmem:[%s5787_s8 + $0x198] sm:$0xff] %vm3596_vm1, %v4926_v30  ;;  %4947 = vrcp.f32 %v3268_v54 }
 0x229   : > { %v4930_v55 = vpop.eup %4929  ;;  %3646 = vst.msk [vmem:[%s5787_s8 + $0x188] sm:$0xff] %vm3596_vm1, %v4928_v10  ;;  %4949 = vpow2.f32 %v4128_v11  ;;  %v2577_v35 = vadd.f32 %v2576_v41, %v2032_v36  ;;  %v2036_v29 = vpop.f32.mrb[132].mxu0 }
 0x22a   : > { %v4932_v48 = vpop.eup %4931  ;;  %3651 = vst.msk [vmem:[%s5787_s8 + $0x1b0] sm:$0xff] %vm3596_vm1, %v4930_v55  ;;  %4951 = vpow2.f32 %v4126_v58  ;;  %v6038_v52 = vpop.f32.mrb[132].mxu1  ;;  %v2037_v34 = vadd.f32 %v5962_v57, %v2036_v29 }
 0x22b   : > { %v4934_v61 = vpop.eup %4933  ;;  %3649 = vst.msk [vmem:[%s5787_s8 + $0x1a0] sm:$0xff] %vm3596_vm1, %v4932_v48  ;;  %4953 = vpow2.f32 %v4129_v37  ;;  %v4130_v60 = vmul.f32 -1.442695, %v2577_v35  ;;  %v2038_v3 = vpop.f32.mrb[133].mxu0 }
 0x22c   : > { %v4936_v21 = vpop.eup %4935  ;;  %v3271_v17 = vadd.f32 1.0, %v4934_v61  ;;  %v2589_v24 = vpop.f32.mrb[133].mxu1  ;;  %v2582_v23 = vadd.f32 %v4331_v13, %v2037_v34 }
 0x22d   : > { %v4938_v45 = vpop.eup %4937  ;;  %v3269_v46 = vadd.f32 1.0, %v4936_v21  ;;  %4955 = vpow2.f32 %v4130_v60  ;;  %v2039_v4 = vpop.f32.mrb[134].mxu0 }
 0x22e   : > { %v4940_v47 = vpop.eup %4939  ;;  %4957 = vrcp.f32 %v3271_v17  ;;  %v3274_v59 = vadd.f32 1.0, %v4938_v45  ;;  %v6041_v33 = vpop.f32.mrb[134].mxu1  ;;  %v2040_v18 = vadd.f32 %v5962_v57, %v2039_v4  ;;  %v4131_v15 = vmul.f32 -1.442695, %v2582_v23 }
 0x22f   : > { %v4942_v25 = vpop.eup %4941  ;;  %4959 = vrcp.f32 %v3269_v46  ;;  %v3272_v49 = vadd.f32 1.0, %v4940_v47  ;;  %v2041_v40 = vpop.f32.mrb[135].mxu0 }
 0x230   : > { %v2592_v9 = vpop.f32.mrb[135].mxu1  ;;  %v4944_v27 = vpop.eup %4943  ;;  %3652 = vst.msk [vmem:[%s5787_s8 + $0x1b8] sm:$0xff] %vm3596_vm1, %v4942_v25  ;;  %4961 = vrcp.f32 %v3274_v59  ;;  %v2585_v12 = vadd.f32 %v4332_v7, %v2040_v18 }
 0x231   : > { %v4946_v28 = vpop.eup %4945  ;;  %3650 = vst.msk [vmem:[%s5787_s8 + $0x1a8] sm:$0xff] %vm3596_vm1, %v4944_v27  ;;  %4963 = vrcp.f32 %v3272_v49  ;;  %v2044_v39 = vpop.f32.mrb[136].mxu0 }
 0x232   : > { %v4948_v43 = vpop.eup %4947  ;;  %3655 = vst.msk [vmem:[%s5787_s8 + $0x1d0] sm:$0xff] %vm3596_vm1, %v4946_v28  ;;  %4965 = vpow2.f32 %v4131_v15  ;;  %v4132_v31 = vmul.f32 -1.442695, %v2585_v12  ;;  %v6052_v63 = vpop.f32.mrb[136].mxu1  ;;  %v2045_v51 = vadd.f32 %v5962_v57, %v2044_v39 }
 0x233   : > { %v4950_v16 = vpop.eup %4949  ;;  %3653 = vst.msk [vmem:[%s5787_s8 + $0x1c0] sm:$0xff] %vm3596_vm1, %v4948_v43  ;;  %v2046_v42 = vpop.f32.mrb[137].mxu0 }
 0x234   : > { %v4952_v1 = vpop.eup %4951  ;;  %v3275_v13 = vadd.f32 1.0, %v4950_v16  ;;  %4967 = vpow2.f32 %v4132_v31  ;;  %v6055_v22 = vpop.f32.mrb[137].mxu1  ;;  %v2590_v30 = vadd.f32 %v2589_v24, %v2045_v51 }
 0x235   : > { %v4954_v11 = vpop.eup %4953  ;;  %v3273_v0 = vadd.f32 1.0, %v4952_v1  ;;  %v2047_v58 = vpop.f32.mrb[138].mxu0 }
 0x236   : > { %4969 = vrcp.f32 %v3275_v13  ;;  %v3276_v54 = vadd.f32 1.0, %v4954_v11  ;;  %v6057_v5 = vpop.f32.mrb[138].mxu1  ;;  %v2048_v19 = vadd.f32 %v5962_v57, %v2047_v58  ;;  %v2049_v36 = vpop.f32.mrb[139].mxu0  ;;  %v4133_v37 = vmul.f32 -1.442695, %v2590_v30 }
 0x237   : > { %v4956_v7 = vpop.eup %4955  ;;  %4971 = vrcp.f32 %v3273_v0  ;;  %v6060_v53 = vpop.f32.mrb[139].mxu1 }
 0x238   : > { %v4958_v41 = vpop.eup %4957  ;;  %4973 = vrcp.f32 %v3276_v54  ;;  %v3277_v10 = vadd.f32 1.0, %v4956_v7  ;;  %v2593_v35 = vadd.f32 %v2592_v9, %v2048_v19 }
 0x239   : > { %v4960_v55 = vpop.eup %4959  ;;  %3656 = vst.msk [vmem:[%s5787_s8 + $0x1d8] sm:$0xff] %vm3596_vm1, %v4958_v41  ;;  %v2052_v21 = vpop.f32.mrb[140].mxu0 }
 0x23a   : > { %v4962_v48 = vpop.eup %4961  ;;  %3654 = vst.msk [vmem:[%s5787_s8 + $0x1c8] sm:$0xff] %vm3596_vm1, %v4960_v55  ;;  %4975 = vrcp.f32 %v3277_v10  ;;  %v4134_v60 = vmul.f32 -1.442695, %v2593_v35  ;;  %v6070_v17 = vpop.f32.mrb[140].mxu1  ;;  %v2053_v45 = vadd.f32 %v5962_v57, %v2052_v21 }
 0x23b   : > { %v4964_v61 = vpop.eup %4963  ;;  %3659 = vst.msk [vmem:[%s5787_s8 + $0x1f0] sm:$0xff] %vm3596_vm1, %v4962_v48  ;;  %4977 = vpow2.f32 %v4133_v37  ;;  %v2054_v46 = vpop.f32.mrb[141].mxu0 }
 0x23c   : > { %3657 = vst.msk [vmem:[%s5787_s8 + $0x1e0] sm:$0xff] %vm3596_vm1, %v4964_v61  ;;  %v4966_v29 = vpop.eup %4965  ;;  %4979 = vpow2.f32 %v4134_v60  ;;  %v6073_v34 = vpop.f32.mrb[141].mxu1  ;;  %v2598_v4 = vadd.f32 %v6038_v52, %v2053_v45 }
 0x23d   : > { %v3278_v3 = vadd.f32 1.0, %v4966_v29  ;;  %v2055_v24 = vpop.f32.mrb[142].mxu0  ;;  %v6075_v47 = vpop.f32.mrb[142].mxu1 }
 0x23e   : > { %v4968_v59 = vpop.eup %4967  ;;  %v2056_v25 = vadd.f32 %v5962_v57, %v2055_v24  ;;  %v2057_v49 = vpop.f32.mrb[143].mxu0  ;;  %v4135_v27 = vmul.f32 -1.442695, %v2598_v4 }
 0x23f   : > { %v6079_v23 = vpop.f32.mrb[143].mxu1  ;;  %4981 = vrcp.f32 %v3278_v3  ;;  %v3279_v40 = vadd.f32 1.0, %v4968_v59 }
 0x240   : > { %v4970_v18 = vpop.eup %4969  ;;  %v2601_v28 = vadd.f32 %v6041_v33, %v2056_v25 }
 0x241   : > { %v4972_v9 = vpop.eup %4971  ;;  %3660 = vst.msk [vmem:[%s5787_s8 + $0x1f8] sm:$0xff] %vm3596_vm1, %v4970_v18  ;;  %4983 = vrcp.f32 %v3279_v40  ;;  %v2060_v43 = vpop.f32.mrb[144].mxu0 }
 0x242   : > { %v4974_v15 = vpop.eup %4973  ;;  %3658 = vst.msk [vmem:[%s5787_s8 + $0x1e8] sm:$0xff] %vm3596_vm1, %v4972_v9  ;;  %4985 = vpow2.f32 %v4135_v27  ;;  %v4136_v52 = vmul.f32 -1.442695, %v2601_v28  ;;  %v6088_v16 = vpop.f32.mrb[144].mxu1  ;;  %v2061_v1 = vadd.f32 %v5962_v57, %v2060_v43 }
 0x243   : > { %3661 = vst.msk [vmem:[%s5787_s8 + $0x200] sm:$0xff] %vm3596_vm1, %v4974_v15  ;;  %v2062_v13 = vpop.f32.mrb[145].mxu0  ;;  %v6093_v33 = vpop.f32.mrb[145].mxu1 }
 0x244   : > { %v4976_v12 = vpop.eup %4975  ;;  %4987 = vpow2.f32 %v4136_v52  ;;  %v2063_v11 = vpop.f32.mrb[146].mxu0  ;;  %v2606_v42 = vadd.f32 %v6055_v22, %v2061_v1 }
 0x245   : > { %v4978_v31 = vpop.eup %4977  ;;  %3662 = vst.msk [vmem:[%s5787_s8 + $0x208] sm:$0xff] %vm3596_vm1, %v4976_v12  ;;  %v6095_v0 = vpop.f32.mrb[146].mxu1  ;;  %v2064_v54 = vadd.f32 %v5962_v57, %v2063_v11 }
 0x246   : > { %v3280_v39 = vadd.f32 1.0, %v4978_v31  ;;  %v4980_v51 = vpop.eup %4979  ;;  %v2065_v58 = vpop.f32.mrb[147].mxu0  ;;  %v4137_v19 = vmul.f32 -1.442695, %v2606_v42 }
 0x247   : > { %v6099_v7 = vpop.f32.mrb[147].mxu1  ;;  %v3281_v30 = vadd.f32 1.0, %v4980_v51  ;;  %v2609_v36 = vadd.f32 %v6060_v53, %v2064_v54 }
 0x248   : > { %4989 = vrcp.f32 %v3280_v39 }
 0x249   : > { %v4982_v41 = vpop.eup %4981  ;;  %4991 = vrcp.f32 %v3281_v30  ;;  %v4138_v10 = vmul.f32 -1.442695, %v2609_v36  ;;  %v2068_v37 = vpop.f32.mrb[148].mxu0 }
 0x24a   : > { %3663 = vst.msk [vmem:[%s5787_s8 + $0x210] sm:$0xff] %vm3596_vm1, %v4982_v41  ;;  %4993 = vpow2.f32 %v4137_v19  ;;  %v6104_v22 = vpop.f32.mrb[148].mxu1  ;;  %v2069_v48 = vadd.f32 %v5962_v57, %v2068_v37  ;;  %v2070_v61 = vpop.f32.mrb[149].mxu0 }
 0x24b   : > { %v4984_v55 = vpop.eup %4983  ;;  %4995 = vpow2.f32 %v4138_v10  ;;  %v6109_v60 = vpop.f32.mrb[149].mxu1 }
 0x24c   : > { %v4986_v35 = vpop.eup %4985  ;;  %3664 = vst.msk [vmem:[%s5787_s8 + $0x218] sm:$0xff] %vm3596_vm1, %v4984_v55  ;;  %v2071_v21 = vpop.f32.mrb[150].mxu0  ;;  %v2614_v46 = vadd.f32 %v6052_v63, %v2069_v48 }
 0x24d   : > { %v3282_v53 = vadd.f32 1.0, %v4986_v35  ;;  %v6111_v29 = vpop.f32.mrb[150].mxu1  ;;  %v2072_v3 = vadd.f32 %v5962_v57, %v2071_v21  ;;  %v2073_v24 = vpop.f32.mrb[151].mxu0 }
 0x24e   : > { %v4988_v45 = vpop.eup %4987  ;;  %v6115_v59 = vpop.f32.mrb[151].mxu1  ;;  %v4139_v25 = vmul.f32 -1.442695, %v2614_v46 }
 0x24f   : > { %4997 = vrcp.f32 %v3282_v53  ;;  %v3283_v4 = vadd.f32 1.0, %v4988_v45  ;;  %v2617_v49 = vadd.f32 %v6057_v5, %v2072_v3 }
 0x251   : > { %4999 = vrcp.f32 %v3283_v4  ;;  %v4140_v40 = vmul.f32 -1.442695, %v2617_v49  ;;  %v2076_v27 = vpop.f32.mrb[152].mxu0  ;;  %v6120_v63 = vpop.f32.mrb[152].mxu1 }
 0x252   : > { %v4990_v18 = vpop.eup %4989  ;;  %5001 = vpow2.f32 %v4139_v25  ;;  %v2077_v15 = vadd.f32 %v5962_v57, %v2076_v27  ;;  %v2078_v52 = vpop.f32.mrb[153].mxu0 }
 0x253   : > { %3665 = vst.msk [vmem:[%s5787_s8 + $0x220] sm:$0xff] %vm3596_vm1, %v4990_v18  ;;  %v4992_v9 = vpop.eup %4991  ;;  %5003 = vpow2.f32 %v4140_v40  ;;  %v6125_v12 = vpop.f32.mrb[153].mxu1  ;;  %v2165_v18 = vadd.f32 %v5962_v57, %v5503_v14  ;;  %v2168_v52 = vadd.f32 %v5962_v57, %v5509_v20 }
 0x254   : > { %v4994_v28 = vpop.eup %4993  ;;  %3666 = vst.msk [vmem:[%s5787_s8 + $0x228] sm:$0xff] %vm3596_vm1, %v4992_v9  ;;  %v2079_v43 = vpop.f32.mrb[154].mxu0  ;;  %v2622_v13 = vadd.f32 %v6073_v34, %v2077_v15  ;;  %v2157_v9 = vadd.f32 %v5962_v57, %v5489_v2 }
 0x255   : > { %v3284_v5 = vadd.f32 1.0, %v4994_v28  ;;  %v6127_v31 = vpop.f32.mrb[154].mxu1  ;;  %v4996_v1 = vpop.eup %4995  ;;  %v2080_v39 = vadd.f32 %v5962_v57, %v2079_v43 }
 0x256   : > { %v2081_v11 = vpop.f32.mrb[155].mxu0  ;;  %v6131_v51 = vpop.f32.mrb[155].mxu1  ;;  %v3285_v42 = vadd.f32 1.0, %v4996_v1  ;;  %v4141_v54 = vmul.f32 -1.442695, %v2622_v13  ;;  %v2160_v1 = vadd.f32 %v5962_v57, %v5495_v8 }
 0x257   : > { %5005 = vrcp.f32 %v3284_v5  ;;  %v2625_v58 = vadd.f32 %v6079_v23, %v2080_v39 }
 0x258   : > { %5007 = vrcp.f32 %v3285_v42 }
 0x259   : > { %v4998_v30 = vpop.eup %4997  ;;  %5009 = vpow2.f32 %v4141_v54  ;;  %v4142_v19 = vmul.f32 -1.442695, %v2625_v58  ;;  %v2084_v41 = vpop.f32.mrb[156].mxu0 }
 0x25a   : > { %3667 = vst.msk [vmem:[%s5787_s8 + $0x230] sm:$0xff] %vm3596_vm1, %v4998_v30  ;;  %v6136_v34 = vpop.f32.mrb[156].mxu1  ;;  %v2085_v55 = vadd.f32 %v5962_v57, %v2084_v41  ;;  %v2086_v37 = vpop.f32.mrb[157].mxu0 }
 0x25b   : > { %v5000_v36 = vpop.eup %4999  ;;  %5011 = vpow2.f32 %v4142_v19  ;;  %v6141_v35 = vpop.f32.mrb[157].mxu1 }
 0x25c   : > { %v5002_v10 = vpop.eup %5001  ;;  %3668 = vst.msk [vmem:[%s5787_s8 + $0x238] sm:$0xff] %vm3596_vm1, %v5000_v36  ;;  %v2087_v48 = vpop.f32.mrb[158].mxu0  ;;  %v2630_v21 = vadd.f32 %v6070_v17, %v2085_v55 }
 0x25d   : > { %v3286_v23 = vadd.f32 1.0, %v5002_v10  ;;  %v6143_v61 = vpop.f32.mrb[158].mxu1  ;;  %v5004_v53 = vpop.eup %5003  ;;  %v2088_v45 = vadd.f32 %v5962_v57, %v2087_v48 }
 0x25e   : > { %v2089_v46 = vpop.f32.mrb[159].mxu0  ;;  %v6147_v3 = vpop.f32.mrb[159].mxu1  ;;  %v3287_v24 = vadd.f32 1.0, %v5004_v53  ;;  %v4143_v4 = vmul.f32 -1.442695, %v2630_v21 }
 0x25f   : > { %5013 = vrcp.f32 %v3286_v23  ;;  %v2633_v25 = vadd.f32 %v6075_v47, %v2088_v45  ;;  %v2173_v46 = vadd.f32 %v5962_v57, %v5517_v26 }
 0x260   : > { %5015 = vrcp.f32 %v3287_v24 }
 0x261   : > { %v5006_v49 = vpop.eup %5005  ;;  %5017 = vpow2.f32 %v4143_v4  ;;  %v4144_v17 = vmul.f32 -1.442695, %v2633_v25  ;;  %v2092_v27 = vpop.f32.mrb[160].mxu0  ;;  %v2176_v25 = vadd.f32 %v5962_v57, %v5523_v32 }
 0x262   : > { %3669 = vst.msk [vmem:[%s5787_s8 + $0x240] sm:$0xff] %vm3596_vm1, %v5006_v49  ;;  %v5008_v40 = vpop.eup %5007  ;;  %v4363_v28 = vpop.f32.mrb[160].mxu1  ;;  %v2093_v47 = vadd.f32 %v5962_v57, %v2092_v27 }
 0x263   : > { %v5010_v15 = vpop.eup %5009  ;;  %3670 = vst.msk [vmem:[%s5787_s8 + $0x248] sm:$0xff] %vm3596_vm1, %v5008_v40  ;;  %5019 = vpow2.f32 %v4144_v17  ;;  %v2710_v14 = vadd.f32 %v4363_v28, %v2165_v18  ;;  %v2094_v5 = vpop.f32.mrb[161].mxu0  ;;  %v2184_v40 = vadd.f32 %v5962_v57, %v5537_v44 }
 0x264   : > { %v2701_v43 = vpop.f32.mrb[161].mxu1  ;;  %v3288_v13 = vadd.f32 1.0, %v5010_v15  ;;  %v2095_v2 = vpop.f32.mrb[162].mxu0  ;;  %v2638_v54 = vadd.f32 %v6093_v33, %v2093_v47  ;;  %v2181_v33 = vadd.f32 %v5962_v57, %v5531_v38 }
 0x265   : > { %v2702_v39 = vadd.f32 %v2701_v43, %v2157_v9  ;;  %v4364_v11 = vpop.f32.mrb[162].mxu1  ;;  %v5012_v42 = vpop.eup %5011  ;;  %v4163_v58 = vmul.f32 -1.442695, %v2710_v14  ;;  %v2096_v20 = vadd.f32 %v5962_v57, %v2095_v2 }
 0x266   : > { %v2713_v30 = vadd.f32 %v4364_v11, %v2168_v52  ;;  %v2097_v19 = vpop.f32.mrb[163].mxu0  ;;  %v2704_v36 = vpop.f32.mrb[163].mxu1  ;;  %5021 = vrcp.f32 %v3288_v13  ;;  %v3289_v41 = vadd.f32 1.0, %v5012_v42  ;;  %v4145_v37 = vmul.f32 -1.442695, %v2638_v54 }
 0x267   : > { %v4161_v10 = vmul.f32 -1.442695, %v2702_v39  ;;  %v2705_v55 = vadd.f32 %v2704_v36, %v2160_v1  ;;  %5023 = vpow2.f32 %v4163_v58  ;;  %v2641_v8 = vadd.f32 %v6099_v7, %v2096_v20 }
 0x268   : > { %5025 = vrcp.f32 %v3289_v41  ;;  %v4164_v48 = vmul.f32 -1.442695, %v2713_v30  ;;  %v2189_v30 = vadd.f32 %v5962_v57, %v5545_v50 }
 0x269   : > { %v5014_v23 = vpop.eup %5013  ;;  %5027 = vpow2.f32 %v4145_v37  ;;  %v4146_v53 = vmul.f32 -1.442695, %v2641_v8  ;;  %v4162_v21 = vmul.f32 -1.442695, %v2705_v55  ;;  %v2100_v24 = vpop.f32.mrb[164].mxu0 }
 0x26a   : > { %3671 = vst.msk [vmem:[%s5787_s8 + $0x250] sm:$0xff] %vm3596_vm1, %v5014_v23  ;;  %v5016_v45 = vpop.eup %5015  ;;  %5029 = vpow2.f32 %v4161_v10  ;;  %v4367_v4 = vpop.f32.mrb[164].mxu1  ;;  %v2101_v38 = vadd.f32 %v5962_v57, %v2100_v24 }
 0x26b   : > { %v5018_v7 = vpop.eup %5017  ;;  %3672 = vst.msk [vmem:[%s5787_s8 + $0x258] sm:$0xff] %vm3596_vm1, %v5016_v45  ;;  %5031 = vpow2.f32 %v4146_v53  ;;  %v2726_v49 = vadd.f32 %v4367_v4, %v2181_v33  ;;  %v2102_v18 = vpop.f32.mrb[165].mxu0 }
 0x26c   : > { %v2717_v17 = vpop.f32.mrb[165].mxu1  ;;  %v3290_v9 = vadd.f32 1.0, %v5018_v7  ;;  %5033 = vpow2.f32 %v4164_v48  ;;  %v2103_v27 = vpop.f32.mrb[166].mxu0  ;;  %v2646_v32 = vadd.f32 %v6088_v16, %v2101_v38  ;;  %v2197_v16 = vadd.f32 %v5962_v57, %v5559_v62 }
 0x26d   : > { %v2718_v26 = vadd.f32 %v2717_v17, %v2173_v46  ;;  %v4368_v28 = vpop.f32.mrb[166].mxu1  ;;  %v5020_v15 = vpop.eup %5019  ;;  %5035 = vpow2.f32 %v4162_v21  ;;  %v4167_v52 = vmul.f32 -1.442695, %v2726_v49  ;;  %v2104_v47 = vadd.f32 %v5962_v57, %v2103_v27  ;;  %v6196_v21 = vld [vmem:[%s6446_s2] ss:$0 sm:$0xff] }
 0x26e   : > { %v2105_v14 = vpop.f32.mrb[167].mxu0  ;;  %v2720_v5 = vpop.f32.mrb[167].mxu1  ;;  %5037 = vrcp.f32 %v3290_v9  ;;  %v3291_v43 = vadd.f32 1.0, %v5020_v15  ;;  %v2729_v13 = vadd.f32 %v4368_v28, %v2184_v40  ;;  %v4147_v44 = vmul.f32 -1.442695, %v2646_v32  ;;  %v6468_v32 = vld [vmem:[#allocation4_spill] sm:$0xff] }
 0x26f   : > { %v4165_v1 = vmul.f32 -1.442695, %v2718_v26  ;;  %5039 = vpow2.f32 %v4167_v52  ;;  %v2649_v39 = vadd.f32 %v6095_v0, %v2104_v47  ;;  %v2721_v2 = vadd.f32 %v2720_v5, %v2176_v25 }
 0x270   : > { %v5022_v11 = vpop.eup %5021  ;;  %5041 = vrcp.f32 %v3291_v43  ;;  %v4168_v58 = vmul.f32 -1.442695, %v2729_v13  ;;  %v2200_v45 = vadd.f32 %v6196_v21, %v5565_v6  ;;  %v2192_v25 = vadd.f32 %v6196_v21, %v5551_v56  ;;  %v6469_v43 = vld [vmem:[#allocation2_spill] sm:$0xff]  ;;  %v6470_v13 = vld [vmem:[#allocation5_spill] sm:$0xff] }
 0x271   : > { %v5024_v42 = vpop.eup %5023  ;;  %3673 = vst.msk [vmem:[%s5787_s8 + $0x260] sm:$0xff] %vm3596_vm1, %v5022_v11  ;;  %5043 = vpow2.f32 %v4147_v44  ;;  %v4148_v54 = vmul.f32 -1.442695, %v2649_v39  ;;  %v2108_v0 = vpop.f32.mrb[168].mxu0  ;;  %v4166_v40 = vmul.f32 -1.442695, %v2721_v2  ;;  %v2213_v52 = vadd.f32 %v6196_v21, %v6468_v32 }
 0x272   : > { %v5026_v20 = vpop.eup %5025  ;;  %v3310_v19 = vadd.f32 1.0, %v5024_v42  ;;  %5045 = vpow2.f32 %v4165_v1  ;;  %v4371_v36 = vpop.f32.mrb[168].mxu1  ;;  %v2109_v10 = vadd.f32 %v5962_v57, %v2108_v0  ;;  %v2205_v1 = vadd.f32 %v6196_v21, %v6469_v43 }
 0x273   : > { %v5028_v41 = vpop.eup %5027  ;;  %3674 = vst.msk [vmem:[%s5787_s8 + $0x268] sm:$0xff] %vm3596_vm1, %v5026_v20  ;;  %5047 = vpow2.f32 %v4148_v54  ;;  %v2742_v62 = vadd.f32 %v4371_v36, %v2197_v16  ;;  %v2110_v55 = vpop.f32.mrb[169].mxu0 }
 0x274   : > { %v2733_v37 = vpop.f32.mrb[169].mxu1  ;;  %v5030_v8 = vpop.eup %5029  ;;  %v3292_v23 = vadd.f32 1.0, %v5028_v41  ;;  %5049 = vrcp.f32 %v3310_v19  ;;  %v2654_v46 = vadd.f32 %v6109_v60, %v2109_v10 }
 0x275   : > { %v6191_v48 = vadd.f32 %v2733_v37, %v2189_v30  ;;  %v2111_v33 = vpop.f32.mrb[170].mxu0  ;;  %v4372_v50 = vpop.f32.mrb[170].mxu1  ;;  %v3308_v57 = vadd.f32 1.0, %v5030_v8  ;;  %5051 = vpow2.f32 %v4168_v58  ;;  %v4171_v16 = vmul.f32 -1.442695, %v2742_v62  ;;  %v6471_v37 = vld [vmem:[#allocation3_spill] sm:$0xff] }
 0x276   : > { %v5032_v53 = vpop.eup %5031  ;;  %v2113_v24 = vpop.f32.mrb[171].mxu0  ;;  %5053 = vrcp.f32 %v3292_v23  ;;  %v2112_v49 = vadd.f32 %v6196_v21, %v2111_v33  ;;  %v2745_v6 = vadd.f32 %v4372_v50, %v2200_v45  ;;  %v4149_v56 = vmul.f32 -1.442695, %v2654_v46 }
 0x277   : > { %v2736_v4 = vpop.f32.mrb[171].mxu1  ;;  %v5034_v7 = vpop.eup %5033  ;;  %v3293_v38 = vadd.f32 1.0, %v5032_v53  ;;  %5055 = vrcp.f32 %v3308_v57  ;;  %v2208_v8 = vadd.f32 %v6196_v21, %v6471_v37 }
 0x278   : > { %v5036_v18 = vpop.eup %5035  ;;  %v3311_v17 = vadd.f32 1.0, %v5034_v7  ;;  %v2657_v26 = vadd.f32 %v6115_v59, %v2112_v49  ;;  %v2737_v27 = vadd.f32 %v2736_v4, %v2192_v25  ;;  %v2216_v59 = vadd.f32 %v6196_v21, %v6470_v13  ;;  %v6472_v25 = vld [vmem:[#allocation8_spill] sm:$0xff] }
 0x279   : > { %v5038_v9 = vpop.eup %5037  ;;  %5057 = vrcp.f32 %v3293_v38  ;;  %v3309_v60 = vadd.f32 1.0, %v5036_v18  ;;  %v2116_v14 = vpop.f32.mrb[172].mxu0  ;;  %v2229_v38 = vadd.f32 %v6196_v21, %v6472_v25  ;;  %v4172_v49 = vmul.f32 -1.442695, %v2745_v6 }
 0x27a   : > { %v5040_v28 = vpop.eup %5039  ;;  %3675 = vst.msk [vmem:[%s5787_s8 + $0x270] sm:$0xff] %vm3596_vm1, %v5038_v9  ;;  %5059 = vrcp.f32 %v3311_v17  ;;  %v2117_v44 = vadd.f32 %v6196_v21, %v2116_v14  ;;  %v4375_v39 = vpop.f32.mrb[172].mxu1  ;;  %v4150_v53 = vmul.f32 -1.442695, %v2657_v26  ;;  %v6475_v14 = vld [vmem:[#allocation9_spill] sm:$0xff] }
 0x27b   : > { %v5042_v15 = vpop.eup %5041  ;;  %5061 = vrcp.f32 %v3309_v60  ;;  %v3314_v47 = vadd.f32 1.0, %v5040_v28  ;;  %v2118_v2 = vpop.f32.mrb[173].mxu0  ;;  %v2758_v54 = vadd.f32 %v4375_v39, %v2213_v52  ;;  %v6474_v52 = vld [vmem:[#allocation7_spill] sm:$0xff] }
 0x27c   : > { %v5044_v5 = vpop.eup %5043  ;;  %3676 = vst.msk [vmem:[%s5787_s8 + $0x278] sm:$0xff] %vm3596_vm1, %v5042_v15  ;;  %5063 = vpow2.f32 %v4166_v40  ;;  %v2749_v58 = vpop.f32.mrb[173].mxu1  ;;  %v2662_v0 = vadd.f32 %v6104_v22, %v2117_v44  ;;  %v4169_v22 = vmul.f32 -1.442695, %v6191_v48  ;;  %v6473_v48 = vld [vmem:[#allocation6_spill] sm:$0xff] }
 0x27d   : > { %v5046_v11 = vpop.eup %5045  ;;  %v3294_v42 = vadd.f32 1.0, %v5044_v5  ;;  %5065 = vrcp.f32 %v3314_v47  ;;  %v2119_v20 = vpop.f32.mrb[174].mxu0  ;;  %v2750_v36 = vadd.f32 %v2749_v58, %v2205_v1  ;;  %v2221_v17 = vadd.f32 %v6196_v21, %v6473_v48 }
 0x27e   : > { %v5048_v30 = vpop.eup %5047  ;;  %v3312_v19 = vadd.f32 1.0, %v5046_v11  ;;  %5067 = vpow2.f32 %v4149_v56  ;;  %v4376_v41 = vpop.f32.mrb[174].mxu1  ;;  %v2120_v62 = vadd.f32 %v6196_v21, %v2119_v20  ;;  %v4170_v40 = vmul.f32 -1.442695, %v2737_v27 }
 0x27f   : > { %v2121_v10 = vpop.f32.mrb[175].mxu0  ;;  %v5050_v55 = vpop.eup %5049  ;;  %5069 = vrcp.f32 %v3294_v42  ;;  %v3295_v23 = vadd.f32 1.0, %v5048_v30  ;;  %v2761_v45 = vadd.f32 %v4376_v41, %v2216_v59  ;;  %v4151_v26 = vmul.f32 -1.442695, %v2662_v0 }
 0x280   : > { %v2752_v33 = vpop.f32.mrb[175].mxu1  ;;  %v5052_v50 = vpop.eup %5051  ;;  %3695 = vst.msk [vmem:[%s5787_s8 + $0x310] sm:$0xff] %vm3596_vm1, %v5050_v55  ;;  %5071 = vrcp.f32 %v3312_v19  ;;  %v2665_v24 = vadd.f32 %v6111_v29, %v2120_v62  ;;  %v2224_v47 = vadd.f32 %v6196_v21, %v6474_v52  ;;  %v2232_v27 = vadd.f32 %v6196_v21, %v6475_v14  ;;  %v6476_v55 = vld [vmem:[#allocation12_spill] sm:$0xff] }
 0x281   : > { %v5054_v57 = vpop.eup %5053  ;;  %5073 = vrcp.f32 %v3295_v23  ;;  %v3315_v46 = vadd.f32 1.0, %v5052_v50  ;;  %v6224_v4 = vadd.f32 %v2752_v33, %v2208_v8  ;;  %v2124_v29 = vpop.f32.mrb[176].mxu0  ;;  %v4175_v59 = vmul.f32 -1.442695, %v2758_v54 }
 0x282   : > { %v5056_v7 = vpop.eup %5055  ;;  %3677 = vst.msk [vmem:[%s5787_s8 + $0x280] sm:$0xff] %vm3596_vm1, %v5054_v57  ;;  %5075 = vpow2.f32 %v4171_v16  ;;  %v4379_v9 = vpop.f32.mrb[176].mxu1  ;;  %v2125_v28 = vadd.f32 %v6196_v21, %v2124_v29  ;;  %v4173_v30 = vmul.f32 -1.442695, %v2750_v36  ;;  %v4152_v41 = vmul.f32 -1.442695, %v2665_v24 }
 0x283   : > { %v5058_v18 = vpop.eup %5057  ;;  %3693 = vst.msk [vmem:[%s5787_s8 + $0x300] sm:$0xff] %vm3596_vm1, %v5056_v7  ;;  %5077 = vrcp.f32 %v3315_v46  ;;  %v6237_v6 = vadd.f32 %v4379_v9, %v2229_v38  ;;  %v2126_v56 = vpop.f32.mrb[177].mxu0  ;;  %v2245_v37 = vadd.f32 %v6196_v21, %v6476_v55  ;;  %v4176_v8 = vmul.f32 -1.442695, %v2761_v45  ;;  %v6477_v36 = vld [vmem:[#allocation10_spill] sm:$0xff]  ;;  %v6478_v7 = vld [vmem:[#allocation13_spill] sm:$0xff] }
 0x284   : > { %v5060_v60 = vpop.eup %5059  ;;  %3678 = vst.msk [vmem:[%s5787_s8 + $0x288] sm:$0xff] %vm3596_vm1, %v5058_v18  ;;  %5079 = vpow2.f32 %v4169_v22  ;;  %v2765_v15 = vpop.f32.mrb[177].mxu1  ;;  %v6250_v44 = vadd.f32 %v6125_v12, %v2125_v28  ;;  %v4174_v22 = vmul.f32 -1.442695, %v6224_v4  ;;  %v2248_v25 = vadd.f32 %v6196_v21, %v6478_v7 }
 0x285   : > { %v5062_v32 = vpop.eup %5061  ;;  %3696 = vst.msk [vmem:[%s5787_s8 + $0x318] sm:$0xff] %vm3596_vm1, %v5060_v60  ;;  %5081 = vpow2.f32 %v4150_v53  ;;  %v6245_v5 = vadd.f32 %v2765_v15, %v2221_v17  ;;  %v2127_v43 = vpop.f32.mrb[178].mxu0 }
 0x286   : > { %v4380_v1 = vpop.f32.mrb[178].mxu1  ;;  %v5064_v13 = vpop.eup %5063  ;;  %3694 = vst.msk [vmem:[%s5787_s8 + $0x308] sm:$0xff] %vm3596_vm1, %v5062_v32  ;;  %5083 = vpow2.f32 %v4172_v49  ;;  %v2128_v39 = vadd.f32 %v6196_v21, %v2127_v43 }
 0x287   : > { %v2129_v2 = vpop.f32.mrb[179].mxu0  ;;  %v2768_v11 = vpop.f32.mrb[179].mxu1  ;;  %v3313_v16 = vadd.f32 1.0, %v5064_v13  ;;  %5085 = vpow2.f32 %v4170_v40  ;;  %v6253_v58 = vadd.f32 %v4380_v1, %v2232_v27  ;;  %v6480_v1 = vld [vmem:[#allocation16_spill] sm:$0xff] }
 0x288   : > { %v5066_v42 = vpop.eup %5065  ;;  %5087 = vpow2.f32 %v4151_v26  ;;  %v6258_v54 = vadd.f32 %v6131_v51, %v2128_v39  ;;  %v6260_v12 = vadd.f32 %v2768_v11, %v2224_v47  ;;  %v2237_v51 = vadd.f32 %v6196_v21, %v6477_v36  ;;  %v6479_v26 = vld [vmem:[#allocation11_spill] sm:$0xff]  ;;  %v6481_v11 = vld [vmem:[#allocation14_spill] sm:$0xff] }
 0x289   : > { %v5068_v20 = vpop.eup %5067  ;;  %3699 = vst.msk [vmem:[%s5787_s8 + $0x330] sm:$0xff] %vm3596_vm1, %v5066_v42  ;;  %5089 = vrcp.f32 %v3313_v16  ;;  %v2132_v62 = vpop.f32.mrb[180].mxu0  ;;  %v2240_v28 = vadd.f32 %v6196_v21, %v6479_v26  ;;  %v2261_v13 = vadd.f32 %v6196_v21, %v6480_v1  ;;  %v4153_v39 = vmul.f32 -1.442695, %v6250_v44 }
 0x28a   : > { %v5070_v19 = vpop.eup %5069  ;;  %v3296_v0 = vadd.f32 1.0, %v5068_v20  ;;  %5091 = vpow2.f32 %v4175_v59  ;;  %v4383_v33 = vpop.f32.mrb[180].mxu1  ;;  %v2133_v53 = vadd.f32 %v6196_v21, %v2132_v62  ;;  %v2253_v42 = vadd.f32 %v6196_v21, %v6481_v11 }
 0x28b   : > { %v5072_v10 = vpop.eup %5071  ;;  %3679 = vst.msk [vmem:[%s5787_s8 + $0x290] sm:$0xff] %vm3596_vm1, %v5070_v19  ;;  %v6274_v57 = vadd.f32 %v4383_v33, %v2245_v37  ;;  %v2134_v45 = vpop.f32.mrb[181].mxu0  ;;  %v4179_v19 = vmul.f32 -1.442695, %v6237_v6  ;;  %v6482_v37 = vld [vmem:[#allocation17_spill] sm:$0xff] }
 0x28c   : > { %v5074_v23 = vpop.eup %5073  ;;  %3697 = vst.msk [vmem:[%s5787_s8 + $0x320] sm:$0xff] %vm3596_vm1, %v5072_v10  ;;  %5093 = vrcp.f32 %v3296_v0  ;;  %v2781_v46 = vpop.f32.mrb[181].mxu1  ;;  %v6283_v4 = vadd.f32 %v6120_v63, %v2133_v53 }
 0x28d   : > { %v5076_v50 = vpop.eup %5075  ;;  %3680 = vst.msk [vmem:[%s5787_s8 + $0x298] sm:$0xff] %vm3596_vm1, %v5074_v23  ;;  %5095 = vpow2.f32 %v4173_v30  ;;  %v6278_v49 = vadd.f32 %v2781_v46, %v2237_v51  ;;  %v2135_v18 = vpop.f32.mrb[182].mxu0  ;;  %v6483_v46 = vld [vmem:[#allocation15_spill] sm:$0xff] }
 0x28e   : > { %v5078_v24 = vpop.eup %5077  ;;  %v3318_v38 = vadd.f32 1.0, %v5076_v50  ;;  %5097 = vpow2.f32 %v4152_v41  ;;  %v4384_v48 = vpop.f32.mrb[182].mxu1  ;;  %v2136_v40 = vadd.f32 %v6196_v21, %v2135_v18 }
 0x28f   : > { %v5080_v17 = vpop.eup %5079  ;;  %3700 = vst.msk [vmem:[%s5787_s8 + $0x338] sm:$0xff] %vm3596_vm1, %v5078_v24  ;;  %5099 = vpow2.f32 %v4176_v8  ;;  %v2137_v29 = vpop.f32.mrb[183].mxu0  ;;  %v6288_v15 = vadd.f32 %v4384_v48, %v2248_v25  ;;  %v2264_v8 = vadd.f32 %v6196_v21, %v6482_v37  ;;  %v2256_v24 = vadd.f32 %v6196_v21, %v6483_v46 }
 0x290   : > { %v2784_v9 = vpop.f32.mrb[183].mxu1  ;;  %v5082_v60 = vpop.eup %5081  ;;  %5101 = vrcp.f32 %v3318_v38  ;;  %v3316_v56 = vadd.f32 1.0, %v5080_v17  ;;  %v6291_v47 = vadd.f32 %v6127_v31, %v2136_v40  ;;  %v4177_v48 = vmul.f32 -1.442695, %v6245_v5 }
 0x291   : > { %v5084_v32 = vpop.eup %5083  ;;  %v3297_v52 = vadd.f32 1.0, %v5082_v60  ;;  %5103 = vpow2.f32 %v4174_v22  ;;  %v6293_v27 = vadd.f32 %v2784_v9, %v2240_v28  ;;  %v2140_v16 = vpop.f32.mrb[184].mxu0  ;;  %v6484_v60 = vld [vmem:[#allocation18_spill] sm:$0xff]  ;;  %v6485_v28 = vld [vmem:[#allocation20_spill] sm:$0xff]  ;;  %v4154_v5 = vmul.f32 -1.442695, %v6258_v54 }
 0x292   : > { %v5086_v63 = vpop.eup %5085  ;;  %5105 = vrcp.f32 %v3316_v56  ;;  %v3319_v14 = vadd.f32 1.0, %v5084_v32  ;;  %v4387_v20 = vpop.f32.mrb[184].mxu1  ;;  %v2141_v0 = vadd.f32 %v6196_v21, %v2140_v16  ;;  %v2269_v26 = vadd.f32 %v6196_v21, %v6484_v60  ;;  %v6486_v32 = vld [vmem:[#allocation19_spill] sm:$0xff] }
 0x293   : > { %v5088_v43 = vpop.eup %5087  ;;  %5107 = vrcp.f32 %v3297_v52  ;;  %v3317_v59 = vadd.f32 1.0, %v5086_v63  ;;  %v6304_v41 = vadd.f32 %v4387_v20, %v2261_v13  ;;  %v2142_v44 = vpop.f32.mrb[185].mxu0  ;;  %v2277_v56 = vadd.f32 %v6196_v21, %v6485_v28 }
 0x294   : > { %v5090_v2 = vpop.eup %5089  ;;  %5109 = vrcp.f32 %v3319_v14  ;;  %v3298_v31 = vadd.f32 1.0, %v5088_v43  ;;  %v2797_v10 = vpop.f32.mrb[185].mxu1  ;;  %v6313_v6 = vadd.f32 %v6141_v35, %v2141_v0  ;;  %v2272_v52 = vadd.f32 %v6196_v21, %v6486_v32 }
 0x295   : > { %v5092_v30 = vpop.eup %5091  ;;  %3698 = vst.msk [vmem:[%s5787_s8 + $0x328] sm:$0xff] %vm3596_vm1, %v5090_v2  ;;  %5111 = vrcp.f32 %v3317_v59  ;;  %v6308_v36 = vadd.f32 %v2797_v10, %v2253_v42  ;;  %v2143_v51 = vpop.f32.mrb[186].mxu0  ;;  %v4180_v14 = vmul.f32 -1.442695, %v6253_v58  ;;  %v4178_v59 = vmul.f32 -1.442695, %v6260_v12 }
 0x296   : > { %v5094_v55 = vpop.eup %5093  ;;  %5113 = vrcp.f32 %v3298_v31  ;;  %v3322_v23 = vadd.f32 1.0, %v5092_v30  ;;  %v4388_v62 = vpop.f32.mrb[186].mxu1  ;;  %v2144_v50 = vadd.f32 %v6196_v21, %v2143_v51  ;;  %v6487_v31 = vld [vmem:[#allocation21_spill] sm:$0xff]  ;;  %v4155_v58 = vmul.f32 -1.442695, %v6283_v4 }
 0x297   : > { %v5096_v33 = vpop.eup %5095  ;;  %3681 = vst.msk [vmem:[%s5787_s8 + $0x2a0] sm:$0xff] %vm3596_vm1, %v5094_v55  ;;  %5115 = vpow2.f32 %v4153_v39  ;;  %v2145_v22 = vpop.f32.mrb[187].mxu0  ;;  %v6318_v25 = vadd.f32 %v4388_v62, %v2264_v8  ;;  %v2280_v16 = vadd.f32 %v6196_v21, %v6487_v31  ;;  %v4183_v0 = vmul.f32 -1.442695, %v6274_v57 }
 0x298   : > { %v2800_v53 = vpop.f32.mrb[187].mxu1  ;;  %v5098_v45 = vpop.eup %5097  ;;  %5117 = vrcp.f32 %v3322_v23  ;;  %v3320_v7 = vadd.f32 1.0, %v5096_v33  ;;  %v6322_v35 = vadd.f32 %v6147_v3, %v2144_v50  ;;  %v4156_v50 = vmul.f32 -1.442695, %v6291_v47 }
 0x299   : > { %v5100_v38 = vpop.eup %5099  ;;  %v3299_v18 = vadd.f32 1.0, %v5098_v45  ;;  %5119 = vpow2.f32 %v4179_v19  ;;  %v6324_v29 = vadd.f32 %v2800_v53, %v2256_v24  ;;  %v2148_v43 = vpop.f32.mrb[188].mxu0  ;;  %v4184_v45 = vmul.f32 -1.442695, %v6288_v15 }
 0x29a   : > { %v5102_v17 = vpop.eup %5101  ;;  %5121 = vrcp.f32 %v3320_v7  ;;  %v3323_v40 = vadd.f32 1.0, %v5100_v38  ;;  %v4391_v1 = vpop.f32.mrb[188].mxu1  ;;  %v2149_v54 = vadd.f32 %v6196_v21, %v2148_v43  ;;  %v4157_v47 = vmul.f32 -1.442695, %v6313_v6 }
 0x29b   : > { %v5104_v9 = vpop.eup %5103  ;;  %3703 = vst.msk [vmem:[%s5787_s8 + $0x350] sm:$0xff] %vm3596_vm1, %v5102_v17  ;;  %5123 = vrcp.f32 %v3299_v18  ;;  %v6340_v39 = vadd.f32 %v4391_v1, %v2277_v56  ;;  %v2150_v2 = vpop.f32.mrb[189].mxu0  ;;  %v4186_v31 = vmul.f32 -1.442695, %v6324_v29 }
 0x29c   : > { %v5106_v3 = vpop.eup %5105  ;;  %5125 = vrcp.f32 %v3323_v40  ;;  %v3321_v63 = vadd.f32 1.0, %v5104_v9  ;;  %v2813_v11 = vpop.f32.mrb[189].mxu1  ;;  %v6353_v44 = vadd.f32 %v6136_v34, %v2149_v54  ;;  %v4181_v34 = vmul.f32 -1.442695, %v6278_v49 }
 0x29d   : > { %v5108_v13 = vpop.eup %5107  ;;  %3701 = vst.msk [vmem:[%s5787_s8 + $0x340] sm:$0xff] %vm3596_vm1, %v5106_v3  ;;  %5127 = vpow2.f32 %v4177_v48  ;;  %v6347_v20 = vadd.f32 %v2813_v11, %v2269_v26  ;;  %v2151_v30 = vpop.f32.mrb[190].mxu0  ;;  %v4187_v26 = vmul.f32 -1.442695, %v6304_v41  ;;  %v4185_v3 = vmul.f32 -1.442695, %v6308_v36 }
 0x29e   : > { %v5110_v42 = vpop.eup %5109  ;;  %3682 = vst.msk [vmem:[%s5787_s8 + $0x2a8] sm:$0xff] %vm3596_vm1, %v5108_v13  ;;  %5129 = vrcp.f32 %v3321_v63  ;;  %v4392_v12 = vpop.f32.mrb[190].mxu1  ;;  %v2152_v10 = vadd.f32 %v6196_v21, %v2151_v30  ;;  %v4158_v13 = vmul.f32 -1.442695, %v6322_v35  ;;  %v4188_v2 = vmul.f32 -1.442695, %v6318_v25 }
 0x29f   : > { %v5112_v19 = vpop.eup %5111  ;;  %3704 = vst.msk [vmem:[%s5787_s8 + $0x358] sm:$0xff] %vm3596_vm1, %v5110_v42  ;;  %5131 = vpow2.f32 %v4154_v5  ;;  %v2153_v55 = vpop.f32.mrb[191].mxu0  ;;  %v6358_v8 = vadd.f32 %v4392_v12, %v2280_v16  ;;  %v4159_v35 = vmul.f32 -1.442695, %v6353_v44  ;;  %v4191_v30 = vmul.f32 -1.442695, %v6340_v39 }
 0x2a0   : > { %v2816_v37 = vpop.f32.mrb[191].mxu1  ;;  %v5114_v4 = vpop.eup %5113  ;;  %3702 = vst.msk [vmem:[%s5787_s8 + $0x348] sm:$0xff] %vm3596_vm1, %v5112_v19  ;;  %5133 = vpow2.f32 %v4180_v14  ;;  %v6366_v21 = vadd.f32 %v6143_v61, %v2152_v10  ;;  %v4182_v61 = vmul.f32 -1.442695, %v6293_v27  ;;  %v4189_v29 = vmul.f32 -1.442695, %v6347_v20 }
 0x2a1   : > { %v6360_v23 = vadd.f32 %v2816_v37, %v2272_v52  ;;  %v5116_v51 = vpop.eup %5115  ;;  %3683 = vst.msk [vmem:[%s5787_s8 + $0x2b0] sm:$0xff] %vm3596_vm1, %v5114_v4  ;;  %5135 = vpow2.f32 %v4178_v59  ;;  %v4192_v20 = vmul.f32 -1.442695, %v6358_v8 }
 0x2a2   : > { %v5118_v57 = vpop.eup %5117  ;;  %v3300_v62 = vadd.f32 1.0, %v5116_v51  ;;  %5137 = vpow2.f32 %v4155_v58 }
 0x2a3   : > { %v5120_v33 = vpop.eup %5119  ;;  %3707 = vst.msk [vmem:[%s5787_s8 + $0x370] sm:$0xff] %vm3596_vm1, %v5118_v57  ;;  %5139 = vpow2.f32 %v4183_v0  ;;  %v4160_v0 = vmul.f32 -1.442695, %v6366_v21  ;;  %v4190_v4 = vmul.f32 -1.442695, %v6360_v23 }
 0x2a4   : > { %v5122_v22 = vpop.eup %5121  ;;  %5141 = vrcp.f32 %v3300_v62  ;;  %v3326_v53 = vadd.f32 1.0, %v5120_v33 }
 0x2a5   : > { %v5124_v49 = vpop.eup %5123  ;;  %3705 = vst.msk [vmem:[%s5787_s8 + $0x360] sm:$0xff] %vm3596_vm1, %v5122_v22  ;;  %5143 = vpow2.f32 %v4181_v34 }
 0x2a6   : > { %v5126_v46 = vpop.eup %5125  ;;  %3684 = vst.msk [vmem:[%s5787_s8 + $0x2b8] sm:$0xff] %vm3596_vm1, %v5124_v49  ;;  %5145 = vrcp.f32 %v3326_v53 }
 0x2a7   : > { %v5128_v24 = vpop.eup %5127  ;;  %3708 = vst.msk [vmem:[%s5787_s8 + $0x378] sm:$0xff] %vm3596_vm1, %v5126_v46  ;;  %5147 = vpow2.f32 %v4156_v50 }
 0x2a8   : > { %v5130_v7 = vpop.eup %5129  ;;  %v3324_v38 = vadd.f32 1.0, %v5128_v24  ;;  %5149 = vpow2.f32 %v4184_v45 }
 0x2a9   : > { %v5132_v15 = vpop.eup %5131  ;;  %3706 = vst.msk [vmem:[%s5787_s8 + $0x368] sm:$0xff] %vm3596_vm1, %v5130_v7  ;;  %5151 = vpow2.f32 %v4182_v61 }
 0x2aa   : > { %v5134_v18 = vpop.eup %5133  ;;  %5153 = vrcp.f32 %v3324_v38  ;;  %v3301_v27 = vadd.f32 1.0, %v5132_v15 }
 0x2ab   : > { %v5136_v48 = vpop.eup %5135  ;;  %v3327_v17 = vadd.f32 1.0, %v5134_v18  ;;  %5155 = vpow2.f32 %v4157_v47 }
 0x2ac   : > { %v5138_v40 = vpop.eup %5137  ;;  %5157 = vrcp.f32 %v3301_v27  ;;  %v3325_v9 = vadd.f32 1.0, %v5136_v48 }
 0x2ad   : > { %v5140_v60 = vpop.eup %5139  ;;  %5159 = vrcp.f32 %v3327_v17  ;;  %v3302_v6 = vadd.f32 1.0, %v5138_v40 }
 0x2ae   : > { %v5142_v28 = vpop.eup %5141  ;;  %5161 = vrcp.f32 %v3325_v9  ;;  %v3330_v56 = vadd.f32 1.0, %v5140_v60 }
 0x2af   : > { %v5144_v5 = vpop.eup %5143  ;;  %3685 = vst.msk [vmem:[%s5787_s8 + $0x2c0] sm:$0xff] %vm3596_vm1, %v5142_v28  ;;  %5163 = vrcp.f32 %v3302_v6 }
 0x2b0   : > { %v5146_v32 = vpop.eup %5145  ;;  %5165 = vrcp.f32 %v3330_v56  ;;  %v3328_v52 = vadd.f32 1.0, %v5144_v5 }
 0x2b1   : > { %v5148_v63 = vpop.eup %5147  ;;  %3711 = vst.msk [vmem:[%s5787_s8 + $0x390] sm:$0xff] %vm3596_vm1, %v5146_v32  ;;  %5167 = vpow2.f32 %v4187_v26 }
 0x2b2   : > { %v5150_v14 = vpop.eup %5149  ;;  %5169 = vrcp.f32 %v3328_v52  ;;  %v3303_v41 = vadd.f32 1.0, %v5148_v63 }
 0x2b3   : > { %v5152_v43 = vpop.eup %5151  ;;  %v3331_v1 = vadd.f32 1.0, %v5150_v14  ;;  %5171 = vpow2.f32 %v4185_v3 }
 0x2b4   : > { %v5154_v59 = vpop.eup %5153  ;;  %5173 = vrcp.f32 %v3303_v41  ;;  %v3329_v36 = vadd.f32 1.0, %v5152_v43 }
 0x2b5   : > { %v5156_v54 = vpop.eup %5155  ;;  %3709 = vst.msk [vmem:[%s5787_s8 + $0x380] sm:$0xff] %vm3596_vm1, %v5154_v59  ;;  %5175 = vrcp.f32 %v3331_v1 }
 0x2b6   : > { %v5158_v11 = vpop.eup %5157  ;;  %5177 = vrcp.f32 %v3329_v36  ;;  %v3304_v42 = vadd.f32 1.0, %v5156_v54 }
 0x2b7   : > { %v5160_v16 = vpop.eup %5159  ;;  %3686 = vst.msk [vmem:[%s5787_s8 + $0x2c8] sm:$0xff] %vm3596_vm1, %v5158_v11  ;;  %5179 = vpow2.f32 %v4158_v13 }
 0x2b8   : > { %v5162_v58 = vpop.eup %5161  ;;  %3712 = vst.msk [vmem:[%s5787_s8 + $0x398] sm:$0xff] %vm3596_vm1, %v5160_v16  ;;  %5181 = vrcp.f32 %v3304_v42 }
 0x2b9   : > { %v5164_v25 = vpop.eup %5163  ;;  %3710 = vst.msk [vmem:[%s5787_s8 + $0x388] sm:$0xff] %vm3596_vm1, %v5162_v58  ;;  %5183 = vpow2.f32 %v4188_v2 }
 0x2ba   : > { %v5166_v12 = vpop.eup %5165  ;;  %3687 = vst.msk [vmem:[%s5787_s8 + $0x2d0] sm:$0xff] %vm3596_vm1, %v5164_v25  ;;  %5185 = vpow2.f32 %v4186_v31 }
 0x2bb   : > { %v5168_v19 = vpop.eup %5167  ;;  %3715 = vst.msk [vmem:[%s5787_s8 + $0x3b0] sm:$0xff] %vm3596_vm1, %v5166_v12  ;;  %5187 = vpow2.f32 %v4159_v35 }
 0x2bc   : > { %v5170_v39 = vpop.eup %5169  ;;  %v3334_v44 = vadd.f32 1.0, %v5168_v19  ;;  %5189 = vpow2.f32 %v4191_v30 }
 0x2bd   : > { %v5172_v10 = vpop.eup %5171  ;;  %3713 = vst.msk [vmem:[%s5787_s8 + $0x3a0] sm:$0xff] %vm3596_vm1, %v5170_v39  ;;  %5191 = vpow2.f32 %v4189_v29 }
 0x2be   : > { %v5174_v55 = vpop.eup %5173  ;;  %5193 = vrcp.f32 %v3334_v44  ;;  %v3332_v37 = vadd.f32 1.0, %v5172_v10 }
 0x2bf   : > { %v5176_v51 = vpop.eup %5175  ;;  %3688 = vst.msk [vmem:[%s5787_s8 + $0x2d8] sm:$0xff] %vm3596_vm1, %v5174_v55  ;;  %5195 = vpow2.f32 %v4160_v0 }
 0x2c0   : > { %v5178_v34 = vpop.eup %5177  ;;  %3716 = vst.msk [vmem:[%s5787_s8 + $0x3b8] sm:$0xff] %vm3596_vm1, %v5176_v51  ;;  %5197 = vrcp.f32 %v3332_v37 }
 0x2c1   : > { %v5180_v21 = vpop.eup %5179  ;;  %3714 = vst.msk [vmem:[%s5787_s8 + $0x3a8] sm:$0xff] %vm3596_vm1, %v5178_v34  ;;  %5199 = vpow2.f32 %v4192_v20 }
 0x2c2   : > { %v5182_v57 = vpop.eup %5181  ;;  %v3305_v8 = vadd.f32 1.0, %v5180_v21  ;;  %5201 = vpow2.f32 %v4190_v4 }
 0x2c3   : > { %v5184_v62 = vpop.eup %5183  ;;  %3689 = vst.msk [vmem:[%s5787_s8 + $0x2e0] sm:$0xff] %vm3596_vm1, %v5182_v57 }
 0x2c4   : > { %v5186_v23 = vpop.eup %5185  ;;  %5203 = vrcp.f32 %v3305_v8  ;;  %v3335_v33 = vadd.f32 1.0, %v5184_v62 }
 0x2c5   : > { %v5188_v50 = vpop.eup %5187  ;;  %v3333_v22 = vadd.f32 1.0, %v5186_v23 }
 0x2c6   : > { %v5190_v53 = vpop.eup %5189  ;;  %5205 = vrcp.f32 %v3335_v33  ;;  %v3306_v45 = vadd.f32 1.0, %v5188_v50 }
 0x2c7   : > { %v5192_v49 = vpop.eup %5191  ;;  %5207 = vrcp.f32 %v3333_v22  ;;  %v3338_v61 = vadd.f32 1.0, %v5190_v53 }
 0x2c8   : > { %v5194_v46 = vpop.eup %5193  ;;  %5209 = vrcp.f32 %v3306_v45  ;;  %v3336_v24 = vadd.f32 1.0, %v5192_v49 }
 0x2c9   : > { %v5196_v47 = vpop.eup %5195  ;;  %3719 = vst.msk [vmem:[%s5787_s8 + $0x3d0] sm:$0xff] %vm3596_vm1, %v5194_v46  ;;  %5211 = vrcp.f32 %v3338_v61 }
 0x2ca   : > { %v5198_v7 = vpop.eup %5197  ;;  %5213 = vrcp.f32 %v3336_v24  ;;  %v3307_v38 = vadd.f32 1.0, %v5196_v47 }
 0x2cb   : > { %v5200_v15 = vpop.eup %5199  ;;  %3717 = vst.msk [vmem:[%s5787_s8 + $0x3c0] sm:$0xff] %vm3596_vm1, %v5198_v7 }
 0x2cc   : > { %v5202_v18 = vpop.eup %5201  ;;  %5215 = vrcp.f32 %v3307_v38  ;;  %v3339_v27 = vadd.f32 1.0, %v5200_v15 }
 0x2cd   : > { %v3337_v48 = vadd.f32 1.0, %v5202_v18 }
 0x2ce   : > { %v5204_v17 = vpop.eup %5203  ;;  %5217 = vrcp.f32 %v3339_v27 }
 0x2cf   : > { %3690 = vst.msk [vmem:[%s5787_s8 + $0x2e8] sm:$0xff] %vm3596_vm1, %v5204_v17  ;;  %5219 = vrcp.f32 %v3337_v48 }
 0x2d0   : > { %v5206_v40 = vpop.eup %5205 }
 0x2d1   : > { %v5208_v9 = vpop.eup %5207  ;;  %3720 = vst.msk [vmem:[%s5787_s8 + $0x3d8] sm:$0xff] %vm3596_vm1, %v5206_v40 }
 0x2d2   : > { %v5210_v60 = vpop.eup %5209  ;;  %3718 = vst.msk [vmem:[%s5787_s8 + $0x3c8] sm:$0xff] %vm3596_vm1, %v5208_v9 }
 0x2d3   : > { %v5212_v6 = vpop.eup %5211  ;;  %3691 = vst.msk [vmem:[%s5787_s8 + $0x2f0] sm:$0xff] %vm3596_vm1, %v5210_v60 }
 0x2d4   : > { %v5214_v26 = vpop.eup %5213  ;;  %3723 = vst.msk [vmem:[%s5787_s8 + $0x3f0] sm:$0xff] %vm3596_vm1, %v5212_v6 }
 0x2d5   : > { %3721 = vst.msk [vmem:[%s5787_s8 + $0x3e0] sm:$0xff] %vm3596_vm1, %v5214_v26 }
 0x2d6   : > { %v5216_v28 = vpop.eup %5215 }
 0x2d7   : > { %3692 = vst.msk [vmem:[%s5787_s8 + $0x2f8] sm:$0xff] %vm3596_vm1, %v5216_v28 }
 0x2d8   : > { %v5218_v56 = vpop.eup %5217 }
 0x2d9   : > { %v5220_v5 = vpop.eup %5219  ;;  %3724 = vst.msk [vmem:[%s5787_s8 + $0x3f8] sm:$0xff] %vm3596_vm1, %v5218_v56 }
 0x2da   : > { %3722 = vst.msk [vmem:[%s5787_s8 + $0x3e8] sm:$0xff] %vm3596_vm1, %v5220_v5 }
 0x2db PF: > { %s13_s12 = sadd.s32 1, %s5229_s12  }
 0x2dc   : > { %p10_p4 = scmp.ge.s32.totalorder %s13_s12, 5  }
 0x2de   :  { %12 = sbr.rel (!%p10_p4) target bundleno = 1 (0x1), region = 62 }

</bundles_post_ra>
